<compile_context>
chip_gen: v7x
topology: tpu7x:2x2x1
jax: 0.10.0
libtpu: 0.0.40
codegen_flags: <defaults>
</compile_context>

<pallas_src>
import functools

import jax
import jax.numpy as jnp
import numpy as np
from jax.experimental import pallas as pl
from jax.experimental.pallas import tpu as pltpu


# ----------------------------------------------------------------------------
# Config (scaled-down stand-in for ResNet-50 / LazyLinear(2048))
# ----------------------------------------------------------------------------
B = 2            # batch
T = 3            # number of "views" looped over in forward (x.shape[1])
C_IN = 3         # RGB
H = W = 64       # spatial
N_BETA = 4       # n_beta
STEM_C = 16
BLK1_W, BLK1_OUT = 16, 64
BLK2_W, BLK2_OUT = 32, 128
FEAT = BLK2_OUT  # backbone feature dim (stands in for 2048)
HIDDEN = 64      # fc1 output dim (stands in for 2048)

C_PAD = 128                     # lane-dense channel width carried end-to-end
ACT_DTYPE = jnp.bfloat16        # activation dtype between kernels
W_DTYPE = jnp.bfloat16          # MXU weight dtype (f32 accumulation)
VMEM_LIMIT = 32 * 1024 * 1024   # explicit scoped-VMEM budget (safe on v5e/v6e/v7x)


def _round_up(x, m):
    return (x + m - 1) // m * m


def _cp(*sems):
    return pltpu.CompilerParams(dimension_semantics=sems,
                                vmem_limit_bytes=VMEM_LIMIT)


# ----------------------------------------------------------------------------
# Pallas kernels
# ----------------------------------------------------------------------------
def _mm_bias_kernel(x_ref, w_ref, b_ref, o_ref, *, relu):
    acc = jnp.dot(x_ref[...], w_ref[...], preferred_element_type=jnp.float32)
    acc = acc + b_ref[...]
    if relu:
        acc = jnp.maximum(acc, 0.0)
    o_ref[...] = acc.astype(o_ref.dtype)


def _mm_bias_res_kernel(x_ref, w_ref, b_ref, r_ref, o_ref, *, relu):
    # matmul + bias + fused residual add (+ ReLU) epilogue.
    acc = jnp.dot(x_ref[...], w_ref[...], preferred_element_type=jnp.float32)
    acc = acc + b_ref[...] + r_ref[...].astype(jnp.float32)
    if relu:
        acc = jnp.maximum(acc, 0.0)
    o_ref[...] = acc.astype(o_ref.dtype)


def _conv3x3_kernel(x_ref, w_ref, b_ref, o_ref, *, stride, relu):
    # x_ref: (1, P, Hr, Wo, Cin) column-gathered planes for one image.
    # w_ref: (9, Cin, Cout); b_ref: (1, Cout); o_ref: (1, Ho, Wo, Cout).
    _, _, _, wo, cin = x_ref.shape
    ho = o_ref.shape[1]
    cout = o_ref.shape[3]
    acc = jnp.zeros((ho * wo, cout), jnp.float32)
    for di in range(3):
        for dj in range(3):
            if stride == 1:
                plane, r0 = dj, di
            else:
                plane, r0 = dj * 2 + (di % 2), di // 2
            patch = x_ref[0, plane, r0:r0 + ho, :, :]          # (ho, wo, cin)
            acc = acc + jnp.dot(patch.reshape(ho * wo, cin),
                                w_ref[di * 3 + dj],
                                preferred_element_type=jnp.float32)
    acc = acc + b_ref[...]
    if relu:
        acc = jnp.maximum(acc, 0.0)
    o_ref[0] = acc.reshape(ho, wo, cout).astype(o_ref.dtype)


def _maxpool3x3_s2_kernel(x_ref, o_ref):
    # Same plane layout as the stride-2 conv; 0-padding is safe (post-ReLU input).
    ho = o_ref.shape[1]
    acc = None
    for di in range(3):
        for dj in range(3):
            plane, r0 = dj * 2 + (di % 2), di // 2
            patch = x_ref[0, plane, r0:r0 + ho, :, :]
            acc = patch if acc is None else jnp.maximum(acc, patch)
    o_ref[0] = acc


def _head_kernel(x_ref, w1_ref, b1_ref, w2_ref, b2_ref, o_ref, *, inv_hw):
    # Fused: global average pool + fc1 + ReLU + fc2.
    x = x_ref[...].astype(jnp.float32)                         # (N, HW, C)
    feat = jnp.sum(x, axis=1) * inv_hw                         # (N, C)   GAP
    h = jnp.dot(feat.astype(jnp.bfloat16), w1_ref[...],
                preferred_element_type=jnp.float32) + b1_ref[...]
    h = jnp.maximum(h, 0.0)                                    # relu(fc1(y))
    o = jnp.dot(h.astype(jnp.bfloat16), w2_ref[...],
                preferred_element_type=jnp.float32) + b2_ref[...]
    o_ref[...] = o                                             # fc2(y), f32


# ----------------------------------------------------------------------------
# Wrappers around pallas_call
# ----------------------------------------------------------------------------
def _pick_tm(m):
    for tm in (512, 256, 128):
        if m % tm == 0:
            return tm
    return 128


def matmul_bias(x, w, b, relu=False, residual=None, out_dtype=ACT_DTYPE):
    """y = (relu)(x @ w + b [+ residual]); x:[M,K] bf16, w:[K,N] bf16, b:[1,N] f32."""
    m, k = x.shape
    n_out = w.shape[1]
    tm = _pick_tm(m)
    mp = _round_up(m, tm)
    if mp != m:
        x = jnp.pad(x, ((0, mp - m), (0, 0)))
        if residual is not None:
            residual = jnp.pad(residual, ((0, mp - m), (0, 0)))
    x_spec = pl.BlockSpec((tm, k), lambda i: (i, 0))
    w_spec = pl.BlockSpec((k, n_out), lambda i: (0, 0))
    b_spec = pl.BlockSpec((1, n_out), lambda i: (0, 0))
    o_spec = pl.BlockSpec((tm, n_out), lambda i: (i, 0))
    if residual is None:
        out = pl.pallas_call(
            functools.partial(_mm_bias_kernel, relu=relu),
            out_shape=jax.ShapeDtypeStruct((mp, n_out), out_dtype),
            grid=(mp // tm,),
            in_specs=[x_spec, w_spec, b_spec],
            out_specs=o_spec,
            compiler_params=_cp("parallel"),
        )(x, w, b)
    else:
        r_spec = pl.BlockSpec((tm, n_out), lambda i: (i, 0))
        out = pl.pallas_call(
            functools.partial(_mm_bias_res_kernel, relu=relu),
            out_shape=jax.ShapeDtypeStruct((mp, n_out), out_dtype),
            grid=(mp // tm,),
            in_specs=[x_spec, w_spec, b_spec, r_spec],
            out_specs=o_spec,
            compiler_params=_cp("parallel"),
        )(x, w, b, residual)
    return out if mp == m else out[:m]


def conv1x1(x, w, b, stride=1, relu=False, residual=None):
    """1x1 conv as a direct matmul (no im2col).  x: [N,H,W,Cp] bf16."""
    if stride != 1:
        x = x[:, ::stride, ::stride, :]
    n, h, wd, c = x.shape
    cout = w.shape[1]
    res = None if residual is None else residual.reshape(n * h * wd, cout)
    y = matmul_bias(x.reshape(n * h * wd, c), w, b, relu=relu, residual=res)
    return y.reshape(n, h, wd, cout)


def _conv3x3_planes(x, stride):
    """Column-gathered (and, for stride 2, row-parity-split) views of the
    spatially padded input.  The kernel then only needs contiguous leading-dim
    row slices per tap: no kh*kw im2col blow-up in HBM and no unaligned
    sublane reads in-kernel.  Output: (N, P, Hr, Wo, C)."""
    n, h, w, c = x.shape
    xp = jnp.pad(x, ((0, 0), (1, 1), (1, 1), (0, 0)))
    wo = w // stride
    planes = []
    if stride == 1:
        for dj in range(3):
            planes.append(xp[:, :, dj:dj + wo, :])                 # (N, h+2, wo, C)
    else:
        for dj in range(3):
            cols = xp[:, :, dj:dj + 2 * wo - 1:2, :]               # (N, h+2, wo, C)
            for rp in range(2):
                planes.append(cols[:, rp::2, :, :])                # (N,(h+2)//2,wo,C)
    return jnp.stack(planes, axis=1)


def conv3x3(x, w9, b, stride, relu=True):
    """3x3 conv (pad=1) with in-kernel tap accumulation; bias+ReLU fused."""
    n, h, wdt, _ = x.shape
    xpl = _conv3x3_planes(x, stride)
    ho, wo = h // stride, wdt // stride
    cout = w9.shape[-1]
    return pl.pallas_call(
        functools.partial(_conv3x3_kernel, stride=stride, relu=relu),
        out_shape=jax.ShapeDtypeStruct((n, ho, wo, cout), ACT_DTYPE),
        grid=(n,),
        in_specs=[
            pl.BlockSpec((1,) + xpl.shape[1:], lambda i: (i, 0, 0, 0, 0)),
            pl.BlockSpec(w9.shape, lambda i: (0, 0, 0)),
            pl.BlockSpec((1, cout), lambda i: (0, 0)),
        ],
        out_specs=pl.BlockSpec((1, ho, wo, cout), lambda i: (i, 0, 0, 0)),
        compiler_params=_cp("parallel"),
    )(xpl, w9, b)


def maxpool3x3_s2(x):
    n, h, wdt, c = x.shape
    xpl = _conv3x3_planes(x, stride=2)
    ho, wo = h // 2, wdt // 2
    return pl.pallas_call(
        _maxpool3x3_s2_kernel,
        out_shape=jax.ShapeDtypeStruct((n, ho, wo, c), x.dtype),
        grid=(n,),
        in_specs=[pl.BlockSpec((1,) + xpl.shape[1:], lambda i: (i, 0, 0, 0, 0))],
        out_specs=pl.BlockSpec((1, ho, wo, c), lambda i: (i, 0, 0, 0)),
        compiler_params=_cp("parallel"),
    )(xpl)


def head(x, p_fc1, p_fc2):
    """Fused global-average-pool + fc1(ReLU) + fc2 -> [N, C_PAD] f32."""
    n, h, wdt, c = x.shape
    xr = x.reshape(n, h * wdt, c)
    out = pl.pallas_call(
        functools.partial(_head_kernel, inv_hw=1.0 / float(h * wdt)),
        out_shape=jax.ShapeDtypeStruct((n, C_PAD), jnp.float32),
        grid=(1,),
        in_specs=[
            pl.BlockSpec((n, h * wdt, c), lambda i: (0, 0, 0)),
            pl.BlockSpec((C_PAD, C_PAD), lambda i: (0, 0)),
            pl.BlockSpec((1, C_PAD), lambda i: (0, 0)),
            pl.BlockSpec((C_PAD, C_PAD), lambda i: (0, 0)),
            pl.BlockSpec((1, C_PAD), lambda i: (0, 0)),
        ],
        out_specs=pl.BlockSpec((n, C_PAD), lambda i: (0, 0)),
        compiler_params=_cp("arbitrary"),
    )(xr, p_fc1["w"], p_fc1["b"], p_fc2["w"], p_fc2["b"])
    return out[:, :N_BETA]


# ----------------------------------------------------------------------------
# Stem im2col (XLA side; only 3 input channels so the patch tensor is tiny)
# ----------------------------------------------------------------------------
def _im2col(x, kh, kw, stride, pad):
    n, h, w, c = x.shape
    xp = jnp.pad(x, ((0, 0), (pad, pad), (pad, pad), (0, 0)))
    ho = (h + 2 * pad - kh) // stride + 1
    wo = (w + 2 * pad - kw) // stride + 1
    cols = []
    for i in range(kh):
        for j in range(kw):
            cols.append(xp[:, i:i + stride * (ho - 1) + 1:stride,
                           j:j + stride * (wo - 1) + 1:stride, :])
    patches = jnp.stack(cols, axis=3)                  # (N, Ho, Wo, kh*kw, C)
    return patches.reshape(n * ho * wo, kh * kw * c), ho, wo


# ----------------------------------------------------------------------------
# Deterministic parameters (BN folded into conv weights, inference semantics),
# zero-padded to the lane-dense 128-wide layout, weights cast to bf16 once.
# ----------------------------------------------------------------------------
def _conv_bn_raw(key, kh, kw, cin, cout):
    k1, k2, k3, k4, k5 = jax.random.split(key, 5)
    fan_in = kh * kw * cin
    w = jax.random.normal(k1, (kh, kw, cin, cout), jnp.float32) * np.sqrt(2.0 / fan_in)
    gamma = jax.random.uniform(k2, (cout,), jnp.float32, 0.5, 1.5)
    beta = jax.random.normal(k3, (cout,), jnp.float32) * 0.1
    mean = jax.random.normal(k4, (cout,), jnp.float32) * 0.1
    var = jax.random.uniform(k5, (cout,), jnp.float32, 0.5, 1.5)
    scale = gamma / jnp.sqrt(var + 1e-5)
    return w * scale, beta - mean * scale              # BN folded (inference)


def _linear_raw(key, fan_in, fan_out, bias_range=None):
    k1, k2 = jax.random.split(key)
    bound = 1.0 / np.sqrt(fan_in)
    w = jax.random.uniform(k1, (fan_in, fan_out), jnp.float32, -bound, bound)
    if bias_range is None:
        b = jax.random.uniform(k2, (fan_out,), jnp.float32, -bound, bound)
    else:
        b = jax.random.uniform(k2, (fan_out,), jnp.float32, *bias_range)
    return w, b


def _pad_bias(b):
    return jnp.pad(b, (0, C_PAD - b.shape[0])).reshape(1, C_PAD).astype(jnp.float32)


def _pack_stem(w, b):
    kh, kw, cin, cout = w.shape
    wm = jnp.pad(w.reshape(kh * kw * cin, cout), ((0, 0), (0, C_PAD - cout)))
    return {"w": wm.astype(W_DTYPE), "b": _pad_bias(b)}


def _pack_1x1(w, b):
    cin, cout = w.shape[2], w.shape[3]
    wm = jnp.pad(w.reshape(cin, cout), ((0, C_PAD - cin), (0, C_PAD - cout)))
    return {"w": wm.astype(W_DTYPE), "b": _pad_bias(b)}


def _pack_3x3(w, b):
    kh, kw, cin, cout = w.shape
    wm = jnp.pad(w.reshape(kh * kw, cin, cout),
                 ((0, 0), (0, C_PAD - cin), (0, C_PAD - cout)))
    return {"w": wm.astype(W_DTYPE), "b": _pad_bias(b)}


def _pack_linear(w, b):
    fin, fout = w.shape
    wm = jnp.pad(w, ((0, C_PAD - fin), (0, C_PAD - fout)))
    return {"w": wm.astype(W_DTYPE), "b": _pad_bias(b)}


def make_params(key):
    ks = jax.random.split(key, 10)
    block1 = {
        "c1": _pack_1x1(*_conv_bn_raw(ks[1], 1, 1, STEM_C, BLK1_W)),
        "c2": _pack_3x3(*_conv_bn_raw(ks[2], 3, 3, BLK1_W, BLK1_W)),
        "c3": _pack_1x1(*_conv_bn_raw(ks[3], 1, 1, BLK1_W, BLK1_OUT)),
        "ds": _pack_1x1(*_conv_bn_raw(ks[4], 1, 1, STEM_C, BLK1_OUT)),
    }
    block2 = {
        "c1": _pack_1x1(*_conv_bn_raw(ks[5], 1, 1, BLK1_OUT, BLK2_W)),
        "c2": _pack_3x3(*_conv_bn_raw(ks[6], 3, 3, BLK2_W, BLK2_W)),
        "c3": _pack_1x1(*_conv_bn_raw(ks[7], 1, 1, BLK2_W, BLK2_OUT)),
        "ds": _pack_1x1(*_conv_bn_raw(ks[8], 1, 1, BLK1_OUT, BLK2_OUT)),
    }
    kf1, kf2 = jax.random.split(ks[9])
    return {
        "stem": _pack_stem(*_conv_bn_raw(ks[0], 7, 7, C_IN, STEM_C)),
        "block1": block1,
        "block2": block2,
        "fc1": _pack_linear(*_linear_raw(kf1, FEAT, HIDDEN)),              # LazyLinear stand-in
        "fc2": _pack_linear(*_linear_raw(kf2, HIDDEN, N_BETA, (0.0, 2.0))),  # uniform_(bias,0,2)
    }


# ----------------------------------------------------------------------------
# Model forward
# ----------------------------------------------------------------------------
def bottleneck(x, p, stride):
    identity = conv1x1(x, p["ds"]["w"], p["ds"]["b"], stride=stride, relu=False)
    out = conv1x1(x, p["c1"]["w"], p["c1"]["b"], stride=1, relu=True)
    out = conv3x3(out, p["c2"]["w"], p["c2"]["b"], stride=stride, relu=True)
    # c3 1x1 conv with residual add + ReLU fused in the matmul epilogue.
    out = conv1x1(out, p["c3"]["w"], p["c3"]["b"], stride=1, relu=True,
                  residual=identity)
    return out


def forward(x, params):
    # x: [B, T, C, H, W]  (torch loops over dim 1; here T is folded into batch)
    b, t, c, h, w = x.shape
    n = b * t
    y = jnp.transpose(x.reshape(n, c, h, w), (0, 2, 3, 1)).astype(ACT_DTYPE)  # one NCHW->NHWC
    # stem: 7x7 stride-2 pad-3 conv + (folded) BN + ReLU
    patches, ho, wo = _im2col(y, 7, 7, 2, 3)
    stem = matmul_bias(patches, params["stem"]["w"], params["stem"]["b"], relu=True)
    stem = stem.reshape(n, ho, wo, C_PAD)
    xm = maxpool3x3_s2(stem)
    x1 = bottleneck(xm, params["block1"], stride=1)
    x2 = bottleneck(x1, params["block2"], stride=2)
    out = head(x2, params["fc1"], params["fc2"])          # GAP + relu(fc1) + fc2, f32
    return out.reshape(b, t, N_BETA)                      # == torch.stack(outputs, 1)


if __name__ == "__main__":
    key = jax.random.PRNGKey(0)
    k_params, k_x = jax.random.split(key)
    params = make_params(k_params)
    x = jax.random.normal(k_x, (B, T, C_IN, H, W), jnp.float32)

    fwd = jax.jit(forward)
    out = fwd(x, params)
    out = jax.block_until_ready(out)

    assert out.shape == (B, T, N_BETA), out.shape
    assert out.dtype == jnp.float32
    assert bool(jnp.all(jnp.isfinite(out)))
    print("KERNEL_OK")
</pallas_src>

<mosaic_0001>
module attributes {stable_mosaic.version = 11 : i64} {
  func.func @_mm_bias_kernel(%arg0: i32, %arg1: memref<512x147xbf16, #tpu.memory_space<vmem>>, %arg2: memref<147x128xbf16, #tpu.memory_space<vmem>>, %arg3: memref<1x128xf32, #tpu.memory_space<vmem>>, %arg4: memref<512x128xbf16, #tpu.memory_space<vmem>>) attributes {dimension_semantics = [#tpu.dimension_semantics<parallel>], iteration_bounds = array<i64: 12>, scalar_prefetch = 0 : i64, scratch_operands = 0 : i64, tpu.core_type = #tpu.core_type<tc>, window_params = [{transform_indices = @transform_0, window_bounds = array<i64: 512, 147>}, {pipeline_mode = #tpu.pipeline_mode<synchronous>, transform_indices = @transform_1, window_bounds = array<i64: 147, 128>}, {pipeline_mode = #tpu.pipeline_mode<synchronous>, transform_indices = @transform_2, window_bounds = array<i64: 1, 128>}, {transform_indices = @transform_3, window_bounds = array<i64: 512, 128>}]} {
    %c0 = arith.constant 0 : index
    %c0_0 = arith.constant 0 : index
    %0 = vector.load %arg1[%c0, %c0_0] : memref<512x147xbf16, #tpu.memory_space<vmem>>, vector<512x147xbf16>
    %c0_1 = arith.constant 0 : index
    %c0_2 = arith.constant 0 : index
    %1 = vector.load %arg2[%c0_1, %c0_2] : memref<147x128xbf16, #tpu.memory_space<vmem>>, vector<147x128xbf16>
    %cst = arith.constant dense<0.000000e+00> : vector<512x128xf32>
    %2 = tpu.matmul %0, %1, %cst {dimension_numbers = #tpu.dot_dimension_numbers<[1], [0], [0], [1], [0, 0, 1, 1], [], []>} : vector<512x147xbf16>, vector<147x128xbf16>, vector<512x128xf32> -> vector<512x128xf32>
    %c0_3 = arith.constant 0 : index
    %c0_4 = arith.constant 0 : index
    %3 = vector.load %arg3[%c0_3, %c0_4] : memref<1x128xf32, #tpu.memory_space<vmem>>, vector<1x128xf32>
    %4 = vector.broadcast %3 : vector<1x128xf32> to vector<512x128xf32>
    %5 = arith.addf %2, %4 : vector<512x128xf32>
    %cst_5 = arith.constant 0.000000e+00 : f32
    %6 = vector.broadcast %cst_5 : f32 to vector<512x128xf32>
    %7 = arith.maximumf %5, %6 : vector<512x128xf32>
    %8 = arith.truncf %7 : vector<512x128xf32> to vector<512x128xbf16>
    %c0_6 = arith.constant 0 : index
    %c0_7 = arith.constant 0 : index
    %9 = vector.load %arg4[%c0_6, %c0_7] : memref<512x128xbf16, #tpu.memory_space<vmem>>, vector<512x128xbf16>
    tpu.vector_store %arg4[%c0_6, %c0_7], %8 {strides = array<i32>} : memref<512x128xbf16, #tpu.memory_space<vmem>>, vector<512x128xbf16>,
    return
  }
  func.func @transform_0(%arg0: i32) -> (i32, i32) {
    %c0_i32 = arith.constant 0 : i32
    %c0_i32_0 = arith.constant 0 : i32
    return %arg0, %c0_i32 : i32, i32
  }
  func.func @transform_1(%arg0: i32) -> (i32, i32) {
    %c0_i32 = arith.constant 0 : i32
    %c0_i32_0 = arith.constant 0 : i32
    %c0_i32_1 = arith.constant 0 : i32
    return %c0_i32, %c0_i32_0 : i32, i32
  }
  func.func @transform_2(%arg0: i32) -> (i32, i32) {
    %c0_i32 = arith.constant 0 : i32
    %c0_i32_0 = arith.constant 0 : i32
    %c0_i32_1 = arith.constant 0 : i32
    return %c0_i32, %c0_i32_0 : i32, i32
  }
  func.func @transform_3(%arg0: i32) -> (i32, i32) {
    %c0_i32 = arith.constant 0 : i32
    %c0_i32_0 = arith.constant 0 : i32
    return %arg0, %c0_i32 : i32, i32
  }
}

module attributes {stable_mosaic.version = 11 : i64} {
  func.func @_maxpool3x3_s2_kernel(%arg0: i32, %arg1: memref<1x6x17x16x128xbf16, #tpu.memory_space<vmem>>, %arg2: memref<1x16x16x128xbf16, #tpu.memory_space<vmem>>) attributes {dimension_semantics = [#tpu.dimension_semantics<parallel>], iteration_bounds = array<i64: 6>, scalar_prefetch = 0 : i64, scratch_operands = 0 : i64, tpu.core_type = #tpu.core_type<tc>, window_params = [{transform_indices = @transform_0, window_bounds = array<i64: 1, 6, 17, 16, 128>}, {transform_indices = @transform_1, window_bounds = array<i64: 1, 16, 16, 128>}]} {
    %c0 = arith.constant 0 : index
    %c0_0 = arith.constant 0 : index
    %c0_1 = arith.constant 0 : index
    %c0_2 = arith.constant 0 : index
    %c0_3 = arith.constant 0 : index
    %0 = vector.load %arg1[%c0, %c0_0, %c0_1, %c0_2, %c0_3] : memref<1x6x17x16x128xbf16, #tpu.memory_space<vmem>>, vector<1x1x16x16x128xbf16>
    %1 = vector.shape_cast %0 : vector<1x1x16x16x128xbf16> to vector<16x16x128xbf16>
    %c0_4 = arith.constant 0 : index
    %c2 = arith.constant 2 : index
    %c0_5 = arith.constant 0 : index
    %c0_6 = arith.constant 0 : index
    %c0_7 = arith.constant 0 : index
    %2 = vector.load %arg1[%c0_4, %c2, %c0_5, %c0_6, %c0_7] : memref<1x6x17x16x128xbf16, #tpu.memory_space<vmem>>, vector<1x1x16x16x128xbf16>
    %3 = vector.shape_cast %2 : vector<1x1x16x16x128xbf16> to vector<16x16x128xbf16>
    %4 = arith.maximumf %1, %3 : vector<16x16x128xbf16>
    %c0_8 = arith.constant 0 : index
    %c4 = arith.constant 4 : index
    %c0_9 = arith.constant 0 : index
    %c0_10 = arith.constant 0 : index
    %c0_11 = arith.constant 0 : index
    %5 = vector.load %arg1[%c0_8, %c4, %c0_9, %c0_10, %c0_11] : memref<1x6x17x16x128xbf16, #tpu.memory_space<vmem>>, vector<1x1x16x16x128xbf16>
    %6 = vector.shape_cast %5 : vector<1x1x16x16x128xbf16> to vector<16x16x128xbf16>
    %7 = arith.maximumf %4, %6 : vector<16x16x128xbf16>
    %c0_12 = arith.constant 0 : index
    %c1 = arith.constant 1 : index
    %c0_13 = arith.constant 0 : index
    %c0_14 = arith.constant 0 : index
    %c0_15 = arith.constant 0 : index
    %8 = vector.load %arg1[%c0_12, %c1, %c0_13, %c0_14, %c0_15] : memref<1x6x17x16x128xbf16, #tpu.memory_space<vmem>>, vector<1x1x16x16x128xbf16>
    %9 = vector.shape_cast %8 : vector<1x1x16x16x128xbf16> to vector<16x16x128xbf16>
    %10 = arith.maximumf %7, %9 : vector<16x16x128xbf16>
    %c0_16 = arith.constant 0 : index
    %c3 = arith.constant 3 : index
    %c0_17 = arith.constant 0 : index
    %c0_18 = arith.constant 0 : index
    %c0_19 = arith.constant 0 : index
    %11 = vector.load %arg1[%c0_16, %c3, %c0_17, %c0_18, %c0_19] : memref<1x6x17x16x128xbf16, #tpu.memory_space<vmem>>, vector<1x1x16x16x128xbf16>
    %12 = vector.shape_cast %11 : vector<1x1x16x16x128xbf16> to vector<16x16x128xbf16>
    %13 = arith.maximumf %10, %12 : vector<16x16x128xbf16>
    %c0_20 = arith.constant 0 : index
    %c5 = arith.constant 5 : index
    %c0_21 = arith.constant 0 : index
    %c0_22 = arith.constant 0 : index
    %c0_23 = arith.constant 0 : index
    %14 = vector.load %arg1[%c0_20, %c5, %c0_21, %c0_22, %c0_23] : memref<1x6x17x16x128xbf16, #tpu.memory_space<vmem>>, vector<1x1x16x16x128xbf16>
    %15 = vector.shape_cast %14 : vector<1x1x16x16x128xbf16> to vector<16x16x128xbf16>
    %16 = arith.maximumf %13, %15 : vector<16x16x128xbf16>
    %c0_24 = arith.constant 0 : index
    %c0_25 = arith.constant 0 : index
    %c1_26 = arith.constant 1 : index
    %c0_27 = arith.constant 0 : index
    %c0_28 = arith.constant 0 : index
    %17 = vector.load %arg1[%c0_24, %c0_25, %c1_26, %c0_27, %c0_28] : memref<1x6x17x16x128xbf16, #tpu.memory_space<vmem>>, vector<1x1x16x16x128xbf16>
    %18 = vector.shape_cast %17 : vector<1x1x16x16x128xbf16> to vector<16x16x128xbf16>
    %19 = arith.maximumf %16, %18 : vector<16x16x128xbf16>
    %c0_29 = arith.constant 0 : index
    %c2_30 = arith.constant 2 : index
    %c1_31 = arith.constant 1 : index
    %c0_32 = arith.constant 0 : index
    %c0_33 = arith.constant 0 : index
    %20 = vector.load %arg1[%c0_29, %c2_30, %c1_31, %c0_32, %c0_33] : memref<1x6x17x16x128xbf16, #tpu.memory_space<vmem>>, vector<1x1x16x16x128xbf16>
    %21 = vector.shape_cast %20 : vector<1x1x16x16x128xbf16> to vector<16x16x128xbf16>
    %22 = arith.maximumf %19, %21 : vector<16x16x128xbf16>
    %c0_34 = arith.constant 0 : index
    %c4_35 = arith.constant 4 : index
    %c1_36 = arith.constant 1 : index
    %c0_37 = arith.constant 0 : index
    %c0_38 = arith.constant 0 : index
    %23 = vector.load %arg1[%c0_34, %c4_35, %c1_36, %c0_37, %c0_38] : memref<1x6x17x16x128xbf16, #tpu.memory_space<vmem>>, vector<1x1x16x16x128xbf16>
    %24 = vector.shape_cast %23 : vector<1x1x16x16x128xbf16> to vector<16x16x128xbf16>
    %25 = arith.maximumf %22, %24 : vector<16x16x128xbf16>
    %c0_39 = arith.constant 0 : index
    %c0_40 = arith.constant 0 : index
    %c0_41 = arith.constant 0 : index
    %c0_42 = arith.constant 0 : index
    %26 = vector.load %arg2[%c0_39, %c0_40, %c0_41, %c0_42] : memref<1x16x16x128xbf16, #tpu.memory_space<vmem>>, vector<1x16x16x128xbf16>
    %27 = vector.shape_cast %26 : vector<1x16x16x128xbf16> to vector<16x16x128xbf16>
    %28 = vector.shape_cast %25 : vector<16x16x128xbf16> to vector<1x16x16x128xbf16>
    tpu.vector_store %arg2[%c0_39, %c0_40, %c0_41, %c0_42], %28 {strides = array<i32>} : memref<1x16x16x128xbf16, #tpu.memory_space<vmem>>, vector<1x16x16x128xbf16>,
    return
  }
  func.func @transform_0(%arg0: i32) -> (i32, i32, i32, i32, i32) {
    %c0_i32 = arith.constant 0 : i32
    %c0_i32_0 = arith.constant 0 : i32
    %c0_i32_1 = arith.constant 0 : i32
    %c0_i32_2 = arith.constant 0 : i32
    %c0_i32_3 = arith.constant 0 : i32
    return %arg0, %c0_i32, %c0_i32_0, %c0_i32_1, %c0_i32_2 : i32, i32, i32, i32, i32
  }
  func.func @transform_1(%arg0: i32) -> (i32, i32, i32, i32) {
    %c0_i32 = arith.constant 0 : i32
    %c0_i32_0 = arith.constant 0 : i32
    %c0_i32_1 = arith.constant 0 : i32
    %c0_i32_2 = arith.constant 0 : i32
    return %arg0, %c0_i32, %c0_i32_0, %c0_i32_1 : i32, i32, i32, i32
  }
}

module attributes {stable_mosaic.version = 11 : i64} {
  func.func @_mm_bias_kernel(%arg0: i32, %arg1: memref<512x128xbf16, #tpu.memory_space<vmem>>, %arg2: memref<128x128xbf16, #tpu.memory_space<vmem>>, %arg3: memref<1x128xf32, #tpu.memory_space<vmem>>, %arg4: memref<512x128xbf16, #tpu.memory_space<vmem>>) attributes {dimension_semantics = [#tpu.dimension_semantics<parallel>], iteration_bounds = array<i64: 3>, scalar_prefetch = 0 : i64, scratch_operands = 0 : i64, tpu.core_type = #tpu.core_type<tc>, window_params = [{transform_indices = @transform_0, window_bounds = array<i64: 512, 128>}, {pipeline_mode = #tpu.pipeline_mode<synchronous>, transform_indices = @transform_1, window_bounds = array<i64: 128, 128>}, {pipeline_mode = #tpu.pipeline_mode<synchronous>, transform_indices = @transform_2, window_bounds = array<i64: 1, 128>}, {transform_indices = @transform_3, window_bounds = array<i64: 512, 128>}]} {
    %c0 = arith.constant 0 : index
    %c0_0 = arith.constant 0 : index
    %0 = vector.load %arg1[%c0, %c0_0] : memref<512x128xbf16, #tpu.memory_space<vmem>>, vector<512x128xbf16>
    %c0_1 = arith.constant 0 : index
    %c0_2 = arith.constant 0 : index
    %1 = vector.load %arg2[%c0_1, %c0_2] : memref<128x128xbf16, #tpu.memory_space<vmem>>, vector<128x128xbf16>
    %cst = arith.constant dense<0.000000e+00> : vector<512x128xf32>
    %2 = tpu.matmul %0, %1, %cst {dimension_numbers = #tpu.dot_dimension_numbers<[1], [0], [0], [1], [0, 0, 1, 1], [], []>} : vector<512x128xbf16>, vector<128x128xbf16>, vector<512x128xf32> -> vector<512x128xf32>
    %c0_3 = arith.constant 0 : index
    %c0_4 = arith.constant 0 : index
    %3 = vector.load %arg3[%c0_3, %c0_4] : memref<1x128xf32, #tpu.memory_space<vmem>>, vector<1x128xf32>
    %4 = vector.broadcast %3 : vector<1x128xf32> to vector<512x128xf32>
    %5 = arith.addf %2, %4 : vector<512x128xf32>
    %cst_5 = arith.constant 0.000000e+00 : f32
    %6 = vector.broadcast %cst_5 : f32 to vector<512x128xf32>
    %7 = arith.maximumf %5, %6 : vector<512x128xf32>
    %8 = arith.truncf %7 : vector<512x128xf32> to vector<512x128xbf16>
    %c0_6 = arith.constant 0 : index
    %c0_7 = arith.constant 0 : index
    %9 = vector.load %arg4[%c0_6, %c0_7] : memref<512x128xbf16, #tpu.memory_space<vmem>>, vector<512x128xbf16>
    tpu.vector_store %arg4[%c0_6, %c0_7], %8 {strides = array<i32>} : memref<512x128xbf16, #tpu.memory_space<vmem>>, vector<512x128xbf16>,
    return
  }
  func.func @transform_0(%arg0: i32) -> (i32, i32) {
    %c0_i32 = arith.constant 0 : i32
    %c0_i32_0 = arith.constant 0 : i32
    return %arg0, %c0_i32 : i32, i32
  }
  func.func @transform_1(%arg0: i32) -> (i32, i32) {
    %c0_i32 = arith.constant 0 : i32
    %c0_i32_0 = arith.constant 0 : i32
    %c0_i32_1 = arith.constant 0 : i32
    return %c0_i32, %c0_i32_0 : i32, i32
  }
  func.func @transform_2(%arg0: i32) -> (i32, i32) {
    %c0_i32 = arith.constant 0 : i32
    %c0_i32_0 = arith.constant 0 : i32
    %c0_i32_1 = arith.constant 0 : i32
    return %c0_i32, %c0_i32_0 : i32, i32
  }
  func.func @transform_3(%arg0: i32) -> (i32, i32) {
    %c0_i32 = arith.constant 0 : i32
    %c0_i32_0 = arith.constant 0 : i32
    return %arg0, %c0_i32 : i32, i32
  }
}

module attributes {stable_mosaic.version = 11 : i64} {
  func.func @_conv3x3_kernel(%arg0: i32, %arg1: memref<1x3x18x16x128xbf16, #tpu.memory_space<vmem>>, %arg2: memref<9x128x128xbf16, #tpu.memory_space<vmem>>, %arg3: memref<1x128xf32, #tpu.memory_space<vmem>>, %arg4: memref<1x16x16x128xbf16, #tpu.memory_space<vmem>>) attributes {dimension_semantics = [#tpu.dimension_semantics<parallel>], iteration_bounds = array<i64: 6>, scalar_prefetch = 0 : i64, scratch_operands = 0 : i64, tpu.core_type = #tpu.core_type<tc>, window_params = [{transform_indices = @transform_0, window_bounds = array<i64: 1, 3, 18, 16, 128>}, {pipeline_mode = #tpu.pipeline_mode<synchronous>, transform_indices = @transform_1, window_bounds = array<i64: 9, 128, 128>}, {pipeline_mode = #tpu.pipeline_mode<synchronous>, transform_indices = @transform_2, window_bounds = array<i64: 1, 128>}, {transform_indices = @transform_3, window_bounds = array<i64: 1, 16, 16, 128>}]} {
    %cst = arith.constant 0.000000e+00 : f32
    %0 = vector.broadcast %cst : f32 to vector<256x128xf32>
    %c0 = arith.constant 0 : index
    %c0_0 = arith.constant 0 : index
    %c0_1 = arith.constant 0 : index
    %c0_2 = arith.constant 0 : index
    %c0_3 = arith.constant 0 : index
    %1 = vector.load %arg1[%c0, %c0_0, %c0_1, %c0_2, %c0_3] : memref<1x3x18x16x128xbf16, #tpu.memory_space<vmem>>, vector<1x1x16x16x128xbf16>
    %2 = vector.shape_cast %1 : vector<1x1x16x16x128xbf16> to vector<16x16x128xbf16>
    %3 = vector.shape_cast %2 : vector<16x16x128xbf16> to vector<256x128xbf16>
    %c0_4 = arith.constant 0 : index
    %c0_5 = arith.constant 0 : index
    %c0_6 = arith.constant 0 : index
    %4 = vector.load %arg2[%c0_4, %c0_5, %c0_6] : memref<9x128x128xbf16, #tpu.memory_space<vmem>>, vector<1x128x128xbf16>
    %5 = vector.shape_cast %4 : vector<1x128x128xbf16> to vector<128x128xbf16>
    %cst_7 = arith.constant dense<0.000000e+00> : vector<256x128xf32>
    %6 = tpu.matmul %3, %5, %cst_7 {dimension_numbers = #tpu.dot_dimension_numbers<[1], [0], [0], [1], [0, 0, 1, 1], [], []>} : vector<256x128xbf16>, vector<128x128xbf16>, vector<256x128xf32> -> vector<256x128xf32>
    %7 = arith.addf %0, %6 : vector<256x128xf32>
    %c0_8 = arith.constant 0 : index
    %c1 = arith.constant 1 : index
    %c0_9 = arith.constant 0 : index
    %c0_10 = arith.constant 0 : index
    %c0_11 = arith.constant 0 : index
    %8 = vector.load %arg1[%c0_8, %c1, %c0_9, %c0_10, %c0_11] : memref<1x3x18x16x128xbf16, #tpu.memory_space<vmem>>, vector<1x1x16x16x128xbf16>
    %9 = vector.shape_cast %8 : vector<1x1x16x16x128xbf16> to vector<16x16x128xbf16>
    %10 = vector.shape_cast %9 : vector<16x16x128xbf16> to vector<256x128xbf16>
    %c1_12 = arith.constant 1 : index
    %c0_13 = arith.constant 0 : index
    %c0_14 = arith.constant 0 : index
    %11 = vector.load %arg2[%c1_12, %c0_13, %c0_14] : memref<9x128x128xbf16, #tpu.memory_space<vmem>>, vector<1x128x128xbf16>
    %12 = vector.shape_cast %11 : vector<1x128x128xbf16> to vector<128x128xbf16>
    %cst_15 = arith.constant dense<0.000000e+00> : vector<256x128xf32>
    %13 = tpu.matmul %10, %12, %cst_15 {dimension_numbers = #tpu.dot_dimension_numbers<[1], [0], [0], [1], [0, 0, 1, 1], [], []>} : vector<256x128xbf16>, vector<128x128xbf16>, vector<256x128xf32> -> vector<256x128xf32>
    %14 = arith.addf %7, %13 : vector<256x128xf32>
    %c0_16 = arith.constant 0 : index
    %c2 = arith.constant 2 : index
    %c0_17 = arith.constant 0 : index
    %c0_18 = arith.constant 0 : index
    %c0_19 = arith.constant 0 : index
    %15 = vector.load %arg1[%c0_16, %c2, %c0_17, %c0_18, %c0_19] : memref<1x3x18x16x128xbf16, #tpu.memory_space<vmem>>, vector<1x1x16x16x128xbf16>
    %16 = vector.shape_cast %15 : vector<1x1x16x16x128xbf16> to vector<16x16x128xbf16>
    %17 = vector.shape_cast %16 : vector<16x16x128xbf16> to vector<256x128xbf16>
    %c2_20 = arith.constant 2 : index
    %c0_21 = arith.constant 0 : index
    %c0_22 = arith.constant 0 : index
    %18 = vector.load %arg2[%c2_20, %c0_21, %c0_22] : memref<9x128x128xbf16, #tpu.memory_space<vmem>>, vector<1x128x128xbf16>
    %19 = vector.shape_cast %18 : vector<1x128x128xbf16> to vector<128x128xbf16>
    %cst_23 = arith.constant dense<0.000000e+00> : vector<256x128xf32>
    %20 = tpu.matmul %17, %19, %cst_23 {dimension_numbers = #tpu.dot_dimension_numbers<[1], [0], [0], [1], [0, 0, 1, 1], [], []>} : vector<256x128xbf16>, vector<128x128xbf16>, vector<256x128xf32> -> vector<256x128xf32>
    %21 = arith.addf %14, %20 : vector<256x128xf32>
    %c0_24 = arith.constant 0 : index
    %c0_25 = arith.constant 0 : index
    %c1_26 = arith.constant 1 : index
    %c0_27 = arith.constant 0 : index
    %c0_28 = arith.constant 0 : index
    %22 = vector.load %arg1[%c0_24, %c0_25, %c1_26, %c0_27, %c0_28] : memref<1x3x18x16x128xbf16, #tpu.memory_space<vmem>>, vector<1x1x16x16x128xbf16>
    %23 = vector.shape_cast %22 : vector<1x1x16x16x128xbf16> to vector<16x16x128xbf16>
    %24 = vector.shape_cast %23 : vector<16x16x128xbf16> to vector<256x128xbf16>
    %c3 = arith.constant 3 : index
    %c0_29 = arith.constant 0 : index
    %c0_30 = arith.constant 0 : index
    %25 = vector.load %arg2[%c3, %c0_29, %c0_30] : memref<9x128x128xbf16, #tpu.memory_space<vmem>>, vector<1x128x128xbf16>
    %26 = vector.shape_cast %25 : vector<1x128x128xbf16> to vector<128x128xbf16>
    %cst_31 = arith.constant dense<0.000000e+00> : vector<256x128xf32>
    %27 = tpu.matmul %24, %26, %cst_31 {dimension_numbers = #tpu.dot_dimension_numbers<[1], [0], [0], [1], [0, 0, 1, 1], [], []>} : vector<256x128xbf16>, vector<128x128xbf16>, vector<256x128xf32> -> vector<256x128xf32>
    %28 = arith.addf %21, %27 : vector<256x128xf32>
    %c0_32 = arith.constant 0 : index
    %c1_33 = arith.constant 1 : index
    %c1_34 = arith.constant 1 : index
    %c0_35 = arith.constant 0 : index
    %c0_36 = arith.constant 0 : index
    %29 = vector.load %arg1[%c0_32, %c1_33, %c1_34, %c0_35, %c0_36] : memref<1x3x18x16x128xbf16, #tpu.memory_space<vmem>>, vector<1x1x16x16x128xbf16>
    %30 = vector.shape_cast %29 : vector<1x1x16x16x128xbf16> to vector<16x16x128xbf16>
    %31 = vector.shape_cast %30 : vector<16x16x128xbf16> to vector<256x128xbf16>
    %c4 = arith.constant 4 : index
    %c0_37 = arith.constant 0 : index
    %c0_38 = arith.constant 0 : index
    %32 = vector.load %arg2[%c4, %c0_37, %c0_38] : memref<9x128x128xbf16, #tpu.memory_space<vmem>>, vector<1x128x128xbf16>
    %33 = vector.shape_cast %32 : vector<1x128x128xbf16> to vector<128x128xbf16>
    %cst_39 = arith.constant dense<0.000000e+00> : vector<256x128xf32>
    %34 = tpu.matmul %31, %33, %cst_39 {dimension_numbers = #tpu.dot_dimension_numbers<[1], [0], [0], [1], [0, 0, 1, 1], [], []>} : vector<256x128xbf16>, vector<128x128xbf16>, vector<256x128xf32> -> vector<256x128xf32>
    %35 = arith.addf %28, %34 : vector<256x128xf32>
    %c0_40 = arith.constant 0 : index
    %c2_41 = arith.constant 2 : index
    %c1_42 = arith.constant 1 : index
    %c0_43 = arith.constant 0 : index
    %c0_44 = arith.constant 0 : index
    %36 = vector.load %arg1[%c0_40, %c2_41, %c1_42, %c0_43, %c0_44] : memref<1x3x18x16x128xbf16, #tpu.memory_space<vmem>>, vector<1x1x16x16x128xbf16>
    %37 = vector.shape_cast %36 : vector<1x1x16x16x128xbf16> to vector<16x16x128xbf16>
    %38 = vector.shape_cast %37 : vector<16x16x128xbf16> to vector<256x128xbf16>
    %c5 = arith.constant 5 : index
    %c0_45 = arith.constant 0 : index
    %c0_46 = arith.constant 0 : index
    %39 = vector.load %arg2[%c5, %c0_45, %c0_46] : memref<9x128x128xbf16, #tpu.memory_space<vmem>>, vector<1x128x128xbf16>
    %40 = vector.shape_cast %39 : vector<1x128x128xbf16> to vector<128x128xbf16>
    %cst_47 = arith.constant dense<0.000000e+00> : vector<256x128xf32>
    %41 = tpu.matmul %38, %40, %cst_47 {dimension_numbers = #tpu.dot_dimension_numbers<[1], [0], [0], [1], [0, 0, 1, 1], [], []>} : vector<256x128xbf16>, vector<128x128xbf16>, vector<256x128xf32> -> vector<256x128xf32>
    %42 = arith.addf %35, %41 : vector<256x128xf32>
    %c0_48 = arith.constant 0 : index
    %c0_49 = arith.constant 0 : index
    %c2_50 = arith.constant 2 : index
    %c0_51 = arith.constant 0 : index
    %c0_52 = arith.constant 0 : index
    %43 = vector.load %arg1[%c0_48, %c0_49, %c2_50, %c0_51, %c0_52] : memref<1x3x18x16x128xbf16, #tpu.memory_space<vmem>>, vector<1x1x16x16x128xbf16>
    %44 = vector.shape_cast %43 : vector<1x1x16x16x128xbf16> to vector<16x16x128xbf16>
    %45 = vector.shape_cast %44 : vector<16x16x128xbf16> to vector<256x128xbf16>
    %c6 = arith.constant 6 : index
    %c0_53 = arith.constant 0 : index
    %c0_54 = arith.constant 0 : index
    %46 = vector.load %arg2[%c6, %c0_53, %c0_54] : memref<9x128x128xbf16, #tpu.memory_space<vmem>>, vector<1x128x128xbf16>
    %47 = vector.shape_cast %46 : vector<1x128x128xbf16> to vector<128x128xbf16>
    %cst_55 = arith.constant dense<0.000000e+00> : vector<256x128xf32>
    %48 = tpu.matmul %45, %47, %cst_55 {dimension_numbers = #tpu.dot_dimension_numbers<[1], [0], [0], [1], [0, 0, 1, 1], [], []>} : vector<256x128xbf16>, vector<128x128xbf16>, vector<256x128xf32> -> vector<256x128xf32>
    %49 = arith.addf %42, %48 : vector<256x128xf32>
    %c0_56 = arith.constant 0 : index
    %c1_57 = arith.constant 1 : index
    %c2_58 = arith.constant 2 : index
    %c0_59 = arith.constant 0 : index
    %c0_60 = arith.constant 0 : index
    %50 = vector.load %arg1[%c0_56, %c1_57, %c2_58, %c0_59, %c0_60] : memref<1x3x18x16x128xbf16, #tpu.memory_space<vmem>>, vector<1x1x16x16x128xbf16>
    %51 = vector.shape_cast %50 : vector<1x1x16x16x128xbf16> to vector<16x16x128xbf16>
    %52 = vector.shape_cast %51 : vector<16x16x128xbf16> to vector<256x128xbf16>
    %c7 = arith.constant 7 : index
    %c0_61 = arith.constant 0 : index
    %c0_62 = arith.constant 0 : index
    %53 = vector.load %arg2[%c7, %c0_61, %c0_62] : memref<9x128x128xbf16, #tpu.memory_space<vmem>>, vector<1x128x128xbf16>
    %54 = vector.shape_cast %53 : vector<1x128x128xbf16> to vector<128x128xbf16>
    %cst_63 = arith.constant dense<0.000000e+00> : vector<256x128xf32>
    %55 = tpu.matmul %52, %54, %cst_63 {dimension_numbers = #tpu.dot_dimension_numbers<[1], [0], [0], [1], [0, 0, 1, 1], [], []>} : vector<256x128xbf16>, vector<128x128xbf16>, vector<256x128xf32> -> vector<256x128xf32>
    %56 = arith.addf %49, %55 : vector<256x128xf32>
    %c0_64 = arith.constant 0 : index
    %c2_65 = arith.constant 2 : index
    %c2_66 = arith.constant 2 : index
    %c0_67 = arith.constant 0 : index
    %c0_68 = arith.constant 0 : index
    %57 = vector.load %arg1[%c0_64, %c2_65, %c2_66, %c0_67, %c0_68] : memref<1x3x18x16x128xbf16, #tpu.memory_space<vmem>>, vector<1x1x16x16x128xbf16>
    %58 = vector.shape_cast %57 : vector<1x1x16x16x128xbf16> to vector<16x16x128xbf16>
    %59 = vector.shape_cast %58 : vector<16x16x128xbf16> to vector<256x128xbf16>
    %c8 = arith.constant 8 : index
    %c0_69 = arith.constant 0 : index
    %c0_70 = arith.constant 0 : index
    %60 = vector.load %arg2[%c8, %c0_69, %c0_70] : memref<9x128x128xbf16, #tpu.memory_space<vmem>>, vector<1x128x128xbf16>
    %61 = vector.shape_cast %60 : vector<1x128x128xbf16> to vector<128x128xbf16>
    %cst_71 = arith.constant dense<0.000000e+00> : vector<256x128xf32>
    %62 = tpu.matmul %59, %61, %cst_71 {dimension_numbers = #tpu.dot_dimension_numbers<[1], [0], [0], [1], [0, 0, 1, 1], [], []>} : vector<256x128xbf16>, vector<128x128xbf16>, vector<256x128xf32> -> vector<256x128xf32>
    %63 = arith.addf %56, %62 : vector<256x128xf32>
    %c0_72 = arith.constant 0 : index
    %c0_73 = arith.constant 0 : index
    %64 = vector.load %arg3[%c0_72, %c0_73] : memref<1x128xf32, #tpu.memory_space<vmem>>, vector<1x128xf32>
    %65 = vector.broadcast %64 : vector<1x128xf32> to vector<256x128xf32>
    %66 = arith.addf %63, %65 : vector<256x128xf32>
    %cst_74 = arith.constant 0.000000e+00 : f32
    %67 = vector.broadcast %cst_74 : f32 to vector<256x128xf32>
    %68 = arith.maximumf %66, %67 : vector<256x128xf32>
    %69 = vector.shape_cast %68 : vector<256x128xf32> to vector<16x16x128xf32>
    %70 = arith.truncf %69 : vector<16x16x128xf32> to vector<16x16x128xbf16>
    %c0_75 = arith.constant 0 : index
    %c0_76 = arith.constant 0 : index
    %c0_77 = arith.constant 0 : index
    %c0_78 = arith.constant 0 : index
    %71 = vector.load %arg4[%c0_75, %c0_76, %c0_77, %c0_78] : memref<1x16x16x128xbf16, #tpu.memory_space<vmem>>, vector<1x16x16x128xbf16>
    %72 = vector.shape_cast %71 : vector<1x16x16x128xbf16> to vector<16x16x128xbf16>
    %73 = vector.shape_cast %70 : vector<16x16x128xbf16> to vector<1x16x16x128xbf16>
    tpu.vector_store %arg4[%c0_75, %c0_76, %c0_77, %c0_78], %73 {strides = array<i32>} : memref<1x16x16x128xbf16, #tpu.memory_space<vmem>>, vector<1x16x16x128xbf16>,
    return
  }
  func.func @transform_0(%arg0: i32) -> (i32, i32, i32, i32, i32) {
    %c0_i32 = arith.constant 0 : i32
    %c0_i32_0 = arith.constant 0 : i32
    %c0_i32_1 = arith.constant 0 : i32
    %c0_i32_2 = arith.constant 0 : i32
    %c0_i32_3 = arith.constant 0 : i32
    return %arg0, %c0_i32, %c0_i32_0, %c0_i32_1, %c0_i32_2 : i32, i32, i32, i32, i32
  }
  func.func @transform_1(%arg0: i32) -> (i32, i32, i32) {
    %c0_i32 = arith.constant 0 : i32
    %c0_i32_0 = arith.constant 0 : i32
    %c0_i32_1 = arith.constant 0 : i32
    %c0_i32_2 = arith.constant 0 : i32
    return %c0_i32, %c0_i32_0, %c0_i32_1 : i32, i32, i32
  }
  func.func @transform_2(%arg0: i32) -> (i32, i32) {
    %c0_i32 = arith.constant 0 : i32
    %c0_i32_0 = arith.constant 0 : i32
    %c0_i32_1 = arith.constant 0 : i32
    return %c0_i32, %c0_i32_0 : i32, i32
  }
  func.func @transform_3(%arg0: i32) -> (i32, i32, i32, i32) {
    %c0_i32 = arith.constant 0 : i32
    %c0_i32_0 = arith.constant 0 : i32
    %c0_i32_1 = arith.constant 0 : i32
    %c0_i32_2 = arith.constant 0 : i32
    return %arg0, %c0_i32, %c0_i32_0, %c0_i32_1 : i32, i32, i32, i32
  }
}

module attributes {stable_mosaic.version = 11 : i64} {
  func.func @_mm_bias_kernel(%arg0: i32, %arg1: memref<512x128xbf16, #tpu.memory_space<vmem>>, %arg2: memref<128x128xbf16, #tpu.memory_space<vmem>>, %arg3: memref<1x128xf32, #tpu.memory_space<vmem>>, %arg4: memref<512x128xbf16, #tpu.memory_space<vmem>>) attributes {dimension_semantics = [#tpu.dimension_semantics<parallel>], iteration_bounds = array<i64: 3>, scalar_prefetch = 0 : i64, scratch_operands = 0 : i64, tpu.core_type = #tpu.core_type<tc>, window_params = [{transform_indices = @transform_0, window_bounds = array<i64: 512, 128>}, {pipeline_mode = #tpu.pipeline_mode<synchronous>, transform_indices = @transform_1, window_bounds = array<i64: 128, 128>}, {pipeline_mode = #tpu.pipeline_mode<synchronous>, transform_indices = @transform_2, window_bounds = array<i64: 1, 128>}, {transform_indices = @transform_3, window_bounds = array<i64: 512, 128>}]} {
    %c0 = arith.constant 0 : index
    %c0_0 = arith.constant 0 : index
    %0 = vector.load %arg1[%c0, %c0_0] : memref<512x128xbf16, #tpu.memory_space<vmem>>, vector<512x128xbf16>
    %c0_1 = arith.constant 0 : index
    %c0_2 = arith.constant 0 : index
    %1 = vector.load %arg2[%c0_1, %c0_2] : memref<128x128xbf16, #tpu.memory_space<vmem>>, vector<128x128xbf16>
    %cst = arith.constant dense<0.000000e+00> : vector<512x128xf32>
    %2 = tpu.matmul %0, %1, %cst {dimension_numbers = #tpu.dot_dimension_numbers<[1], [0], [0], [1], [0, 0, 1, 1], [], []>} : vector<512x128xbf16>, vector<128x128xbf16>, vector<512x128xf32> -> vector<512x128xf32>
    %c0_3 = arith.constant 0 : index
    %c0_4 = arith.constant 0 : index
    %3 = vector.load %arg3[%c0_3, %c0_4] : memref<1x128xf32, #tpu.memory_space<vmem>>, vector<1x128xf32>
    %4 = vector.broadcast %3 : vector<1x128xf32> to vector<512x128xf32>
    %5 = arith.addf %2, %4 : vector<512x128xf32>
    %6 = arith.truncf %5 : vector<512x128xf32> to vector<512x128xbf16>
    %c0_5 = arith.constant 0 : index
    %c0_6 = arith.constant 0 : index
    %7 = vector.load %arg4[%c0_5, %c0_6] : memref<512x128xbf16, #tpu.memory_space<vmem>>, vector<512x128xbf16>
    tpu.vector_store %arg4[%c0_5, %c0_6], %6 {strides = array<i32>} : memref<512x128xbf16, #tpu.memory_space<vmem>>, vector<512x128xbf16>,
    return
  }
  func.func @transform_0(%arg0: i32) -> (i32, i32) {
    %c0_i32 = arith.constant 0 : i32
    %c0_i32_0 = arith.constant 0 : i32
    return %arg0, %c0_i32 : i32, i32
  }
  func.func @transform_1(%arg0: i32) -> (i32, i32) {
    %c0_i32 = arith.constant 0 : i32
    %c0_i32_0 = arith.constant 0 : i32
    %c0_i32_1 = arith.constant 0 : i32
    return %c0_i32, %c0_i32_0 : i32, i32
  }
  func.func @transform_2(%arg0: i32) -> (i32, i32) {
    %c0_i32 = arith.constant 0 : i32
    %c0_i32_0 = arith.constant 0 : i32
    %c0_i32_1 = arith.constant 0 : i32
    return %c0_i32, %c0_i32_0 : i32, i32
  }
  func.func @transform_3(%arg0: i32) -> (i32, i32) {
    %c0_i32 = arith.constant 0 : i32
    %c0_i32_0 = arith.constant 0 : i32
    return %arg0, %c0_i32 : i32, i32
  }
}

module attributes {stable_mosaic.version = 11 : i64} {
  func.func @_mm_bias_res_kernel(%arg0: i32, %arg1: memref<512x128xbf16, #tpu.memory_space<vmem>>, %arg2: memref<128x128xbf16, #tpu.memory_space<vmem>>, %arg3: memref<1x128xf32, #tpu.memory_space<vmem>>, %arg4: memref<512x128xbf16, #tpu.memory_space<vmem>>, %arg5: memref<512x128xbf16, #tpu.memory_space<vmem>>) attributes {dimension_semantics = [#tpu.dimension_semantics<parallel>], iteration_bounds = array<i64: 3>, scalar_prefetch = 0 : i64, scratch_operands = 0 : i64, tpu.core_type = #tpu.core_type<tc>, window_params = [{transform_indices = @transform_0, window_bounds = array<i64: 512, 128>}, {pipeline_mode = #tpu.pipeline_mode<synchronous>, transform_indices = @transform_1, window_bounds = array<i64: 128, 128>}, {pipeline_mode = #tpu.pipeline_mode<synchronous>, transform_indices = @transform_2, window_bounds = array<i64: 1, 128>}, {transform_indices = @transform_3, window_bounds = array<i64: 512, 128>}, {transform_indices = @transform_4, window_bounds = array<i64: 512, 128>}]} {
    %c0 = arith.constant 0 : index
    %c0_0 = arith.constant 0 : index
    %0 = vector.load %arg1[%c0, %c0_0] : memref<512x128xbf16, #tpu.memory_space<vmem>>, vector<512x128xbf16>
    %c0_1 = arith.constant 0 : index
    %c0_2 = arith.constant 0 : index
    %1 = vector.load %arg2[%c0_1, %c0_2] : memref<128x128xbf16, #tpu.memory_space<vmem>>, vector<128x128xbf16>
    %cst = arith.constant dense<0.000000e+00> : vector<512x128xf32>
    %2 = tpu.matmul %0, %1, %cst {dimension_numbers = #tpu.dot_dimension_numbers<[1], [0], [0], [1], [0, 0, 1, 1], [], []>} : vector<512x128xbf16>, vector<128x128xbf16>, vector<512x128xf32> -> vector<512x128xf32>
    %c0_3 = arith.constant 0 : index
    %c0_4 = arith.constant 0 : index
    %3 = vector.load %arg3[%c0_3, %c0_4] : memref<1x128xf32, #tpu.memory_space<vmem>>, vector<1x128xf32>
    %4 = vector.broadcast %3 : vector<1x128xf32> to vector<512x128xf32>
    %5 = arith.addf %2, %4 : vector<512x128xf32>
    %c0_5 = arith.constant 0 : index
    %c0_6 = arith.constant 0 : index
    %6 = vector.load %arg4[%c0_5, %c0_6] : memref<512x128xbf16, #tpu.memory_space<vmem>>, vector<512x128xbf16>
    %7 = arith.extf %6 : vector<512x128xbf16> to vector<512x128xf32>
    %8 = arith.addf %5, %7 : vector<512x128xf32>
    %cst_7 = arith.constant 0.000000e+00 : f32
    %9 = vector.broadcast %cst_7 : f32 to vector<512x128xf32>
    %10 = arith.maximumf %8, %9 : vector<512x128xf32>
    %11 = arith.truncf %10 : vector<512x128xf32> to vector<512x128xbf16>
    %c0_8 = arith.constant 0 : index
    %c0_9 = arith.constant 0 : index
    %12 = vector.load %arg5[%c0_8, %c0_9] : memref<512x128xbf16, #tpu.memory_space<vmem>>, vector<512x128xbf16>
    tpu.vector_store %arg5[%c0_8, %c0_9], %11 {strides = array<i32>} : memref<512x128xbf16, #tpu.memory_space<vmem>>, vector<512x128xbf16>,
    return
  }
  func.func @transform_0(%arg0: i32) -> (i32, i32) {
    %c0_i32 = arith.constant 0 : i32
    %c0_i32_0 = arith.constant 0 : i32
    return %arg0, %c0_i32 : i32, i32
  }
  func.func @transform_1(%arg0: i32) -> (i32, i32) {
    %c0_i32 = arith.constant 0 : i32
    %c0_i32_0 = arith.constant 0 : i32
    %c0_i32_1 = arith.constant 0 : i32
    return %c0_i32, %c0_i32_0 : i32, i32
  }
  func.func @transform_2(%arg0: i32) -> (i32, i32) {
    %c0_i32 = arith.constant 0 : i32
    %c0_i32_0 = arith.constant 0 : i32
    %c0_i32_1 = arith.constant 0 : i32
    return %c0_i32, %c0_i32_0 : i32, i32
  }
  func.func @transform_3(%arg0: i32) -> (i32, i32) {
    %c0_i32 = arith.constant 0 : i32
    %c0_i32_0 = arith.constant 0 : i32
    return %arg0, %c0_i32 : i32, i32
  }
  func.func @transform_4(%arg0: i32) -> (i32, i32) {
    %c0_i32 = arith.constant 0 : i32
    %c0_i32_0 = arith.constant 0 : i32
    return %arg0, %c0_i32 : i32, i32
  }
}

module attributes {stable_mosaic.version = 11 : i64} {
  func.func @_conv3x3_kernel(%arg0: i32, %arg1: memref<1x6x9x8x128xbf16, #tpu.memory_space<vmem>>, %arg2: memref<9x128x128xbf16, #tpu.memory_space<vmem>>, %arg3: memref<1x128xf32, #tpu.memory_space<vmem>>, %arg4: memref<1x8x8x128xbf16, #tpu.memory_space<vmem>>) attributes {dimension_semantics = [#tpu.dimension_semantics<parallel>], iteration_bounds = array<i64: 6>, scalar_prefetch = 0 : i64, scratch_operands = 0 : i64, tpu.core_type = #tpu.core_type<tc>, window_params = [{transform_indices = @transform_0, window_bounds = array<i64: 1, 6, 9, 8, 128>}, {pipeline_mode = #tpu.pipeline_mode<synchronous>, transform_indices = @transform_1, window_bounds = array<i64: 9, 128, 128>}, {pipeline_mode = #tpu.pipeline_mode<synchronous>, transform_indices = @transform_2, window_bounds = array<i64: 1, 128>}, {transform_indices = @transform_3, window_bounds = array<i64: 1, 8, 8, 128>}]} {
    %cst = arith.constant 0.000000e+00 : f32
    %0 = vector.broadcast %cst : f32 to vector<64x128xf32>
    %c0 = arith.constant 0 : index
    %c0_0 = arith.constant 0 : index
    %c0_1 = arith.constant 0 : index
    %c0_2 = arith.constant 0 : index
    %c0_3 = arith.constant 0 : index
    %1 = vector.load %arg1[%c0, %c0_0, %c0_1, %c0_2, %c0_3] : memref<1x6x9x8x128xbf16, #tpu.memory_space<vmem>>, vector<1x1x8x8x128xbf16>
    %2 = vector.shape_cast %1 : vector<1x1x8x8x128xbf16> to vector<8x8x128xbf16>
    %3 = vector.shape_cast %2 : vector<8x8x128xbf16> to vector<64x128xbf16>
    %c0_4 = arith.constant 0 : index
    %c0_5 = arith.constant 0 : index
    %c0_6 = arith.constant 0 : index
    %4 = vector.load %arg2[%c0_4, %c0_5, %c0_6] : memref<9x128x128xbf16, #tpu.memory_space<vmem>>, vector<1x128x128xbf16>
    %5 = vector.shape_cast %4 : vector<1x128x128xbf16> to vector<128x128xbf16>
    %cst_7 = arith.constant dense<0.000000e+00> : vector<64x128xf32>
    %6 = tpu.matmul %3, %5, %cst_7 {dimension_numbers = #tpu.dot_dimension_numbers<[1], [0], [0], [1], [0, 0, 1, 1], [], []>} : vector<64x128xbf16>, vector<128x128xbf16>, vector<64x128xf32> -> vector<64x128xf32>
    %7 = arith.addf %0, %6 : vector<64x128xf32>
    %c0_8 = arith.constant 0 : index
    %c2 = arith.constant 2 : index
    %c0_9 = arith.constant 0 : index
    %c0_10 = arith.constant 0 : index
    %c0_11 = arith.constant 0 : index
    %8 = vector.load %arg1[%c0_8, %c2, %c0_9, %c0_10, %c0_11] : memref<1x6x9x8x128xbf16, #tpu.memory_space<vmem>>, vector<1x1x8x8x128xbf16>
    %9 = vector.shape_cast %8 : vector<1x1x8x8x128xbf16> to vector<8x8x128xbf16>
    %10 = vector.shape_cast %9 : vector<8x8x128xbf16> to vector<64x128xbf16>
    %c1 = arith.constant 1 : index
    %c0_12 = arith.constant 0 : index
    %c0_13 = arith.constant 0 : index
    %11 = vector.load %arg2[%c1, %c0_12, %c0_13] : memref<9x128x128xbf16, #tpu.memory_space<vmem>>, vector<1x128x128xbf16>
    %12 = vector.shape_cast %11 : vector<1x128x128xbf16> to vector<128x128xbf16>
    %cst_14 = arith.constant dense<0.000000e+00> : vector<64x128xf32>
    %13 = tpu.matmul %10, %12, %cst_14 {dimension_numbers = #tpu.dot_dimension_numbers<[1], [0], [0], [1], [0, 0, 1, 1], [], []>} : vector<64x128xbf16>, vector<128x128xbf16>, vector<64x128xf32> -> vector<64x128xf32>
    %14 = arith.addf %7, %13 : vector<64x128xf32>
    %c0_15 = arith.constant 0 : index
    %c4 = arith.constant 4 : index
    %c0_16 = arith.constant 0 : index
    %c0_17 = arith.constant 0 : index
    %c0_18 = arith.constant 0 : index
    %15 = vector.load %arg1[%c0_15, %c4, %c0_16, %c0_17, %c0_18] : memref<1x6x9x8x128xbf16, #tpu.memory_space<vmem>>, vector<1x1x8x8x128xbf16>
    %16 = vector.shape_cast %15 : vector<1x1x8x8x128xbf16> to vector<8x8x128xbf16>
    %17 = vector.shape_cast %16 : vector<8x8x128xbf16> to vector<64x128xbf16>
    %c2_19 = arith.constant 2 : index
    %c0_20 = arith.constant 0 : index
    %c0_21 = arith.constant 0 : index
    %18 = vector.load %arg2[%c2_19, %c0_20, %c0_21] : memref<9x128x128xbf16, #tpu.memory_space<vmem>>, vector<1x128x128xbf16>
    %19 = vector.shape_cast %18 : vector<1x128x128xbf16> to vector<128x128xbf16>
    %cst_22 = arith.constant dense<0.000000e+00> : vector<64x128xf32>
    %20 = tpu.matmul %17, %19, %cst_22 {dimension_numbers = #tpu.dot_dimension_numbers<[1], [0], [0], [1], [0, 0, 1, 1], [], []>} : vector<64x128xbf16>, vector<128x128xbf16>, vector<64x128xf32> -> vector<64x128xf32>
    %21 = arith.addf %14, %20 : vector<64x128xf32>
    %c0_23 = arith.constant 0 : index
    %c1_24 = arith.constant 1 : index
    %c0_25 = arith.constant 0 : index
    %c0_26 = arith.constant 0 : index
    %c0_27 = arith.constant 0 : index
    %22 = vector.load %arg1[%c0_23, %c1_24, %c0_25, %c0_26, %c0_27] : memref<1x6x9x8x128xbf16, #tpu.memory_space<vmem>>, vector<1x1x8x8x128xbf16>
    %23 = vector.shape_cast %22 : vector<1x1x8x8x128xbf16> to vector<8x8x128xbf16>
    %24 = vector.shape_cast %23 : vector<8x8x128xbf16> to vector<64x128xbf16>
    %c3 = arith.constant 3 : index
    %c0_28 = arith.constant 0 : index
    %c0_29 = arith.constant 0 : index
    %25 = vector.load %arg2[%c3, %c0_28, %c0_29] : memref<9x128x128xbf16, #tpu.memory_space<vmem>>, vector<1x128x128xbf16>
    %26 = vector.shape_cast %25 : vector<1x128x128xbf16> to vector<128x128xbf16>
    %cst_30 = arith.constant dense<0.000000e+00> : vector<64x128xf32>
    %27 = tpu.matmul %24, %26, %cst_30 {dimension_numbers = #tpu.dot_dimension_numbers<[1], [0], [0], [1], [0, 0, 1, 1], [], []>} : vector<64x128xbf16>, vector<128x128xbf16>, vector<64x128xf32> -> vector<64x128xf32>
    %28 = arith.addf %21, %27 : vector<64x128xf32>
    %c0_31 = arith.constant 0 : index
    %c3_32 = arith.constant 3 : index
    %c0_33 = arith.constant 0 : index
    %c0_34 = arith.constant 0 : index
    %c0_35 = arith.constant 0 : index
    %29 = vector.load %arg1[%c0_31, %c3_32, %c0_33, %c0_34, %c0_35] : memref<1x6x9x8x128xbf16, #tpu.memory_space<vmem>>, vector<1x1x8x8x128xbf16>
    %30 = vector.shape_cast %29 : vector<1x1x8x8x128xbf16> to vector<8x8x128xbf16>
    %31 = vector.shape_cast %30 : vector<8x8x128xbf16> to vector<64x128xbf16>
    %c4_36 = arith.constant 4 : index
    %c0_37 = arith.constant 0 : index
    %c0_38 = arith.constant 0 : index
    %32 = vector.load %arg2[%c4_36, %c0_37, %c0_38] : memref<9x128x128xbf16, #tpu.memory_space<vmem>>, vector<1x128x128xbf16>
    %33 = vector.shape_cast %32 : vector<1x128x128xbf16> to vector<128x128xbf16>
    %cst_39 = arith.constant dense<0.000000e+00> : vector<64x128xf32>
    %34 = tpu.matmul %31, %33, %cst_39 {dimension_numbers = #tpu.dot_dimension_numbers<[1], [0], [0], [1], [0, 0, 1, 1], [], []>} : vector<64x128xbf16>, vector<128x128xbf16>, vector<64x128xf32> -> vector<64x128xf32>
    %35 = arith.addf %28, %34 : vector<64x128xf32>
    %c0_40 = arith.constant 0 : index
    %c5 = arith.constant 5 : index
    %c0_41 = arith.constant 0 : index
    %c0_42 = arith.constant 0 : index
    %c0_43 = arith.constant 0 : index
    %36 = vector.load %arg1[%c0_40, %c5, %c0_41, %c0_42, %c0_43] : memref<1x6x9x8x128xbf16, #tpu.memory_space<vmem>>, vector<1x1x8x8x128xbf16>
    %37 = vector.shape_cast %36 : vector<1x1x8x8x128xbf16> to vector<8x8x128xbf16>
    %38 = vector.shape_cast %37 : vector<8x8x128xbf16> to vector<64x128xbf16>
    %c5_44 = arith.constant 5 : index
    %c0_45 = arith.constant 0 : index
    %c0_46 = arith.constant 0 : index
    %39 = vector.load %arg2[%c5_44, %c0_45, %c0_46] : memref<9x128x128xbf16, #tpu.memory_space<vmem>>, vector<1x128x128xbf16>
    %40 = vector.shape_cast %39 : vector<1x128x128xbf16> to vector<128x128xbf16>
    %cst_47 = arith.constant dense<0.000000e+00> : vector<64x128xf32>
    %41 = tpu.matmul %38, %40, %cst_47 {dimension_numbers = #tpu.dot_dimension_numbers<[1], [0], [0], [1], [0, 0, 1, 1], [], []>} : vector<64x128xbf16>, vector<128x128xbf16>, vector<64x128xf32> -> vector<64x128xf32>
    %42 = arith.addf %35, %41 : vector<64x128xf32>
    %c0_48 = arith.constant 0 : index
    %c0_49 = arith.constant 0 : index
    %c1_50 = arith.constant 1 : index
    %c0_51 = arith.constant 0 : index
    %c0_52 = arith.constant 0 : index
    %43 = vector.load %arg1[%c0_48, %c0_49, %c1_50, %c0_51, %c0_52] : memref<1x6x9x8x128xbf16, #tpu.memory_space<vmem>>, vector<1x1x8x8x128xbf16>
    %44 = vector.shape_cast %43 : vector<1x1x8x8x128xbf16> to vector<8x8x128xbf16>
    %45 = vector.shape_cast %44 : vector<8x8x128xbf16> to vector<64x128xbf16>
    %c6 = arith.constant 6 : index
    %c0_53 = arith.constant 0 : index
    %c0_54 = arith.constant 0 : index
    %46 = vector.load %arg2[%c6, %c0_53, %c0_54] : memref<9x128x128xbf16, #tpu.memory_space<vmem>>, vector<1x128x128xbf16>
    %47 = vector.shape_cast %46 : vector<1x128x128xbf16> to vector<128x128xbf16>
    %cst_55 = arith.constant dense<0.000000e+00> : vector<64x128xf32>
    %48 = tpu.matmul %45, %47, %cst_55 {dimension_numbers = #tpu.dot_dimension_numbers<[1], [0], [0], [1], [0, 0, 1, 1], [], []>} : vector<64x128xbf16>, vector<128x128xbf16>, vector<64x128xf32> -> vector<64x128xf32>
    %49 = arith.addf %42, %48 : vector<64x128xf32>
    %c0_56 = arith.constant 0 : index
    %c2_57 = arith.constant 2 : index
    %c1_58 = arith.constant 1 : index
    %c0_59 = arith.constant 0 : index
    %c0_60 = arith.constant 0 : index
    %50 = vector.load %arg1[%c0_56, %c2_57, %c1_58, %c0_59, %c0_60] : memref<1x6x9x8x128xbf16, #tpu.memory_space<vmem>>, vector<1x1x8x8x128xbf16>
    %51 = vector.shape_cast %50 : vector<1x1x8x8x128xbf16> to vector<8x8x128xbf16>
    %52 = vector.shape_cast %51 : vector<8x8x128xbf16> to vector<64x128xbf16>
    %c7 = arith.constant 7 : index
    %c0_61 = arith.constant 0 : index
    %c0_62 = arith.constant 0 : index
    %53 = vector.load %arg2[%c7, %c0_61, %c0_62] : memref<9x128x128xbf16, #tpu.memory_space<vmem>>, vector<1x128x128xbf16>
    %54 = vector.shape_cast %53 : vector<1x128x128xbf16> to vector<128x128xbf16>
    %cst_63 = arith.constant dense<0.000000e+00> : vector<64x128xf32>
    %55 = tpu.matmul %52, %54, %cst_63 {dimension_numbers = #tpu.dot_dimension_numbers<[1], [0], [0], [1], [0, 0, 1, 1], [], []>} : vector<64x128xbf16>, vector<128x128xbf16>, vector<64x128xf32> -> vector<64x128xf32>
    %56 = arith.addf %49, %55 : vector<64x128xf32>
    %c0_64 = arith.constant 0 : index
    %c4_65 = arith.constant 4 : index
    %c1_66 = arith.constant 1 : index
    %c0_67 = arith.constant 0 : index
    %c0_68 = arith.constant 0 : index
    %57 = vector.load %arg1[%c0_64, %c4_65, %c1_66, %c0_67, %c0_68] : memref<1x6x9x8x128xbf16, #tpu.memory_space<vmem>>, vector<1x1x8x8x128xbf16>
    %58 = vector.shape_cast %57 : vector<1x1x8x8x128xbf16> to vector<8x8x128xbf16>
    %59 = vector.shape_cast %58 : vector<8x8x128xbf16> to vector<64x128xbf16>
    %c8 = arith.constant 8 : index
    %c0_69 = arith.constant 0 : index
    %c0_70 = arith.constant 0 : index
    %60 = vector.load %arg2[%c8, %c0_69, %c0_70] : memref<9x128x128xbf16, #tpu.memory_space<vmem>>, vector<1x128x128xbf16>
    %61 = vector.shape_cast %60 : vector<1x128x128xbf16> to vector<128x128xbf16>
    %cst_71 = arith.constant dense<0.000000e+00> : vector<64x128xf32>
    %62 = tpu.matmul %59, %61, %cst_71 {dimension_numbers = #tpu.dot_dimension_numbers<[1], [0], [0], [1], [0, 0, 1, 1], [], []>} : vector<64x128xbf16>, vector<128x128xbf16>, vector<64x128xf32> -> vector<64x128xf32>
    %63 = arith.addf %56, %62 : vector<64x128xf32>
    %c0_72 = arith.constant 0 : index
    %c0_73 = arith.constant 0 : index
    %64 = vector.load %arg3[%c0_72, %c0_73] : memref<1x128xf32, #tpu.memory_space<vmem>>, vector<1x128xf32>
    %65 = vector.broadcast %64 : vector<1x128xf32> to vector<64x128xf32>
    %66 = arith.addf %63, %65 : vector<64x128xf32>
    %cst_74 = arith.constant 0.000000e+00 : f32
    %67 = vector.broadcast %cst_74 : f32 to vector<64x128xf32>
    %68 = arith.maximumf %66, %67 : vector<64x128xf32>
    %69 = vector.shape_cast %68 : vector<64x128xf32> to vector<8x8x128xf32>
    %70 = arith.truncf %69 : vector<8x8x128xf32> to vector<8x8x128xbf16>
    %c0_75 = arith.constant 0 : index
    %c0_76 = arith.constant 0 : index
    %c0_77 = arith.constant 0 : index
    %c0_78 = arith.constant 0 : index
    %71 = vector.load %arg4[%c0_75, %c0_76, %c0_77, %c0_78] : memref<1x8x8x128xbf16, #tpu.memory_space<vmem>>, vector<1x8x8x128xbf16>
    %72 = vector.shape_cast %71 : vector<1x8x8x128xbf16> to vector<8x8x128xbf16>
    %73 = vector.shape_cast %70 : vector<8x8x128xbf16> to vector<1x8x8x128xbf16>
    tpu.vector_store %arg4[%c0_75, %c0_76, %c0_77, %c0_78], %73 {strides = array<i32>} : memref<1x8x8x128xbf16, #tpu.memory_space<vmem>>, vector<1x8x8x128xbf16>,
    return
  }
  func.func @transform_0(%arg0: i32) -> (i32, i32, i32, i32, i32) {
    %c0_i32 = arith.constant 0 : i32
    %c0_i32_0 = arith.constant 0 : i32
    %c0_i32_1 = arith.constant 0 : i32
    %c0_i32_2 = arith.constant 0 : i32
    %c0_i32_3 = arith.constant 0 : i32
    return %arg0, %c0_i32, %c0_i32_0, %c0_i32_1, %c0_i32_2 : i32, i32, i32, i32, i32
  }
  func.func @transform_1(%arg0: i32) -> (i32, i32, i32) {
    %c0_i32 = arith.constant 0 : i32
    %c0_i32_0 = arith.constant 0 : i32
    %c0_i32_1 = arith.constant 0 : i32
    %c0_i32_2 = arith.constant 0 : i32
    return %c0_i32, %c0_i32_0, %c0_i32_1 : i32, i32, i32
  }
  func.func @transform_2(%arg0: i32) -> (i32, i32) {
    %c0_i32 = arith.constant 0 : i32
    %c0_i32_0 = arith.constant 0 : i32
    %c0_i32_1 = arith.constant 0 : i32
    return %c0_i32, %c0_i32_0 : i32, i32
  }
  func.func @transform_3(%arg0: i32) -> (i32, i32, i32, i32) {
    %c0_i32 = arith.constant 0 : i32
    %c0_i32_0 = arith.constant 0 : i32
    %c0_i32_1 = arith.constant 0 : i32
    %c0_i32_2 = arith.constant 0 : i32
    return %arg0, %c0_i32, %c0_i32_0, %c0_i32_1 : i32, i32, i32, i32
  }
}

module attributes {stable_mosaic.version = 11 : i64} {
  func.func @_mm_bias_kernel(%arg0: i32, %arg1: memref<128x128xbf16, #tpu.memory_space<vmem>>, %arg2: memref<128x128xbf16, #tpu.memory_space<vmem>>, %arg3: memref<1x128xf32, #tpu.memory_space<vmem>>, %arg4: memref<128x128xbf16, #tpu.memory_space<vmem>>) attributes {dimension_semantics = [#tpu.dimension_semantics<parallel>], iteration_bounds = array<i64: 3>, scalar_prefetch = 0 : i64, scratch_operands = 0 : i64, tpu.core_type = #tpu.core_type<tc>, window_params = [{transform_indices = @transform_0, window_bounds = array<i64: 128, 128>}, {pipeline_mode = #tpu.pipeline_mode<synchronous>, transform_indices = @transform_1, window_bounds = array<i64: 128, 128>}, {pipeline_mode = #tpu.pipeline_mode<synchronous>, transform_indices = @transform_2, window_bounds = array<i64: 1, 128>}, {transform_indices = @transform_3, window_bounds = array<i64: 128, 128>}]} {
    %c0 = arith.constant 0 : index
    %c0_0 = arith.constant 0 : index
    %0 = vector.load %arg1[%c0, %c0_0] : memref<128x128xbf16, #tpu.memory_space<vmem>>, vector<128x128xbf16>
    %c0_1 = arith.constant 0 : index
    %c0_2 = arith.constant 0 : index
    %1 = vector.load %arg2[%c0_1, %c0_2] : memref<128x128xbf16, #tpu.memory_space<vmem>>, vector<128x128xbf16>
    %cst = arith.constant dense<0.000000e+00> : vector<128x128xf32>
    %2 = tpu.matmul %0, %1, %cst {dimension_numbers = #tpu.dot_dimension_numbers<[1], [0], [0], [1], [0, 0, 1, 1], [], []>} : vector<128x128xbf16>, vector<128x128xbf16>, vector<128x128xf32> -> vector<128x128xf32>
    %c0_3 = arith.constant 0 : index
    %c0_4 = arith.constant 0 : index
    %3 = vector.load %arg3[%c0_3, %c0_4] : memref<1x128xf32, #tpu.memory_space<vmem>>, vector<1x128xf32>
    %4 = vector.broadcast %3 : vector<1x128xf32> to vector<128x128xf32>
    %5 = arith.addf %2, %4 : vector<128x128xf32>
    %6 = arith.truncf %5 : vector<128x128xf32> to vector<128x128xbf16>
    %c0_5 = arith.constant 0 : index
    %c0_6 = arith.constant 0 : index
    %7 = vector.load %arg4[%c0_5, %c0_6] : memref<128x128xbf16, #tpu.memory_space<vmem>>, vector<128x128xbf16>
    tpu.vector_store %arg4[%c0_5, %c0_6], %6 {strides = array<i32>} : memref<128x128xbf16, #tpu.memory_space<vmem>>, vector<128x128xbf16>,
    return
  }
  func.func @transform_0(%arg0: i32) -> (i32, i32) {
    %c0_i32 = arith.constant 0 : i32
    %c0_i32_0 = arith.constant 0 : i32
    return %arg0, %c0_i32 : i32, i32
  }
  func.func @transform_1(%arg0: i32) -> (i32, i32) {
    %c0_i32 = arith.constant 0 : i32
    %c0_i32_0 = arith.constant 0 : i32
    %c0_i32_1 = arith.constant 0 : i32
    return %c0_i32, %c0_i32_0 : i32, i32
  }
  func.func @transform_2(%arg0: i32) -> (i32, i32) {
    %c0_i32 = arith.constant 0 : i32
    %c0_i32_0 = arith.constant 0 : i32
    %c0_i32_1 = arith.constant 0 : i32
    return %c0_i32, %c0_i32_0 : i32, i32
  }
  func.func @transform_3(%arg0: i32) -> (i32, i32) {
    %c0_i32 = arith.constant 0 : i32
    %c0_i32_0 = arith.constant 0 : i32
    return %arg0, %c0_i32 : i32, i32
  }
}

module attributes {stable_mosaic.version = 11 : i64} {
  func.func @_mm_bias_res_kernel(%arg0: i32, %arg1: memref<128x128xbf16, #tpu.memory_space<vmem>>, %arg2: memref<128x128xbf16, #tpu.memory_space<vmem>>, %arg3: memref<1x128xf32, #tpu.memory_space<vmem>>, %arg4: memref<128x128xbf16, #tpu.memory_space<vmem>>, %arg5: memref<128x128xbf16, #tpu.memory_space<vmem>>) attributes {dimension_semantics = [#tpu.dimension_semantics<parallel>], iteration_bounds = array<i64: 3>, scalar_prefetch = 0 : i64, scratch_operands = 0 : i64, tpu.core_type = #tpu.core_type<tc>, window_params = [{transform_indices = @transform_0, window_bounds = array<i64: 128, 128>}, {pipeline_mode = #tpu.pipeline_mode<synchronous>, transform_indices = @transform_1, window_bounds = array<i64: 128, 128>}, {pipeline_mode = #tpu.pipeline_mode<synchronous>, transform_indices = @transform_2, window_bounds = array<i64: 1, 128>}, {transform_indices = @transform_3, window_bounds = array<i64: 128, 128>}, {transform_indices = @transform_4, window_bounds = array<i64: 128, 128>}]} {
    %c0 = arith.constant 0 : index
    %c0_0 = arith.constant 0 : index
    %0 = vector.load %arg1[%c0, %c0_0] : memref<128x128xbf16, #tpu.memory_space<vmem>>, vector<128x128xbf16>
    %c0_1 = arith.constant 0 : index
    %c0_2 = arith.constant 0 : index
    %1 = vector.load %arg2[%c0_1, %c0_2] : memref<128x128xbf16, #tpu.memory_space<vmem>>, vector<128x128xbf16>
    %cst = arith.constant dense<0.000000e+00> : vector<128x128xf32>
    %2 = tpu.matmul %0, %1, %cst {dimension_numbers = #tpu.dot_dimension_numbers<[1], [0], [0], [1], [0, 0, 1, 1], [], []>} : vector<128x128xbf16>, vector<128x128xbf16>, vector<128x128xf32> -> vector<128x128xf32>
    %c0_3 = arith.constant 0 : index
    %c0_4 = arith.constant 0 : index
    %3 = vector.load %arg3[%c0_3, %c0_4] : memref<1x128xf32, #tpu.memory_space<vmem>>, vector<1x128xf32>
    %4 = vector.broadcast %3 : vector<1x128xf32> to vector<128x128xf32>
    %5 = arith.addf %2, %4 : vector<128x128xf32>
    %c0_5 = arith.constant 0 : index
    %c0_6 = arith.constant 0 : index
    %6 = vector.load %arg4[%c0_5, %c0_6] : memref<128x128xbf16, #tpu.memory_space<vmem>>, vector<128x128xbf16>
    %7 = arith.extf %6 : vector<128x128xbf16> to vector<128x128xf32>
    %8 = arith.addf %5, %7 : vector<128x128xf32>
    %cst_7 = arith.constant 0.000000e+00 : f32
    %9 = vector.broadcast %cst_7 : f32 to vector<128x128xf32>
    %10 = arith.maximumf %8, %9 : vector<128x128xf32>
    %11 = arith.truncf %10 : vector<128x128xf32> to vector<128x128xbf16>
    %c0_8 = arith.constant 0 : index
    %c0_9 = arith.constant 0 : index
    %12 = vector.load %arg5[%c0_8, %c0_9] : memref<128x128xbf16, #tpu.memory_space<vmem>>, vector<128x128xbf16>
    tpu.vector_store %arg5[%c0_8, %c0_9], %11 {strides = array<i32>} : memref<128x128xbf16, #tpu.memory_space<vmem>>, vector<128x128xbf16>,
    return
  }
  func.func @transform_0(%arg0: i32) -> (i32, i32) {
    %c0_i32 = arith.constant 0 : i32
    %c0_i32_0 = arith.constant 0 : i32
    return %arg0, %c0_i32 : i32, i32
  }
  func.func @transform_1(%arg0: i32) -> (i32, i32) {
    %c0_i32 = arith.constant 0 : i32
    %c0_i32_0 = arith.constant 0 : i32
    %c0_i32_1 = arith.constant 0 : i32
    return %c0_i32, %c0_i32_0 : i32, i32
  }
  func.func @transform_2(%arg0: i32) -> (i32, i32) {
    %c0_i32 = arith.constant 0 : i32
    %c0_i32_0 = arith.constant 0 : i32
    %c0_i32_1 = arith.constant 0 : i32
    return %c0_i32, %c0_i32_0 : i32, i32
  }
  func.func @transform_3(%arg0: i32) -> (i32, i32) {
    %c0_i32 = arith.constant 0 : i32
    %c0_i32_0 = arith.constant 0 : i32
    return %arg0, %c0_i32 : i32, i32
  }
  func.func @transform_4(%arg0: i32) -> (i32, i32) {
    %c0_i32 = arith.constant 0 : i32
    %c0_i32_0 = arith.constant 0 : i32
    return %arg0, %c0_i32 : i32, i32
  }
}

module attributes {stable_mosaic.version = 11 : i64} {
  func.func @_head_kernel(%arg0: i32, %arg1: memref<6x64x128xbf16, #tpu.memory_space<vmem>>, %arg2: memref<128x128xbf16, #tpu.memory_space<vmem>>, %arg3: memref<1x128xf32, #tpu.memory_space<vmem>>, %arg4: memref<128x128xbf16, #tpu.memory_space<vmem>>, %arg5: memref<1x128xf32, #tpu.memory_space<vmem>>, %arg6: memref<6x128xf32, #tpu.memory_space<vmem>>) attributes {dimension_semantics = [#tpu.dimension_semantics<arbitrary>], iteration_bounds = array<i64: 1>, scalar_prefetch = 0 : i64, scratch_operands = 0 : i64, tpu.core_type = #tpu.core_type<tc>, window_params = [{pipeline_mode = #tpu.pipeline_mode<synchronous>, transform_indices = @transform_0, window_bounds = array<i64: 6, 64, 128>}, {pipeline_mode = #tpu.pipeline_mode<synchronous>, transform_indices = @transform_1, window_bounds = array<i64: 128, 128>}, {pipeline_mode = #tpu.pipeline_mode<synchronous>, transform_indices = @transform_2, window_bounds = array<i64: 1, 128>}, {pipeline_mode = #tpu.pipeline_mode<synchronous>, transform_indices = @transform_3, window_bounds = array<i64: 128, 128>}, {pipeline_mode = #tpu.pipeline_mode<synchronous>, transform_indices = @transform_4, window_bounds = array<i64: 1, 128>}, {pipeline_mode = #tpu.pipeline_mode<synchronous>, transform_indices = @transform_5, window_bounds = array<i64: 6, 128>}]} {
    %c0 = arith.constant 0 : index
    %c0_0 = arith.constant 0 : index
    %c0_1 = arith.constant 0 : index
    %0 = vector.load %arg1[%c0, %c0_0, %c0_1] : memref<6x64x128xbf16, #tpu.memory_space<vmem>>, vector<6x64x128xbf16>
    %1 = arith.extf %0 : vector<6x64x128xbf16> to vector<6x64x128xf32>
    %cst = arith.constant dense<0.000000e+00> : vector<6x128xf32>
    %2 = vector.multi_reduction <add>, %1, %cst [1] : vector<6x64x128xf32> to vector<6x128xf32>
    %cst_2 = arith.constant 1.562500e-02 : f32
    %3 = vector.broadcast %cst_2 : f32 to vector<6x128xf32>
    %4 = arith.mulf %2, %3 : vector<6x128xf32>
    %5 = arith.truncf %4 : vector<6x128xf32> to vector<6x128xbf16>
    %c0_3 = arith.constant 0 : index
    %c0_4 = arith.constant 0 : index
    %6 = vector.load %arg2[%c0_3, %c0_4] : memref<128x128xbf16, #tpu.memory_space<vmem>>, vector<128x128xbf16>
    %cst_5 = arith.constant dense<0.000000e+00> : vector<6x128xf32>
    %7 = tpu.matmul %5, %6, %cst_5 {dimension_numbers = #tpu.dot_dimension_numbers<[1], [0], [0], [1], [0, 0, 1, 1], [], []>} : vector<6x128xbf16>, vector<128x128xbf16>, vector<6x128xf32> -> vector<6x128xf32>
    %c0_6 = arith.constant 0 : index
    %c0_7 = arith.constant 0 : index
    %8 = vector.load %arg3[%c0_6, %c0_7] : memref<1x128xf32, #tpu.memory_space<vmem>>, vector<1x128xf32>
    %9 = vector.broadcast %8 : vector<1x128xf32> to vector<6x128xf32>
    %10 = arith.addf %7, %9 : vector<6x128xf32>
    %cst_8 = arith.constant 0.000000e+00 : f32
    %11 = vector.broadcast %cst_8 : f32 to vector<6x128xf32>
    %12 = arith.maximumf %10, %11 : vector<6x128xf32>
    %13 = arith.truncf %12 : vector<6x128xf32> to vector<6x128xbf16>
    %c0_9 = arith.constant 0 : index
    %c0_10 = arith.constant 0 : index
    %14 = vector.load %arg4[%c0_9, %c0_10] : memref<128x128xbf16, #tpu.memory_space<vmem>>, vector<128x128xbf16>
    %cst_11 = arith.constant dense<0.000000e+00> : vector<6x128xf32>
    %15 = tpu.matmul %13, %14, %cst_11 {dimension_numbers = #tpu.dot_dimension_numbers<[1], [0], [0], [1], [0, 0, 1, 1], [], []>} : vector<6x128xbf16>, vector<128x128xbf16>, vector<6x128xf32> -> vector<6x128xf32>
    %c0_12 = arith.constant 0 : index
    %c0_13 = arith.constant 0 : index
    %16 = vector.load %arg5[%c0_12, %c0_13] : memref<1x128xf32, #tpu.memory_space<vmem>>, vector<1x128xf32>
    %17 = vector.broadcast %16 : vector<1x128xf32> to vector<6x128xf32>
    %18 = arith.addf %15, %17 : vector<6x128xf32>
    %c0_14 = arith.constant 0 : index
    %c0_15 = arith.constant 0 : index
    %19 = vector.load %arg6[%c0_14, %c0_15] : memref<6x128xf32, #tpu.memory_space<vmem>>, vector<6x128xf32>
    tpu.vector_store %arg6[%c0_14, %c0_15], %18 {strides = array<i32>} : memref<6x128xf32, #tpu.memory_space<vmem>>, vector<6x128xf32>,
    return
  }
  func.func @transform_0(%arg0: i32) -> (i32, i32, i32) {
    %c0_i32 = arith.constant 0 : i32
    %c0_i32_0 = arith.constant 0 : i32
    %c0_i32_1 = arith.constant 0 : i32
    %c0_i32_2 = arith.constant 0 : i32
    return %c0_i32, %c0_i32_0, %c0_i32_1 : i32, i32, i32
  }
  func.func @transform_1(%arg0: i32) -> (i32, i32) {
    %c0_i32 = arith.constant 0 : i32
    %c0_i32_0 = arith.constant 0 : i32
    %c0_i32_1 = arith.constant 0 : i32
    return %c0_i32, %c0_i32_0 : i32, i32
  }
  func.func @transform_2(%arg0: i32) -> (i32, i32) {
    %c0_i32 = arith.constant 0 : i32
    %c0_i32_0 = arith.constant 0 : i32
    %c0_i32_1 = arith.constant 0 : i32
    return %c0_i32, %c0_i32_0 : i32, i32
  }
  func.func @transform_3(%arg0: i32) -> (i32, i32) {
    %c0_i32 = arith.constant 0 : i32
    %c0_i32_0 = arith.constant 0 : i32
    %c0_i32_1 = arith.constant 0 : i32
    return %c0_i32, %c0_i32_0 : i32, i32
  }
  func.func @transform_4(%arg0: i32) -> (i32, i32) {
    %c0_i32 = arith.constant 0 : i32
    %c0_i32_0 = arith.constant 0 : i32
    %c0_i32_1 = arith.constant 0 : i32
    return %c0_i32, %c0_i32_0 : i32, i32
  }
  func.func @transform_5(%arg0: i32) -> (i32, i32) {
    %c0_i32 = arith.constant 0 : i32
    %c0_i32_0 = arith.constant 0 : i32
    %c0_i32_1 = arith.constant 0 : i32
    return %c0_i32, %c0_i32_0 : i32, i32
  }
}

</mosaic_0001>

<bundles_post_ra>
// kernel: forward.11
= control target key start
LH: loop header
LB: loop body
LE: loop exit
PB: predicated region body
PF: predicated region fallthrough
CT: control target
= control target key end

     0   :  { %s2051_s12 = smov 0   ;;  %s2303_s0 = inlined_call_operand.vmem [shape: bf16[6144,147], index: 0, kind: input, shape index: {}]   ;;  %s2304_s1 = inlined_call_operand.vmem [shape: bf16[147,128], index: 1, kind: input, shape index: {}]   ;;  %s2305_s2 = inlined_call_operand.vmem [shape: f32[1,128], index: 2, kind: input, shape index: {}]   ;;  %s2306_s3 = inlined_call_operand.vmem [shape: bf16[6144,128], index: 3, kind: output, shape index: {}]  }
   0x1 LB: > { %s1446_s13 = sadd.s32 4294967295, %s2027_s12   ;;  %p1450_p0 = scmp.ge.s32.totalorder %s2027_s12, 1  ;;  %s2027_s12 = sphi %s2051_s12, %s13_s12  }
   0x2   : > { %p139_p1 = scmp.lt.s32.totalorder %s2027_s12, 13 }
   0x4   : > { %p140_p2 = pnand %p1450_p0, %p139_p1 }
   0x5   : > { %v1915_v0 = vld [vmem:[%s2304_s1] sm:$0xff] (!%p140_p2)   ;;  %v2029_v1 = vmov (!%p140_p2), 0   ;;  %v1916_v2 = vld [vmem:[%s2304_s1 + $0x8] sm:$0xff] (!%p140_p2)   ;;  %v1917_v3 = vld [vmem:[%s2304_s1 + $0x10] sm:$0xff] (!%p140_p2)   ;;  %s1451_s20 = sshll.u32 (!%p140_p2), %s1446_s13, 6  ;;  %vm613_vm0 = vcmask (!%p140_p2), 154624  }
   0x6   : > { %143 = sbr.rel (%p140_p2) target bundleno = 387 (0x183), region = 32  ;;  %717 = vmatprep.subr.bf16.mxu0 (!%p140_p2), %v2029_v1  ;;  %1885 = vmatprep.subr.bf16.mxu1 (!%p140_p2), %v2029_v1  ;;  %p165_p3 = scmp.lt.s32.totalorder (!%p140_p2), %s1451_s20, 767  ;;  %v1918_v4 = vld [vmem:[%s2304_s1 + $0x18] sm:$0xff] (!%p140_p2)   ;;  %v1919_v5 = vld [vmem:[%s2304_s1 + $0x20] sm:$0xff] (!%p140_p2)   ;;  %v1920_v8 = vld [vmem:[%s2304_s1 + $0x28] sm:$0xff] (!%p140_p2)   ;;  %vm710_vm1 = vcmask (!%p140_p2), 1040384  }
   0x7   : > { %718 = vmatpush1.bf16.msra.mxu0 (!%p140_p2), %v1915_v0  ;;  %1895 = vmatpush1.bf16.msra.mxu1 (!%p140_p2), %v1915_v0  ;;  %v1921_v9 = vld [vmem:[%s2304_s1 + $0x30] sm:$0xff] (!%p140_p2)   ;;  %v1922_v10 = vld [vmem:[%s2304_s1 + $0x38] sm:$0xff] (!%p140_p2)   ;;  %vm711_vm2 = vcmask (!%p140_p2), 1041408   ;;  %v2030_v11 = vmov (!%p140_p2), 65535   ;;  %v1923_v13 = vld [vmem:[%s2304_s1 + $0x40] sm:$0xff] (!%p140_p2)  }
   0x8   : > { %719 = vmatprep.subr.bf16.mxu0 (!%p140_p2), %v2029_v1  ;;  %1886 = vmatprep.subr.bf16.mxu1 (!%p140_p2), %v2029_v1  ;;  %v712_v12 = vsel (!%p140_p2), %vm710_vm1, 4294967295, %v2030_v11  ;;  %v1924_v14 = vld [vmem:[%s2304_s1 + $0x48] ss:$0 sps:$4 sm:$0x33] (!%p140_p2)  }
   0x9   : > { %v713_v15 = vsel (!%p140_p2), %vm711_vm2, %v712_v12, 0 }
   0xa   : > { %v715_v16 = vand.u32 (!%p140_p2), %v1924_v14, %v713_v15  ;;  %v2196_v15 = vld [vmem:[%s2305_s2] ss:$0 sm:$0xff] (!%p140_p2) }
   0xb   : > { %720 = vmatpush1.bf16.msra.mxu0 (!%p140_p2), %v1916_v2  ;;  %1896 = vmatpush1.bf16.msra.mxu1 (!%p140_p2), %v1916_v2 }
   0xc   : > { %721 = vmatprep.subr.bf16.mxu0 (!%p140_p2), %v2029_v1  ;;  %1887 = vmatprep.subr.bf16.mxu1 (!%p140_p2), %v2029_v1 }
   0xd   : > { %s2308_s20 = smov (!%p165_p3, %s1451_s20), 767 }
   0xe   : > { %s1629_s23 = sshll.u32 %s2308_s20, 3  ;;  %s1455_s15 = sshll.u32 %s2308_s20, 2 }
   0xf   : > { %722 = vmatpush1.bf16.msra.mxu0 %v1917_v3  ;;  %1897 = vmatpush1.bf16.msra.mxu1 %v1917_v3  ;;  %s2077_s26 = scalar_lea.vmem %s2303_s0, %s1629_s23  ;;  %s2206_s18 = scalar_lea.vmem %s2306_s3, %s1455_s15 }
  0x10   : > { %723 = vmatprep.subr.bf16.mxu0 %v2029_v1  ;;  %1888 = vmatprep.subr.bf16.mxu1 %v2029_v1  ;;  %v1927_v6 = vld [vmem:[%s2077_s26 + $0x4] ss:$8 sps:$4 sm:$0xff]   ;;  %v1925_v17 = vld [vmem:[%s2077_s26] ss:$8 sps:$4 sm:$0xff]   ;;  %v1931_v19 = vld [vmem:[%s2077_s26 + $0x14] ss:$8 sps:$4 sm:$0xff]  }
  0x11   : > { %v1930_v7 = vld [vmem:[%s2077_s26 + $0x104] ss:$8 sps:$4 sm:$0xff]   ;;  %1531 = vmatprep.mubr.msk.bf16.mxu0 %vm613_vm0, %v1927_v6  ;;  %v1928_v18 = vld [vmem:[%s2077_s26 + $0x100] ss:$8 sps:$4 sm:$0xff]   ;;  %v1933_v20 = vld [vmem:[%s2077_s26 + $0x114] ss:$8 sps:$4 sm:$0xff]  }
  0x12   : > { %1547 = vmatprep.mubr.msk.bf16.mxu1 %vm613_vm0, %v1930_v7  ;;  %v1935_v21 = vld [vmem:[%s2077_s26 + $0x10] ss:$8 sps:$4 sm:$0xff]   ;;  %v1937_v23 = vld [vmem:[%s2077_s26 + $0x24] ss:$8 sps:$4 sm:$0xff]   ;;  %v1941_v25 = vld [vmem:[%s2077_s26 + $0x20] ss:$8 sps:$4 sm:$0xff]  }
  0x13   : > { %724 = vmatpush1.bf16.msra.mxu0 %v1918_v4  ;;  %1898 = vmatpush1.bf16.msra.mxu1 %v1918_v4  ;;  %v1936_v22 = vld [vmem:[%s2077_s26 + $0x110] ss:$8 sps:$4 sm:$0xff]   ;;  %v1939_v24 = vld [vmem:[%s2077_s26 + $0x124] ss:$8 sps:$4 sm:$0xff]   ;;  %v1942_v26 = vld [vmem:[%s2077_s26 + $0x120] ss:$8 sps:$4 sm:$0xff]  }
  0x14   : > { %725 = vmatprep.subr.bf16.mxu0 %v2029_v1  ;;  %1889 = vmatprep.subr.bf16.mxu1 %v2029_v1  ;;  %v1943_v27 = vld [vmem:[%s2077_s26 + $0x34] ss:$8 sps:$4 sm:$0xff]   ;;  %v1947_v29 = vld [vmem:[%s2077_s26 + $0x30] ss:$8 sps:$4 sm:$0xff]   ;;  %v1949_v31 = vld [vmem:[%s2077_s26 + $0x44] ss:$8 sps:$4 sm:$0xff]  }
  0x15   : > { %v1945_v28 = vld [vmem:[%s2077_s26 + $0x134] ss:$8 sps:$4 sm:$0xff]   ;;  %v1948_v30 = vld [vmem:[%s2077_s26 + $0x130] ss:$8 sps:$4 sm:$0xff]   ;;  %v1951_v32 = vld [vmem:[%s2077_s26 + $0x144] ss:$8 sps:$4 sm:$0xff]  }
  0x16   : > { %v1953_v33 = vld [vmem:[%s2077_s26 + $0x40] ss:$8 sps:$4 sm:$0xff]   ;;  %v1955_v35 = vld [vmem:[%s2077_s26 + $0x54] ss:$8 sps:$4 sm:$0xff]   ;;  %v1959_v37 = vld [vmem:[%s2077_s26 + $0x50] ss:$8 sps:$4 sm:$0xff]  }
  0x17   : > { %726 = vmatpush1.bf16.msra.mxu0 %v1919_v5  ;;  %1899 = vmatpush1.bf16.msra.mxu1 %v1919_v5  ;;  %v1954_v34 = vld [vmem:[%s2077_s26 + $0x140] ss:$8 sps:$4 sm:$0xff]   ;;  %v1957_v36 = vld [vmem:[%s2077_s26 + $0x154] ss:$8 sps:$4 sm:$0xff]   ;;  %v1960_v38 = vld [vmem:[%s2077_s26 + $0x150] ss:$8 sps:$4 sm:$0xff]  }
  0x18   : > { %727 = vmatprep.subr.bf16.mxu0 %v2029_v1  ;;  %1890 = vmatprep.subr.bf16.mxu1 %v2029_v1  ;;  %v1961_v39 = vld [vmem:[%s2077_s26 + $0x64] ss:$8 sps:$4 sm:$0xff]   ;;  %v1965_v41 = vld [vmem:[%s2077_s26 + $0x60] ss:$8 sps:$4 sm:$0xff]   ;;  %v1967_v43 = vld [vmem:[%s2077_s26 + $0x74] ss:$8 sps:$4 sm:$0xff]  }
  0x19   : > { %v1963_v40 = vld [vmem:[%s2077_s26 + $0x164] ss:$8 sps:$4 sm:$0xff]   ;;  %v1966_v42 = vld [vmem:[%s2077_s26 + $0x160] ss:$8 sps:$4 sm:$0xff]   ;;  %v1969_v44 = vld [vmem:[%s2077_s26 + $0x174] ss:$8 sps:$4 sm:$0xff]  }
  0x1a   : > { %v1971_v45 = vld [vmem:[%s2077_s26 + $0x70] ss:$8 sps:$4 sm:$0xff]   ;;  %v1973_v47 = vld [vmem:[%s2077_s26 + $0x84] ss:$8 sps:$4 sm:$0xff]   ;;  %v1977_v49 = vld [vmem:[%s2077_s26 + $0x80] ss:$8 sps:$4 sm:$0xff]  }
  0x1b   : > { %728 = vmatpush1.bf16.msra.mxu0 %v1920_v8  ;;  %1900 = vmatpush1.bf16.msra.mxu1 %v1920_v8  ;;  %v1972_v46 = vld [vmem:[%s2077_s26 + $0x170] ss:$8 sps:$4 sm:$0xff]   ;;  %v1975_v48 = vld [vmem:[%s2077_s26 + $0x184] ss:$8 sps:$4 sm:$0xff]   ;;  %v1978_v50 = vld [vmem:[%s2077_s26 + $0x180] ss:$8 sps:$4 sm:$0xff]  }
  0x1c   : > { %729 = vmatprep.subr.bf16.mxu0 %v2029_v1  ;;  %1891 = vmatprep.subr.bf16.mxu1 %v2029_v1  ;;  %v1979_v51 = vld [vmem:[%s2077_s26 + $0x94] ss:$8 sps:$4 sm:$0xff]   ;;  %v1983_v53 = vld [vmem:[%s2077_s26 + $0x90] ss:$8 sps:$4 sm:$0xff]   ;;  %v1985_v55 = vld [vmem:[%s2077_s26 + $0xa4] ss:$8 sps:$4 sm:$0xff]  }
  0x1d   : > { %v1981_v52 = vld [vmem:[%s2077_s26 + $0x194] ss:$8 sps:$4 sm:$0xff]   ;;  %v1984_v54 = vld [vmem:[%s2077_s26 + $0x190] ss:$8 sps:$4 sm:$0xff]   ;;  %v1987_v56 = vld [vmem:[%s2077_s26 + $0x1a4] ss:$8 sps:$4 sm:$0xff]  }
  0x1e   : > { %v1989_v57 = vld [vmem:[%s2077_s26 + $0xa0] ss:$8 sps:$4 sm:$0xff]   ;;  %v1991_v59 = vld [vmem:[%s2077_s26 + $0xb4] ss:$8 sps:$4 sm:$0xff]   ;;  %v1995_v61 = vld [vmem:[%s2077_s26 + $0xb0] ss:$8 sps:$4 sm:$0xff]  }
  0x1f   : > { %730 = vmatpush1.bf16.msra.mxu0 %v1921_v9  ;;  %1901 = vmatpush1.bf16.msra.mxu1 %v1921_v9  ;;  %v1990_v58 = vld [vmem:[%s2077_s26 + $0x1a0] ss:$8 sps:$4 sm:$0xff]   ;;  %v1993_v60 = vld [vmem:[%s2077_s26 + $0x1b4] ss:$8 sps:$4 sm:$0xff]   ;;  %v1996_v62 = vld [vmem:[%s2077_s26 + $0x1b0] ss:$8 sps:$4 sm:$0xff]  }
  0x20   : > { %731 = vmatprep.subr.bf16.mxu0 %v2029_v1  ;;  %1892 = vmatprep.subr.bf16.mxu1 %v2029_v1  ;;  %v1997_v63 = vld [vmem:[%s2077_s26 + $0xc4] ss:$8 sps:$4 sm:$0xff]   ;;  %v2002_v2 = vld [vmem:[%s2077_s26 + $0x1c0] ss:$8 sps:$4 sm:$0xff]   ;;  %v2003_v3 = vld [vmem:[%s2077_s26 + $0xd4] ss:$8 sps:$4 sm:$0xff]  }
  0x21   : > { %v1999_v0 = vld [vmem:[%s2077_s26 + $0x1c4] ss:$8 sps:$4 sm:$0xff]   ;;  %v2005_v4 = vld [vmem:[%s2077_s26 + $0x1d4] ss:$8 sps:$4 sm:$0xff]   ;;  %v2007_v5 = vld [vmem:[%s2077_s26 + $0xd0] ss:$8 sps:$4 sm:$0xff]  }
  0x22   : > { %v2008_v6 = vld [vmem:[%s2077_s26 + $0x1d0] ss:$8 sps:$4 sm:$0xff]   ;;  %v2009_v7 = vld [vmem:[%s2077_s26 + $0xe4] ss:$8 sps:$4 sm:$0xff]   ;;  %v2013_v9 = vld [vmem:[%s2077_s26 + $0xe0] ss:$8 sps:$4 sm:$0xff]  }
  0x23   : > { %732 = vmatpush1.bf16.msra.mxu0 %v1922_v10  ;;  %1902 = vmatpush1.bf16.msra.mxu1 %v1922_v10  ;;  %v2011_v8 = vld [vmem:[%s2077_s26 + $0x1e4] ss:$8 sps:$4 sm:$0xff]   ;;  %v2014_v10 = vld [vmem:[%s2077_s26 + $0x1e0] ss:$8 sps:$4 sm:$0xff]   ;;  %v2015_v11 = vld [vmem:[%s2077_s26 + $0xf4] ss:$8 sps:$4 sm:$0xff]  }
  0x24   : > { %733 = vmatprep.subr.bf16.mxu0 %v2029_v1  ;;  %1893 = vmatprep.subr.bf16.mxu1 %v2029_v1  ;;  %v2017_v12 = vld [vmem:[%s2077_s26 + $0x1f4] ss:$8 sps:$4 sm:$0xff]   ;;  %v2020_v14 = vld [vmem:[%s2077_s26 + $0x1f0] ss:$8 sps:$4 sm:$0xff]  }
  0x27   : > { %734 = vmatpush1.bf16.msra.mxu0 %v1923_v13  ;;  %1903 = vmatpush1.bf16.msra.mxu1 %v1923_v13  ;;  %v2019_v13 = vld [vmem:[%s2077_s26 + $0xf0] ss:$8 sps:$4 sm:$0xff]  }
  0x28   : > { %735 = vmatprep.subr.bf16.mxu0 %v2029_v1  ;;  %1894 = vmatprep.subr.bf16.mxu1 %v2029_v1  ;;  %v2001_v1 = vld [vmem:[%s2077_s26 + $0xc0] ss:$8 sps:$4 sm:$0xff]  }
  0x2b   : > { %736 = vmatpush1.bf16.msra.mxu0 %v715_v16  ;;  %1904 = vmatpush1.bf16.msra.mxu1 %v715_v16 }
  0x2e   : > { %750 = vmatmul.mubr.bf16.vlgmr.msra.gmra.mrb[0].mxu0 %v1925_v17  ;;  %878 = vmatmul.mubr.bf16.vlgmr.msra.gmra.mrb[0].mxu1 %v1928_v18 }
  0x2f   : > { %1532 = vmatprep.mubr.msk.bf16.mxu0 %vm613_vm0, %v1931_v19  ;;  %1548 = vmatprep.mubr.msk.bf16.mxu1 %vm613_vm0, %v1933_v20 }
  0x36   : > { %758 = vmatmul.mubr.bf16.gmra.mrb[4].mxu0 %v1935_v21  ;;  %886 = vmatmul.mubr.bf16.gmra.mrb[4].mxu1 %v1936_v22 }
  0x37   : > { %1533 = vmatprep.mubr.msk.bf16.mxu0 %vm613_vm0, %v1937_v23  ;;  %1549 = vmatprep.mubr.msk.bf16.mxu1 %vm613_vm0, %v1939_v24 }
  0x3e   : > { %766 = vmatmul.mubr.bf16.gmra.mrb[8].mxu0 %v1941_v25  ;;  %894 = vmatmul.mubr.bf16.gmra.mrb[8].mxu1 %v1942_v26 }
  0x3f   : > { %1534 = vmatprep.mubr.msk.bf16.mxu0 %vm613_vm0, %v1943_v27  ;;  %1550 = vmatprep.mubr.msk.bf16.mxu1 %vm613_vm0, %v1945_v28 }
  0x46   : > { %774 = vmatmul.mubr.bf16.gmra.mrb[12].mxu0 %v1947_v29  ;;  %902 = vmatmul.mubr.bf16.gmra.mrb[12].mxu1 %v1948_v30 }
  0x47   : > { %1535 = vmatprep.mubr.msk.bf16.mxu0 %vm613_vm0, %v1949_v31  ;;  %1551 = vmatprep.mubr.msk.bf16.mxu1 %vm613_vm0, %v1951_v32 }
  0x4e   : > { %782 = vmatmul.mubr.bf16.gmra.mrb[16].mxu0 %v1953_v33  ;;  %910 = vmatmul.mubr.bf16.gmra.mrb[16].mxu1 %v1954_v34 }
  0x4f   : > { %1536 = vmatprep.mubr.msk.bf16.mxu0 %vm613_vm0, %v1955_v35  ;;  %1552 = vmatprep.mubr.msk.bf16.mxu1 %vm613_vm0, %v1957_v36 }
  0x56   : > { %790 = vmatmul.mubr.bf16.gmra.mrb[20].mxu0 %v1959_v37  ;;  %918 = vmatmul.mubr.bf16.gmra.mrb[20].mxu1 %v1960_v38 }
  0x57   : > { %1537 = vmatprep.mubr.msk.bf16.mxu0 %vm613_vm0, %v1961_v39  ;;  %1553 = vmatprep.mubr.msk.bf16.mxu1 %vm613_vm0, %v1963_v40 }
  0x5e   : > { %798 = vmatmul.mubr.bf16.gmra.mrb[24].mxu0 %v1965_v41  ;;  %926 = vmatmul.mubr.bf16.gmra.mrb[24].mxu1 %v1966_v42 }
  0x5f   : > { %1538 = vmatprep.mubr.msk.bf16.mxu0 %vm613_vm0, %v1967_v43  ;;  %1554 = vmatprep.mubr.msk.bf16.mxu1 %vm613_vm0, %v1969_v44 }
  0x66   : > { %806 = vmatmul.mubr.bf16.gmra.mrb[28].mxu0 %v1971_v45  ;;  %934 = vmatmul.mubr.bf16.gmra.mrb[28].mxu1 %v1972_v46 }
  0x67   : > { %1539 = vmatprep.mubr.msk.bf16.mxu0 %vm613_vm0, %v1973_v47  ;;  %1555 = vmatprep.mubr.msk.bf16.mxu1 %vm613_vm0, %v1975_v48 }
  0x6e   : > { %814 = vmatmul.mubr.bf16.gmra.mrb[32].mxu0 %v1977_v49  ;;  %942 = vmatmul.mubr.bf16.gmra.mrb[32].mxu1 %v1978_v50 }
  0x6f   : > { %1540 = vmatprep.mubr.msk.bf16.mxu0 %vm613_vm0, %v1979_v51  ;;  %1556 = vmatprep.mubr.msk.bf16.mxu1 %vm613_vm0, %v1981_v52 }
  0x76   : > { %822 = vmatmul.mubr.bf16.gmra.mrb[36].mxu0 %v1983_v53  ;;  %950 = vmatmul.mubr.bf16.gmra.mrb[36].mxu1 %v1984_v54 }
  0x77   : > { %1541 = vmatprep.mubr.msk.bf16.mxu0 %vm613_vm0, %v1985_v55  ;;  %1557 = vmatprep.mubr.msk.bf16.mxu1 %vm613_vm0, %v1987_v56 }
  0x7e   : > { %830 = vmatmul.mubr.bf16.gmra.mrb[40].mxu0 %v1989_v57  ;;  %958 = vmatmul.mubr.bf16.gmra.mrb[40].mxu1 %v1990_v58 }
  0x7f   : > { %1542 = vmatprep.mubr.msk.bf16.mxu0 %vm613_vm0, %v1991_v59  ;;  %1558 = vmatprep.mubr.msk.bf16.mxu1 %vm613_vm0, %v1993_v60 }
  0x86   : > { %838 = vmatmul.mubr.bf16.gmra.mrb[44].mxu0 %v1995_v61  ;;  %966 = vmatmul.mubr.bf16.gmra.mrb[44].mxu1 %v1996_v62 }
  0x87   : > { %1543 = vmatprep.mubr.msk.bf16.mxu0 %vm613_vm0, %v1997_v63  ;;  %1559 = vmatprep.mubr.msk.bf16.mxu1 %vm613_vm0, %v1999_v0 }
  0x8e   : > { %846 = vmatmul.mubr.bf16.gmra.mrb[48].mxu0 %v2001_v1  ;;  %974 = vmatmul.mubr.bf16.gmra.mrb[48].mxu1 %v2002_v2 }
  0x8f   : > { %1544 = vmatprep.mubr.msk.bf16.mxu0 %vm613_vm0, %v2003_v3  ;;  %1560 = vmatprep.mubr.msk.bf16.mxu1 %vm613_vm0, %v2005_v4 }
  0x96   : > { %854 = vmatmul.mubr.bf16.gmra.mrb[52].mxu0 %v2007_v5  ;;  %982 = vmatmul.mubr.bf16.gmra.mrb[52].mxu1 %v2008_v6 }
  0x97   : > { %1545 = vmatprep.mubr.msk.bf16.mxu0 %vm613_vm0, %v2009_v7  ;;  %1561 = vmatprep.mubr.msk.bf16.mxu1 %vm613_vm0, %v2011_v8 }
  0x9e   : > { %862 = vmatmul.mubr.bf16.gmra.mrb[56].mxu0 %v2013_v9  ;;  %990 = vmatmul.mubr.bf16.gmra.mrb[56].mxu1 %v2014_v10 }
  0x9f   : > { %1546 = vmatprep.mubr.msk.bf16.mxu0 %vm613_vm0, %v2015_v11  ;;  %1562 = vmatprep.mubr.msk.bf16.mxu1 %vm613_vm0, %v2017_v12 }
  0xa6   : > { %870 = vmatmul.mubr.bf16.gmra.mrb[60].mxu0 %v2019_v13  ;;  %998 = vmatmul.mubr.bf16.gmra.mrb[60].mxu1 %v2020_v14 }
 0x101   : > { %v751_v16 = vpop.f32.mrb[0].mxu0  ;;  %v879_v17 = vpop.f32.mrb[0].mxu1 }
 0x102   : > { %v752_v18 = vadd.f32 %v2196_v15, %v751_v16  ;;  %v880_v19 = vadd.f32 %v2196_v15, %v879_v17  ;;  %v753_v20 = vpop.f32.mrb[1].mxu0  ;;  %v881_v21 = vpop.f32.mrb[1].mxu1 }
 0x103   : > { %v754_v22 = vpop.f32.mrb[2].mxu0  ;;  %v882_v23 = vpop.f32.mrb[2].mxu1 }
 0x104   : > { %v755_v24 = vadd.f32 %v2196_v15, %v754_v22  ;;  %v883_v25 = vadd.f32 %v2196_v15, %v882_v23  ;;  %v756_v26 = vpop.f32.mrb[3].mxu0  ;;  %v884_v27 = vpop.f32.mrb[3].mxu1  ;;  %v1006_v28 = vmax.f32 %v752_v18, 0.0  ;;  %v1038_v29 = vmax.f32 %v880_v19, 0.0 }
 0x106   : > { %v1007_v30 = vmax.f32 %v755_v24, 0.0  ;;  %v1039_v31 = vmax.f32 %v883_v25, 0.0 }
 0x108   : > { %v1697_v32 = vpack.c.bf16 %v1007_v30, %v1006_v28  ;;  %v1777_v33 = vpack.c.bf16 %v1039_v31, %v1038_v29 }
 0x109   : > { %v759_v34 = vpop.f32.mrb[4].mxu0  ;;  %v887_v35 = vpop.f32.mrb[4].mxu1 }
 0x10a   : > { %1698 = vst [vmem:[%s2206_s18] sm:$0xff] %v1697_v32   ;;  %1869 = vst [vmem:[%s2206_s18 + $0x80] sm:$0xff] %v1777_v33   ;;  %v760_v36 = vadd.f32 %v2196_v15, %v759_v34  ;;  %v888_v37 = vadd.f32 %v2196_v15, %v887_v35  ;;  %v761_v38 = vpop.f32.mrb[5].mxu0  ;;  %v889_v39 = vpop.f32.mrb[5].mxu1 }
 0x10b   : > { %v762_v40 = vpop.f32.mrb[6].mxu0  ;;  %v890_v41 = vpop.f32.mrb[6].mxu1 }
 0x10c   : > { %v763_v42 = vadd.f32 %v2196_v15, %v762_v40  ;;  %v891_v43 = vadd.f32 %v2196_v15, %v890_v41  ;;  %v764_v44 = vpop.f32.mrb[7].mxu0  ;;  %v892_v45 = vpop.f32.mrb[7].mxu1  ;;  %v1008_v46 = vmax.f32 %v760_v36, 0.0  ;;  %v1040_v47 = vmax.f32 %v888_v37, 0.0 }
 0x10e   : > { %v1009_v48 = vmax.f32 %v763_v42, 0.0  ;;  %v1041_v49 = vmax.f32 %v891_v43, 0.0 }
 0x110   : > { %v1702_v50 = vpack.c.bf16 %v1009_v48, %v1008_v46  ;;  %v1782_v51 = vpack.c.bf16 %v1041_v49, %v1040_v47 }
 0x111   : > { %v767_v52 = vpop.f32.mrb[8].mxu0  ;;  %v895_v53 = vpop.f32.mrb[8].mxu1 }
 0x112   : > { %1854 = vst [vmem:[%s2206_s18 + $0x8] sm:$0xff] %v1702_v50   ;;  %1870 = vst [vmem:[%s2206_s18 + $0x88] sm:$0xff] %v1782_v51   ;;  %v768_v54 = vadd.f32 %v2196_v15, %v767_v52  ;;  %v896_v55 = vadd.f32 %v2196_v15, %v895_v53  ;;  %v769_v56 = vpop.f32.mrb[9].mxu0  ;;  %v897_v57 = vpop.f32.mrb[9].mxu1 }
 0x113   : > { %v770_v58 = vpop.f32.mrb[10].mxu0  ;;  %v898_v59 = vpop.f32.mrb[10].mxu1 }
 0x114   : > { %v771_v60 = vadd.f32 %v2196_v15, %v770_v58  ;;  %v899_v61 = vadd.f32 %v2196_v15, %v898_v59  ;;  %v772_v62 = vpop.f32.mrb[11].mxu0  ;;  %v900_v63 = vpop.f32.mrb[11].mxu1  ;;  %v1010_v0 = vmax.f32 %v768_v54, 0.0  ;;  %v1042_v1 = vmax.f32 %v896_v55, 0.0 }
 0x116   : > { %v1011_v2 = vmax.f32 %v771_v60, 0.0  ;;  %v1043_v3 = vmax.f32 %v899_v61, 0.0 }
 0x118   : > { %v1707_v4 = vpack.c.bf16 %v1011_v2, %v1010_v0  ;;  %v1787_v5 = vpack.c.bf16 %v1043_v3, %v1042_v1 }
 0x119   : > { %v775_v6 = vpop.f32.mrb[12].mxu0  ;;  %v903_v7 = vpop.f32.mrb[12].mxu1 }
 0x11a   : > { %1855 = vst [vmem:[%s2206_s18 + $0x10] sm:$0xff] %v1707_v4   ;;  %1871 = vst [vmem:[%s2206_s18 + $0x90] sm:$0xff] %v1787_v5   ;;  %v776_v8 = vadd.f32 %v2196_v15, %v775_v6  ;;  %v904_v9 = vadd.f32 %v2196_v15, %v903_v7  ;;  %v777_v10 = vpop.f32.mrb[13].mxu0  ;;  %v905_v11 = vpop.f32.mrb[13].mxu1 }
 0x11b   : > { %v778_v12 = vpop.f32.mrb[14].mxu0  ;;  %v906_v13 = vpop.f32.mrb[14].mxu1 }
 0x11c   : > { %v779_v14 = vadd.f32 %v2196_v15, %v778_v12  ;;  %v907_v16 = vadd.f32 %v2196_v15, %v906_v13  ;;  %v780_v17 = vpop.f32.mrb[15].mxu0  ;;  %v908_v18 = vpop.f32.mrb[15].mxu1  ;;  %v1012_v19 = vmax.f32 %v776_v8, 0.0  ;;  %v1044_v20 = vmax.f32 %v904_v9, 0.0 }
 0x11e   : > { %v1013_v21 = vmax.f32 %v779_v14, 0.0  ;;  %v1045_v22 = vmax.f32 %v907_v16, 0.0 }
 0x120   : > { %v1712_v23 = vpack.c.bf16 %v1013_v21, %v1012_v19  ;;  %v1792_v24 = vpack.c.bf16 %v1045_v22, %v1044_v20 }
 0x121   : > { %v783_v25 = vpop.f32.mrb[16].mxu0  ;;  %v911_v26 = vpop.f32.mrb[16].mxu1 }
 0x122   : > { %1856 = vst [vmem:[%s2206_s18 + $0x18] sm:$0xff] %v1712_v23   ;;  %1872 = vst [vmem:[%s2206_s18 + $0x98] sm:$0xff] %v1792_v24   ;;  %v784_v27 = vadd.f32 %v2196_v15, %v783_v25  ;;  %v912_v28 = vadd.f32 %v2196_v15, %v911_v26  ;;  %v785_v29 = vpop.f32.mrb[17].mxu0  ;;  %v913_v30 = vpop.f32.mrb[17].mxu1 }
 0x123   : > { %v786_v31 = vpop.f32.mrb[18].mxu0  ;;  %v914_v32 = vpop.f32.mrb[18].mxu1 }
 0x124   : > { %v787_v33 = vadd.f32 %v2196_v15, %v786_v31  ;;  %v915_v34 = vadd.f32 %v2196_v15, %v914_v32  ;;  %v788_v35 = vpop.f32.mrb[19].mxu0  ;;  %v916_v36 = vpop.f32.mrb[19].mxu1  ;;  %v1014_v37 = vmax.f32 %v784_v27, 0.0  ;;  %v1046_v38 = vmax.f32 %v912_v28, 0.0 }
 0x126   : > { %v1015_v39 = vmax.f32 %v787_v33, 0.0  ;;  %v1047_v40 = vmax.f32 %v915_v34, 0.0 }
 0x128   : > { %v1717_v41 = vpack.c.bf16 %v1015_v39, %v1014_v37  ;;  %v1797_v42 = vpack.c.bf16 %v1047_v40, %v1046_v38 }
 0x129   : > { %v791_v43 = vpop.f32.mrb[20].mxu0  ;;  %v919_v44 = vpop.f32.mrb[20].mxu1 }
 0x12a   : > { %1857 = vst [vmem:[%s2206_s18 + $0x20] sm:$0xff] %v1717_v41   ;;  %1873 = vst [vmem:[%s2206_s18 + $0xa0] sm:$0xff] %v1797_v42   ;;  %v792_v45 = vadd.f32 %v2196_v15, %v791_v43  ;;  %v920_v46 = vadd.f32 %v2196_v15, %v919_v44  ;;  %v793_v47 = vpop.f32.mrb[21].mxu0  ;;  %v921_v48 = vpop.f32.mrb[21].mxu1 }
 0x12b   : > { %v794_v49 = vpop.f32.mrb[22].mxu0  ;;  %v922_v50 = vpop.f32.mrb[22].mxu1 }
 0x12c   : > { %v795_v51 = vadd.f32 %v2196_v15, %v794_v49  ;;  %v923_v52 = vadd.f32 %v2196_v15, %v922_v50  ;;  %v796_v53 = vpop.f32.mrb[23].mxu0  ;;  %v924_v54 = vpop.f32.mrb[23].mxu1  ;;  %v1016_v55 = vmax.f32 %v792_v45, 0.0  ;;  %v1048_v56 = vmax.f32 %v920_v46, 0.0 }
 0x12e   : > { %v1017_v57 = vmax.f32 %v795_v51, 0.0  ;;  %v1049_v58 = vmax.f32 %v923_v52, 0.0 }
 0x130   : > { %v1722_v59 = vpack.c.bf16 %v1017_v57, %v1016_v55  ;;  %v1802_v60 = vpack.c.bf16 %v1049_v58, %v1048_v56 }
 0x131   : > { %v799_v61 = vpop.f32.mrb[24].mxu0  ;;  %v927_v62 = vpop.f32.mrb[24].mxu1 }
 0x132   : > { %1858 = vst [vmem:[%s2206_s18 + $0x28] sm:$0xff] %v1722_v59   ;;  %1874 = vst [vmem:[%s2206_s18 + $0xa8] sm:$0xff] %v1802_v60   ;;  %v800_v63 = vadd.f32 %v2196_v15, %v799_v61  ;;  %v928_v0 = vadd.f32 %v2196_v15, %v927_v62  ;;  %v801_v1 = vpop.f32.mrb[25].mxu0  ;;  %v929_v2 = vpop.f32.mrb[25].mxu1 }
 0x133   : > { %v802_v3 = vpop.f32.mrb[26].mxu0  ;;  %v930_v4 = vpop.f32.mrb[26].mxu1 }
 0x134   : > { %v803_v5 = vadd.f32 %v2196_v15, %v802_v3  ;;  %v931_v6 = vadd.f32 %v2196_v15, %v930_v4  ;;  %v804_v7 = vpop.f32.mrb[27].mxu0  ;;  %v932_v8 = vpop.f32.mrb[27].mxu1  ;;  %v1018_v9 = vmax.f32 %v800_v63, 0.0  ;;  %v1050_v10 = vmax.f32 %v928_v0, 0.0 }
 0x136   : > { %v1019_v11 = vmax.f32 %v803_v5, 0.0  ;;  %v1051_v12 = vmax.f32 %v931_v6, 0.0 }
 0x138   : > { %v1727_v13 = vpack.c.bf16 %v1019_v11, %v1018_v9  ;;  %v1807_v14 = vpack.c.bf16 %v1051_v12, %v1050_v10 }
 0x139   : > { %v807_v16 = vpop.f32.mrb[28].mxu0  ;;  %v935_v17 = vpop.f32.mrb[28].mxu1 }
 0x13a   : > { %1859 = vst [vmem:[%s2206_s18 + $0x30] sm:$0xff] %v1727_v13   ;;  %1875 = vst [vmem:[%s2206_s18 + $0xb0] sm:$0xff] %v1807_v14   ;;  %v808_v18 = vadd.f32 %v2196_v15, %v807_v16  ;;  %v936_v19 = vadd.f32 %v2196_v15, %v935_v17  ;;  %v809_v20 = vpop.f32.mrb[29].mxu0  ;;  %v937_v21 = vpop.f32.mrb[29].mxu1 }
 0x13b   : > { %v810_v22 = vpop.f32.mrb[30].mxu0  ;;  %v938_v23 = vpop.f32.mrb[30].mxu1 }
 0x13c   : > { %v811_v24 = vadd.f32 %v2196_v15, %v810_v22  ;;  %v939_v25 = vadd.f32 %v2196_v15, %v938_v23  ;;  %v812_v26 = vpop.f32.mrb[31].mxu0  ;;  %v940_v27 = vpop.f32.mrb[31].mxu1  ;;  %v1020_v28 = vmax.f32 %v808_v18, 0.0  ;;  %v1052_v29 = vmax.f32 %v936_v19, 0.0 }
 0x13e   : > { %v1021_v30 = vmax.f32 %v811_v24, 0.0  ;;  %v1053_v31 = vmax.f32 %v939_v25, 0.0 }
 0x140   : > { %v1732_v32 = vpack.c.bf16 %v1021_v30, %v1020_v28  ;;  %v1812_v33 = vpack.c.bf16 %v1053_v31, %v1052_v29 }
 0x141   : > { %v815_v34 = vpop.f32.mrb[32].mxu0  ;;  %v943_v35 = vpop.f32.mrb[32].mxu1 }
 0x142   : > { %1860 = vst [vmem:[%s2206_s18 + $0x38] sm:$0xff] %v1732_v32   ;;  %1876 = vst [vmem:[%s2206_s18 + $0xb8] sm:$0xff] %v1812_v33   ;;  %v816_v36 = vadd.f32 %v2196_v15, %v815_v34  ;;  %v944_v37 = vadd.f32 %v2196_v15, %v943_v35  ;;  %v817_v38 = vpop.f32.mrb[33].mxu0  ;;  %v945_v39 = vpop.f32.mrb[33].mxu1 }
 0x143   : > { %v818_v40 = vpop.f32.mrb[34].mxu0  ;;  %v946_v41 = vpop.f32.mrb[34].mxu1 }
 0x144   : > { %v819_v42 = vadd.f32 %v2196_v15, %v818_v40  ;;  %v947_v43 = vadd.f32 %v2196_v15, %v946_v41  ;;  %v820_v44 = vpop.f32.mrb[35].mxu0  ;;  %v948_v45 = vpop.f32.mrb[35].mxu1  ;;  %v1022_v46 = vmax.f32 %v816_v36, 0.0  ;;  %v1054_v47 = vmax.f32 %v944_v37, 0.0 }
 0x146   : > { %v1023_v48 = vmax.f32 %v819_v42, 0.0  ;;  %v1055_v49 = vmax.f32 %v947_v43, 0.0 }
 0x148   : > { %v1737_v50 = vpack.c.bf16 %v1023_v48, %v1022_v46  ;;  %v1817_v51 = vpack.c.bf16 %v1055_v49, %v1054_v47 }
 0x149   : > { %v823_v52 = vpop.f32.mrb[36].mxu0  ;;  %v951_v53 = vpop.f32.mrb[36].mxu1 }
 0x14a   : > { %1861 = vst [vmem:[%s2206_s18 + $0x40] sm:$0xff] %v1737_v50   ;;  %1877 = vst [vmem:[%s2206_s18 + $0xc0] sm:$0xff] %v1817_v51   ;;  %v824_v54 = vadd.f32 %v2196_v15, %v823_v52  ;;  %v952_v55 = vadd.f32 %v2196_v15, %v951_v53  ;;  %v825_v56 = vpop.f32.mrb[37].mxu0  ;;  %v953_v57 = vpop.f32.mrb[37].mxu1 }
 0x14b   : > { %v826_v58 = vpop.f32.mrb[38].mxu0  ;;  %v954_v59 = vpop.f32.mrb[38].mxu1 }
 0x14c   : > { %v827_v60 = vadd.f32 %v2196_v15, %v826_v58  ;;  %v955_v61 = vadd.f32 %v2196_v15, %v954_v59  ;;  %v828_v62 = vpop.f32.mrb[39].mxu0  ;;  %v956_v63 = vpop.f32.mrb[39].mxu1  ;;  %v1024_v0 = vmax.f32 %v824_v54, 0.0  ;;  %v1056_v1 = vmax.f32 %v952_v55, 0.0 }
 0x14e   : > { %v1025_v2 = vmax.f32 %v827_v60, 0.0  ;;  %v1057_v3 = vmax.f32 %v955_v61, 0.0 }
 0x150   : > { %v1742_v4 = vpack.c.bf16 %v1025_v2, %v1024_v0  ;;  %v1822_v5 = vpack.c.bf16 %v1057_v3, %v1056_v1 }
 0x151   : > { %v831_v6 = vpop.f32.mrb[40].mxu0  ;;  %v959_v7 = vpop.f32.mrb[40].mxu1 }
 0x152   : > { %1862 = vst [vmem:[%s2206_s18 + $0x48] sm:$0xff] %v1742_v4   ;;  %1878 = vst [vmem:[%s2206_s18 + $0xc8] sm:$0xff] %v1822_v5   ;;  %v832_v8 = vadd.f32 %v2196_v15, %v831_v6  ;;  %v960_v9 = vadd.f32 %v2196_v15, %v959_v7  ;;  %v833_v10 = vpop.f32.mrb[41].mxu0  ;;  %v961_v11 = vpop.f32.mrb[41].mxu1 }
 0x153   : > { %v834_v12 = vpop.f32.mrb[42].mxu0  ;;  %v962_v13 = vpop.f32.mrb[42].mxu1 }
 0x154   : > { %v835_v14 = vadd.f32 %v2196_v15, %v834_v12  ;;  %v963_v16 = vadd.f32 %v2196_v15, %v962_v13  ;;  %v836_v17 = vpop.f32.mrb[43].mxu0  ;;  %v964_v18 = vpop.f32.mrb[43].mxu1  ;;  %v1026_v19 = vmax.f32 %v832_v8, 0.0  ;;  %v1058_v20 = vmax.f32 %v960_v9, 0.0 }
 0x156   : > { %v1027_v21 = vmax.f32 %v835_v14, 0.0  ;;  %v1059_v22 = vmax.f32 %v963_v16, 0.0 }
 0x158   : > { %v1747_v23 = vpack.c.bf16 %v1027_v21, %v1026_v19  ;;  %v1827_v24 = vpack.c.bf16 %v1059_v22, %v1058_v20 }
 0x159   : > { %v839_v25 = vpop.f32.mrb[44].mxu0  ;;  %v967_v26 = vpop.f32.mrb[44].mxu1 }
 0x15a   : > { %1863 = vst [vmem:[%s2206_s18 + $0x50] sm:$0xff] %v1747_v23   ;;  %1879 = vst [vmem:[%s2206_s18 + $0xd0] sm:$0xff] %v1827_v24   ;;  %v840_v27 = vadd.f32 %v2196_v15, %v839_v25  ;;  %v968_v28 = vadd.f32 %v2196_v15, %v967_v26  ;;  %v841_v29 = vpop.f32.mrb[45].mxu0  ;;  %v969_v30 = vpop.f32.mrb[45].mxu1 }
 0x15b   : > { %v842_v31 = vpop.f32.mrb[46].mxu0  ;;  %v970_v32 = vpop.f32.mrb[46].mxu1 }
 0x15c   : > { %v843_v33 = vadd.f32 %v2196_v15, %v842_v31  ;;  %v971_v34 = vadd.f32 %v2196_v15, %v970_v32  ;;  %v844_v35 = vpop.f32.mrb[47].mxu0  ;;  %v972_v36 = vpop.f32.mrb[47].mxu1  ;;  %v1028_v37 = vmax.f32 %v840_v27, 0.0  ;;  %v1060_v38 = vmax.f32 %v968_v28, 0.0 }
 0x15e   : > { %v1029_v39 = vmax.f32 %v843_v33, 0.0  ;;  %v1061_v40 = vmax.f32 %v971_v34, 0.0 }
 0x160   : > { %v1752_v41 = vpack.c.bf16 %v1029_v39, %v1028_v37  ;;  %v1832_v42 = vpack.c.bf16 %v1061_v40, %v1060_v38 }
 0x161   : > { %v847_v43 = vpop.f32.mrb[48].mxu0  ;;  %v975_v44 = vpop.f32.mrb[48].mxu1 }
 0x162   : > { %1864 = vst [vmem:[%s2206_s18 + $0x58] sm:$0xff] %v1752_v41   ;;  %1880 = vst [vmem:[%s2206_s18 + $0xd8] sm:$0xff] %v1832_v42   ;;  %v848_v45 = vadd.f32 %v2196_v15, %v847_v43  ;;  %v976_v46 = vadd.f32 %v2196_v15, %v975_v44  ;;  %v849_v47 = vpop.f32.mrb[49].mxu0  ;;  %v977_v48 = vpop.f32.mrb[49].mxu1 }
 0x163   : > { %v850_v49 = vpop.f32.mrb[50].mxu0  ;;  %v978_v50 = vpop.f32.mrb[50].mxu1 }
 0x164   : > { %v851_v51 = vadd.f32 %v2196_v15, %v850_v49  ;;  %v979_v52 = vadd.f32 %v2196_v15, %v978_v50  ;;  %v852_v53 = vpop.f32.mrb[51].mxu0  ;;  %v980_v54 = vpop.f32.mrb[51].mxu1  ;;  %v1030_v55 = vmax.f32 %v848_v45, 0.0  ;;  %v1062_v56 = vmax.f32 %v976_v46, 0.0 }
 0x166   : > { %v1031_v57 = vmax.f32 %v851_v51, 0.0  ;;  %v1063_v58 = vmax.f32 %v979_v52, 0.0 }
 0x168   : > { %v1757_v59 = vpack.c.bf16 %v1031_v57, %v1030_v55  ;;  %v1837_v60 = vpack.c.bf16 %v1063_v58, %v1062_v56 }
 0x169   : > { %v855_v61 = vpop.f32.mrb[52].mxu0  ;;  %v983_v62 = vpop.f32.mrb[52].mxu1 }
 0x16a   : > { %1865 = vst [vmem:[%s2206_s18 + $0x60] sm:$0xff] %v1757_v59   ;;  %1881 = vst [vmem:[%s2206_s18 + $0xe0] sm:$0xff] %v1837_v60   ;;  %v856_v63 = vadd.f32 %v2196_v15, %v855_v61  ;;  %v984_v0 = vadd.f32 %v2196_v15, %v983_v62  ;;  %v857_v1 = vpop.f32.mrb[53].mxu0  ;;  %v985_v2 = vpop.f32.mrb[53].mxu1 }
 0x16b   : > { %v858_v3 = vpop.f32.mrb[54].mxu0  ;;  %v986_v4 = vpop.f32.mrb[54].mxu1 }
 0x16c   : > { %v859_v5 = vadd.f32 %v2196_v15, %v858_v3  ;;  %v987_v6 = vadd.f32 %v2196_v15, %v986_v4  ;;  %v860_v7 = vpop.f32.mrb[55].mxu0  ;;  %v988_v8 = vpop.f32.mrb[55].mxu1  ;;  %v1032_v9 = vmax.f32 %v856_v63, 0.0  ;;  %v1064_v10 = vmax.f32 %v984_v0, 0.0 }
 0x16e   : > { %v1033_v11 = vmax.f32 %v859_v5, 0.0  ;;  %v1065_v12 = vmax.f32 %v987_v6, 0.0 }
 0x170   : > { %v1762_v13 = vpack.c.bf16 %v1033_v11, %v1032_v9  ;;  %v1842_v14 = vpack.c.bf16 %v1065_v12, %v1064_v10 }
 0x171   : > { %v863_v16 = vpop.f32.mrb[56].mxu0  ;;  %v991_v17 = vpop.f32.mrb[56].mxu1 }
 0x172   : > { %1866 = vst [vmem:[%s2206_s18 + $0x68] sm:$0xff] %v1762_v13   ;;  %1882 = vst [vmem:[%s2206_s18 + $0xe8] sm:$0xff] %v1842_v14   ;;  %v864_v18 = vadd.f32 %v2196_v15, %v863_v16  ;;  %v992_v19 = vadd.f32 %v2196_v15, %v991_v17  ;;  %v865_v20 = vpop.f32.mrb[57].mxu0  ;;  %v993_v21 = vpop.f32.mrb[57].mxu1 }
 0x173   : > { %v866_v22 = vpop.f32.mrb[58].mxu0  ;;  %v994_v23 = vpop.f32.mrb[58].mxu1 }
 0x174   : > { %v867_v24 = vadd.f32 %v2196_v15, %v866_v22  ;;  %v995_v25 = vadd.f32 %v2196_v15, %v994_v23  ;;  %v868_v26 = vpop.f32.mrb[59].mxu0  ;;  %v996_v27 = vpop.f32.mrb[59].mxu1  ;;  %v1034_v28 = vmax.f32 %v864_v18, 0.0  ;;  %v1066_v29 = vmax.f32 %v992_v19, 0.0 }
 0x176   : > { %v1035_v30 = vmax.f32 %v867_v24, 0.0  ;;  %v1067_v31 = vmax.f32 %v995_v25, 0.0 }
 0x178   : > { %v1767_v32 = vpack.c.bf16 %v1035_v30, %v1034_v28  ;;  %v1847_v33 = vpack.c.bf16 %v1067_v31, %v1066_v29 }
 0x179   : > { %v871_v34 = vpop.f32.mrb[60].mxu0  ;;  %v999_v35 = vpop.f32.mrb[60].mxu1 }
 0x17a   : > { %1867 = vst [vmem:[%s2206_s18 + $0x70] sm:$0xff] %v1767_v32   ;;  %1883 = vst [vmem:[%s2206_s18 + $0xf0] sm:$0xff] %v1847_v33   ;;  %v872_v36 = vadd.f32 %v2196_v15, %v871_v34  ;;  %v1000_v37 = vadd.f32 %v2196_v15, %v999_v35  ;;  %v873_v38 = vpop.f32.mrb[61].mxu0  ;;  %v1001_v39 = vpop.f32.mrb[61].mxu1 }
 0x17b   : > { %v874_v40 = vpop.f32.mrb[62].mxu0  ;;  %v1002_v41 = vpop.f32.mrb[62].mxu1 }
 0x17c   : > { %v875_v42 = vadd.f32 %v2196_v15, %v874_v40  ;;  %v1003_v43 = vadd.f32 %v2196_v15, %v1002_v41  ;;  %v876_v44 = vpop.f32.mrb[63].mxu0  ;;  %v1004_v45 = vpop.f32.mrb[63].mxu1  ;;  %v1036_v46 = vmax.f32 %v872_v36, 0.0  ;;  %v1068_v47 = vmax.f32 %v1000_v37, 0.0 }
 0x17e   : > { %v1037_v48 = vmax.f32 %v875_v42, 0.0  ;;  %v1069_v49 = vmax.f32 %v1003_v43, 0.0 }
 0x180   : > { %v1772_v50 = vpack.c.bf16 %v1037_v48, %v1036_v46  ;;  %v1852_v51 = vpack.c.bf16 %v1069_v49, %v1068_v47 }
 0x182   : > { %1868 = vst [vmem:[%s2206_s18 + $0x78] sm:$0xff] %v1772_v50   ;;  %1884 = vst [vmem:[%s2206_s18 + $0xf8] sm:$0xff] %v1852_v51  }
 0x183 PF: > { %s13_s12 = sadd.s32 1, %s2027_s12  }
 0x184   : > { %p10_p4 = scmp.ge.s32.totalorder %s13_s12, 14  }
 0x186   :  { %12 = sbr.rel (!%p10_p4) target bundleno = 1 (0x1), region = 62 }

// kernel: forward.12
= control target key start
LH: loop header
LB: loop body
LE: loop exit
PB: predicated region body
PF: predicated region fallthrough
CT: control target
= control target key end

     0   :  { %s1161_s6 = smov 0   ;;  %s1490_s0 = inlined_call_operand.vmem [shape: bf16[6,6,17,16,128], index: 0, kind: input, shape index: {}]   ;;  %s1491_s1 = inlined_call_operand.vmem [shape: bf16[6,16,16,128], index: 1, kind: output, shape index: {}]  }
   0x1 LB: > { %s756_s7 = sadd.s32 4294967295, %s1149_s6   ;;  %p760_p0 = scmp.ge.s32.totalorder %s1149_s6, 1  ;;  %s1149_s6 = sphi %s1161_s6, %s11_s6  }
   0x2   : > { %p87_p1 = scmp.lt.s32.totalorder %s1149_s6, 7 }
   0x4   : > { %p88_p2 = pnand %p760_p0, %p87_p1 }
   0x5   : > { %p107_p3 = scmp.lt.s32.totalorder (!%p88_p2), %s756_s7, 5 }
   0x6   : > { %91 = sbr.rel (%p88_p2) target bundleno = 129 (0x81), region = 24 }
   0xd   : > { %s1493_s7 = smov (!%p107_p3, %s756_s7), 5 }
   0xe   : > { %s1134_s8 = smul.u32 816, %s1493_s7  ;;  %s1022_s12 = sshll.u32 %s1493_s7, 7 }
   0xf   : > { %s1225_s15 = scalar_lea.vmem %s1491_s1, %s1022_s12 }
  0x10   : > { %s1175_s11 = scalar_lea.vmem %s1490_s0, %s1134_s8 }
  0x11   : > { %v117_v0 = vld [vmem:[%s1175_s11] sm:$0xf]  ;;  %v118_v1 = vld [vmem:[%s1175_s11 + $0x4] sm:$0xf]  ;;  %v764_v2 = vld [vmem:[%s1175_s11 + $0x110] sm:$0xf] }
  0x12   : > { %v765_v3 = vld [vmem:[%s1175_s11 + $0x114] sm:$0xf]  ;;  %v182_v4 = vmax.bf16 %v764_v2, %v117_v0  ;;  %v796_v5 = vld [vmem:[%s1175_s11 + $0x220] sm:$0xf]  ;;  %v797_v6 = vld [vmem:[%s1175_s11 + $0x224] sm:$0xf] }
  0x13   : > { %v183_v7 = vmax.bf16 %v765_v3, %v118_v1  ;;  %v828_v8 = vld [vmem:[%s1175_s11 + $0x88] sm:$0xf]  ;;  %v829_v10 = vld [vmem:[%s1175_s11 + $0x8c] sm:$0xf]  ;;  %v860_v12 = vld [vmem:[%s1175_s11 + $0x198] sm:$0xf] }
  0x14   : > { %v247_v9 = vmax.bf16 %v796_v5, %v182_v4  ;;  %v861_v14 = vld [vmem:[%s1175_s11 + $0x19c] sm:$0xf]  ;;  %v892_v15 = vld [vmem:[%s1175_s11 + $0x2a8] sm:$0xf]  ;;  %v893_v16 = vld [vmem:[%s1175_s11 + $0x2ac] sm:$0xf] }
  0x15   : > { %v248_v11 = vmax.bf16 %v797_v6, %v183_v7  ;;  %v119_v18 = vld [vmem:[%s1175_s11 + $0x8] sm:$0xf]  ;;  %v120_v19 = vld [vmem:[%s1175_s11 + $0xc] sm:$0xf]  ;;  %v766_v20 = vld [vmem:[%s1175_s11 + $0x118] sm:$0xf] }
  0x16   : > { %v312_v13 = vmax.bf16 %v828_v8, %v247_v9  ;;  %v767_v22 = vld [vmem:[%s1175_s11 + $0x11c] sm:$0xf]  ;;  %v184_v23 = vmax.bf16 %v766_v20, %v119_v18  ;;  %v798_v24 = vld [vmem:[%s1175_s11 + $0x228] sm:$0xf]  ;;  %v799_v25 = vld [vmem:[%s1175_s11 + $0x22c] sm:$0xf] }
  0x17   : > { %v313_v17 = vmax.bf16 %v829_v10, %v248_v11  ;;  %v924_v27 = vld [vmem:[%s1175_s11 + $0x8] sm:$0xf]  ;;  %v185_v28 = vmax.bf16 %v767_v22, %v120_v19  ;;  %v830_v29 = vld [vmem:[%s1175_s11 + $0x90] sm:$0xf]  ;;  %v925_v31 = vld [vmem:[%s1175_s11 + $0xc] sm:$0xf] }
  0x18   : > { %v377_v21 = vmax.bf16 %v860_v12, %v312_v13  ;;  %v956_v32 = vld [vmem:[%s1175_s11 + $0x118] sm:$0xf]  ;;  %v249_v33 = vmax.bf16 %v798_v24, %v184_v23  ;;  %v831_v34 = vld [vmem:[%s1175_s11 + $0x94] sm:$0xf]  ;;  %v957_v36 = vld [vmem:[%s1175_s11 + $0x11c] sm:$0xf] }
  0x19   : > { %v378_v26 = vmax.bf16 %v861_v14, %v313_v17  ;;  %v988_v37 = vld [vmem:[%s1175_s11 + $0x228] sm:$0xf]  ;;  %v250_v38 = vmax.bf16 %v799_v25, %v185_v28  ;;  %v862_v39 = vld [vmem:[%s1175_s11 + $0x1a0] sm:$0xf]  ;;  %v989_v41 = vld [vmem:[%s1175_s11 + $0x22c] sm:$0xf] }
  0x1a   : > { %v442_v30 = vmax.bf16 %v892_v15, %v377_v21  ;;  %v314_v42 = vmax.bf16 %v830_v29, %v249_v33  ;;  %v863_v43 = vld [vmem:[%s1175_s11 + $0x1a4] sm:$0xf]  ;;  %v894_v44 = vld [vmem:[%s1175_s11 + $0x2b0] sm:$0xf]  ;;  %v895_v45 = vld [vmem:[%s1175_s11 + $0x2b4] sm:$0xf] }
  0x1b   : > { %v443_v35 = vmax.bf16 %v893_v16, %v378_v26  ;;  %v315_v47 = vmax.bf16 %v831_v34, %v250_v38  ;;  %v121_v48 = vld [vmem:[%s1175_s11 + $0x10] sm:$0xf]  ;;  %v122_v49 = vld [vmem:[%s1175_s11 + $0x14] sm:$0xf]  ;;  %v768_v50 = vld [vmem:[%s1175_s11 + $0x120] sm:$0xf] }
  0x1c   : > { %v507_v40 = vmax.bf16 %v924_v27, %v442_v30  ;;  %v379_v52 = vmax.bf16 %v862_v39, %v314_v42  ;;  %v769_v53 = vld [vmem:[%s1175_s11 + $0x124] sm:$0xf]  ;;  %v186_v54 = vmax.bf16 %v768_v50, %v121_v48  ;;  %v800_v55 = vld [vmem:[%s1175_s11 + $0x230] sm:$0xf]  ;;  %v801_v56 = vld [vmem:[%s1175_s11 + $0x234] sm:$0xf] }
  0x1d   : > { %v508_v46 = vmax.bf16 %v925_v31, %v443_v35  ;;  %v380_v58 = vmax.bf16 %v863_v43, %v315_v47  ;;  %v926_v59 = vld [vmem:[%s1175_s11 + $0x10] sm:$0xf]  ;;  %v187_v60 = vmax.bf16 %v769_v53, %v122_v49  ;;  %v832_v61 = vld [vmem:[%s1175_s11 + $0x98] sm:$0xf]  ;;  %v927_v0 = vld [vmem:[%s1175_s11 + $0x14] sm:$0xf] }
  0x1e   : > { %v572_v51 = vmax.bf16 %v956_v32, %v507_v40  ;;  %v444_v63 = vmax.bf16 %v894_v44, %v379_v52  ;;  %v958_v1 = vld [vmem:[%s1175_s11 + $0x120] sm:$0xf]  ;;  %v251_v2 = vmax.bf16 %v800_v55, %v186_v54  ;;  %v833_v3 = vld [vmem:[%s1175_s11 + $0x9c] sm:$0xf]  ;;  %v959_v6 = vld [vmem:[%s1175_s11 + $0x124] sm:$0xf] }
  0x1f   : > { %v573_v57 = vmax.bf16 %v957_v36, %v508_v46  ;;  %v445_v5 = vmax.bf16 %v895_v45, %v380_v58  ;;  %v990_v7 = vld [vmem:[%s1175_s11 + $0x230] sm:$0xf]  ;;  %v252_v8 = vmax.bf16 %v801_v56, %v187_v60  ;;  %v864_v9 = vld [vmem:[%s1175_s11 + $0x1a8] sm:$0xf]  ;;  %v991_v11 = vld [vmem:[%s1175_s11 + $0x234] sm:$0xf] }
  0x20   : > { %v637_v62 = vmax.bf16 %v988_v37, %v572_v51  ;;  %v509_v10 = vmax.bf16 %v926_v59, %v444_v63  ;;  %v316_v12 = vmax.bf16 %v832_v61, %v251_v2  ;;  %v865_v13 = vld [vmem:[%s1175_s11 + $0x1ac] sm:$0xf]  ;;  %v896_v14 = vld [vmem:[%s1175_s11 + $0x2b8] sm:$0xf]  ;;  %v897_v15 = vld [vmem:[%s1175_s11 + $0x2bc] sm:$0xf] }
  0x21   : > { %v638_v4 = vmax.bf16 %v989_v41, %v573_v57  ;;  %v510_v17 = vmax.bf16 %v927_v0, %v445_v5  ;;  %v317_v18 = vmax.bf16 %v833_v3, %v252_v8  ;;  %v123_v19 = vld [vmem:[%s1175_s11 + $0x18] sm:$0xf]  ;;  %v124_v20 = vld [vmem:[%s1175_s11 + $0x1c] sm:$0xf]  ;;  %v770_v21 = vld [vmem:[%s1175_s11 + $0x128] sm:$0xf] }
  0x22   : > { %v574_v22 = vmax.bf16 %v958_v1, %v509_v10  ;;  %v381_v23 = vmax.bf16 %v864_v9, %v316_v12  ;;  %v771_v24 = vld [vmem:[%s1175_s11 + $0x12c] sm:$0xf]  ;;  %v188_v25 = vmax.bf16 %v770_v21, %v123_v19  ;;  %v802_v26 = vld [vmem:[%s1175_s11 + $0x238] sm:$0xf]  ;;  %v803_v27 = vld [vmem:[%s1175_s11 + $0x23c] sm:$0xf] }
  0x23   : > { %v1103_v16 = vcombine.low %v637_v62, %v638_v4  ;;  %v575_v28 = vmax.bf16 %v959_v6, %v510_v17  ;;  %v382_v29 = vmax.bf16 %v865_v13, %v317_v18  ;;  %v928_v30 = vld [vmem:[%s1175_s11 + $0x18] sm:$0xf]  ;;  %v189_v31 = vmax.bf16 %v771_v24, %v124_v20  ;;  %v834_v32 = vld [vmem:[%s1175_s11 + $0xa0] sm:$0xf]  ;;  %v929_v35 = vld [vmem:[%s1175_s11 + $0x1c] sm:$0xf] }
  0x24   : > { %v639_v33 = vmax.bf16 %v990_v7, %v574_v22  ;;  %v446_v34 = vmax.bf16 %v896_v14, %v381_v23  ;;  %v960_v36 = vld [vmem:[%s1175_s11 + $0x128] sm:$0xf]  ;;  %v253_v37 = vmax.bf16 %v802_v26, %v188_v25  ;;  %v835_v38 = vld [vmem:[%s1175_s11 + $0xa4] sm:$0xf]  ;;  %v961_v41 = vld [vmem:[%s1175_s11 + $0x12c] sm:$0xf] }
  0x25   : > { %1027 = vst [vmem:[%s1225_s15] sm:$0xff] %v1103_v16   ;;  %v640_v39 = vmax.bf16 %v991_v11, %v575_v28  ;;  %v447_v40 = vmax.bf16 %v897_v15, %v382_v29  ;;  %v992_v42 = vld [vmem:[%s1175_s11 + $0x238] sm:$0xf]  ;;  %v254_v43 = vmax.bf16 %v803_v27, %v189_v31  ;;  %v866_v44 = vld [vmem:[%s1175_s11 + $0x1b0] sm:$0xf]  ;;  %v993_v46 = vld [vmem:[%s1175_s11 + $0x23c] sm:$0xf] }
  0x26   : > { %v511_v45 = vmax.bf16 %v928_v30, %v446_v34  ;;  %v318_v47 = vmax.bf16 %v834_v32, %v253_v37  ;;  %v867_v48 = vld [vmem:[%s1175_s11 + $0x1b4] sm:$0xf]  ;;  %v898_v49 = vld [vmem:[%s1175_s11 + $0x2c0] sm:$0xf]  ;;  %v899_v50 = vld [vmem:[%s1175_s11 + $0x2c4] sm:$0xf] }
  0x27   : > { %v1104_v51 = vcombine.low %v639_v33, %v640_v39  ;;  %v512_v52 = vmax.bf16 %v929_v35, %v447_v40  ;;  %v319_v53 = vmax.bf16 %v835_v38, %v254_v43  ;;  %v125_v54 = vld [vmem:[%s1175_s11 + $0x20] sm:$0xf]  ;;  %v126_v55 = vld [vmem:[%s1175_s11 + $0x24] sm:$0xf]  ;;  %v772_v56 = vld [vmem:[%s1175_s11 + $0x130] sm:$0xf] }
  0x28   : > { %v576_v57 = vmax.bf16 %v960_v36, %v511_v45  ;;  %v383_v58 = vmax.bf16 %v866_v44, %v318_v47  ;;  %v773_v59 = vld [vmem:[%s1175_s11 + $0x134] sm:$0xf]  ;;  %v190_v60 = vmax.bf16 %v772_v56, %v125_v54  ;;  %v804_v61 = vld [vmem:[%s1175_s11 + $0x240] sm:$0xf]  ;;  %v805_v62 = vld [vmem:[%s1175_s11 + $0x244] sm:$0xf] }
  0x29   : > { %1105 = vst [vmem:[%s1225_s15 + $0x8] sm:$0xff] %v1104_v51   ;;  %v577_v63 = vmax.bf16 %v961_v41, %v512_v52  ;;  %v384_v0 = vmax.bf16 %v867_v48, %v319_v53  ;;  %v930_v1 = vld [vmem:[%s1175_s11 + $0x20] sm:$0xf]  ;;  %v191_v2 = vmax.bf16 %v773_v59, %v126_v55  ;;  %v836_v3 = vld [vmem:[%s1175_s11 + $0xa8] sm:$0xf] }
  0x2a   : > { %v641_v4 = vmax.bf16 %v992_v42, %v576_v57  ;;  %v448_v5 = vmax.bf16 %v898_v49, %v383_v58  ;;  %v931_v6 = vld [vmem:[%s1175_s11 + $0x24] sm:$0xf]  ;;  %v962_v7 = vld [vmem:[%s1175_s11 + $0x130] sm:$0xf]  ;;  %v255_v8 = vmax.bf16 %v804_v61, %v190_v60  ;;  %v837_v9 = vld [vmem:[%s1175_s11 + $0xac] sm:$0xf] }
  0x2b   : > { %v642_v10 = vmax.bf16 %v993_v46, %v577_v63  ;;  %v449_v11 = vmax.bf16 %v899_v50, %v384_v0  ;;  %v963_v12 = vld [vmem:[%s1175_s11 + $0x134] sm:$0xf]  ;;  %v994_v13 = vld [vmem:[%s1175_s11 + $0x240] sm:$0xf]  ;;  %v256_v14 = vmax.bf16 %v805_v62, %v191_v2  ;;  %v868_v15 = vld [vmem:[%s1175_s11 + $0x1b8] sm:$0xf] }
  0x2c   : > { %v513_v16 = vmax.bf16 %v930_v1, %v448_v5  ;;  %v995_v17 = vld [vmem:[%s1175_s11 + $0x244] sm:$0xf]  ;;  %v320_v18 = vmax.bf16 %v836_v3, %v255_v8  ;;  %v869_v19 = vld [vmem:[%s1175_s11 + $0x1bc] sm:$0xf]  ;;  %v900_v20 = vld [vmem:[%s1175_s11 + $0x2c8] sm:$0xf] }
  0x2d   : > { %v901_v21 = vld [vmem:[%s1175_s11 + $0x2cc] sm:$0xf]  ;;  %v1106_v22 = vcombine.low %v641_v4, %v642_v10  ;;  %v514_v23 = vmax.bf16 %v931_v6, %v449_v11  ;;  %v321_v24 = vmax.bf16 %v837_v9, %v256_v14  ;;  %v127_v25 = vld [vmem:[%s1175_s11 + $0x28] sm:$0xf]  ;;  %v774_v27 = vld [vmem:[%s1175_s11 + $0x138] sm:$0xf] }
  0x2e   : > { %v128_v26 = vld [vmem:[%s1175_s11 + $0x2c] sm:$0xf]  ;;  %v578_v28 = vmax.bf16 %v962_v7, %v513_v16  ;;  %v385_v29 = vmax.bf16 %v868_v15, %v320_v18  ;;  %v775_v30 = vld [vmem:[%s1175_s11 + $0x13c] sm:$0xf]  ;;  %v192_v31 = vmax.bf16 %v774_v27, %v127_v25  ;;  %v806_v32 = vld [vmem:[%s1175_s11 + $0x248] sm:$0xf] }
  0x2f   : > { %v807_v33 = vld [vmem:[%s1175_s11 + $0x24c] sm:$0xf]  ;;  %1107 = vst [vmem:[%s1225_s15 + $0x10] sm:$0xff] %v1106_v22   ;;  %v579_v34 = vmax.bf16 %v963_v12, %v514_v23  ;;  %v386_v35 = vmax.bf16 %v869_v19, %v321_v24  ;;  %v932_v36 = vld [vmem:[%s1175_s11 + $0x28] sm:$0xf]  ;;  %v193_v37 = vmax.bf16 %v775_v30, %v128_v26 }
  0x30   : > { %v838_v38 = vld [vmem:[%s1175_s11 + $0xb0] sm:$0xf]  ;;  %v643_v39 = vmax.bf16 %v994_v13, %v578_v28  ;;  %v450_v40 = vmax.bf16 %v900_v20, %v385_v29  ;;  %v933_v41 = vld [vmem:[%s1175_s11 + $0x2c] sm:$0xf]  ;;  %v964_v42 = vld [vmem:[%s1175_s11 + $0x138] sm:$0xf]  ;;  %v257_v43 = vmax.bf16 %v806_v32, %v192_v31 }
  0x31   : > { %v839_v44 = vld [vmem:[%s1175_s11 + $0xb4] sm:$0xf]  ;;  %v644_v45 = vmax.bf16 %v995_v17, %v579_v34  ;;  %v451_v46 = vmax.bf16 %v901_v21, %v386_v35  ;;  %v965_v47 = vld [vmem:[%s1175_s11 + $0x13c] sm:$0xf]  ;;  %v996_v48 = vld [vmem:[%s1175_s11 + $0x248] sm:$0xf]  ;;  %v258_v49 = vmax.bf16 %v807_v33, %v193_v37 }
  0x32   : > { %v870_v50 = vld [vmem:[%s1175_s11 + $0x1c0] sm:$0xf]  ;;  %v515_v51 = vmax.bf16 %v932_v36, %v450_v40  ;;  %v997_v52 = vld [vmem:[%s1175_s11 + $0x24c] sm:$0xf]  ;;  %v322_v53 = vmax.bf16 %v838_v38, %v257_v43  ;;  %v871_v54 = vld [vmem:[%s1175_s11 + $0x1c4] sm:$0xf] }
  0x33   : > { %v902_v55 = vld [vmem:[%s1175_s11 + $0x2d0] sm:$0xf]  ;;  %v903_v56 = vld [vmem:[%s1175_s11 + $0x2d4] sm:$0xf]  ;;  %v1108_v57 = vcombine.low %v643_v39, %v644_v45  ;;  %v516_v58 = vmax.bf16 %v933_v41, %v451_v46  ;;  %v323_v59 = vmax.bf16 %v839_v44, %v258_v49  ;;  %v776_v62 = vld [vmem:[%s1175_s11 + $0x140] sm:$0xf] }
  0x34   : > { %v129_v60 = vld [vmem:[%s1175_s11 + $0x30] sm:$0xf]  ;;  %v130_v61 = vld [vmem:[%s1175_s11 + $0x34] sm:$0xf]  ;;  %v580_v63 = vmax.bf16 %v964_v42, %v515_v51  ;;  %v387_v0 = vmax.bf16 %v870_v50, %v322_v53  ;;  %v777_v1 = vld [vmem:[%s1175_s11 + $0x144] sm:$0xf] }
  0x35   : > { %v194_v2 = vmax.bf16 %v776_v62, %v129_v60  ;;  %v808_v3 = vld [vmem:[%s1175_s11 + $0x250] sm:$0xf]  ;;  %v809_v4 = vld [vmem:[%s1175_s11 + $0x254] sm:$0xf]  ;;  %1109 = vst [vmem:[%s1225_s15 + $0x18] sm:$0xff] %v1108_v57   ;;  %v581_v5 = vmax.bf16 %v965_v47, %v516_v58  ;;  %v388_v6 = vmax.bf16 %v871_v54, %v323_v59  ;;  %v195_v8 = vmax.bf16 %v777_v1, %v130_v61 }
  0x36   : > { %v934_v7 = vld [vmem:[%s1175_s11 + $0x30] sm:$0xf]  ;;  %v840_v9 = vld [vmem:[%s1175_s11 + $0xb8] sm:$0xf]  ;;  %v645_v10 = vmax.bf16 %v996_v48, %v580_v63  ;;  %v452_v11 = vmax.bf16 %v902_v55, %v387_v0  ;;  %v935_v12 = vld [vmem:[%s1175_s11 + $0x34] sm:$0xf] }
  0x37   : > { %v966_v13 = vld [vmem:[%s1175_s11 + $0x140] sm:$0xf]  ;;  %v259_v14 = vmax.bf16 %v808_v3, %v194_v2  ;;  %v841_v15 = vld [vmem:[%s1175_s11 + $0xbc] sm:$0xf]  ;;  %v646_v16 = vmax.bf16 %v997_v52, %v581_v5  ;;  %v453_v17 = vmax.bf16 %v903_v56, %v388_v6  ;;  %v967_v18 = vld [vmem:[%s1175_s11 + $0x144] sm:$0xf]  ;;  %v260_v20 = vmax.bf16 %v809_v4, %v195_v8 }
  0x38   : > { %v998_v19 = vld [vmem:[%s1175_s11 + $0x250] sm:$0xf]  ;;  %v872_v21 = vld [vmem:[%s1175_s11 + $0x1c8] sm:$0xf]  ;;  %v517_v22 = vmax.bf16 %v934_v7, %v452_v11  ;;  %v999_v23 = vld [vmem:[%s1175_s11 + $0x254] sm:$0xf] }
  0x39   : > { %v324_v24 = vmax.bf16 %v840_v9, %v259_v14  ;;  %v873_v25 = vld [vmem:[%s1175_s11 + $0x1cc] sm:$0xf]  ;;  %v904_v26 = vld [vmem:[%s1175_s11 + $0x2d8] sm:$0xf]  ;;  %v905_v27 = vld [vmem:[%s1175_s11 + $0x2dc] sm:$0xf]  ;;  %v1110_v28 = vcombine.low %v645_v10, %v646_v16  ;;  %v518_v29 = vmax.bf16 %v935_v12, %v453_v17  ;;  %v325_v30 = vmax.bf16 %v841_v15, %v260_v20 }
  0x3a   : > { %v131_v31 = vld [vmem:[%s1175_s11 + $0x38] sm:$0xf]  ;;  %v132_v32 = vld [vmem:[%s1175_s11 + $0x3c] sm:$0xf]  ;;  %v778_v33 = vld [vmem:[%s1175_s11 + $0x148] sm:$0xf]  ;;  %v582_v34 = vmax.bf16 %v966_v13, %v517_v22 }
  0x3b   : > { %v389_v35 = vmax.bf16 %v872_v21, %v324_v24  ;;  %v779_v36 = vld [vmem:[%s1175_s11 + $0x14c] sm:$0xf]  ;;  %v196_v37 = vmax.bf16 %v778_v33, %v131_v31  ;;  %v810_v38 = vld [vmem:[%s1175_s11 + $0x258] sm:$0xf]  ;;  %v811_v39 = vld [vmem:[%s1175_s11 + $0x25c] sm:$0xf]  ;;  %v583_v40 = vmax.bf16 %v967_v18, %v518_v29  ;;  %v390_v41 = vmax.bf16 %v873_v25, %v325_v30 }
  0x3c   : > { %1111 = vst [vmem:[%s1225_s15 + $0x20] sm:$0xff] %v1110_v28   ;;  %v936_v42 = vld [vmem:[%s1175_s11 + $0x38] sm:$0xf]  ;;  %v197_v43 = vmax.bf16 %v779_v36, %v132_v32  ;;  %v842_v44 = vld [vmem:[%s1175_s11 + $0xc0] sm:$0xf]  ;;  %v647_v45 = vmax.bf16 %v998_v19, %v582_v34 }
  0x3d   : > { %v454_v46 = vmax.bf16 %v904_v26, %v389_v35  ;;  %v937_v47 = vld [vmem:[%s1175_s11 + $0x3c] sm:$0xf]  ;;  %v968_v48 = vld [vmem:[%s1175_s11 + $0x148] sm:$0xf]  ;;  %v261_v49 = vmax.bf16 %v810_v38, %v196_v37  ;;  %v843_v50 = vld [vmem:[%s1175_s11 + $0xc4] sm:$0xf]  ;;  %v648_v51 = vmax.bf16 %v999_v23, %v583_v40  ;;  %v455_v52 = vmax.bf16 %v905_v27, %v390_v41 }
  0x3e   : > { %v969_v53 = vld [vmem:[%s1175_s11 + $0x14c] sm:$0xf]  ;;  %v1000_v54 = vld [vmem:[%s1175_s11 + $0x258] sm:$0xf]  ;;  %v262_v55 = vmax.bf16 %v811_v39, %v197_v43  ;;  %v874_v56 = vld [vmem:[%s1175_s11 + $0x1d0] sm:$0xf] }
  0x3f   : > { %v519_v57 = vmax.bf16 %v936_v42, %v454_v46  ;;  %v1001_v58 = vld [vmem:[%s1175_s11 + $0x25c] sm:$0xf]  ;;  %v326_v59 = vmax.bf16 %v842_v44, %v261_v49  ;;  %v875_v60 = vld [vmem:[%s1175_s11 + $0x1d4] sm:$0xf]  ;;  %v906_v61 = vld [vmem:[%s1175_s11 + $0x2e0] sm:$0xf]  ;;  %v1112_v63 = vcombine.low %v647_v45, %v648_v51  ;;  %v520_v0 = vmax.bf16 %v937_v47, %v455_v52 }
  0x40   : > { %v907_v62 = vld [vmem:[%s1175_s11 + $0x2e4] sm:$0xf]  ;;  %v327_v1 = vmax.bf16 %v843_v50, %v262_v55  ;;  %v133_v2 = vld [vmem:[%s1175_s11 + $0x40] sm:$0xf]  ;;  %v780_v4 = vld [vmem:[%s1175_s11 + $0x150] sm:$0xf] }
  0x41   : > { %v134_v3 = vld [vmem:[%s1175_s11 + $0x44] sm:$0xf]  ;;  %v584_v5 = vmax.bf16 %v968_v48, %v519_v57  ;;  %v391_v6 = vmax.bf16 %v874_v56, %v326_v59  ;;  %v781_v7 = vld [vmem:[%s1175_s11 + $0x154] sm:$0xf]  ;;  %v198_v8 = vmax.bf16 %v780_v4, %v133_v2  ;;  %v812_v9 = vld [vmem:[%s1175_s11 + $0x260] sm:$0xf]  ;;  %v585_v11 = vmax.bf16 %v969_v53, %v520_v0 }
  0x42   : > { %v813_v10 = vld [vmem:[%s1175_s11 + $0x264] sm:$0xf]  ;;  %1113 = vst [vmem:[%s1225_s15 + $0x28] sm:$0xff] %v1112_v63   ;;  %v392_v12 = vmax.bf16 %v875_v60, %v327_v1  ;;  %v938_v13 = vld [vmem:[%s1175_s11 + $0x40] sm:$0xf]  ;;  %v199_v14 = vmax.bf16 %v781_v7, %v134_v3 }
  0x43   : > { %v844_v15 = vld [vmem:[%s1175_s11 + $0xc8] sm:$0xf]  ;;  %v649_v16 = vmax.bf16 %v1000_v54, %v584_v5  ;;  %v456_v17 = vmax.bf16 %v906_v61, %v391_v6  ;;  %v939_v18 = vld [vmem:[%s1175_s11 + $0x44] sm:$0xf]  ;;  %v970_v19 = vld [vmem:[%s1175_s11 + $0x150] sm:$0xf]  ;;  %v263_v20 = vmax.bf16 %v812_v9, %v198_v8  ;;  %v650_v22 = vmax.bf16 %v1001_v58, %v585_v11 }
  0x44   : > { %v845_v21 = vld [vmem:[%s1175_s11 + $0xcc] sm:$0xf]  ;;  %v457_v23 = vmax.bf16 %v907_v62, %v392_v12  ;;  %v971_v24 = vld [vmem:[%s1175_s11 + $0x154] sm:$0xf]  ;;  %v1002_v25 = vld [vmem:[%s1175_s11 + $0x260] sm:$0xf]  ;;  %v264_v26 = vmax.bf16 %v813_v10, %v199_v14 }
  0x45   : > { %v876_v27 = vld [vmem:[%s1175_s11 + $0x1d8] sm:$0xf]  ;;  %v521_v28 = vmax.bf16 %v938_v13, %v456_v17  ;;  %v1003_v29 = vld [vmem:[%s1175_s11 + $0x264] sm:$0xf]  ;;  %v328_v30 = vmax.bf16 %v844_v15, %v263_v20  ;;  %v877_v31 = vld [vmem:[%s1175_s11 + $0x1dc] sm:$0xf]  ;;  %v1114_v34 = vcombine.low %v649_v16, %v650_v22 }
  0x46   : > { %v908_v32 = vld [vmem:[%s1175_s11 + $0x2e8] sm:$0xf]  ;;  %v909_v33 = vld [vmem:[%s1175_s11 + $0x2ec] sm:$0xf]  ;;  %v522_v35 = vmax.bf16 %v939_v18, %v457_v23  ;;  %v329_v36 = vmax.bf16 %v845_v21, %v264_v26  ;;  %v782_v39 = vld [vmem:[%s1175_s11 + $0x158] sm:$0xf] }
  0x47   : > { %v135_v37 = vld [vmem:[%s1175_s11 + $0x48] sm:$0xf]  ;;  %v136_v38 = vld [vmem:[%s1175_s11 + $0x4c] sm:$0xf]  ;;  %v586_v40 = vmax.bf16 %v970_v19, %v521_v28  ;;  %v393_v41 = vmax.bf16 %v876_v27, %v328_v30  ;;  %v783_v42 = vld [vmem:[%s1175_s11 + $0x15c] sm:$0xf] }
  0x48   : > { %v200_v43 = vmax.bf16 %v782_v39, %v135_v37  ;;  %v814_v44 = vld [vmem:[%s1175_s11 + $0x268] sm:$0xf]  ;;  %v815_v45 = vld [vmem:[%s1175_s11 + $0x26c] sm:$0xf]  ;;  %1115 = vst [vmem:[%s1225_s15 + $0x30] sm:$0xff] %v1114_v34   ;;  %v587_v46 = vmax.bf16 %v971_v24, %v522_v35  ;;  %v394_v47 = vmax.bf16 %v877_v31, %v329_v36  ;;  %v201_v49 = vmax.bf16 %v783_v42, %v136_v38 }
  0x49   : > { %v940_v48 = vld [vmem:[%s1175_s11 + $0x48] sm:$0xf]  ;;  %v846_v50 = vld [vmem:[%s1175_s11 + $0xd0] sm:$0xf]  ;;  %v651_v51 = vmax.bf16 %v1002_v25, %v586_v40  ;;  %v458_v52 = vmax.bf16 %v908_v32, %v393_v41  ;;  %v941_v53 = vld [vmem:[%s1175_s11 + $0x4c] sm:$0xf] }
  0x4a   : > { %v972_v54 = vld [vmem:[%s1175_s11 + $0x158] sm:$0xf]  ;;  %v265_v55 = vmax.bf16 %v814_v44, %v200_v43  ;;  %v847_v56 = vld [vmem:[%s1175_s11 + $0xd4] sm:$0xf]  ;;  %v652_v57 = vmax.bf16 %v1003_v29, %v587_v46  ;;  %v459_v58 = vmax.bf16 %v909_v33, %v394_v47  ;;  %v973_v59 = vld [vmem:[%s1175_s11 + $0x15c] sm:$0xf]  ;;  %v266_v61 = vmax.bf16 %v815_v45, %v201_v49 }
  0x4b   : > { %v1004_v60 = vld [vmem:[%s1175_s11 + $0x268] sm:$0xf]  ;;  %v878_v62 = vld [vmem:[%s1175_s11 + $0x1e0] sm:$0xf]  ;;  %v523_v63 = vmax.bf16 %v940_v48, %v458_v52  ;;  %v1005_v0 = vld [vmem:[%s1175_s11 + $0x26c] sm:$0xf] }
  0x4c   : > { %v330_v1 = vmax.bf16 %v846_v50, %v265_v55  ;;  %v879_v2 = vld [vmem:[%s1175_s11 + $0x1e4] sm:$0xf]  ;;  %v910_v3 = vld [vmem:[%s1175_s11 + $0x2f0] sm:$0xf]  ;;  %v911_v4 = vld [vmem:[%s1175_s11 + $0x2f4] sm:$0xf]  ;;  %v1116_v5 = vcombine.low %v651_v51, %v652_v57  ;;  %v524_v6 = vmax.bf16 %v941_v53, %v459_v58  ;;  %v331_v7 = vmax.bf16 %v847_v56, %v266_v61 }
  0x4d   : > { %v137_v8 = vld [vmem:[%s1175_s11 + $0x50] sm:$0xf]  ;;  %v138_v9 = vld [vmem:[%s1175_s11 + $0x54] sm:$0xf]  ;;  %v784_v10 = vld [vmem:[%s1175_s11 + $0x160] sm:$0xf]  ;;  %v588_v11 = vmax.bf16 %v972_v54, %v523_v63 }
  0x4e   : > { %v395_v12 = vmax.bf16 %v878_v62, %v330_v1  ;;  %v785_v13 = vld [vmem:[%s1175_s11 + $0x164] sm:$0xf]  ;;  %v202_v14 = vmax.bf16 %v784_v10, %v137_v8  ;;  %v816_v15 = vld [vmem:[%s1175_s11 + $0x270] sm:$0xf]  ;;  %v817_v16 = vld [vmem:[%s1175_s11 + $0x274] sm:$0xf]  ;;  %v589_v17 = vmax.bf16 %v973_v59, %v524_v6  ;;  %v396_v18 = vmax.bf16 %v879_v2, %v331_v7 }
  0x4f   : > { %1117 = vst [vmem:[%s1225_s15 + $0x38] sm:$0xff] %v1116_v5   ;;  %v942_v19 = vld [vmem:[%s1175_s11 + $0x50] sm:$0xf]  ;;  %v203_v20 = vmax.bf16 %v785_v13, %v138_v9  ;;  %v848_v21 = vld [vmem:[%s1175_s11 + $0xd8] sm:$0xf]  ;;  %v653_v22 = vmax.bf16 %v1004_v60, %v588_v11 }
  0x50   : > { %v460_v23 = vmax.bf16 %v910_v3, %v395_v12  ;;  %v943_v24 = vld [vmem:[%s1175_s11 + $0x54] sm:$0xf]  ;;  %v974_v25 = vld [vmem:[%s1175_s11 + $0x160] sm:$0xf]  ;;  %v267_v26 = vmax.bf16 %v816_v15, %v202_v14  ;;  %v849_v27 = vld [vmem:[%s1175_s11 + $0xdc] sm:$0xf]  ;;  %v654_v28 = vmax.bf16 %v1005_v0, %v589_v17  ;;  %v461_v29 = vmax.bf16 %v911_v4, %v396_v18 }
  0x51   : > { %v975_v30 = vld [vmem:[%s1175_s11 + $0x164] sm:$0xf]  ;;  %v1006_v31 = vld [vmem:[%s1175_s11 + $0x270] sm:$0xf]  ;;  %v268_v32 = vmax.bf16 %v817_v16, %v203_v20  ;;  %v880_v33 = vld [vmem:[%s1175_s11 + $0x1e8] sm:$0xf] }
  0x52   : > { %v525_v34 = vmax.bf16 %v942_v19, %v460_v23  ;;  %v1007_v35 = vld [vmem:[%s1175_s11 + $0x274] sm:$0xf]  ;;  %v332_v36 = vmax.bf16 %v848_v21, %v267_v26  ;;  %v881_v37 = vld [vmem:[%s1175_s11 + $0x1ec] sm:$0xf]  ;;  %v912_v38 = vld [vmem:[%s1175_s11 + $0x2f8] sm:$0xf]  ;;  %v1118_v40 = vcombine.low %v653_v22, %v654_v28  ;;  %v526_v41 = vmax.bf16 %v943_v24, %v461_v29 }
  0x53   : > { %v913_v39 = vld [vmem:[%s1175_s11 + $0x2fc] sm:$0xf]  ;;  %v333_v42 = vmax.bf16 %v849_v27, %v268_v32  ;;  %v139_v43 = vld [vmem:[%s1175_s11 + $0x58] sm:$0xf]  ;;  %v786_v45 = vld [vmem:[%s1175_s11 + $0x168] sm:$0xf] }
  0x54   : > { %v140_v44 = vld [vmem:[%s1175_s11 + $0x5c] sm:$0xf]  ;;  %v590_v46 = vmax.bf16 %v974_v25, %v525_v34  ;;  %v397_v47 = vmax.bf16 %v880_v33, %v332_v36  ;;  %v787_v48 = vld [vmem:[%s1175_s11 + $0x16c] sm:$0xf]  ;;  %v204_v49 = vmax.bf16 %v786_v45, %v139_v43  ;;  %v818_v50 = vld [vmem:[%s1175_s11 + $0x278] sm:$0xf]  ;;  %v591_v52 = vmax.bf16 %v975_v30, %v526_v41 }
  0x55   : > { %v819_v51 = vld [vmem:[%s1175_s11 + $0x27c] sm:$0xf]  ;;  %1119 = vst [vmem:[%s1225_s15 + $0x40] sm:$0xff] %v1118_v40   ;;  %v398_v53 = vmax.bf16 %v881_v37, %v333_v42  ;;  %v944_v54 = vld [vmem:[%s1175_s11 + $0x58] sm:$0xf]  ;;  %v205_v55 = vmax.bf16 %v787_v48, %v140_v44 }
  0x56   : > { %v850_v56 = vld [vmem:[%s1175_s11 + $0xe0] sm:$0xf]  ;;  %v655_v57 = vmax.bf16 %v1006_v31, %v590_v46  ;;  %v462_v58 = vmax.bf16 %v912_v38, %v397_v47  ;;  %v945_v59 = vld [vmem:[%s1175_s11 + $0x5c] sm:$0xf]  ;;  %v976_v60 = vld [vmem:[%s1175_s11 + $0x168] sm:$0xf]  ;;  %v269_v61 = vmax.bf16 %v818_v50, %v204_v49  ;;  %v656_v63 = vmax.bf16 %v1007_v35, %v591_v52 }
  0x57   : > { %v851_v62 = vld [vmem:[%s1175_s11 + $0xe4] sm:$0xf]  ;;  %v463_v0 = vmax.bf16 %v913_v39, %v398_v53  ;;  %v977_v1 = vld [vmem:[%s1175_s11 + $0x16c] sm:$0xf]  ;;  %v1008_v2 = vld [vmem:[%s1175_s11 + $0x278] sm:$0xf]  ;;  %v270_v3 = vmax.bf16 %v819_v51, %v205_v55 }
  0x58   : > { %v882_v4 = vld [vmem:[%s1175_s11 + $0x1f0] sm:$0xf]  ;;  %v527_v5 = vmax.bf16 %v944_v54, %v462_v58  ;;  %v1009_v6 = vld [vmem:[%s1175_s11 + $0x27c] sm:$0xf]  ;;  %v334_v7 = vmax.bf16 %v850_v56, %v269_v61  ;;  %v883_v8 = vld [vmem:[%s1175_s11 + $0x1f4] sm:$0xf]  ;;  %v1120_v11 = vcombine.low %v655_v57, %v656_v63 }
  0x59   : > { %v914_v9 = vld [vmem:[%s1175_s11 + $0x300] sm:$0xf]  ;;  %v915_v10 = vld [vmem:[%s1175_s11 + $0x304] sm:$0xf]  ;;  %v528_v12 = vmax.bf16 %v945_v59, %v463_v0  ;;  %v335_v13 = vmax.bf16 %v851_v62, %v270_v3  ;;  %v788_v16 = vld [vmem:[%s1175_s11 + $0x170] sm:$0xf] }
  0x5a   : > { %v141_v14 = vld [vmem:[%s1175_s11 + $0x60] sm:$0xf]  ;;  %v142_v15 = vld [vmem:[%s1175_s11 + $0x64] sm:$0xf]  ;;  %v592_v17 = vmax.bf16 %v976_v60, %v527_v5  ;;  %v399_v18 = vmax.bf16 %v882_v4, %v334_v7  ;;  %v789_v19 = vld [vmem:[%s1175_s11 + $0x174] sm:$0xf] }
  0x5b   : > { %v206_v20 = vmax.bf16 %v788_v16, %v141_v14  ;;  %v820_v21 = vld [vmem:[%s1175_s11 + $0x280] sm:$0xf]  ;;  %v821_v22 = vld [vmem:[%s1175_s11 + $0x284] sm:$0xf]  ;;  %1121 = vst [vmem:[%s1225_s15 + $0x48] sm:$0xff] %v1120_v11   ;;  %v593_v23 = vmax.bf16 %v977_v1, %v528_v12  ;;  %v400_v24 = vmax.bf16 %v883_v8, %v335_v13  ;;  %v207_v26 = vmax.bf16 %v789_v19, %v142_v15 }
  0x5c   : > { %v946_v25 = vld [vmem:[%s1175_s11 + $0x60] sm:$0xf]  ;;  %v852_v27 = vld [vmem:[%s1175_s11 + $0xe8] sm:$0xf]  ;;  %v657_v28 = vmax.bf16 %v1008_v2, %v592_v17  ;;  %v464_v29 = vmax.bf16 %v914_v9, %v399_v18  ;;  %v947_v30 = vld [vmem:[%s1175_s11 + $0x64] sm:$0xf] }
  0x5d   : > { %v978_v31 = vld [vmem:[%s1175_s11 + $0x170] sm:$0xf]  ;;  %v271_v32 = vmax.bf16 %v820_v21, %v206_v20  ;;  %v853_v33 = vld [vmem:[%s1175_s11 + $0xec] sm:$0xf]  ;;  %v658_v34 = vmax.bf16 %v1009_v6, %v593_v23  ;;  %v465_v35 = vmax.bf16 %v915_v10, %v400_v24  ;;  %v979_v36 = vld [vmem:[%s1175_s11 + $0x174] sm:$0xf]  ;;  %v272_v38 = vmax.bf16 %v821_v22, %v207_v26 }
  0x5e   : > { %v1010_v37 = vld [vmem:[%s1175_s11 + $0x280] sm:$0xf]  ;;  %v884_v39 = vld [vmem:[%s1175_s11 + $0x1f8] sm:$0xf]  ;;  %v529_v40 = vmax.bf16 %v946_v25, %v464_v29  ;;  %v1011_v41 = vld [vmem:[%s1175_s11 + $0x284] sm:$0xf] }
  0x5f   : > { %v336_v42 = vmax.bf16 %v852_v27, %v271_v32  ;;  %v885_v43 = vld [vmem:[%s1175_s11 + $0x1fc] sm:$0xf]  ;;  %v916_v44 = vld [vmem:[%s1175_s11 + $0x308] sm:$0xf]  ;;  %v917_v45 = vld [vmem:[%s1175_s11 + $0x30c] sm:$0xf]  ;;  %v1122_v46 = vcombine.low %v657_v28, %v658_v34  ;;  %v530_v47 = vmax.bf16 %v947_v30, %v465_v35  ;;  %v337_v48 = vmax.bf16 %v853_v33, %v272_v38 }
  0x60   : > { %v143_v49 = vld [vmem:[%s1175_s11 + $0x68] sm:$0xf]  ;;  %v144_v50 = vld [vmem:[%s1175_s11 + $0x6c] sm:$0xf]  ;;  %v790_v51 = vld [vmem:[%s1175_s11 + $0x178] sm:$0xf]  ;;  %v594_v52 = vmax.bf16 %v978_v31, %v529_v40 }
  0x61   : > { %v401_v53 = vmax.bf16 %v884_v39, %v336_v42  ;;  %v791_v54 = vld [vmem:[%s1175_s11 + $0x17c] sm:$0xf]  ;;  %v208_v55 = vmax.bf16 %v790_v51, %v143_v49  ;;  %v822_v56 = vld [vmem:[%s1175_s11 + $0x288] sm:$0xf]  ;;  %v823_v57 = vld [vmem:[%s1175_s11 + $0x28c] sm:$0xf]  ;;  %v595_v58 = vmax.bf16 %v979_v36, %v530_v47  ;;  %v402_v59 = vmax.bf16 %v885_v43, %v337_v48 }
  0x62   : > { %1123 = vst [vmem:[%s1225_s15 + $0x50] sm:$0xff] %v1122_v46   ;;  %v948_v60 = vld [vmem:[%s1175_s11 + $0x68] sm:$0xf]  ;;  %v209_v61 = vmax.bf16 %v791_v54, %v144_v50  ;;  %v854_v62 = vld [vmem:[%s1175_s11 + $0xf0] sm:$0xf]  ;;  %v659_v63 = vmax.bf16 %v1010_v37, %v594_v52 }
  0x63   : > { %v466_v0 = vmax.bf16 %v916_v44, %v401_v53  ;;  %v949_v1 = vld [vmem:[%s1175_s11 + $0x6c] sm:$0xf]  ;;  %v980_v2 = vld [vmem:[%s1175_s11 + $0x178] sm:$0xf]  ;;  %v273_v3 = vmax.bf16 %v822_v56, %v208_v55  ;;  %v855_v4 = vld [vmem:[%s1175_s11 + $0xf4] sm:$0xf]  ;;  %v660_v5 = vmax.bf16 %v1011_v41, %v595_v58  ;;  %v467_v6 = vmax.bf16 %v917_v45, %v402_v59 }
  0x64   : > { %v981_v7 = vld [vmem:[%s1175_s11 + $0x17c] sm:$0xf]  ;;  %v1012_v8 = vld [vmem:[%s1175_s11 + $0x288] sm:$0xf]  ;;  %v274_v9 = vmax.bf16 %v823_v57, %v209_v61  ;;  %v886_v10 = vld [vmem:[%s1175_s11 + $0x200] sm:$0xf] }
  0x65   : > { %v531_v11 = vmax.bf16 %v948_v60, %v466_v0  ;;  %v1013_v12 = vld [vmem:[%s1175_s11 + $0x28c] sm:$0xf]  ;;  %v338_v13 = vmax.bf16 %v854_v62, %v273_v3  ;;  %v887_v14 = vld [vmem:[%s1175_s11 + $0x204] sm:$0xf]  ;;  %v918_v15 = vld [vmem:[%s1175_s11 + $0x310] sm:$0xf]  ;;  %v1124_v17 = vcombine.low %v659_v63, %v660_v5  ;;  %v532_v18 = vmax.bf16 %v949_v1, %v467_v6 }
  0x66   : > { %v919_v16 = vld [vmem:[%s1175_s11 + $0x314] sm:$0xf]  ;;  %v339_v19 = vmax.bf16 %v855_v4, %v274_v9  ;;  %v145_v20 = vld [vmem:[%s1175_s11 + $0x70] sm:$0xf]  ;;  %v792_v22 = vld [vmem:[%s1175_s11 + $0x180] sm:$0xf] }
  0x67   : > { %v146_v21 = vld [vmem:[%s1175_s11 + $0x74] sm:$0xf]  ;;  %v596_v23 = vmax.bf16 %v980_v2, %v531_v11  ;;  %v403_v24 = vmax.bf16 %v886_v10, %v338_v13  ;;  %v793_v25 = vld [vmem:[%s1175_s11 + $0x184] sm:$0xf]  ;;  %v210_v26 = vmax.bf16 %v792_v22, %v145_v20  ;;  %v824_v27 = vld [vmem:[%s1175_s11 + $0x290] sm:$0xf]  ;;  %v597_v29 = vmax.bf16 %v981_v7, %v532_v18 }
  0x68   : > { %v825_v28 = vld [vmem:[%s1175_s11 + $0x294] sm:$0xf]  ;;  %1125 = vst [vmem:[%s1225_s15 + $0x58] sm:$0xff] %v1124_v17   ;;  %v404_v30 = vmax.bf16 %v887_v14, %v339_v19  ;;  %v950_v31 = vld [vmem:[%s1175_s11 + $0x70] sm:$0xf]  ;;  %v211_v32 = vmax.bf16 %v793_v25, %v146_v21 }
  0x69   : > { %v856_v33 = vld [vmem:[%s1175_s11 + $0xf8] sm:$0xf]  ;;  %v661_v34 = vmax.bf16 %v1012_v8, %v596_v23  ;;  %v468_v35 = vmax.bf16 %v918_v15, %v403_v24  ;;  %v951_v36 = vld [vmem:[%s1175_s11 + $0x74] sm:$0xf]  ;;  %v982_v37 = vld [vmem:[%s1175_s11 + $0x180] sm:$0xf]  ;;  %v275_v38 = vmax.bf16 %v824_v27, %v210_v26  ;;  %v662_v40 = vmax.bf16 %v1013_v12, %v597_v29 }
  0x6a   : > { %v857_v39 = vld [vmem:[%s1175_s11 + $0xfc] sm:$0xf]  ;;  %v469_v41 = vmax.bf16 %v919_v16, %v404_v30  ;;  %v983_v42 = vld [vmem:[%s1175_s11 + $0x184] sm:$0xf]  ;;  %v1014_v43 = vld [vmem:[%s1175_s11 + $0x290] sm:$0xf]  ;;  %v276_v44 = vmax.bf16 %v825_v28, %v211_v32 }
  0x6b   : > { %v888_v45 = vld [vmem:[%s1175_s11 + $0x208] sm:$0xf]  ;;  %v533_v46 = vmax.bf16 %v950_v31, %v468_v35  ;;  %v1015_v47 = vld [vmem:[%s1175_s11 + $0x294] sm:$0xf]  ;;  %v340_v48 = vmax.bf16 %v856_v33, %v275_v38  ;;  %v889_v49 = vld [vmem:[%s1175_s11 + $0x20c] sm:$0xf]  ;;  %v1126_v52 = vcombine.low %v661_v34, %v662_v40 }
  0x6c   : > { %v920_v50 = vld [vmem:[%s1175_s11 + $0x318] sm:$0xf]  ;;  %v921_v51 = vld [vmem:[%s1175_s11 + $0x31c] sm:$0xf]  ;;  %v534_v53 = vmax.bf16 %v951_v36, %v469_v41  ;;  %v341_v54 = vmax.bf16 %v857_v39, %v276_v44  ;;  %v794_v57 = vld [vmem:[%s1175_s11 + $0x188] sm:$0xf] }
  0x6d   : > { %v147_v55 = vld [vmem:[%s1175_s11 + $0x78] sm:$0xf]  ;;  %v148_v56 = vld [vmem:[%s1175_s11 + $0x7c] sm:$0xf]  ;;  %v598_v58 = vmax.bf16 %v982_v37, %v533_v46  ;;  %v405_v59 = vmax.bf16 %v888_v45, %v340_v48  ;;  %v795_v60 = vld [vmem:[%s1175_s11 + $0x18c] sm:$0xf] }
  0x6e   : > { %v212_v61 = vmax.bf16 %v794_v57, %v147_v55  ;;  %v826_v62 = vld [vmem:[%s1175_s11 + $0x298] sm:$0xf]  ;;  %v827_v63 = vld [vmem:[%s1175_s11 + $0x29c] sm:$0xf]  ;;  %1127 = vst [vmem:[%s1225_s15 + $0x60] sm:$0xff] %v1126_v52   ;;  %v599_v0 = vmax.bf16 %v983_v42, %v534_v53  ;;  %v406_v1 = vmax.bf16 %v889_v49, %v341_v54  ;;  %v213_v3 = vmax.bf16 %v795_v60, %v148_v56 }
  0x6f   : > { %v952_v2 = vld [vmem:[%s1175_s11 + $0x78] sm:$0xf]  ;;  %v858_v4 = vld [vmem:[%s1175_s11 + $0x100] sm:$0xf]  ;;  %v663_v5 = vmax.bf16 %v1014_v43, %v598_v58  ;;  %v470_v6 = vmax.bf16 %v920_v50, %v405_v59  ;;  %v953_v7 = vld [vmem:[%s1175_s11 + $0x7c] sm:$0xf] }
  0x70   : > { %v277_v8 = vmax.bf16 %v826_v62, %v212_v61  ;;  %v859_v9 = vld [vmem:[%s1175_s11 + $0x104] sm:$0xf]  ;;  %v664_v10 = vmax.bf16 %v1015_v47, %v599_v0  ;;  %v471_v11 = vmax.bf16 %v921_v51, %v406_v1  ;;  %v984_v12 = vld [vmem:[%s1175_s11 + $0x188] sm:$0xf]  ;;  %v278_v13 = vmax.bf16 %v827_v63, %v213_v3  ;;  %v890_v14 = vld [vmem:[%s1175_s11 + $0x210] sm:$0xf] }
  0x71   : > { %v535_v15 = vmax.bf16 %v952_v2, %v470_v6  ;;  %v985_v16 = vld [vmem:[%s1175_s11 + $0x18c] sm:$0xf]  ;;  %v891_v18 = vld [vmem:[%s1175_s11 + $0x214] sm:$0xf]  ;;  %v1016_v21 = vld [vmem:[%s1175_s11 + $0x298] sm:$0xf] }
  0x72   : > { %v342_v17 = vmax.bf16 %v858_v4, %v277_v8  ;;  %v1128_v19 = vcombine.low %v663_v5, %v664_v10  ;;  %v536_v20 = vmax.bf16 %v953_v7, %v471_v11  ;;  %v343_v22 = vmax.bf16 %v859_v9, %v278_v13  ;;  %v922_v23 = vld [vmem:[%s1175_s11 + $0x320] sm:$0xf]  ;;  %v1017_v25 = vld [vmem:[%s1175_s11 + $0x29c] sm:$0xf]  ;;  %v923_v27 = vld [vmem:[%s1175_s11 + $0x324] sm:$0xf] }
  0x73   : > { %v600_v24 = vmax.bf16 %v984_v12, %v535_v15  ;;  %v954_v30 = vld [vmem:[%s1175_s11 + $0x80] sm:$0xf]  ;;  %v955_v33 = vld [vmem:[%s1175_s11 + $0x84] sm:$0xf]  ;;  %v986_v36 = vld [vmem:[%s1175_s11 + $0x190] sm:$0xf] }
  0x74   : > { %v407_v26 = vmax.bf16 %v890_v14, %v342_v17  ;;  %1129 = vst [vmem:[%s1225_s15 + $0x68] sm:$0xff] %v1128_v19   ;;  %v601_v28 = vmax.bf16 %v985_v16, %v536_v20  ;;  %v408_v29 = vmax.bf16 %v891_v18, %v343_v22  ;;  %v987_v38 = vld [vmem:[%s1175_s11 + $0x194] sm:$0xf]  ;;  %v1018_v41 = vld [vmem:[%s1175_s11 + $0x2a0] sm:$0xf] }
  0x75   : > { %v665_v31 = vmax.bf16 %v1016_v21, %v600_v24  ;;  %v1019_v43 = vld [vmem:[%s1175_s11 + $0x2a4] sm:$0xf] }
  0x76   : > { %v472_v32 = vmax.bf16 %v922_v23, %v407_v26  ;;  %v666_v34 = vmax.bf16 %v1017_v25, %v601_v28  ;;  %v473_v35 = vmax.bf16 %v923_v27, %v408_v29 }
  0x78   : > { %v537_v37 = vmax.bf16 %v954_v30, %v472_v32  ;;  %v1130_v39 = vcombine.low %v665_v31, %v666_v34  ;;  %v538_v40 = vmax.bf16 %v955_v33, %v473_v35 }
  0x7a   : > { %v602_v42 = vmax.bf16 %v986_v36, %v537_v37  ;;  %1131 = vst [vmem:[%s1225_s15 + $0x70] sm:$0xff] %v1130_v39   ;;  %v603_v44 = vmax.bf16 %v987_v38, %v538_v40 }
  0x7c   : > { %v667_v45 = vmax.bf16 %v1018_v41, %v602_v42  ;;  %v668_v46 = vmax.bf16 %v1019_v43, %v603_v44 }
  0x7e   : > { %v1132_v47 = vcombine.low %v667_v45, %v668_v46 }
  0x80   : > { %1133 = vst [vmem:[%s1225_s15 + $0x78] sm:$0xff] %v1132_v47  }
  0x81 PF: > { %s11_s6 = sadd.s32 1, %s1149_s6  }
  0x82   : > { %p8_p4 = scmp.ge.s32.totalorder %s11_s6, 8  }
  0x84   :  { %10 = sbr.rel (!%p8_p4) target bundleno = 1 (0x1), region = 62 }

// kernel: forward.14
= control target key start
LH: loop header
LB: loop body
LE: loop exit
PB: predicated region body
PF: predicated region fallthrough
CT: control target
= control target key end

     0   :  { %s1814_s12 = smov 0   ;;  %s1999_s0 = inlined_call_operand.vmem [shape: bf16[1536,128], index: 0, kind: input, shape index: {}]   ;;  %s2000_s1 = inlined_call_operand.vmem [shape: bf16[128,128], index: 1, kind: input, shape index: {}]   ;;  %s2001_s2 = inlined_call_operand.vmem [shape: f32[1,128], index: 2, kind: input, shape index: {}]   ;;  %s2002_s3 = inlined_call_operand.vmem [shape: bf16[1536,128], index: 3, kind: output, shape index: {}]  }
   0x1 LB: > { %s1231_s13 = sadd.s32 4294967295, %s1792_s12   ;;  %p1235_p0 = scmp.ge.s32.totalorder %s1792_s12, 1  ;;  %s1792_s12 = sphi %s1814_s12, %s13_s12  }
   0x2   : > { %p138_p1 = scmp.lt.s32.totalorder %s1792_s12, 4 }
   0x4   : > { %p139_p2 = pnand %p1235_p0, %p138_p1 }
   0x5   : > { %v1746_v0 = vld [vmem:[%s2000_s1] sm:$0xff] (!%p139_p2)   ;;  %s1236_s16 = sshll.u32 (!%p139_p2), %s1231_s13, 6  ;;  %v1747_v1 = vld [vmem:[%s2000_s1 + $0x8] sm:$0xff] (!%p139_p2)   ;;  %v1748_v2 = vld [vmem:[%s2000_s1 + $0x10] sm:$0xff] (!%p139_p2)  }
   0x6   : > { %142 = sbr.rel (%p139_p2) target bundleno = 316 (0x13c), region = 32  ;;  %p163_p3 = scmp.lt.s32.totalorder (!%p139_p2), %s1236_s16, 191  ;;  %1642 = vmatprep.subr.bf16.mxu0 (!%p139_p2), %v1746_v0  ;;  %1722 = vmatprep.subr.bf16.mxu1 (!%p139_p2), %v1746_v0  ;;  %v1749_v3 = vld [vmem:[%s2000_s1 + $0x18] sm:$0xff] (!%p139_p2)   ;;  %v1750_v6 = vld [vmem:[%s2000_s1 + $0x20] sm:$0xff] (!%p139_p2)   ;;  %v1751_v7 = vld [vmem:[%s2000_s1 + $0x28] sm:$0xff] (!%p139_p2)  }
   0x7   : > { %1643 = vmatpush3.bf16.msra.mxu0 (!%p139_p2), %v1746_v0  ;;  %1730 = vmatpush3.bf16.msra.mxu1 (!%p139_p2), %v1746_v0  ;;  %v1752_v8 = vld [vmem:[%s2000_s1 + $0x30] sm:$0xff] (!%p139_p2)   ;;  %v1753_v9 = vld [vmem:[%s2000_s1 + $0x38] sm:$0xff] (!%p139_p2)   ;;  %v1891_v40 = vld [vmem:[%s2001_s2] ss:$0 sm:$0xff] (!%p139_p2) }
   0x8   : > { %1644 = vmatprep.subr.bf16.mxu0 (!%p139_p2), %v1747_v1  ;;  %1723 = vmatprep.subr.bf16.mxu1 (!%p139_p2), %v1747_v1 }
   0xb   : > { %1645 = vmatpush3.bf16.msra.mxu0 (!%p139_p2), %v1747_v1  ;;  %1731 = vmatpush3.bf16.msra.mxu1 (!%p139_p2), %v1747_v1 }
   0xc   : > { %1646 = vmatprep.subr.bf16.mxu0 (!%p139_p2), %v1748_v2  ;;  %1724 = vmatprep.subr.bf16.mxu1 (!%p139_p2), %v1748_v2 }
   0xd   : > { %s2004_s16 = smov (!%p163_p3, %s1236_s16), 191 }
   0xe   : > { %s1237_s21 = sshll.u32 %s2004_s16, 2 }
   0xf   : > { %s1839_s24 = scalar_lea.vmem %s1999_s0, %s1237_s21  ;;  %1647 = vmatpush3.bf16.msra.mxu0 %v1748_v2  ;;  %1732 = vmatpush3.bf16.msra.mxu1 %v1748_v2  ;;  %s1906_s13 = scalar_lea.vmem %s2002_s3, %s1237_s21 }
  0x10   : > { %v1754_v4 = vld [vmem:[%s1839_s24] sm:$0xff]   ;;  %1648 = vmatprep.subr.bf16.mxu0 %v1749_v3  ;;  %1725 = vmatprep.subr.bf16.mxu1 %v1749_v3  ;;  %v1756_v10 = vld [vmem:[%s1839_s24 + $0x8] sm:$0xff]   ;;  %v1758_v12 = vld [vmem:[%s1839_s24 + $0x10] sm:$0xff]  }
  0x11   : > { %v1755_v5 = vld [vmem:[%s1839_s24 + $0x80] sm:$0xff]   ;;  %1658 = vmatprep.mubr.bf16.mxu0 %v1754_v4  ;;  %v1757_v11 = vld [vmem:[%s1839_s24 + $0x88] sm:$0xff]   ;;  %v1759_v13 = vld [vmem:[%s1839_s24 + $0x90] sm:$0xff]  }
  0x12   : > { %1690 = vmatprep.mubr.bf16.mxu1 %v1755_v5  ;;  %v1760_v14 = vld [vmem:[%s1839_s24 + $0x18] sm:$0xff]   ;;  %v1762_v16 = vld [vmem:[%s1839_s24 + $0x20] sm:$0xff]   ;;  %v1764_v18 = vld [vmem:[%s1839_s24 + $0x28] sm:$0xff]  }
  0x13   : > { %1649 = vmatpush3.bf16.msra.mxu0 %v1749_v3  ;;  %1733 = vmatpush3.bf16.msra.mxu1 %v1749_v3  ;;  %v1761_v15 = vld [vmem:[%s1839_s24 + $0x98] sm:$0xff]   ;;  %v1763_v17 = vld [vmem:[%s1839_s24 + $0xa0] sm:$0xff]   ;;  %v1765_v19 = vld [vmem:[%s1839_s24 + $0xa8] sm:$0xff]  }
  0x14   : > { %1650 = vmatprep.subr.bf16.mxu0 %v1750_v6  ;;  %1726 = vmatprep.subr.bf16.mxu1 %v1750_v6  ;;  %v1766_v20 = vld [vmem:[%s1839_s24 + $0x30] sm:$0xff]   ;;  %v1768_v22 = vld [vmem:[%s1839_s24 + $0x38] sm:$0xff]   ;;  %v1770_v24 = vld [vmem:[%s1839_s24 + $0x40] sm:$0xff]  }
  0x15   : > { %v1767_v21 = vld [vmem:[%s1839_s24 + $0xb0] sm:$0xff]   ;;  %v1769_v23 = vld [vmem:[%s1839_s24 + $0xb8] sm:$0xff]   ;;  %v1771_v25 = vld [vmem:[%s1839_s24 + $0xc0] sm:$0xff]  }
  0x16   : > { %v1772_v26 = vld [vmem:[%s1839_s24 + $0x48] sm:$0xff]   ;;  %v1774_v28 = vld [vmem:[%s1839_s24 + $0x50] sm:$0xff]   ;;  %v1776_v30 = vld [vmem:[%s1839_s24 + $0x58] sm:$0xff]  }
  0x17   : > { %1651 = vmatpush3.bf16.msra.mxu0 %v1750_v6  ;;  %1734 = vmatpush3.bf16.msra.mxu1 %v1750_v6  ;;  %v1773_v27 = vld [vmem:[%s1839_s24 + $0xc8] sm:$0xff]   ;;  %v1775_v29 = vld [vmem:[%s1839_s24 + $0xd0] sm:$0xff]   ;;  %v1777_v31 = vld [vmem:[%s1839_s24 + $0xd8] sm:$0xff]  }
  0x18   : > { %1652 = vmatprep.subr.bf16.mxu0 %v1751_v7  ;;  %1727 = vmatprep.subr.bf16.mxu1 %v1751_v7  ;;  %v1778_v32 = vld [vmem:[%s1839_s24 + $0x60] sm:$0xff]   ;;  %v1780_v34 = vld [vmem:[%s1839_s24 + $0x68] sm:$0xff]   ;;  %v1782_v36 = vld [vmem:[%s1839_s24 + $0x70] sm:$0xff]  }
  0x19   : > { %v1779_v33 = vld [vmem:[%s1839_s24 + $0xe0] sm:$0xff]   ;;  %v1781_v35 = vld [vmem:[%s1839_s24 + $0xe8] sm:$0xff]   ;;  %v1783_v37 = vld [vmem:[%s1839_s24 + $0xf0] sm:$0xff]  }
  0x1a   : > { %v1784_v38 = vld [vmem:[%s1839_s24 + $0x78] sm:$0xff]  }
  0x1b   : > { %1653 = vmatpush3.bf16.msra.mxu0 %v1751_v7  ;;  %1735 = vmatpush3.bf16.msra.mxu1 %v1751_v7  ;;  %v1785_v39 = vld [vmem:[%s1839_s24 + $0xf8] sm:$0xff]  }
  0x1c   : > { %1654 = vmatprep.subr.bf16.mxu0 %v1752_v8  ;;  %1728 = vmatprep.subr.bf16.mxu1 %v1752_v8 }
  0x1f   : > { %1655 = vmatpush3.bf16.msra.mxu0 %v1752_v8  ;;  %1736 = vmatpush3.bf16.msra.mxu1 %v1752_v8 }
  0x20   : > { %1656 = vmatprep.subr.bf16.mxu0 %v1753_v9  ;;  %1729 = vmatprep.subr.bf16.mxu1 %v1753_v9 }
  0x23   : > { %1657 = vmatpush3.bf16.msra.mxu0 %v1753_v9  ;;  %1737 = vmatpush3.bf16.msra.mxu1 %v1753_v9 }
  0x26   : > { %1659 = vmatmul.mubr.bf16.vlgmr.msra.gmra.mrb[0].mxu0 %v1756_v10  ;;  %1691 = vmatmul.mubr.bf16.vlgmr.msra.gmra.mrb[0].mxu1 %v1757_v11 }
  0x27   : > { %1662 = vmatprep.mubr.bf16.mxu0 %v1758_v12  ;;  %1694 = vmatprep.mubr.bf16.mxu1 %v1759_v13 }
  0x2e   : > { %1663 = vmatmul.mubr.bf16.gmra.mrb[4].mxu0 %v1760_v14  ;;  %1695 = vmatmul.mubr.bf16.gmra.mrb[4].mxu1 %v1761_v15 }
  0x2f   : > { %1666 = vmatprep.mubr.bf16.mxu0 %v1762_v16  ;;  %1698 = vmatprep.mubr.bf16.mxu1 %v1763_v17 }
  0x36   : > { %1667 = vmatmul.mubr.bf16.gmra.mrb[8].mxu0 %v1764_v18  ;;  %1699 = vmatmul.mubr.bf16.gmra.mrb[8].mxu1 %v1765_v19 }
  0x37   : > { %1670 = vmatprep.mubr.bf16.mxu0 %v1766_v20  ;;  %1702 = vmatprep.mubr.bf16.mxu1 %v1767_v21 }
  0x3e   : > { %1671 = vmatmul.mubr.bf16.gmra.mrb[12].mxu0 %v1768_v22  ;;  %1703 = vmatmul.mubr.bf16.gmra.mrb[12].mxu1 %v1769_v23 }
  0x3f   : > { %1674 = vmatprep.mubr.bf16.mxu0 %v1770_v24  ;;  %1706 = vmatprep.mubr.bf16.mxu1 %v1771_v25 }
  0x46   : > { %1675 = vmatmul.mubr.bf16.gmra.mrb[16].mxu0 %v1772_v26  ;;  %1707 = vmatmul.mubr.bf16.gmra.mrb[16].mxu1 %v1773_v27 }
  0x47   : > { %1678 = vmatprep.mubr.bf16.mxu0 %v1774_v28  ;;  %1710 = vmatprep.mubr.bf16.mxu1 %v1775_v29 }
  0x4e   : > { %1679 = vmatmul.mubr.bf16.gmra.mrb[20].mxu0 %v1776_v30  ;;  %1711 = vmatmul.mubr.bf16.gmra.mrb[20].mxu1 %v1777_v31 }
  0x4f   : > { %1682 = vmatprep.mubr.bf16.mxu0 %v1778_v32  ;;  %1714 = vmatprep.mubr.bf16.mxu1 %v1779_v33 }
  0x56   : > { %1683 = vmatmul.mubr.bf16.gmra.mrb[24].mxu0 %v1780_v34  ;;  %1715 = vmatmul.mubr.bf16.gmra.mrb[24].mxu1 %v1781_v35 }
  0x57   : > { %1686 = vmatprep.mubr.bf16.mxu0 %v1782_v36  ;;  %1718 = vmatprep.mubr.bf16.mxu1 %v1783_v37 }
  0x5e   : > { %1687 = vmatmul.mubr.bf16.gmra.mrb[28].mxu0 %v1784_v38  ;;  %1719 = vmatmul.mubr.bf16.gmra.mrb[28].mxu1 %v1785_v39 }
  0xf9   : > { %v1660_v41 = vpop.f32.mrb[0].mxu0  ;;  %v1692_v42 = vpop.f32.mrb[0].mxu1 }
  0xfa   : > { %v545_v43 = vadd.f32 %v1660_v41, %v1891_v40  ;;  %v673_v44 = vadd.f32 %v1692_v42, %v1891_v40  ;;  %v536_v45 = vpop.f32.mrb[1].mxu0  ;;  %v664_v46 = vpop.f32.mrb[1].mxu1 }
  0xfb   : > { %v537_v47 = vadd.f32 %v1891_v40, %v536_v45  ;;  %v665_v48 = vadd.f32 %v1891_v40, %v664_v46  ;;  %v1661_v49 = vpop.f32.mrb[2].mxu0  ;;  %v1693_v50 = vpop.f32.mrb[2].mxu1 }
  0xfc   : > { %v548_v51 = vadd.f32 %v1661_v49, %v1891_v40  ;;  %v676_v52 = vadd.f32 %v1693_v50, %v1891_v40  ;;  %v539_v53 = vpop.f32.mrb[3].mxu0  ;;  %v667_v54 = vpop.f32.mrb[3].mxu1  ;;  %v793_v57 = vmax.f32 %v545_v43, 0.0  ;;  %v825_v58 = vmax.f32 %v673_v44, 0.0 }
  0xfd   : > { %v540_v55 = vadd.f32 %v1891_v40, %v539_v53  ;;  %v668_v56 = vadd.f32 %v1891_v40, %v667_v54  ;;  %v791_v61 = vmax.f32 %v537_v47, 0.0  ;;  %v823_v62 = vmax.f32 %v665_v48, 0.0 }
  0xfe   : > { %v794_v59 = vmax.f32 %v548_v51, 0.0  ;;  %v826_v60 = vmax.f32 %v676_v52, 0.0 }
  0xff   : > { %v792_v63 = vmax.f32 %v540_v55, 0.0  ;;  %v824_v0 = vmax.f32 %v668_v56, 0.0 }
 0x100   : > { %v1419_v1 = vpack.c.bf16 %v794_v59, %v793_v57  ;;  %v1499_v2 = vpack.c.bf16 %v826_v60, %v825_v58 }
 0x101   : > { %v1414_v3 = vpack.c.bf16 %v792_v63, %v791_v61  ;;  %v1494_v4 = vpack.c.bf16 %v824_v0, %v823_v62  ;;  %v1664_v5 = vpop.f32.mrb[4].mxu0  ;;  %v1696_v6 = vpop.f32.mrb[4].mxu1 }
 0x102   : > { %1571 = vst [vmem:[%s1906_s13 + $0x8] sm:$0xff] %v1419_v1   ;;  %1587 = vst [vmem:[%s1906_s13 + $0x88] sm:$0xff] %v1499_v2   ;;  %v561_v7 = vadd.f32 %v1664_v5, %v1891_v40  ;;  %v689_v8 = vadd.f32 %v1696_v6, %v1891_v40  ;;  %v552_v9 = vpop.f32.mrb[5].mxu0  ;;  %v680_v10 = vpop.f32.mrb[5].mxu1 }
 0x103   : > { %1415 = vst [vmem:[%s1906_s13] sm:$0xff] %v1414_v3   ;;  %1586 = vst [vmem:[%s1906_s13 + $0x80] sm:$0xff] %v1494_v4   ;;  %v553_v11 = vadd.f32 %v1891_v40, %v552_v9  ;;  %v681_v12 = vadd.f32 %v1891_v40, %v680_v10  ;;  %v1665_v13 = vpop.f32.mrb[6].mxu0  ;;  %v1697_v14 = vpop.f32.mrb[6].mxu1 }
 0x104   : > { %v564_v15 = vadd.f32 %v1665_v13, %v1891_v40  ;;  %v692_v16 = vadd.f32 %v1697_v14, %v1891_v40  ;;  %v555_v17 = vpop.f32.mrb[7].mxu0  ;;  %v683_v18 = vpop.f32.mrb[7].mxu1  ;;  %v797_v21 = vmax.f32 %v561_v7, 0.0  ;;  %v829_v22 = vmax.f32 %v689_v8, 0.0 }
 0x105   : > { %v556_v19 = vadd.f32 %v1891_v40, %v555_v17  ;;  %v684_v20 = vadd.f32 %v1891_v40, %v683_v18  ;;  %v795_v25 = vmax.f32 %v553_v11, 0.0  ;;  %v827_v26 = vmax.f32 %v681_v12, 0.0 }
 0x106   : > { %v798_v23 = vmax.f32 %v564_v15, 0.0  ;;  %v830_v24 = vmax.f32 %v692_v16, 0.0 }
 0x107   : > { %v796_v27 = vmax.f32 %v556_v19, 0.0  ;;  %v828_v28 = vmax.f32 %v684_v20, 0.0 }
 0x108   : > { %v1429_v29 = vpack.c.bf16 %v798_v23, %v797_v21  ;;  %v1509_v30 = vpack.c.bf16 %v830_v24, %v829_v22 }
 0x109   : > { %v1424_v31 = vpack.c.bf16 %v796_v27, %v795_v25  ;;  %v1504_v32 = vpack.c.bf16 %v828_v28, %v827_v26  ;;  %v1668_v33 = vpop.f32.mrb[8].mxu0  ;;  %v1700_v34 = vpop.f32.mrb[8].mxu1 }
 0x10a   : > { %1573 = vst [vmem:[%s1906_s13 + $0x18] sm:$0xff] %v1429_v29   ;;  %1589 = vst [vmem:[%s1906_s13 + $0x98] sm:$0xff] %v1509_v30   ;;  %v577_v35 = vadd.f32 %v1668_v33, %v1891_v40  ;;  %v705_v36 = vadd.f32 %v1700_v34, %v1891_v40  ;;  %v568_v37 = vpop.f32.mrb[9].mxu0  ;;  %v696_v38 = vpop.f32.mrb[9].mxu1 }
 0x10b   : > { %1572 = vst [vmem:[%s1906_s13 + $0x10] sm:$0xff] %v1424_v31   ;;  %1588 = vst [vmem:[%s1906_s13 + $0x90] sm:$0xff] %v1504_v32   ;;  %v569_v39 = vadd.f32 %v1891_v40, %v568_v37  ;;  %v697_v41 = vadd.f32 %v1891_v40, %v696_v38  ;;  %v1669_v42 = vpop.f32.mrb[10].mxu0  ;;  %v1701_v43 = vpop.f32.mrb[10].mxu1 }
 0x10c   : > { %v580_v44 = vadd.f32 %v1669_v42, %v1891_v40  ;;  %v708_v45 = vadd.f32 %v1701_v43, %v1891_v40  ;;  %v571_v46 = vpop.f32.mrb[11].mxu0  ;;  %v699_v47 = vpop.f32.mrb[11].mxu1  ;;  %v801_v50 = vmax.f32 %v577_v35, 0.0  ;;  %v833_v51 = vmax.f32 %v705_v36, 0.0 }
 0x10d   : > { %v572_v48 = vadd.f32 %v1891_v40, %v571_v46  ;;  %v700_v49 = vadd.f32 %v1891_v40, %v699_v47  ;;  %v799_v54 = vmax.f32 %v569_v39, 0.0  ;;  %v831_v55 = vmax.f32 %v697_v41, 0.0 }
 0x10e   : > { %v802_v52 = vmax.f32 %v580_v44, 0.0  ;;  %v834_v53 = vmax.f32 %v708_v45, 0.0 }
 0x10f   : > { %v800_v56 = vmax.f32 %v572_v48, 0.0  ;;  %v832_v57 = vmax.f32 %v700_v49, 0.0 }
 0x110   : > { %v1439_v58 = vpack.c.bf16 %v802_v52, %v801_v50  ;;  %v1519_v59 = vpack.c.bf16 %v834_v53, %v833_v51 }
 0x111   : > { %v1434_v60 = vpack.c.bf16 %v800_v56, %v799_v54  ;;  %v1514_v61 = vpack.c.bf16 %v832_v57, %v831_v55  ;;  %v1672_v62 = vpop.f32.mrb[12].mxu0  ;;  %v1704_v63 = vpop.f32.mrb[12].mxu1 }
 0x112   : > { %1575 = vst [vmem:[%s1906_s13 + $0x28] sm:$0xff] %v1439_v58   ;;  %1591 = vst [vmem:[%s1906_s13 + $0xa8] sm:$0xff] %v1519_v59   ;;  %v593_v0 = vadd.f32 %v1672_v62, %v1891_v40  ;;  %v721_v1 = vadd.f32 %v1704_v63, %v1891_v40  ;;  %v584_v2 = vpop.f32.mrb[13].mxu0  ;;  %v712_v3 = vpop.f32.mrb[13].mxu1 }
 0x113   : > { %1574 = vst [vmem:[%s1906_s13 + $0x20] sm:$0xff] %v1434_v60   ;;  %1590 = vst [vmem:[%s1906_s13 + $0xa0] sm:$0xff] %v1514_v61   ;;  %v585_v4 = vadd.f32 %v1891_v40, %v584_v2  ;;  %v713_v5 = vadd.f32 %v1891_v40, %v712_v3  ;;  %v1673_v6 = vpop.f32.mrb[14].mxu0  ;;  %v1705_v7 = vpop.f32.mrb[14].mxu1 }
 0x114   : > { %v596_v8 = vadd.f32 %v1673_v6, %v1891_v40  ;;  %v724_v9 = vadd.f32 %v1705_v7, %v1891_v40  ;;  %v587_v10 = vpop.f32.mrb[15].mxu0  ;;  %v715_v11 = vpop.f32.mrb[15].mxu1  ;;  %v805_v14 = vmax.f32 %v593_v0, 0.0  ;;  %v837_v15 = vmax.f32 %v721_v1, 0.0 }
 0x115   : > { %v588_v12 = vadd.f32 %v1891_v40, %v587_v10  ;;  %v716_v13 = vadd.f32 %v1891_v40, %v715_v11  ;;  %v803_v18 = vmax.f32 %v585_v4, 0.0  ;;  %v835_v19 = vmax.f32 %v713_v5, 0.0 }
 0x116   : > { %v806_v16 = vmax.f32 %v596_v8, 0.0  ;;  %v838_v17 = vmax.f32 %v724_v9, 0.0 }
 0x117   : > { %v804_v20 = vmax.f32 %v588_v12, 0.0  ;;  %v836_v21 = vmax.f32 %v716_v13, 0.0 }
 0x118   : > { %v1449_v22 = vpack.c.bf16 %v806_v16, %v805_v14  ;;  %v1529_v23 = vpack.c.bf16 %v838_v17, %v837_v15 }
 0x119   : > { %v1444_v24 = vpack.c.bf16 %v804_v20, %v803_v18  ;;  %v1524_v25 = vpack.c.bf16 %v836_v21, %v835_v19  ;;  %v1676_v26 = vpop.f32.mrb[16].mxu0  ;;  %v1708_v27 = vpop.f32.mrb[16].mxu1 }
 0x11a   : > { %1577 = vst [vmem:[%s1906_s13 + $0x38] sm:$0xff] %v1449_v22   ;;  %1593 = vst [vmem:[%s1906_s13 + $0xb8] sm:$0xff] %v1529_v23   ;;  %v609_v28 = vadd.f32 %v1676_v26, %v1891_v40  ;;  %v737_v29 = vadd.f32 %v1708_v27, %v1891_v40  ;;  %v600_v30 = vpop.f32.mrb[17].mxu0  ;;  %v728_v31 = vpop.f32.mrb[17].mxu1 }
 0x11b   : > { %1576 = vst [vmem:[%s1906_s13 + $0x30] sm:$0xff] %v1444_v24   ;;  %1592 = vst [vmem:[%s1906_s13 + $0xb0] sm:$0xff] %v1524_v25   ;;  %v601_v32 = vadd.f32 %v1891_v40, %v600_v30  ;;  %v729_v33 = vadd.f32 %v1891_v40, %v728_v31  ;;  %v1677_v34 = vpop.f32.mrb[18].mxu0  ;;  %v1709_v35 = vpop.f32.mrb[18].mxu1 }
 0x11c   : > { %v612_v36 = vadd.f32 %v1677_v34, %v1891_v40  ;;  %v740_v37 = vadd.f32 %v1709_v35, %v1891_v40  ;;  %v603_v38 = vpop.f32.mrb[19].mxu0  ;;  %v731_v39 = vpop.f32.mrb[19].mxu1  ;;  %v809_v43 = vmax.f32 %v609_v28, 0.0  ;;  %v841_v44 = vmax.f32 %v737_v29, 0.0 }
 0x11d   : > { %v604_v41 = vadd.f32 %v1891_v40, %v603_v38  ;;  %v732_v42 = vadd.f32 %v1891_v40, %v731_v39  ;;  %v807_v47 = vmax.f32 %v601_v32, 0.0  ;;  %v839_v48 = vmax.f32 %v729_v33, 0.0 }
 0x11e   : > { %v810_v45 = vmax.f32 %v612_v36, 0.0  ;;  %v842_v46 = vmax.f32 %v740_v37, 0.0 }
 0x11f   : > { %v808_v49 = vmax.f32 %v604_v41, 0.0  ;;  %v840_v50 = vmax.f32 %v732_v42, 0.0 }
 0x120   : > { %v1459_v51 = vpack.c.bf16 %v810_v45, %v809_v43  ;;  %v1539_v52 = vpack.c.bf16 %v842_v46, %v841_v44 }
 0x121   : > { %v1454_v53 = vpack.c.bf16 %v808_v49, %v807_v47  ;;  %v1534_v54 = vpack.c.bf16 %v840_v50, %v839_v48  ;;  %v1680_v55 = vpop.f32.mrb[20].mxu0  ;;  %v1712_v56 = vpop.f32.mrb[20].mxu1 }
 0x122   : > { %1579 = vst [vmem:[%s1906_s13 + $0x48] sm:$0xff] %v1459_v51   ;;  %1595 = vst [vmem:[%s1906_s13 + $0xc8] sm:$0xff] %v1539_v52   ;;  %v625_v57 = vadd.f32 %v1680_v55, %v1891_v40  ;;  %v753_v58 = vadd.f32 %v1712_v56, %v1891_v40  ;;  %v616_v59 = vpop.f32.mrb[21].mxu0  ;;  %v744_v60 = vpop.f32.mrb[21].mxu1 }
 0x123   : > { %1578 = vst [vmem:[%s1906_s13 + $0x40] sm:$0xff] %v1454_v53   ;;  %1594 = vst [vmem:[%s1906_s13 + $0xc0] sm:$0xff] %v1534_v54   ;;  %v617_v61 = vadd.f32 %v1891_v40, %v616_v59  ;;  %v745_v62 = vadd.f32 %v1891_v40, %v744_v60  ;;  %v1681_v63 = vpop.f32.mrb[22].mxu0  ;;  %v1713_v0 = vpop.f32.mrb[22].mxu1 }
 0x124   : > { %v628_v1 = vadd.f32 %v1681_v63, %v1891_v40  ;;  %v756_v2 = vadd.f32 %v1713_v0, %v1891_v40  ;;  %v619_v3 = vpop.f32.mrb[23].mxu0  ;;  %v747_v4 = vpop.f32.mrb[23].mxu1  ;;  %v813_v7 = vmax.f32 %v625_v57, 0.0  ;;  %v845_v8 = vmax.f32 %v753_v58, 0.0 }
 0x125   : > { %v620_v5 = vadd.f32 %v1891_v40, %v619_v3  ;;  %v748_v6 = vadd.f32 %v1891_v40, %v747_v4  ;;  %v811_v11 = vmax.f32 %v617_v61, 0.0  ;;  %v843_v12 = vmax.f32 %v745_v62, 0.0 }
 0x126   : > { %v814_v9 = vmax.f32 %v628_v1, 0.0  ;;  %v846_v10 = vmax.f32 %v756_v2, 0.0 }
 0x127   : > { %v812_v13 = vmax.f32 %v620_v5, 0.0  ;;  %v844_v14 = vmax.f32 %v748_v6, 0.0 }
 0x128   : > { %v1469_v15 = vpack.c.bf16 %v814_v9, %v813_v7  ;;  %v1549_v16 = vpack.c.bf16 %v846_v10, %v845_v8 }
 0x129   : > { %v1464_v17 = vpack.c.bf16 %v812_v13, %v811_v11  ;;  %v1544_v18 = vpack.c.bf16 %v844_v14, %v843_v12  ;;  %v1684_v19 = vpop.f32.mrb[24].mxu0  ;;  %v1716_v20 = vpop.f32.mrb[24].mxu1 }
 0x12a   : > { %1581 = vst [vmem:[%s1906_s13 + $0x58] sm:$0xff] %v1469_v15   ;;  %1597 = vst [vmem:[%s1906_s13 + $0xd8] sm:$0xff] %v1549_v16   ;;  %v641_v21 = vadd.f32 %v1684_v19, %v1891_v40  ;;  %v769_v22 = vadd.f32 %v1716_v20, %v1891_v40  ;;  %v632_v23 = vpop.f32.mrb[25].mxu0  ;;  %v760_v24 = vpop.f32.mrb[25].mxu1 }
 0x12b   : > { %1580 = vst [vmem:[%s1906_s13 + $0x50] sm:$0xff] %v1464_v17   ;;  %1596 = vst [vmem:[%s1906_s13 + $0xd0] sm:$0xff] %v1544_v18   ;;  %v633_v25 = vadd.f32 %v1891_v40, %v632_v23  ;;  %v761_v26 = vadd.f32 %v1891_v40, %v760_v24  ;;  %v1685_v27 = vpop.f32.mrb[26].mxu0  ;;  %v1717_v28 = vpop.f32.mrb[26].mxu1 }
 0x12c   : > { %v644_v29 = vadd.f32 %v1685_v27, %v1891_v40  ;;  %v772_v30 = vadd.f32 %v1717_v28, %v1891_v40  ;;  %v635_v31 = vpop.f32.mrb[27].mxu0  ;;  %v763_v32 = vpop.f32.mrb[27].mxu1  ;;  %v817_v35 = vmax.f32 %v641_v21, 0.0  ;;  %v849_v36 = vmax.f32 %v769_v22, 0.0 }
 0x12d   : > { %v636_v33 = vadd.f32 %v1891_v40, %v635_v31  ;;  %v764_v34 = vadd.f32 %v1891_v40, %v763_v32  ;;  %v815_v39 = vmax.f32 %v633_v25, 0.0  ;;  %v847_v41 = vmax.f32 %v761_v26, 0.0 }
 0x12e   : > { %v818_v37 = vmax.f32 %v644_v29, 0.0  ;;  %v850_v38 = vmax.f32 %v772_v30, 0.0 }
 0x12f   : > { %v816_v42 = vmax.f32 %v636_v33, 0.0  ;;  %v848_v43 = vmax.f32 %v764_v34, 0.0 }
 0x130   : > { %v1479_v44 = vpack.c.bf16 %v818_v37, %v817_v35  ;;  %v1559_v45 = vpack.c.bf16 %v850_v38, %v849_v36 }
 0x131   : > { %v1474_v46 = vpack.c.bf16 %v816_v42, %v815_v39  ;;  %v1554_v47 = vpack.c.bf16 %v848_v43, %v847_v41  ;;  %v1688_v48 = vpop.f32.mrb[28].mxu0  ;;  %v1720_v49 = vpop.f32.mrb[28].mxu1 }
 0x132   : > { %1583 = vst [vmem:[%s1906_s13 + $0x68] sm:$0xff] %v1479_v44   ;;  %1599 = vst [vmem:[%s1906_s13 + $0xe8] sm:$0xff] %v1559_v45   ;;  %v657_v50 = vadd.f32 %v1688_v48, %v1891_v40  ;;  %v785_v51 = vadd.f32 %v1720_v49, %v1891_v40  ;;  %v648_v52 = vpop.f32.mrb[29].mxu0  ;;  %v776_v53 = vpop.f32.mrb[29].mxu1 }
 0x133   : > { %1582 = vst [vmem:[%s1906_s13 + $0x60] sm:$0xff] %v1474_v46   ;;  %1598 = vst [vmem:[%s1906_s13 + $0xe0] sm:$0xff] %v1554_v47   ;;  %v649_v54 = vadd.f32 %v1891_v40, %v648_v52  ;;  %v777_v55 = vadd.f32 %v1891_v40, %v776_v53  ;;  %v1689_v56 = vpop.f32.mrb[30].mxu0  ;;  %v1721_v57 = vpop.f32.mrb[30].mxu1 }
 0x134   : > { %v660_v58 = vadd.f32 %v1689_v56, %v1891_v40  ;;  %v788_v59 = vadd.f32 %v1721_v57, %v1891_v40  ;;  %v651_v60 = vpop.f32.mrb[31].mxu0  ;;  %v779_v61 = vpop.f32.mrb[31].mxu1  ;;  %v821_v0 = vmax.f32 %v657_v50, 0.0  ;;  %v853_v1 = vmax.f32 %v785_v51, 0.0 }
 0x135   : > { %v652_v62 = vadd.f32 %v1891_v40, %v651_v60  ;;  %v780_v63 = vadd.f32 %v1891_v40, %v779_v61  ;;  %v819_v4 = vmax.f32 %v649_v54, 0.0  ;;  %v851_v5 = vmax.f32 %v777_v55, 0.0 }
 0x136   : > { %v822_v2 = vmax.f32 %v660_v58, 0.0  ;;  %v854_v3 = vmax.f32 %v788_v59, 0.0 }
 0x137   : > { %v820_v6 = vmax.f32 %v652_v62, 0.0  ;;  %v852_v7 = vmax.f32 %v780_v63, 0.0 }
 0x138   : > { %v1489_v8 = vpack.c.bf16 %v822_v2, %v821_v0  ;;  %v1569_v9 = vpack.c.bf16 %v854_v3, %v853_v1 }
 0x139   : > { %v1484_v10 = vpack.c.bf16 %v820_v6, %v819_v4  ;;  %v1564_v11 = vpack.c.bf16 %v852_v7, %v851_v5 }
 0x13a   : > { %1585 = vst [vmem:[%s1906_s13 + $0x78] sm:$0xff] %v1489_v8   ;;  %1601 = vst [vmem:[%s1906_s13 + $0xf8] sm:$0xff] %v1569_v9  }
 0x13b   : > { %1584 = vst [vmem:[%s1906_s13 + $0x70] sm:$0xff] %v1484_v10   ;;  %1600 = vst [vmem:[%s1906_s13 + $0xf0] sm:$0xff] %v1564_v11  }
 0x13c PF: > { %s13_s12 = sadd.s32 1, %s1792_s12  }
 0x13d   : > { %p10_p4 = scmp.ge.s32.totalorder %s13_s12, 5  }
 0x13f   :  { %12 = sbr.rel (!%p10_p4) target bundleno = 1 (0x1), region = 62 }

// kernel: forward.15
= control target key start
LH: loop header
LB: loop body
LE: loop exit
PB: predicated region body
PF: predicated region fallthrough
CT: control target
= control target key end

     0   :  { %s5827_s12 = smov 0   ;;  %s6309_s0 = inlined_call_operand.vmem [shape: bf16[6,3,18,16,128], index: 0, kind: input, shape index: {}]   ;;  %s6310_s1 = inlined_call_operand.vmem [shape: bf16[9,128,128], index: 1, kind: input, shape index: {}]   ;;  %s6311_s2 = inlined_call_operand.vmem [shape: f32[1,128], index: 2, kind: input, shape index: {}]   ;;  %s6312_s3 = inlined_call_operand.vmem [shape: bf16[6,16,16,128], index: 3, kind: output, shape index: {}]  }
   0x1 LB: > { %s3875_s13 = sadd.s32 4294967295, %s5805_s12   ;;  %p3879_p0 = scmp.ge.s32.totalorder %s5805_s12, 1  ;;  %s5805_s12 = sphi %s5827_s12, %s13_s12  }
   0x2   : > { %p137_p1 = scmp.lt.s32.totalorder %s5805_s12, 7 }
   0x4   : > { %p138_p2 = pnand %p3879_p0, %p137_p1 }
   0x5   : > { %v5575_v0 = vld [vmem:[%s6310_s1 + $0x40] sm:$0xff] (!%p138_p2)   ;;  %p161_p3 = scmp.lt.s32.totalorder (!%p138_p2), %s3875_s13, 5  ;;  %v5577_v2 = vld [vmem:[%s6310_s1 + $0x48] sm:$0xff] (!%p138_p2)   ;;  %v5579_v4 = vld [vmem:[%s6310_s1 + $0x50] sm:$0xff] (!%p138_p2)  }
   0x6   : > { %141 = sbr.rel (%p138_p2) target bundleno = 543 (0x21f), region = 32  ;;  %v5576_v1 = vld [vmem:[%s6310_s1 + $0x100] sm:$0xff] (!%p138_p2)   ;;  %4862 = vmatprep.subr.bf16.mxu1 (!%p138_p2), %v5575_v0  ;;  %v5578_v3 = vld [vmem:[%s6310_s1 + $0x108] sm:$0xff] (!%p138_p2)   ;;  %v5580_v5 = vld [vmem:[%s6310_s1 + $0x110] sm:$0xff] (!%p138_p2)  }
   0x7   : > { %5054 = vmatprep.subr.bf16.mxu0 (!%p138_p2), %v5576_v1  ;;  %4863 = vmatpush3.bf16.msra.mxu1 (!%p138_p2), %v5575_v0  ;;  %v5581_v6 = vld [vmem:[%s6310_s1 + $0x58] sm:$0xff] (!%p138_p2)   ;;  %v5583_v8 = vld [vmem:[%s6310_s1 + $0x60] sm:$0xff] (!%p138_p2)   ;;  %v5585_v10 = vld [vmem:[%s6310_s1 + $0x68] sm:$0xff] (!%p138_p2)  }
   0x8   : > { %5055 = vmatpush3.bf16.msra.mxu0 (!%p138_p2), %v5576_v1  ;;  %4864 = vmatprep.subr.bf16.mxu1 (!%p138_p2), %v5577_v2  ;;  %v5582_v7 = vld [vmem:[%s6310_s1 + $0x118] sm:$0xff] (!%p138_p2)   ;;  %v5584_v9 = vld [vmem:[%s6310_s1 + $0x120] sm:$0xff] (!%p138_p2)   ;;  %v5586_v11 = vld [vmem:[%s6310_s1 + $0x128] sm:$0xff] (!%p138_p2)  }
   0x9   : > { %5056 = vmatprep.subr.bf16.mxu0 (!%p138_p2), %v5578_v3  ;;  %v5587_v14 = vld [vmem:[%s6310_s1 + $0x70] sm:$0xff] (!%p138_p2)   ;;  %v5589_v16 = vld [vmem:[%s6310_s1 + $0x78] sm:$0xff] (!%p138_p2)   ;;  %v5594_v19 = vld [vmem:[%s6310_s1] sm:$0xff] (!%p138_p2)  }
   0xa   : > { %v5588_v15 = vld [vmem:[%s6310_s1 + $0x130] sm:$0xff] (!%p138_p2)   ;;  %v5590_v17 = vld [vmem:[%s6310_s1 + $0x138] sm:$0xff] (!%p138_p2)   ;;  %v5596_v20 = vld [vmem:[%s6310_s1 + $0x140] sm:$0xff] (!%p138_p2)  }
   0xb   : > { %4865 = vmatpush3.bf16.msra.mxu1 (!%p138_p2), %v5577_v2  ;;  %v5597_v22 = vld [vmem:[%s6310_s1 + $0x148] sm:$0xff] (!%p138_p2)   ;;  %v5608_v27 = vld [vmem:[%s6310_s1 + $0x10] sm:$0xff] (!%p138_p2)   ;;  %v5604_v32 = vld [vmem:[%s6310_s1 + $0x158] sm:$0xff] (!%p138_p2)  }
   0xc   : > { %5057 = vmatpush3.bf16.msra.mxu0 (!%p138_p2), %v5578_v3  ;;  %4866 = vmatprep.subr.bf16.mxu1 (!%p138_p2), %v5579_v4  ;;  %v5601_v25 = vld [vmem:[%s6310_s1 + $0x8] sm:$0xff] (!%p138_p2)   ;;  %v5603_v28 = vld [vmem:[%s6310_s1 + $0x150] sm:$0xff] (!%p138_p2)   ;;  %v5615_v33 = vld [vmem:[%s6310_s1 + $0x18] sm:$0xff] (!%p138_p2)  }
   0xd   : > { %s6314_s13 = smov (!%p161_p3, %s3875_s13), 5  ;;  %5058 = vmatprep.subr.bf16.mxu0 %v5580_v5  ;;  %v5610_v36 = vld [vmem:[%s6310_s1 + $0x160] sm:$0xff]   ;;  %v5611_v40 = vld [vmem:[%s6310_s1 + $0x168] sm:$0xff]   ;;  %v5617_v42 = vld [vmem:[%s6310_s1 + $0x170] sm:$0xff]  }
   0xe   : > { %s5566_s30 = smul.u32 432, %s6314_s13  ;;  %v5622_v38 = vld [vmem:[%s6310_s1 + $0x20] sm:$0xff]   ;;  %v5628_v43 = vld [vmem:[%s6310_s1 + $0x28] sm:$0xff]   ;;  %v5618_v47 = vld [vmem:[%s6310_s1 + $0x178] sm:$0xff]   ;;  %s4518_s7 = sshll.u32 %s6314_s13, 7 }
   0xf   : > { %4867 = vmatpush3.bf16.msra.mxu1 %v5579_v4  ;;  %v5634_v48 = vld [vmem:[%s6310_s1 + $0x30] sm:$0xff]   ;;  %v5624_v51 = vld [vmem:[%s6310_s1 + $0x180] sm:$0xff]   ;;  %v5630_v54 = vld [vmem:[%s6310_s1 + $0x188] sm:$0xff]   ;;  %s6256_s11 = scalar_lea.vmem %s6312_s3, %s4518_s7 }
  0x10   : > { %5059 = vmatpush3.bf16.msra.mxu0 %v5580_v5  ;;  %4868 = vmatprep.subr.bf16.mxu1 %v5581_v6  ;;  %s5871_s10 = scalar_lea.vmem %s6309_s0, %s5566_s30  ;;  %v5640_v55 = vld [vmem:[%s6310_s1 + $0x38] sm:$0xff]   ;;  %v5636_v58 = vld [vmem:[%s6310_s1 + $0x190] sm:$0xff]   ;;  %v5646_v60 = vld [vmem:[%s6310_s1 + $0x80] sm:$0xff]  }
  0x11   : > { %5060 = vmatprep.subr.bf16.mxu0 %v5582_v7  ;;  %v5591_v12 = vld [vmem:[%s5871_s10 + $0x90] sm:$0xff]   ;;  %v5592_v13 = vld [vmem:[%s5871_s10 + $0x98] sm:$0xff]   ;;  %v5595_v21 = vld [vmem:[%s5871_s10 + $0xa0] sm:$0xff]  }
  0x12   : > { %4878 = vmatprep.mubr.bf16.mxu1 %v5591_v12  ;;  %5070 = vmatprep.mubr.bf16.mxu0 %v5592_v13  ;;  %v5593_v18 = vld [vmem:[%s5871_s10 + $0x98] sm:$0xff]   ;;  %v5598_v23 = vld [vmem:[%s5871_s10 + $0xa0] sm:$0xff]   ;;  %v5599_v24 = vld [vmem:[%s5871_s10 + $0xa8] sm:$0xff]  }
  0x13   : > { %4869 = vmatpush3.bf16.msra.mxu1 %v5581_v6  ;;  %v5600_v26 = vld [vmem:[%s5871_s10 + $0xa8] sm:$0xff]   ;;  %v5602_v29 = vld [vmem:[%s5871_s10 + $0xb0] sm:$0xff]   ;;  %v5606_v31 = vld [vmem:[%s5871_s10 + $0xb8] sm:$0xff]  }
  0x14   : > { %5061 = vmatpush3.bf16.msra.mxu0 %v5582_v7  ;;  %4870 = vmatprep.subr.bf16.mxu1 %v5583_v8  ;;  %v5605_v30 = vld [vmem:[%s5871_s10 + $0xb0] sm:$0xff]   ;;  %v5607_v34 = vld [vmem:[%s5871_s10 + $0xb8] sm:$0xff]   ;;  %v5609_v35 = vld [vmem:[%s5871_s10 + $0xc0] sm:$0xff]  }
  0x15   : > { %5062 = vmatprep.subr.bf16.mxu0 %v5584_v9  ;;  %v5612_v37 = vld [vmem:[%s5871_s10 + $0xc0] sm:$0xff]   ;;  %v5613_v39 = vld [vmem:[%s5871_s10 + $0xc8] sm:$0xff]   ;;  %v5616_v44 = vld [vmem:[%s5871_s10 + $0xd0] sm:$0xff]  }
  0x16   : > { %v5614_v41 = vld [vmem:[%s5871_s10 + $0xc8] sm:$0xff]   ;;  %v5619_v45 = vld [vmem:[%s5871_s10 + $0xd0] sm:$0xff]   ;;  %v5621_v49 = vld [vmem:[%s5871_s10 + $0xd8] sm:$0xff]  }
  0x17   : > { %4871 = vmatpush3.bf16.msra.mxu1 %v5583_v8  ;;  %v5620_v46 = vld [vmem:[%s5871_s10 + $0x128] sm:$0xff]   ;;  %v5623_v50 = vld [vmem:[%s5871_s10 + $0x130] sm:$0xff]   ;;  %v5625_v52 = vld [vmem:[%s5871_s10 + $0xe0] sm:$0xff]  }
  0x18   : > { %5063 = vmatpush3.bf16.msra.mxu0 %v5584_v9  ;;  %4872 = vmatprep.subr.bf16.mxu1 %v5585_v10  ;;  %v5626_v53 = vld [vmem:[%s5871_s10 + $0x138] sm:$0xff]   ;;  %v5627_v56 = vld [vmem:[%s5871_s10 + $0xe8] sm:$0xff]   ;;  %v5629_v57 = vld [vmem:[%s5871_s10 + $0x140] sm:$0xff]  }
  0x19   : > { %5064 = vmatprep.subr.bf16.mxu0 %v5586_v11  ;;  %v5631_v59 = vld [vmem:[%s5871_s10 + $0xf0] sm:$0xff]   ;;  %v5632_v61 = vld [vmem:[%s5871_s10 + $0x148] sm:$0xff]   ;;  %v5642_v62 = vld [vmem:[%s6310_s1 + $0x198] sm:$0xff]  }
  0x1a   : > { %v5633_v63 = vld [vmem:[%s5871_s10 + $0xf8] sm:$0xff]   ;;  %v5648_v0 = vld [vmem:[%s6310_s1 + $0x1a0] sm:$0xff]   ;;  %v5635_v1 = vld [vmem:[%s5871_s10 + $0x150] sm:$0xff]  }
  0x1b   : > { %4873 = vmatpush3.bf16.msra.mxu1 %v5585_v10  ;;  %v5637_v2 = vld [vmem:[%s5871_s10 + $0x100] sm:$0xff]   ;;  %v5638_v3 = vld [vmem:[%s5871_s10 + $0x158] sm:$0xff]   ;;  %v5654_v4 = vld [vmem:[%s6310_s1 + $0x1a8] sm:$0xff]  }
  0x1c   : > { %5065 = vmatpush3.bf16.msra.mxu0 %v5586_v11  ;;  %4874 = vmatprep.subr.bf16.mxu1 %v5587_v14  ;;  %v5639_v5 = vld [vmem:[%s5871_s10 + $0x108] sm:$0xff]   ;;  %v5660_v6 = vld [vmem:[%s6310_s1 + $0x1b0] sm:$0xff]   ;;  %v5641_v7 = vld [vmem:[%s5871_s10 + $0x160] sm:$0xff]  }
  0x1d   : > { %5066 = vmatprep.subr.bf16.mxu0 %v5588_v15  ;;  %v5643_v8 = vld [vmem:[%s5871_s10] sm:$0xff]   ;;  %v5644_v9 = vld [vmem:[%s5871_s10 + $0x168] sm:$0xff]   ;;  %v5666_v10 = vld [vmem:[%s6310_s1 + $0x1b8] sm:$0xff]  }
  0x1e   : > { %v5645_v11 = vld [vmem:[%s5871_s10 + $0x8] sm:$0xff]   ;;  %v5647_v12 = vld [vmem:[%s5871_s10 + $0x170] sm:$0xff]  }
  0x1f   : > { %4875 = vmatpush3.bf16.msra.mxu1 %v5587_v14  ;;  %v5649_v13 = vld [vmem:[%s5871_s10 + $0x10] sm:$0xff]   ;;  %v5650_v14 = vld [vmem:[%s5871_s10 + $0x178] sm:$0xff]  }
  0x20   : > { %5067 = vmatpush3.bf16.msra.mxu0 %v5588_v15  ;;  %4876 = vmatprep.subr.bf16.mxu1 %v5589_v16  ;;  %v5652_v15 = vld [vmem:[%s6310_s1 + $0x88] sm:$0xff]  }
  0x21   : > { %5068 = vmatprep.subr.bf16.mxu0 %v5590_v17 }
  0x23   : > { %4877 = vmatpush3.bf16.msra.mxu1 %v5589_v16  ;;  %v5672_v16 = vld [vmem:[%s6310_s1 + $0x1c0] sm:$0xff]  }
  0x24   : > { %5069 = vmatpush3.bf16.msra.mxu0 %v5590_v17  ;;  %4910 = vmatprep.subr.bf16.mxu1 %v5594_v19  ;;  %v5658_v17 = vld [vmem:[%s6310_s1 + $0x90] sm:$0xff]  }
  0x25   : > { %5102 = vmatprep.subr.bf16.mxu0 %v5596_v20 }
  0x26   : > { %4879 = vmatmul.mubr.bf16.vlgmr.msra.gmra.mrb[0].mxu1 %v5593_v18  ;;  %v5651_v18 = vld [vmem:[%s5871_s10 + $0x18] sm:$0xff]  }
  0x27   : > { %5071 = vmatmul.mubr.bf16.vlgmr.msra.gmra.mrb[0].mxu0 %v5595_v21  ;;  %4911 = vmatpush3.bf16.msra.mxu1 %v5594_v19  ;;  %v5653_v19 = vld [vmem:[%s5871_s10 + $0x180] sm:$0xff]   ;;  %v5656_v21 = vld [vmem:[%s5871_s10 + $0x188] sm:$0xff]  }
  0x28   : > { %5103 = vmatpush3.bf16.msra.mxu0 %v5596_v20  ;;  %4882 = vmatprep.mubr.bf16.mxu1 %v5598_v23  ;;  %v5655_v20 = vld [vmem:[%s5871_s10 + $0x20] sm:$0xff]   ;;  %v5657_v23 = vld [vmem:[%s5871_s10 + $0x28] sm:$0xff]  }
  0x29   : > { %5104 = vmatprep.subr.bf16.mxu0 %v5597_v22  ;;  %5074 = vmatprep.mubr.bf16.mxu0 %v5599_v24  ;;  %v5670_v24 = vld [vmem:[%s6310_s1 + $0xa0] sm:$0xff]  }
  0x2a   : > { %4912 = vmatprep.subr.bf16.mxu1 %v5601_v25 }
  0x2b   : > { %4913 = vmatpush3.bf16.msra.mxu1 %v5601_v25  ;;  %v5659_v25 = vld [vmem:[%s5871_s10 + $0x190] sm:$0xff]  }
  0x2c   : > { %5105 = vmatpush3.bf16.msra.mxu0 %v5597_v22  ;;  %4914 = vmatprep.subr.bf16.mxu1 %v5608_v27  ;;  %v5664_v22 = vld [vmem:[%s6310_s1 + $0x98] sm:$0xff]  }
  0x2d   : > { %5106 = vmatprep.subr.bf16.mxu0 %v5603_v28 }
  0x2e   : > { %4883 = vmatmul.mubr.bf16.gmra.mrb[4].mxu1 %v5600_v26  ;;  %v5661_v26 = vld [vmem:[%s5871_s10 + $0x30] sm:$0xff]  }
  0x2f   : > { %5075 = vmatmul.mubr.bf16.gmra.mrb[4].mxu0 %v5602_v29  ;;  %4886 = vmatprep.mubr.bf16.mxu1 %v5605_v30  ;;  %v5663_v29 = vld [vmem:[%s5871_s10 + $0x38] sm:$0xff]   ;;  %v5682_v30 = vld [vmem:[%s6310_s1 + $0xb0] sm:$0xff]  }
  0x30   : > { %5107 = vmatpush3.bf16.msra.mxu0 %v5603_v28  ;;  %5078 = vmatprep.mubr.bf16.mxu0 %v5606_v31  ;;  %v5676_v28 = vld [vmem:[%s6310_s1 + $0xa8] sm:$0xff]   ;;  %v5665_v31 = vld [vmem:[%s5871_s10 + $0x1a0] sm:$0xff]  }
  0x31   : > { %5108 = vmatprep.subr.bf16.mxu0 %v5604_v32  ;;  %4915 = vmatpush3.bf16.msra.mxu1 %v5608_v27  ;;  %v5662_v27 = vld [vmem:[%s5871_s10 + $0x198] sm:$0xff]  }
  0x32   : > { %4916 = vmatprep.subr.bf16.mxu1 %v5615_v33 }
  0x34   : > { %5109 = vmatpush3.bf16.msra.mxu0 %v5604_v32  ;;  %v5667_v32 = vld [vmem:[%s5871_s10 + $0x40] sm:$0xff]  }
  0x35   : > { %5110 = vmatprep.subr.bf16.mxu0 %v5610_v36  ;;  %4917 = vmatpush3.bf16.msra.mxu1 %v5615_v33  ;;  %v5668_v33 = vld [vmem:[%s5871_s10 + $0x10] sm:$0xff]  }
  0x36   : > { %4887 = vmatmul.mubr.bf16.gmra.mrb[8].mxu1 %v5607_v34  ;;  %4918 = vmatprep.subr.bf16.mxu1 %v5622_v38  ;;  %v5688_v34 = vld [vmem:[%s6310_s1 + $0xb8] sm:$0xff]  }
  0x37   : > { %5079 = vmatmul.mubr.bf16.gmra.mrb[8].mxu0 %v5609_v35  ;;  %4890 = vmatprep.mubr.bf16.mxu1 %v5612_v37  ;;  %v5669_v35 = vld [vmem:[%s5871_s10 + $0x48] sm:$0xff]   ;;  %v5671_v37 = vld [vmem:[%s5871_s10 + $0x18] sm:$0xff]  }
  0x38   : > { %5111 = vmatpush3.bf16.msra.mxu0 %v5610_v36  ;;  %5082 = vmatprep.mubr.bf16.mxu0 %v5613_v39  ;;  %v6044_v36 = vld [vmem:[%s6310_s1 + $0xc0] sm:$0xff]  }
  0x39   : > { %5112 = vmatprep.subr.bf16.mxu0 %v5611_v40  ;;  %4919 = vmatpush3.bf16.msra.mxu1 %v5622_v38  ;;  %v5673_v38 = vld [vmem:[%s5871_s10 + $0x50] sm:$0xff]   ;;  %v5674_v39 = vld [vmem:[%s5871_s10 + $0x20] sm:$0xff]  }
  0x3a   : > { %4920 = vmatprep.subr.bf16.mxu1 %v5628_v43 }
  0x3c   : > { %5113 = vmatpush3.bf16.msra.mxu0 %v5611_v40  ;;  %v5678_v40 = vld [vmem:[%s6310_s1 + $0x1c8] sm:$0xff]  }
  0x3d   : > { %5114 = vmatprep.subr.bf16.mxu0 %v5617_v42  ;;  %4921 = vmatpush3.bf16.msra.mxu1 %v5628_v43  ;;  %v5677_v43 = vld [vmem:[%s5871_s10 + $0x28] sm:$0xff]  }
  0x3e   : > { %4891 = vmatmul.mubr.bf16.gmra.mrb[12].mxu1 %v5614_v41  ;;  %4922 = vmatprep.subr.bf16.mxu1 %v5634_v48  ;;  %v5675_v41 = vld [vmem:[%s5871_s10 + $0x58] sm:$0xff]  }
  0x3f   : > { %5083 = vmatmul.mubr.bf16.gmra.mrb[12].mxu0 %v5616_v44  ;;  %4894 = vmatprep.mubr.bf16.mxu1 %v5619_v45  ;;  %v5679_v44 = vld [vmem:[%s5871_s10 + $0x60] sm:$0xff]   ;;  %v5680_v45 = vld [vmem:[%s5871_s10 + $0x30] sm:$0xff]  }
  0x40   : > { %5115 = vmatpush3.bf16.msra.mxu0 %v5617_v42  ;;  %5118 = vmatprep.mubr.bf16.mxu0 %v5620_v46  ;;  %v5684_v42 = vld [vmem:[%s6310_s1 + $0x1d0] sm:$0xff]   ;;  %v5690_v46 = vld [vmem:[%s6310_s1 + $0x1d8] sm:$0xff]  }
  0x41   : > { %5116 = vmatprep.subr.bf16.mxu0 %v5618_v47  ;;  %4923 = vmatpush3.bf16.msra.mxu1 %v5634_v48  ;;  %v5696_v48 = vld [vmem:[%s6310_s1 + $0x1e0] sm:$0xff]  }
  0x42   : > { %4924 = vmatprep.subr.bf16.mxu1 %v5640_v55 }
  0x44   : > { %5117 = vmatpush3.bf16.msra.mxu0 %v5618_v47  ;;  %v5681_v47 = vld [vmem:[%s5871_s10 + $0x68] sm:$0xff]  }
  0x45   : > { %5150 = vmatprep.subr.bf16.mxu0 %v5624_v51  ;;  %4925 = vmatpush3.bf16.msra.mxu1 %v5640_v55  ;;  %v5689_v55 = vld [vmem:[%s5871_s10 + $0x48] sm:$0xff]  }
  0x46   : > { %4895 = vmatmul.mubr.bf16.gmra.mrb[16].mxu1 %v5621_v49  ;;  %4958 = vmatprep.subr.bf16.mxu1 %v5646_v60  ;;  %v5683_v49 = vld [vmem:[%s5871_s10 + $0x38] sm:$0xff]  }
  0x47   : > { %5119 = vmatmul.mubr.bf16.vlgmr.msra.gmra.mrb[0].mxu0 %v5623_v50  ;;  %4898 = vmatprep.mubr.bf16.mxu1 %v5625_v52  ;;  %v5685_v50 = vld [vmem:[%s5871_s10 + $0x70] sm:$0xff]   ;;  %v5702_v52 = vld [vmem:[%s6310_s1 + $0x1e8] sm:$0xff]  }
  0x48   : > { %5151 = vmatpush3.bf16.msra.mxu0 %v5624_v51  ;;  %5122 = vmatprep.mubr.bf16.mxu0 %v5626_v53  ;;  %v5686_v51 = vld [vmem:[%s5871_s10 + $0x40] sm:$0xff]   ;;  %v5687_v53 = vld [vmem:[%s5871_s10 + $0x78] sm:$0xff]  }
  0x49   : > { %5152 = vmatprep.subr.bf16.mxu0 %v5630_v54 }
  0x4c   : > { %5153 = vmatpush3.bf16.msra.mxu0 %v5630_v54  ;;  %v5708_v54 = vld [vmem:[%s6310_s1 + $0x1f0] sm:$0xff]  }
  0x4d   : > { %5154 = vmatprep.subr.bf16.mxu0 %v5636_v58 }
  0x4e   : > { %4899 = vmatmul.mubr.bf16.gmra.mrb[20].mxu1 %v5627_v56  ;;  %v5691_v56 = vld [vmem:[%s5871_s10 + $0x120] sm:$0xff]  }
  0x4f   : > { %5123 = vmatmul.mubr.bf16.gmra.mrb[4].mxu0 %v5629_v57  ;;  %4902 = vmatprep.mubr.bf16.mxu1 %v5631_v59  ;;  %v5692_v57 = vld [vmem:[%s5871_s10 + $0x50] sm:$0xff]   ;;  %v5693_v59 = vld [vmem:[%s5871_s10 + $0x128] sm:$0xff]  }
  0x50   : > { %5126 = vmatprep.mubr.bf16.mxu0 %v5632_v61  ;;  %5155 = vmatpush3.bf16.msra.mxu0 %v5636_v58  ;;  %v5714_v58 = vld [vmem:[%s6310_s1 + $0x1f8] sm:$0xff]  }
  0x51   : > { %5156 = vmatprep.subr.bf16.mxu0 %v5642_v62  ;;  %v5695_v61 = vld [vmem:[%s5871_s10 + $0x58] sm:$0xff]  }
  0x54   : > { %5157 = vmatpush3.bf16.msra.mxu0 %v5642_v62  ;;  %v5697_v62 = vld [vmem:[%s5871_s10 + $0x130] sm:$0xff]  }
  0x55   : > { %5158 = vmatprep.subr.bf16.mxu0 %v5648_v0 }
  0x56   : > { %4903 = vmatmul.mubr.bf16.gmra.mrb[24].mxu1 %v5633_v63  ;;  %v5698_v63 = vld [vmem:[%s5871_s10 + $0x60] sm:$0xff]  }
  0x57   : > { %5127 = vmatmul.mubr.bf16.gmra.mrb[8].mxu0 %v5635_v1  ;;  %4906 = vmatprep.mubr.bf16.mxu1 %v5637_v2  ;;  %v5706_v1 = vld [vmem:[%s6310_s1 + $0xd0] sm:$0xff]   ;;  %v5699_v2 = vld [vmem:[%s5871_s10 + $0x138] sm:$0xff]  }
  0x58   : > { %5130 = vmatprep.mubr.bf16.mxu0 %v5638_v3  ;;  %5159 = vmatpush3.bf16.msra.mxu0 %v5648_v0  ;;  %v5700_v0 = vld [vmem:[%s6310_s1 + $0xc8] sm:$0xff]  }
  0x59   : > { %5160 = vmatprep.subr.bf16.mxu0 %v5654_v4  ;;  %v5701_v3 = vld [vmem:[%s5871_s10 + $0x68] sm:$0xff]  }
  0x5c   : > { %5161 = vmatpush3.bf16.msra.mxu0 %v5654_v4  ;;  %v5703_v4 = vld [vmem:[%s5871_s10 + $0x140] sm:$0xff]  }
  0x5d   : > { %5162 = vmatprep.subr.bf16.mxu0 %v5660_v6 }
  0x5e   : > { %4907 = vmatmul.mubr.bf16.gmra.mrb[28].mxu1 %v5639_v5  ;;  %v5704_v5 = vld [vmem:[%s5871_s10 + $0x70] sm:$0xff]  }
  0x5f   : > { %5131 = vmatmul.mubr.bf16.gmra.mrb[12].mxu0 %v5641_v7  ;;  %4926 = vmatprep.mubr.bf16.mxu1 %v5643_v8  ;;  %v5705_v7 = vld [vmem:[%s5871_s10 + $0x148] sm:$0xff]   ;;  %v5718_v8 = vld [vmem:[%s6310_s1 + $0xe0] sm:$0xff]  }
  0x60   : > { %5134 = vmatprep.mubr.bf16.mxu0 %v5644_v9  ;;  %5163 = vmatpush3.bf16.msra.mxu0 %v5660_v6  ;;  %v5712_v6 = vld [vmem:[%s6310_s1 + $0xd8] sm:$0xff]  }
  0x61   : > { %5164 = vmatprep.subr.bf16.mxu0 %v5666_v10  ;;  %v5707_v9 = vld [vmem:[%s5871_s10 + $0x78] sm:$0xff]  }
  0x64   : > { %5165 = vmatpush3.bf16.msra.mxu0 %v5666_v10  ;;  %v5709_v10 = vld [vmem:[%s5871_s10 + $0x150] sm:$0xff]  }
  0x65   : > { %5198 = vmatprep.subr.bf16.mxu0 %v5672_v16 }
  0x66   : > { %4927 = vmatmul.mubr.bf16.vlgmr.msra.gmra.mrb[0].mxu1 %v5645_v11  ;;  %v5710_v11 = vld [vmem:[%s5871_s10 + $0x80] sm:$0xff]  }
  0x67   : > { %5135 = vmatmul.mubr.bf16.gmra.mrb[16].mxu0 %v5647_v12  ;;  %4959 = vmatpush3.bf16.msra.mxu1 %v5646_v60  ;;  %v6087_v60 = vld [vmem:[%s6310_s1 + $0x200] sm:$0xff]   ;;  %v5724_v12 = vld [vmem:[%s6310_s1 + $0xe8] sm:$0xff]  }
  0x68   : > { %4930 = vmatprep.mubr.bf16.mxu1 %v5649_v13  ;;  %5138 = vmatprep.mubr.bf16.mxu0 %v5650_v14  ;;  %v5711_v13 = vld [vmem:[%s5871_s10 + $0x158] sm:$0xff]   ;;  %v5730_v14 = vld [vmem:[%s6310_s1 + $0xf0] sm:$0xff]  }
  0x69   : > { %4960 = vmatprep.subr.bf16.mxu1 %v5652_v15 }
  0x6b   : > { %4961 = vmatpush3.bf16.msra.mxu1 %v5652_v15  ;;  %v5713_v15 = vld [vmem:[%s5871_s10 + $0x88] sm:$0xff]  }
  0x6c   : > { %4962 = vmatprep.subr.bf16.mxu1 %v5658_v17 }
  0x6e   : > { %4931 = vmatmul.mubr.bf16.gmra.mrb[4].mxu1 %v5651_v18  ;;  %v5736_v18 = vld [vmem:[%s6310_s1 + $0xf8] sm:$0xff]  }
  0x6f   : > { %5139 = vmatmul.mubr.bf16.gmra.mrb[20].mxu0 %v5653_v19  ;;  %4934 = vmatprep.mubr.bf16.mxu1 %v5655_v20  ;;  %v5717_v19 = vld [vmem:[%s5871_s10 + $0x168] sm:$0xff]  }
  0x70   : > { %5142 = vmatprep.mubr.bf16.mxu0 %v5656_v21  ;;  %4963 = vmatpush3.bf16.msra.mxu1 %v5658_v17  ;;  %v5716_v17 = vld [vmem:[%s5871_s10 + $0xa0] sm:$0xff]   ;;  %v5719_v20 = vld [vmem:[%s5871_s10 + $0xa8] sm:$0xff]   ;;  %v5721_v21 = vld [vmem:[%s5871_s10 + $0x170] sm:$0xff]  }
  0x71   : > { %4964 = vmatprep.subr.bf16.mxu1 %v5664_v22 }
  0x74   : > { %4965 = vmatpush3.bf16.msra.mxu1 %v5664_v22  ;;  %v5722_v22 = vld [vmem:[%s5871_s10 + $0xb0] sm:$0xff]  }
  0x75   : > { %4966 = vmatprep.subr.bf16.mxu1 %v5670_v24 }
  0x76   : > { %4935 = vmatmul.mubr.bf16.gmra.mrb[8].mxu1 %v5657_v23  ;;  %v5726_v23 = vld [vmem:[%s6310_s1 + $0x208] sm:$0xff]  }
  0x77   : > { %5143 = vmatmul.mubr.bf16.gmra.mrb[24].mxu0 %v5659_v25  ;;  %4938 = vmatprep.mubr.bf16.mxu1 %v5661_v26  ;;  %v5723_v25 = vld [vmem:[%s5871_s10 + $0x178] sm:$0xff]   ;;  %v5732_v26 = vld [vmem:[%s6310_s1 + $0x210] sm:$0xff]  }
  0x78   : > { %5146 = vmatprep.mubr.bf16.mxu0 %v5662_v27  ;;  %4967 = vmatpush3.bf16.msra.mxu1 %v5670_v24  ;;  %v5791_v24 = vld [vmem:[%s6310_s1 + $0x100] sm:$0xff]   ;;  %v5725_v27 = vld [vmem:[%s5871_s10 + $0xb8] sm:$0xff]  }
  0x79   : > { %4968 = vmatprep.subr.bf16.mxu1 %v5676_v28 }
  0x7c   : > { %4969 = vmatpush3.bf16.msra.mxu1 %v5676_v28  ;;  %v5727_v28 = vld [vmem:[%s5871_s10 + $0x180] sm:$0xff]  }
  0x7d   : > { %4970 = vmatprep.subr.bf16.mxu1 %v5682_v30 }
  0x7e   : > { %4939 = vmatmul.mubr.bf16.gmra.mrb[12].mxu1 %v5663_v29  ;;  %v5728_v29 = vld [vmem:[%s5871_s10 + $0xc0] sm:$0xff]  }
  0x7f   : > { %5147 = vmatmul.mubr.bf16.gmra.mrb[28].mxu0 %v5665_v31  ;;  %4942 = vmatprep.mubr.bf16.mxu1 %v5667_v32  ;;  %v5729_v31 = vld [vmem:[%s5871_s10 + $0x188] sm:$0xff]   ;;  %v5743_v32 = vld [vmem:[%s6310_s1 + $0x220] sm:$0xff]  }
  0x80   : > { %5166 = vmatprep.mubr.bf16.mxu0 %v5668_v33  ;;  %4971 = vmatpush3.bf16.msra.mxu1 %v5682_v30  ;;  %v5738_v30 = vld [vmem:[%s6310_s1 + $0x218] sm:$0xff]   ;;  %v5731_v33 = vld [vmem:[%s5871_s10 + $0xc8] sm:$0xff]  }
  0x81   : > { %4972 = vmatprep.subr.bf16.mxu1 %v5688_v34 }
  0x84   : > { %4973 = vmatpush3.bf16.msra.mxu1 %v5688_v34  ;;  %v5733_v34 = vld [vmem:[%s5871_s10 + $0x190] sm:$0xff]  }
  0x85   : > { %5006 = vmatprep.subr.bf16.mxu1 %v6044_v36 }
  0x86   : > { %4943 = vmatmul.mubr.bf16.gmra.mrb[16].mxu1 %v5669_v35  ;;  %v5734_v35 = vld [vmem:[%s5871_s10 + $0xd0] sm:$0xff]  }
  0x87   : > { %5167 = vmatmul.mubr.bf16.vlgmr.msra.gmra.mrb[0].mxu0 %v5671_v37  ;;  %4946 = vmatprep.mubr.bf16.mxu1 %v5673_v38  ;;  %v5735_v37 = vld [vmem:[%s5871_s10 + $0x198] sm:$0xff]   ;;  %v5753_v38 = vld [vmem:[%s6310_s1 + $0x230] sm:$0xff]  }
  0x88   : > { %5199 = vmatpush3.bf16.msra.mxu0 %v5672_v16  ;;  %5170 = vmatprep.mubr.bf16.mxu0 %v5674_v39  ;;  %v5715_v16 = vld [vmem:[%s5871_s10 + $0x160] sm:$0xff]   ;;  %v5737_v39 = vld [vmem:[%s5871_s10 + $0xd8] sm:$0xff]  }
  0x89   : > { %5200 = vmatprep.subr.bf16.mxu0 %v5678_v40 }
  0x8c   : > { %5201 = vmatpush3.bf16.msra.mxu0 %v5678_v40  ;;  %v5739_v40 = vld [vmem:[%s5871_s10 + $0x8] sm:$0xff]  }
  0x8d   : > { %5202 = vmatprep.subr.bf16.mxu0 %v5684_v42 }
  0x8e   : > { %4947 = vmatmul.mubr.bf16.gmra.mrb[20].mxu1 %v5675_v41  ;;  %v5740_v41 = vld [vmem:[%s5871_s10 + $0xe0] sm:$0xff]  }
  0x8f   : > { %5171 = vmatmul.mubr.bf16.gmra.mrb[4].mxu0 %v5677_v43  ;;  %4950 = vmatprep.mubr.bf16.mxu1 %v5679_v44  ;;  %v5741_v43 = vld [vmem:[%s5871_s10 + $0x10] sm:$0xff]   ;;  %v5742_v44 = vld [vmem:[%s5871_s10 + $0xe8] sm:$0xff]  }
  0x90   : > { %5174 = vmatprep.mubr.bf16.mxu0 %v5680_v45  ;;  %5203 = vmatpush3.bf16.msra.mxu0 %v5684_v42  ;;  %v5758_v42 = vld [vmem:[%s6310_s1 + $0x238] sm:$0xff]  }
  0x91   : > { %5204 = vmatprep.subr.bf16.mxu0 %v5690_v46  ;;  %v5744_v45 = vld [vmem:[%s5871_s10 + $0x18] sm:$0xff]  }
  0x94   : > { %5205 = vmatpush3.bf16.msra.mxu0 %v5690_v46  ;;  %v5745_v46 = vld [vmem:[%s5871_s10 + $0xf0] sm:$0xff]  }
  0x95   : > { %5206 = vmatprep.subr.bf16.mxu0 %v5696_v48 }
  0x96   : > { %4951 = vmatmul.mubr.bf16.gmra.mrb[24].mxu1 %v5681_v47  ;;  %v5792_v47 = vld [vmem:[%s6310_s1 + $0x108] sm:$0xff]  }
  0x97   : > { %5175 = vmatmul.mubr.bf16.gmra.mrb[8].mxu0 %v5683_v49  ;;  %4954 = vmatprep.mubr.bf16.mxu1 %v5685_v50  ;;  %v5747_v49 = vld [vmem:[%s5871_s10 + $0xf8] sm:$0xff]   ;;  %v5749_v50 = vld [vmem:[%s5871_s10 + $0x28] sm:$0xff]  }
  0x98   : > { %5178 = vmatprep.mubr.bf16.mxu0 %v5686_v51  ;;  %5207 = vmatpush3.bf16.msra.mxu0 %v5696_v48  ;;  %v5746_v48 = vld [vmem:[%s5871_s10 + $0x20] sm:$0xff]  }
  0x99   : > { %5208 = vmatprep.subr.bf16.mxu0 %v5702_v52  ;;  %v5750_v51 = vld [vmem:[%s5871_s10 + $0x100] sm:$0xff]  }
  0x9c   : > { %5209 = vmatpush3.bf16.msra.mxu0 %v5702_v52  ;;  %v5793_v52 = vld [vmem:[%s6310_s1 + $0x110] sm:$0xff]  }
  0x9d   : > { %5210 = vmatprep.subr.bf16.mxu0 %v5708_v54 }
  0x9e   : > { %4955 = vmatmul.mubr.bf16.gmra.mrb[28].mxu1 %v5687_v53  ;;  %v5794_v53 = vld [vmem:[%s6310_s1 + $0x118] sm:$0xff]  }
  0x9f   : > { %5179 = vmatmul.mubr.bf16.gmra.mrb[12].mxu0 %v5689_v55  ;;  %4974 = vmatprep.mubr.bf16.mxu1 %v5691_v56  ;;  %v5752_v55 = vld [vmem:[%s5871_s10 + $0x108] sm:$0xff]   ;;  %v5754_v56 = vld [vmem:[%s5871_s10 + $0x38] sm:$0xff]  }
  0xa0   : > { %5182 = vmatprep.mubr.bf16.mxu0 %v5692_v57  ;;  %5211 = vmatpush3.bf16.msra.mxu0 %v5708_v54  ;;  %v5751_v54 = vld [vmem:[%s5871_s10 + $0x30] sm:$0xff]  }
  0xa1   : > { %5212 = vmatprep.subr.bf16.mxu0 %v5714_v58  ;;  %v5755_v57 = vld [vmem:[%s5871_s10 + $0x110] sm:$0xff]  }
  0xa4   : > { %5213 = vmatpush3.bf16.msra.mxu0 %v5714_v58  ;;  %v5795_v58 = vld [vmem:[%s6310_s1 + $0x120] sm:$0xff]  }
  0xa5   : > { %5246 = vmatprep.subr.bf16.mxu0 %v6087_v60 }
  0xa6   : > { %4975 = vmatmul.mubr.bf16.vlgmr.msra.gmra.mrb[0].mxu1 %v5693_v59  ;;  %v5796_v59 = vld [vmem:[%s6310_s1 + $0x128] sm:$0xff]  }
  0xa7   : > { %5183 = vmatmul.mubr.bf16.gmra.mrb[16].mxu0 %v5695_v61  ;;  %5007 = vmatpush3.bf16.msra.mxu1 %v6044_v36  ;;  %v5748_v36 = vld [vmem:[%s6310_s1 + $0x228] sm:$0xff]   ;;  %v5757_v61 = vld [vmem:[%s5871_s10 + $0x118] sm:$0xff]  }
  0xa8   : > { %4978 = vmatprep.mubr.bf16.mxu1 %v5697_v62  ;;  %5186 = vmatprep.mubr.bf16.mxu0 %v5698_v63  ;;  %v5759_v62 = vld [vmem:[%s5871_s10 + $0x48] sm:$0xff]   ;;  %v5760_v63 = vld [vmem:[%s5871_s10 + $0x130] sm:$0xff]  }
  0xa9   : > { %5008 = vmatprep.subr.bf16.mxu1 %v5700_v0 }
  0xab   : > { %5009 = vmatpush3.bf16.msra.mxu1 %v5700_v0  ;;  %v5797_v0 = vld [vmem:[%s6310_s1 + $0x130] sm:$0xff]  }
  0xac   : > { %5010 = vmatprep.subr.bf16.mxu1 %v5706_v1 }
  0xae   : > { %4979 = vmatmul.mubr.bf16.gmra.mrb[4].mxu1 %v5699_v2  ;;  %v5761_v2 = vld [vmem:[%s5871_s10 + $0x50] sm:$0xff]  }
  0xaf   : > { %5187 = vmatmul.mubr.bf16.gmra.mrb[20].mxu0 %v5701_v3  ;;  %4982 = vmatprep.mubr.bf16.mxu1 %v5703_v4  ;;  %v5762_v3 = vld [vmem:[%s5871_s10 + $0x138] sm:$0xff]  }
  0xb0   : > { %5190 = vmatprep.mubr.bf16.mxu0 %v5704_v5  ;;  %5011 = vmatpush3.bf16.msra.mxu1 %v5706_v1  ;;  %v5798_v1 = vld [vmem:[%s6310_s1 + $0x138] sm:$0xff]   ;;  %v5764_v5 = vld [vmem:[%s5871_s10 + $0x140] sm:$0xff]  }
  0xb1   : > { %5012 = vmatprep.subr.bf16.mxu1 %v5712_v6  ;;  %v5763_v4 = vld [vmem:[%s5871_s10 + $0x58] sm:$0xff]  }
  0xb4   : > { %5013 = vmatpush3.bf16.msra.mxu1 %v5712_v6  ;;  %v5765_v6 = vld [vmem:[%s5871_s10 + $0x60] sm:$0xff]  }
  0xb5   : > { %5014 = vmatprep.subr.bf16.mxu1 %v5718_v8 }
  0xb6   : > { %4983 = vmatmul.mubr.bf16.gmra.mrb[8].mxu1 %v5705_v7  ;;  %v5766_v7 = vld [vmem:[%s5871_s10 + $0x148] sm:$0xff]  }
  0xb7   : > { %5191 = vmatmul.mubr.bf16.gmra.mrb[24].mxu0 %v5707_v9  ;;  %4986 = vmatprep.mubr.bf16.mxu1 %v5709_v10  ;;  %v5768_v9 = vld [vmem:[%s5871_s10 + $0x150] sm:$0xff]  }
  0xb8   : > { %5194 = vmatprep.mubr.bf16.mxu0 %v5710_v11  ;;  %5015 = vmatpush3.bf16.msra.mxu1 %v5718_v8  ;;  %v5767_v8 = vld [vmem:[%s5871_s10 + $0x68] sm:$0xff]   ;;  %v5769_v10 = vld [vmem:[%s5871_s10 + $0x70] sm:$0xff]   ;;  %v5770_v11 = vld [vmem:[%s5871_s10 + $0x158] sm:$0xff]  }
  0xb9   : > { %5016 = vmatprep.subr.bf16.mxu1 %v5724_v12 }
  0xbc   : > { %5017 = vmatpush3.bf16.msra.mxu1 %v5724_v12  ;;  %v5771_v12 = vld [vmem:[%s5871_s10 + $0x78] sm:$0xff]  }
  0xbd   : > { %5018 = vmatprep.subr.bf16.mxu1 %v5730_v14 }
  0xbe   : > { %4987 = vmatmul.mubr.bf16.gmra.mrb[12].mxu1 %v5711_v13  ;;  %v5772_v13 = vld [vmem:[%s5871_s10 + $0x160] sm:$0xff]  }
  0xbf   : > { %5195 = vmatmul.mubr.bf16.gmra.mrb[28].mxu0 %v5713_v15  ;;  %4990 = vmatprep.mubr.bf16.mxu1 %v5715_v16  ;;  %v5774_v15 = vld [vmem:[%s5871_s10 + $0x168] sm:$0xff]   ;;  %v5775_v16 = vld [vmem:[%s5871_s10 + $0xd8] sm:$0xff]  }
  0xc0   : > { %5214 = vmatprep.mubr.bf16.mxu0 %v5716_v17  ;;  %5019 = vmatpush3.bf16.msra.mxu1 %v5730_v14  ;;  %v5773_v14 = vld [vmem:[%s5871_s10 + $0x80] sm:$0xff]   ;;  %v5776_v17 = vld [vmem:[%s5871_s10 + $0x170] sm:$0xff]  }
  0xc1   : > { %5020 = vmatprep.subr.bf16.mxu1 %v5736_v18 }
  0xc4   : > { %5021 = vmatpush3.bf16.msra.mxu1 %v5736_v18  ;;  %v5777_v18 = vld [vmem:[%s5871_s10 + $0xe0] sm:$0xff]  }
  0xc5   : > { %5294 = vmatprep.subr.bf16.mxu1 %v5791_v24 }
  0xc6   : > { %4991 = vmatmul.mubr.bf16.gmra.mrb[16].mxu1 %v5717_v19  ;;  %v5778_v19 = vld [vmem:[%s5871_s10 + $0x178] sm:$0xff]  }
  0xc7   : > { %5215 = vmatmul.mubr.bf16.vlgmr.msra.gmra.mrb[0].mxu0 %v5719_v20  ;;  %4994 = vmatprep.mubr.bf16.mxu1 %v5721_v21  ;;  %v5779_v20 = vld [vmem:[%s5871_s10 + $0xe8] sm:$0xff]   ;;  %v5780_v21 = vld [vmem:[%s5871_s10 + $0x180] sm:$0xff]  }
  0xc8   : > { %5247 = vmatpush3.bf16.msra.mxu0 %v6087_v60  ;;  %5218 = vmatprep.mubr.bf16.mxu0 %v5722_v22  ;;  %v5756_v60 = vld [vmem:[%s5871_s10 + $0x40] sm:$0xff]   ;;  %v5781_v22 = vld [vmem:[%s5871_s10 + $0xf0] sm:$0xff]  }
  0xc9   : > { %5248 = vmatprep.subr.bf16.mxu0 %v5726_v23 }
  0xcc   : > { %5249 = vmatpush3.bf16.msra.mxu0 %v5726_v23  ;;  %v5782_v23 = vld [vmem:[%s5871_s10 + $0x188] sm:$0xff]  }
  0xcd   : > { %5250 = vmatprep.subr.bf16.mxu0 %v5732_v26 }
  0xce   : > { %4995 = vmatmul.mubr.bf16.gmra.mrb[20].mxu1 %v5723_v25  ;;  %v5784_v25 = vld [vmem:[%s5871_s10 + $0x190] sm:$0xff]  }
  0xcf   : > { %5219 = vmatmul.mubr.bf16.gmra.mrb[4].mxu0 %v5725_v27  ;;  %4998 = vmatprep.mubr.bf16.mxu1 %v5727_v28  ;;  %v5786_v27 = vld [vmem:[%s5871_s10 + $0x198] sm:$0xff]   ;;  %v5787_v28 = vld [vmem:[%s5871_s10 + $0x108] sm:$0xff]  }
  0xd0   : > { %5222 = vmatprep.mubr.bf16.mxu0 %v5728_v29  ;;  %5251 = vmatpush3.bf16.msra.mxu0 %v5732_v26  ;;  %v5785_v26 = vld [vmem:[%s5871_s10 + $0x100] sm:$0xff]  }
  0xd1   : > { %5252 = vmatprep.subr.bf16.mxu0 %v5738_v30  ;;  %v5788_v29 = vld [vmem:[%s5871_s10 + $0x1a0] sm:$0xff]  }
  0xd4   : > { %5253 = vmatpush3.bf16.msra.mxu0 %v5738_v30  ;;  %v5789_v30 = vld [vmem:[%s5871_s10 + $0x110] sm:$0xff]  }
  0xd5   : > { %5254 = vmatprep.subr.bf16.mxu0 %v5743_v32 }
  0xd6   : > { %4999 = vmatmul.mubr.bf16.gmra.mrb[24].mxu1 %v5729_v31  ;;  %v5790_v31 = vld [vmem:[%s5871_s10 + $0x1a8] sm:$0xff]  }
  0xd7   : > { %5223 = vmatmul.mubr.bf16.gmra.mrb[8].mxu0 %v5731_v33  ;;  %5002 = vmatprep.mubr.bf16.mxu1 %v5733_v34 }
  0xd8   : > { %5226 = vmatprep.mubr.bf16.mxu0 %v5734_v35  ;;  %5255 = vmatpush3.bf16.msra.mxu0 %v5743_v32 }
  0xd9   : > { %5256 = vmatprep.subr.bf16.mxu0 %v5748_v36 }
  0xdc   : > { %5257 = vmatpush3.bf16.msra.mxu0 %v5748_v36 }
  0xdd   : > { %5258 = vmatprep.subr.bf16.mxu0 %v5753_v38 }
  0xde   : > { %5003 = vmatmul.mubr.bf16.gmra.mrb[28].mxu1 %v5735_v37 }
  0xdf   : > { %5227 = vmatmul.mubr.bf16.gmra.mrb[12].mxu0 %v5737_v39  ;;  %5022 = vmatprep.mubr.bf16.mxu1 %v5739_v40 }
  0xe0   : > { %5230 = vmatprep.mubr.bf16.mxu0 %v5740_v41  ;;  %5259 = vmatpush3.bf16.msra.mxu0 %v5753_v38 }
  0xe1   : > { %5260 = vmatprep.subr.bf16.mxu0 %v5758_v42 }
  0xe4   : > { %5261 = vmatpush3.bf16.msra.mxu0 %v5758_v42 }
  0xe6   : > { %5023 = vmatmul.mubr.bf16.vlgmr.msra.gmra.mrb[0].mxu1 %v5741_v43 }
  0xe7   : > { %5231 = vmatmul.mubr.bf16.gmra.mrb[16].mxu0 %v5742_v44  ;;  %5302 = vmatpush3.bf16.msra.mxu1 %v5791_v24  ;;  %v5783_v24 = vld [vmem:[%s5871_s10 + $0xf8] sm:$0xff]  }
  0xe8   : > { %5026 = vmatprep.mubr.bf16.mxu1 %v5744_v45  ;;  %5234 = vmatprep.mubr.bf16.mxu0 %v5745_v46 }
  0xe9   : > { %5295 = vmatprep.subr.bf16.mxu1 %v5792_v47 }
  0xeb   : > { %5303 = vmatpush3.bf16.msra.mxu1 %v5792_v47 }
  0xec   : > { %5296 = vmatprep.subr.bf16.mxu1 %v5793_v52 }
  0xee   : > { %5027 = vmatmul.mubr.bf16.gmra.mrb[4].mxu1 %v5746_v48 }
  0xef   : > { %5235 = vmatmul.mubr.bf16.gmra.mrb[20].mxu0 %v5747_v49  ;;  %5030 = vmatprep.mubr.bf16.mxu1 %v5749_v50  ;;  %v6246_v49 = vld [vmem:[%s6311_s2] ss:$0 sm:$0xff] }
  0xf0   : > { %5238 = vmatprep.mubr.bf16.mxu0 %v5750_v51  ;;  %5304 = vmatpush3.bf16.msra.mxu1 %v5793_v52 }
  0xf1   : > { %5297 = vmatprep.subr.bf16.mxu1 %v5794_v53 }
  0xf4   : > { %5305 = vmatpush3.bf16.msra.mxu1 %v5794_v53 }
  0xf5   : > { %5298 = vmatprep.subr.bf16.mxu1 %v5795_v58 }
  0xf6   : > { %5031 = vmatmul.mubr.bf16.gmra.mrb[8].mxu1 %v5751_v54 }
  0xf7   : > { %5239 = vmatmul.mubr.bf16.gmra.mrb[24].mxu0 %v5752_v55  ;;  %5034 = vmatprep.mubr.bf16.mxu1 %v5754_v56 }
  0xf8   : > { %5242 = vmatprep.mubr.bf16.mxu0 %v5755_v57  ;;  %5306 = vmatpush3.bf16.msra.mxu1 %v5795_v58 }
  0xf9   : > { %5299 = vmatprep.subr.bf16.mxu1 %v5796_v59 }
  0xfc   : > { %5307 = vmatpush3.bf16.msra.mxu1 %v5796_v59 }
  0xfd   : > { %5300 = vmatprep.subr.bf16.mxu1 %v5797_v0 }
  0xfe   : > { %5035 = vmatmul.mubr.bf16.gmra.mrb[12].mxu1 %v5756_v60 }
  0xff   : > { %5243 = vmatmul.mubr.bf16.gmra.mrb[28].mxu0 %v5757_v61  ;;  %5038 = vmatprep.mubr.bf16.mxu1 %v5759_v62 }
 0x100   : > { %5262 = vmatprep.mubr.bf16.mxu0 %v5760_v63  ;;  %5308 = vmatpush3.bf16.msra.mxu1 %v5797_v0 }
 0x101   : > { %5301 = vmatprep.subr.bf16.mxu1 %v5798_v1 }
 0x104   : > { %5309 = vmatpush3.bf16.msra.mxu1 %v5798_v1 }
 0x106   : > { %5039 = vmatmul.mubr.bf16.gmra.mrb[16].mxu1 %v5761_v2 }
 0x107   : > { %5263 = vmatmul.mubr.bf16.vlgmr.msra.gmra.mrb[0].mxu0 %v5762_v3  ;;  %5042 = vmatprep.mubr.bf16.mxu1 %v5763_v4 }
 0x108   : > { %5266 = vmatprep.mubr.bf16.mxu0 %v5764_v5 }
 0x10e   : > { %5043 = vmatmul.mubr.bf16.gmra.mrb[20].mxu1 %v5765_v6 }
 0x10f   : > { %5267 = vmatmul.mubr.bf16.gmra.mrb[4].mxu0 %v5766_v7  ;;  %5046 = vmatprep.mubr.bf16.mxu1 %v5767_v8 }
 0x110   : > { %5270 = vmatprep.mubr.bf16.mxu0 %v5768_v9 }
 0x116   : > { %5047 = vmatmul.mubr.bf16.gmra.mrb[24].mxu1 %v5769_v10 }
 0x117   : > { %5271 = vmatmul.mubr.bf16.gmra.mrb[8].mxu0 %v5770_v11  ;;  %5050 = vmatprep.mubr.bf16.mxu1 %v5771_v12 }
 0x118   : > { %5274 = vmatprep.mubr.bf16.mxu0 %v5772_v13 }
 0x11e   : > { %5051 = vmatmul.mubr.bf16.gmra.mrb[28].mxu1 %v5773_v14 }
 0x11f   : > { %5275 = vmatmul.mubr.bf16.gmra.mrb[12].mxu0 %v5774_v15  ;;  %5086 = vmatprep.mubr.bf16.mxu1 %v5775_v16 }
 0x120   : > { %5278 = vmatprep.mubr.bf16.mxu0 %v5776_v17 }
 0x126   : > { %5087 = vmatmul.mubr.bf16.vlgmr.msra.gmra.mrb[16].mxu1 %v5777_v18 }
 0x127   : > { %5279 = vmatmul.mubr.bf16.gmra.mrb[16].mxu0 %v5778_v19  ;;  %5090 = vmatprep.mubr.bf16.mxu1 %v5779_v20 }
 0x128   : > { %5282 = vmatprep.mubr.bf16.mxu0 %v5780_v21 }
 0x12e   : > { %5091 = vmatmul.mubr.bf16.gmra.mrb[20].mxu1 %v5781_v22 }
 0x12f   : > { %5283 = vmatmul.mubr.bf16.gmra.mrb[20].mxu0 %v5782_v23  ;;  %5094 = vmatprep.mubr.bf16.mxu1 %v5783_v24 }
 0x130   : > { %5286 = vmatprep.mubr.bf16.mxu0 %v5784_v25 }
 0x136   : > { %5095 = vmatmul.mubr.bf16.gmra.mrb[24].mxu1 %v5785_v26 }
 0x137   : > { %5287 = vmatmul.mubr.bf16.gmra.mrb[24].mxu0 %v5786_v27  ;;  %5098 = vmatprep.mubr.bf16.mxu1 %v5787_v28 }
 0x138   : > { %5290 = vmatprep.mubr.bf16.mxu0 %v5788_v29 }
 0x13e   : > { %5099 = vmatmul.mubr.bf16.gmra.mrb[28].mxu1 %v5789_v30 }
 0x13f   : > { %5291 = vmatmul.mubr.bf16.gmra.mrb[28].mxu0 %v5790_v31 }
 0x1b9   : > { %v5024_v32 = vpop.f32.mrb[0].mxu1 }
 0x1ba   : > { %v1495_v33 = vpop.f32.mrb[1].mxu1 }
 0x1bb   : > { %v5025_v34 = vpop.f32.mrb[2].mxu1 }
 0x1bc   : > { %v1498_v35 = vpop.f32.mrb[3].mxu1 }
 0x1c1   : > { %v5028_v36 = vpop.f32.mrb[4].mxu1 }
 0x1c2   : > { %v1511_v37 = vpop.f32.mrb[5].mxu1 }
 0x1c3   : > { %v5029_v38 = vpop.f32.mrb[6].mxu1 }
 0x1c4   : > { %v1514_v39 = vpop.f32.mrb[7].mxu1 }
 0x1c9   : > { %v5032_v40 = vpop.f32.mrb[8].mxu1 }
 0x1ca   : > { %v1527_v41 = vpop.f32.mrb[9].mxu1 }
 0x1cb   : > { %v5033_v42 = vpop.f32.mrb[10].mxu1 }
 0x1cc   : > { %v1530_v43 = vpop.f32.mrb[11].mxu1 }
 0x1d1   : > { %v6235_v44 = vpop.f32.mrb[12].mxu1 }
 0x1d2   : > { %v6237_v45 = vpop.f32.mrb[13].mxu1 }
 0x1d3   : > { %v6239_v46 = vpop.f32.mrb[14].mxu1 }
 0x1d4   : > { %v6241_v47 = vpop.f32.mrb[15].mxu1 }
 0x1da   : > { %v5264_v48 = vpop.f32.mrb[0].mxu0 }
 0x1db   : > { %v5310_v50 = vadd.f32 %v5264_v48, %v5024_v32  ;;  %v3430_v51 = vpop.f32.mrb[1].mxu0 }
 0x1dc   : > { %v5311_v52 = vadd.f32 %v3430_v51, %v1495_v33  ;;  %v5265_v53 = vpop.f32.mrb[2].mxu0 }
 0x1dd   : > { %v3598_v54 = vadd.f32 %v5310_v50, %v6246_v49  ;;  %v5312_v55 = vadd.f32 %v5265_v53, %v5025_v34  ;;  %v3433_v56 = vpop.f32.mrb[3].mxu0 }
 0x1de   : > { %v3596_v57 = vadd.f32 %v5311_v52, %v6246_v49  ;;  %v5313_v58 = vadd.f32 %v3433_v56, %v1498_v35 }
 0x1df   : > { %v3599_v59 = vadd.f32 %v5312_v55, %v6246_v49  ;;  %v3630_v61 = vmax.f32 %v3598_v54, 0.0 }
 0x1e0   : > { %v3597_v60 = vadd.f32 %v5313_v58, %v6246_v49  ;;  %v3628_v63 = vmax.f32 %v3596_v57, 0.0 }
 0x1e1   : > { %v3631_v62 = vmax.f32 %v3599_v59, 0.0 }
 0x1e2   : > { %v3629_v0 = vmax.f32 %v3597_v60, 0.0  ;;  %v5268_v1 = vpop.f32.mrb[4].mxu0 }
 0x1e3   : > { %v4559_v2 = vpack.c.bf16 %v3631_v62, %v3630_v61  ;;  %v5314_v3 = vadd.f32 %v5268_v1, %v5028_v36  ;;  %v3446_v4 = vpop.f32.mrb[5].mxu0 }
 0x1e4   : > { %v4554_v5 = vpack.c.bf16 %v3629_v0, %v3628_v63  ;;  %v5315_v6 = vadd.f32 %v3446_v4, %v1511_v37  ;;  %v5269_v7 = vpop.f32.mrb[6].mxu0 }
 0x1e5   : > { %4631 = vst [vmem:[%s6256_s11 + $0x8] sm:$0xff] %v4559_v2   ;;  %v3602_v8 = vadd.f32 %v5314_v3, %v6246_v49  ;;  %v5316_v9 = vadd.f32 %v5269_v7, %v5029_v38  ;;  %v3449_v10 = vpop.f32.mrb[7].mxu0 }
 0x1e6   : > { %4555 = vst [vmem:[%s6256_s11] sm:$0xff] %v4554_v5   ;;  %v3600_v11 = vadd.f32 %v5315_v6, %v6246_v49  ;;  %v5317_v12 = vadd.f32 %v3449_v10, %v1514_v39 }
 0x1e7   : > { %v3603_v13 = vadd.f32 %v5316_v9, %v6246_v49  ;;  %v3634_v15 = vmax.f32 %v3602_v8, 0.0 }
 0x1e8   : > { %v3601_v14 = vadd.f32 %v5317_v12, %v6246_v49  ;;  %v3632_v17 = vmax.f32 %v3600_v11, 0.0 }
 0x1e9   : > { %v3635_v16 = vmax.f32 %v3603_v13, 0.0 }
 0x1ea   : > { %v3633_v18 = vmax.f32 %v3601_v14, 0.0  ;;  %v5272_v19 = vpop.f32.mrb[8].mxu0 }
 0x1eb   : > { %v4569_v20 = vpack.c.bf16 %v3635_v16, %v3634_v15  ;;  %v5318_v21 = vadd.f32 %v5272_v19, %v5032_v40  ;;  %v3462_v22 = vpop.f32.mrb[9].mxu0 }
 0x1ec   : > { %v4564_v23 = vpack.c.bf16 %v3633_v18, %v3632_v17  ;;  %v5319_v24 = vadd.f32 %v3462_v22, %v1527_v41  ;;  %v5273_v25 = vpop.f32.mrb[10].mxu0 }
 0x1ed   : > { %4633 = vst [vmem:[%s6256_s11 + $0x18] sm:$0xff] %v4569_v20   ;;  %v3606_v26 = vadd.f32 %v5318_v21, %v6246_v49  ;;  %v5320_v27 = vadd.f32 %v5273_v25, %v5033_v42  ;;  %v3465_v28 = vpop.f32.mrb[11].mxu0 }
 0x1ee   : > { %4632 = vst [vmem:[%s6256_s11 + $0x10] sm:$0xff] %v4564_v23   ;;  %v3604_v29 = vadd.f32 %v5319_v24, %v6246_v49  ;;  %v5321_v30 = vadd.f32 %v3465_v28, %v1530_v43 }
 0x1ef   : > { %v3607_v31 = vadd.f32 %v5320_v27, %v6246_v49  ;;  %v3638_v33 = vmax.f32 %v3606_v26, 0.0 }
 0x1f0   : > { %v3605_v32 = vadd.f32 %v5321_v30, %v6246_v49  ;;  %v3636_v35 = vmax.f32 %v3604_v29, 0.0 }
 0x1f1   : > { %v3639_v34 = vmax.f32 %v3607_v31, 0.0 }
 0x1f2   : > { %v3637_v36 = vmax.f32 %v3605_v32, 0.0  ;;  %v5276_v37 = vpop.f32.mrb[12].mxu0 }
 0x1f3   : > { %v4579_v38 = vpack.c.bf16 %v3639_v34, %v3638_v33  ;;  %v5322_v39 = vadd.f32 %v5276_v37, %v6235_v44  ;;  %v3478_v40 = vpop.f32.mrb[13].mxu0 }
 0x1f4   : > { %v4574_v41 = vpack.c.bf16 %v3637_v36, %v3636_v35  ;;  %v5323_v42 = vadd.f32 %v3478_v40, %v6237_v45  ;;  %v5277_v48 = vpop.f32.mrb[14].mxu0 }
 0x1f5   : > { %4635 = vst [vmem:[%s6256_s11 + $0x28] sm:$0xff] %v4579_v38   ;;  %v3610_v43 = vadd.f32 %v5322_v39, %v6246_v49  ;;  %v5324_v50 = vadd.f32 %v5277_v48, %v6239_v46  ;;  %v3481_v51 = vpop.f32.mrb[15].mxu0 }
 0x1f6   : > { %4634 = vst [vmem:[%s6256_s11 + $0x20] sm:$0xff] %v4574_v41   ;;  %v3608_v52 = vadd.f32 %v5323_v42, %v6246_v49  ;;  %v5325_v53 = vadd.f32 %v3481_v51, %v6241_v47 }
 0x1f7   : > { %v3611_v54 = vadd.f32 %v5324_v50, %v6246_v49  ;;  %v3642_v55 = vmax.f32 %v3610_v43, 0.0 }
 0x1f8   : > { %v3609_v44 = vadd.f32 %v5325_v53, %v6246_v49  ;;  %v3640_v57 = vmax.f32 %v3608_v52, 0.0 }
 0x1f9   : > { %v3643_v56 = vmax.f32 %v3611_v54, 0.0  ;;  %v5088_v45 = vpop.f32.mrb[16].mxu1 }
 0x1fa   : > { %v3641_v58 = vmax.f32 %v3609_v44, 0.0  ;;  %v5280_v59 = vpop.f32.mrb[16].mxu0  ;;  %v1946_v60 = vpop.f32.mrb[17].mxu1 }
 0x1fb   : > { %v4589_v46 = vpack.c.bf16 %v3643_v56, %v3642_v55  ;;  %v5326_v61 = vadd.f32 %v5280_v59, %v5088_v45  ;;  %v3494_v62 = vpop.f32.mrb[17].mxu0  ;;  %v5089_v63 = vpop.f32.mrb[18].mxu1 }
 0x1fc   : > { %v4584_v0 = vpack.c.bf16 %v3641_v58, %v3640_v57  ;;  %v5327_v1 = vadd.f32 %v3494_v62, %v1946_v60  ;;  %v5281_v47 = vpop.f32.mrb[18].mxu0  ;;  %v1949_v2 = vpop.f32.mrb[19].mxu1 }
 0x1fd   : > { %4637 = vst [vmem:[%s6256_s11 + $0x38] sm:$0xff] %v4589_v46   ;;  %v3614_v3 = vadd.f32 %v5326_v61, %v6246_v49  ;;  %v5328_v4 = vadd.f32 %v5281_v47, %v5089_v63  ;;  %v3497_v5 = vpop.f32.mrb[19].mxu0 }
 0x1fe   : > { %4636 = vst [vmem:[%s6256_s11 + $0x30] sm:$0xff] %v4584_v0   ;;  %v3612_v6 = vadd.f32 %v5327_v1, %v6246_v49  ;;  %v5329_v7 = vadd.f32 %v3497_v5, %v1949_v2 }
 0x1ff   : > { %v3615_v8 = vadd.f32 %v5328_v4, %v6246_v49  ;;  %v3646_v10 = vmax.f32 %v3614_v3, 0.0 }
 0x200   : > { %v3613_v9 = vadd.f32 %v5329_v7, %v6246_v49  ;;  %v3644_v13 = vmax.f32 %v3612_v6, 0.0 }
 0x201   : > { %v3647_v11 = vmax.f32 %v3615_v8, 0.0  ;;  %v5092_v12 = vpop.f32.mrb[20].mxu1 }
 0x202   : > { %v3645_v14 = vmax.f32 %v3613_v9, 0.0  ;;  %v5284_v15 = vpop.f32.mrb[20].mxu0  ;;  %v1962_v16 = vpop.f32.mrb[21].mxu1 }
 0x203   : > { %v4599_v17 = vpack.c.bf16 %v3647_v11, %v3646_v10  ;;  %v5330_v18 = vadd.f32 %v5284_v15, %v5092_v12  ;;  %v3510_v19 = vpop.f32.mrb[21].mxu0  ;;  %v5093_v20 = vpop.f32.mrb[22].mxu1 }
 0x204   : > { %v4594_v21 = vpack.c.bf16 %v3645_v14, %v3644_v13  ;;  %v5331_v22 = vadd.f32 %v3510_v19, %v1962_v16  ;;  %v5285_v23 = vpop.f32.mrb[22].mxu0  ;;  %v1965_v24 = vpop.f32.mrb[23].mxu1 }
 0x205   : > { %4639 = vst [vmem:[%s6256_s11 + $0x48] sm:$0xff] %v4599_v17   ;;  %v3618_v25 = vadd.f32 %v5330_v18, %v6246_v49  ;;  %v5332_v26 = vadd.f32 %v5285_v23, %v5093_v20  ;;  %v3513_v27 = vpop.f32.mrb[23].mxu0 }
 0x206   : > { %4638 = vst [vmem:[%s6256_s11 + $0x40] sm:$0xff] %v4594_v21   ;;  %v3616_v28 = vadd.f32 %v5331_v22, %v6246_v49  ;;  %v5333_v29 = vadd.f32 %v3513_v27, %v1965_v24 }
 0x207   : > { %v3619_v30 = vadd.f32 %v5332_v26, %v6246_v49  ;;  %v3650_v32 = vmax.f32 %v3618_v25, 0.0 }
 0x208   : > { %v3617_v31 = vadd.f32 %v5333_v29, %v6246_v49  ;;  %v3648_v35 = vmax.f32 %v3616_v28, 0.0 }
 0x209   : > { %v3651_v33 = vmax.f32 %v3619_v30, 0.0  ;;  %v5096_v34 = vpop.f32.mrb[24].mxu1 }
 0x20a   : > { %v3649_v36 = vmax.f32 %v3617_v31, 0.0  ;;  %v5288_v37 = vpop.f32.mrb[24].mxu0  ;;  %v1978_v38 = vpop.f32.mrb[25].mxu1 }
 0x20b   : > { %v4609_v39 = vpack.c.bf16 %v3651_v33, %v3650_v32  ;;  %v5334_v40 = vadd.f32 %v5288_v37, %v5096_v34  ;;  %v3526_v41 = vpop.f32.mrb[25].mxu0  ;;  %v5097_v42 = vpop.f32.mrb[26].mxu1 }
 0x20c   : > { %v4604_v48 = vpack.c.bf16 %v3649_v36, %v3648_v35  ;;  %v5335_v43 = vadd.f32 %v3526_v41, %v1978_v38  ;;  %v5289_v50 = vpop.f32.mrb[26].mxu0  ;;  %v1981_v51 = vpop.f32.mrb[27].mxu1 }
 0x20d   : > { %4641 = vst [vmem:[%s6256_s11 + $0x58] sm:$0xff] %v4609_v39   ;;  %v3622_v52 = vadd.f32 %v5334_v40, %v6246_v49  ;;  %v5336_v53 = vadd.f32 %v5289_v50, %v5097_v42  ;;  %v3529_v54 = vpop.f32.mrb[27].mxu0 }
 0x20e   : > { %4640 = vst [vmem:[%s6256_s11 + $0x50] sm:$0xff] %v4604_v48   ;;  %v3620_v44 = vadd.f32 %v5335_v43, %v6246_v49  ;;  %v5337_v55 = vadd.f32 %v3529_v54, %v1981_v51 }
 0x20f   : > { %v3623_v56 = vadd.f32 %v5336_v53, %v6246_v49  ;;  %v3654_v57 = vmax.f32 %v3622_v52, 0.0 }
 0x210   : > { %v3621_v45 = vadd.f32 %v5337_v55, %v6246_v49  ;;  %v3652_v60 = vmax.f32 %v3620_v44, 0.0 }
 0x211   : > { %v3655_v58 = vmax.f32 %v3623_v56, 0.0  ;;  %v5100_v59 = vpop.f32.mrb[28].mxu1 }
 0x212   : > { %v3653_v46 = vmax.f32 %v3621_v45, 0.0  ;;  %v5292_v61 = vpop.f32.mrb[28].mxu0  ;;  %v1994_v62 = vpop.f32.mrb[29].mxu1 }
 0x213   : > { %v4619_v63 = vpack.c.bf16 %v3655_v58, %v3654_v57  ;;  %v5338_v0 = vadd.f32 %v5292_v61, %v5100_v59  ;;  %v3542_v1 = vpop.f32.mrb[29].mxu0  ;;  %v5101_v47 = vpop.f32.mrb[30].mxu1 }
 0x214   : > { %v4614_v2 = vpack.c.bf16 %v3653_v46, %v3652_v60  ;;  %v5339_v3 = vadd.f32 %v3542_v1, %v1994_v62  ;;  %v5293_v4 = vpop.f32.mrb[30].mxu0  ;;  %v1997_v5 = vpop.f32.mrb[31].mxu1 }
 0x215   : > { %4643 = vst [vmem:[%s6256_s11 + $0x68] sm:$0xff] %v4619_v63   ;;  %v3626_v6 = vadd.f32 %v5338_v0, %v6246_v49  ;;  %v5340_v7 = vadd.f32 %v5293_v4, %v5101_v47  ;;  %v3545_v8 = vpop.f32.mrb[31].mxu0 }
 0x216   : > { %4642 = vst [vmem:[%s6256_s11 + $0x60] sm:$0xff] %v4614_v2   ;;  %v3624_v9 = vadd.f32 %v5339_v3, %v6246_v49  ;;  %v5341_v10 = vadd.f32 %v3545_v8, %v1997_v5 }
 0x217   : > { %v3627_v11 = vadd.f32 %v5340_v7, %v6246_v49  ;;  %v3658_v13 = vmax.f32 %v3626_v6, 0.0 }
 0x218   : > { %v3625_v12 = vadd.f32 %v5341_v10, %v6246_v49  ;;  %v3656_v15 = vmax.f32 %v3624_v9, 0.0 }
 0x219   : > { %v3659_v14 = vmax.f32 %v3627_v11, 0.0 }
 0x21a   : > { %v3657_v16 = vmax.f32 %v3625_v12, 0.0 }
 0x21b   : > { %v4629_v17 = vpack.c.bf16 %v3659_v14, %v3658_v13 }
 0x21c   : > { %v4624_v18 = vpack.c.bf16 %v3657_v16, %v3656_v15 }
 0x21d   : > { %4645 = vst [vmem:[%s6256_s11 + $0x78] sm:$0xff] %v4629_v17  }
 0x21e   : > { %4644 = vst [vmem:[%s6256_s11 + $0x70] sm:$0xff] %v4624_v18  }
 0x21f PF: > { %s13_s12 = sadd.s32 1, %s5805_s12  }
 0x220   : > { %p10_p4 = scmp.ge.s32.totalorder %s13_s12, 8  }
 0x222   :  { %12 = sbr.rel (!%p10_p4) target bundleno = 1 (0x1), region = 78 }

// kernel: forward.13
= control target key start
LH: loop header
LB: loop body
LE: loop exit
PB: predicated region body
PF: predicated region fallthrough
CT: control target
= control target key end

     0   :  { %s1750_s12 = smov 0   ;;  %s1935_s0 = inlined_call_operand.vmem [shape: bf16[1536,128], index: 0, kind: input, shape index: {}]   ;;  %s1936_s1 = inlined_call_operand.vmem [shape: bf16[128,128], index: 1, kind: input, shape index: {}]   ;;  %s1937_s2 = inlined_call_operand.vmem [shape: f32[1,128], index: 2, kind: input, shape index: {}]   ;;  %s1938_s3 = inlined_call_operand.vmem [shape: bf16[1536,128], index: 3, kind: output, shape index: {}]  }
   0x1 LB: > { %s1167_s13 = sadd.s32 4294967295, %s1728_s12   ;;  %p1171_p0 = scmp.ge.s32.totalorder %s1728_s12, 1  ;;  %s1728_s12 = sphi %s1750_s12, %s13_s12  }
   0x2   : > { %p138_p1 = scmp.lt.s32.totalorder %s1728_s12, 4 }
   0x4   : > { %p139_p2 = pnand %p1171_p0, %p138_p1 }
   0x5   : > { %v1682_v0 = vld [vmem:[%s1936_s1] sm:$0xff] (!%p139_p2)   ;;  %s1172_s16 = sshll.u32 (!%p139_p2), %s1167_s13, 6  ;;  %v1683_v1 = vld [vmem:[%s1936_s1 + $0x8] sm:$0xff] (!%p139_p2)   ;;  %v1684_v2 = vld [vmem:[%s1936_s1 + $0x10] sm:$0xff] (!%p139_p2)  }
   0x6   : > { %142 = sbr.rel (%p139_p2) target bundleno = 314 (0x13a), region = 32  ;;  %p163_p3 = scmp.lt.s32.totalorder (!%p139_p2), %s1172_s16, 191  ;;  %1578 = vmatprep.subr.bf16.mxu0 (!%p139_p2), %v1682_v0  ;;  %1658 = vmatprep.subr.bf16.mxu1 (!%p139_p2), %v1682_v0  ;;  %v1685_v3 = vld [vmem:[%s1936_s1 + $0x18] sm:$0xff] (!%p139_p2)   ;;  %v1686_v6 = vld [vmem:[%s1936_s1 + $0x20] sm:$0xff] (!%p139_p2)   ;;  %v1687_v7 = vld [vmem:[%s1936_s1 + $0x28] sm:$0xff] (!%p139_p2)  }
   0x7   : > { %1579 = vmatpush3.bf16.msra.mxu0 (!%p139_p2), %v1682_v0  ;;  %1666 = vmatpush3.bf16.msra.mxu1 (!%p139_p2), %v1682_v0  ;;  %v1688_v8 = vld [vmem:[%s1936_s1 + $0x30] sm:$0xff] (!%p139_p2)   ;;  %v1689_v9 = vld [vmem:[%s1936_s1 + $0x38] sm:$0xff] (!%p139_p2)   ;;  %v1827_v41 = vld [vmem:[%s1937_s2] ss:$0 sm:$0xff] (!%p139_p2) }
   0x8   : > { %1580 = vmatprep.subr.bf16.mxu0 (!%p139_p2), %v1683_v1  ;;  %1659 = vmatprep.subr.bf16.mxu1 (!%p139_p2), %v1683_v1 }
   0xb   : > { %1581 = vmatpush3.bf16.msra.mxu0 (!%p139_p2), %v1683_v1  ;;  %1667 = vmatpush3.bf16.msra.mxu1 (!%p139_p2), %v1683_v1 }
   0xc   : > { %1582 = vmatprep.subr.bf16.mxu0 (!%p139_p2), %v1684_v2  ;;  %1660 = vmatprep.subr.bf16.mxu1 (!%p139_p2), %v1684_v2 }
   0xd   : > { %s1940_s16 = smov (!%p163_p3, %s1172_s16), 191 }
   0xe   : > { %s1173_s21 = sshll.u32 %s1940_s16, 2 }
   0xf   : > { %s1775_s24 = scalar_lea.vmem %s1935_s0, %s1173_s21  ;;  %1583 = vmatpush3.bf16.msra.mxu0 %v1684_v2  ;;  %1668 = vmatpush3.bf16.msra.mxu1 %v1684_v2  ;;  %s1840_s13 = scalar_lea.vmem %s1938_s3, %s1173_s21 }
  0x10   : > { %v1690_v4 = vld [vmem:[%s1775_s24] sm:$0xff]   ;;  %1584 = vmatprep.subr.bf16.mxu0 %v1685_v3  ;;  %1661 = vmatprep.subr.bf16.mxu1 %v1685_v3  ;;  %v1692_v10 = vld [vmem:[%s1775_s24 + $0x8] sm:$0xff]   ;;  %v1694_v12 = vld [vmem:[%s1775_s24 + $0x10] sm:$0xff]  }
  0x11   : > { %v1691_v5 = vld [vmem:[%s1775_s24 + $0x80] sm:$0xff]   ;;  %1594 = vmatprep.mubr.bf16.mxu0 %v1690_v4  ;;  %v1693_v11 = vld [vmem:[%s1775_s24 + $0x88] sm:$0xff]   ;;  %v1695_v13 = vld [vmem:[%s1775_s24 + $0x90] sm:$0xff]  }
  0x12   : > { %1626 = vmatprep.mubr.bf16.mxu1 %v1691_v5  ;;  %v1696_v14 = vld [vmem:[%s1775_s24 + $0x18] sm:$0xff]   ;;  %v1698_v16 = vld [vmem:[%s1775_s24 + $0x20] sm:$0xff]   ;;  %v1700_v18 = vld [vmem:[%s1775_s24 + $0x28] sm:$0xff]  }
  0x13   : > { %1585 = vmatpush3.bf16.msra.mxu0 %v1685_v3  ;;  %1669 = vmatpush3.bf16.msra.mxu1 %v1685_v3  ;;  %v1697_v15 = vld [vmem:[%s1775_s24 + $0x98] sm:$0xff]   ;;  %v1699_v17 = vld [vmem:[%s1775_s24 + $0xa0] sm:$0xff]   ;;  %v1701_v19 = vld [vmem:[%s1775_s24 + $0xa8] sm:$0xff]  }
  0x14   : > { %1586 = vmatprep.subr.bf16.mxu0 %v1686_v6  ;;  %1662 = vmatprep.subr.bf16.mxu1 %v1686_v6  ;;  %v1702_v20 = vld [vmem:[%s1775_s24 + $0x30] sm:$0xff]   ;;  %v1704_v22 = vld [vmem:[%s1775_s24 + $0x38] sm:$0xff]   ;;  %v1706_v24 = vld [vmem:[%s1775_s24 + $0x40] sm:$0xff]  }
  0x15   : > { %v1703_v21 = vld [vmem:[%s1775_s24 + $0xb0] sm:$0xff]   ;;  %v1705_v23 = vld [vmem:[%s1775_s24 + $0xb8] sm:$0xff]   ;;  %v1707_v25 = vld [vmem:[%s1775_s24 + $0xc0] sm:$0xff]  }
  0x16   : > { %v1708_v26 = vld [vmem:[%s1775_s24 + $0x48] sm:$0xff]   ;;  %v1710_v28 = vld [vmem:[%s1775_s24 + $0x50] sm:$0xff]   ;;  %v1712_v30 = vld [vmem:[%s1775_s24 + $0x58] sm:$0xff]  }
  0x17   : > { %1587 = vmatpush3.bf16.msra.mxu0 %v1686_v6  ;;  %1670 = vmatpush3.bf16.msra.mxu1 %v1686_v6  ;;  %v1709_v27 = vld [vmem:[%s1775_s24 + $0xc8] sm:$0xff]   ;;  %v1711_v29 = vld [vmem:[%s1775_s24 + $0xd0] sm:$0xff]   ;;  %v1713_v31 = vld [vmem:[%s1775_s24 + $0xd8] sm:$0xff]  }
  0x18   : > { %1588 = vmatprep.subr.bf16.mxu0 %v1687_v7  ;;  %1663 = vmatprep.subr.bf16.mxu1 %v1687_v7  ;;  %v1714_v32 = vld [vmem:[%s1775_s24 + $0x60] sm:$0xff]   ;;  %v1716_v34 = vld [vmem:[%s1775_s24 + $0x68] sm:$0xff]   ;;  %v1718_v36 = vld [vmem:[%s1775_s24 + $0x70] sm:$0xff]  }
  0x19   : > { %v1715_v33 = vld [vmem:[%s1775_s24 + $0xe0] sm:$0xff]   ;;  %v1717_v35 = vld [vmem:[%s1775_s24 + $0xe8] sm:$0xff]   ;;  %v1719_v37 = vld [vmem:[%s1775_s24 + $0xf0] sm:$0xff]  }
  0x1a   : > { %v1720_v38 = vld [vmem:[%s1775_s24 + $0x78] sm:$0xff]  }
  0x1b   : > { %1589 = vmatpush3.bf16.msra.mxu0 %v1687_v7  ;;  %1671 = vmatpush3.bf16.msra.mxu1 %v1687_v7  ;;  %v1721_v39 = vld [vmem:[%s1775_s24 + $0xf8] sm:$0xff]  }
  0x1c   : > { %1590 = vmatprep.subr.bf16.mxu0 %v1688_v8  ;;  %1664 = vmatprep.subr.bf16.mxu1 %v1688_v8 }
  0x1f   : > { %1591 = vmatpush3.bf16.msra.mxu0 %v1688_v8  ;;  %1672 = vmatpush3.bf16.msra.mxu1 %v1688_v8 }
  0x20   : > { %1592 = vmatprep.subr.bf16.mxu0 %v1689_v9  ;;  %1665 = vmatprep.subr.bf16.mxu1 %v1689_v9 }
  0x23   : > { %1593 = vmatpush3.bf16.msra.mxu0 %v1689_v9  ;;  %1673 = vmatpush3.bf16.msra.mxu1 %v1689_v9 }
  0x26   : > { %1595 = vmatmul.mubr.bf16.vlgmr.msra.gmra.mrb[0].mxu0 %v1692_v10  ;;  %1627 = vmatmul.mubr.bf16.vlgmr.msra.gmra.mrb[0].mxu1 %v1693_v11 }
  0x27   : > { %1598 = vmatprep.mubr.bf16.mxu0 %v1694_v12  ;;  %1630 = vmatprep.mubr.bf16.mxu1 %v1695_v13 }
  0x2e   : > { %1599 = vmatmul.mubr.bf16.gmra.mrb[4].mxu0 %v1696_v14  ;;  %1631 = vmatmul.mubr.bf16.gmra.mrb[4].mxu1 %v1697_v15 }
  0x2f   : > { %1602 = vmatprep.mubr.bf16.mxu0 %v1698_v16  ;;  %1634 = vmatprep.mubr.bf16.mxu1 %v1699_v17 }
  0x36   : > { %1603 = vmatmul.mubr.bf16.gmra.mrb[8].mxu0 %v1700_v18  ;;  %1635 = vmatmul.mubr.bf16.gmra.mrb[8].mxu1 %v1701_v19 }
  0x37   : > { %1606 = vmatprep.mubr.bf16.mxu0 %v1702_v20  ;;  %1638 = vmatprep.mubr.bf16.mxu1 %v1703_v21 }
  0x3e   : > { %1607 = vmatmul.mubr.bf16.gmra.mrb[12].mxu0 %v1704_v22  ;;  %1639 = vmatmul.mubr.bf16.gmra.mrb[12].mxu1 %v1705_v23 }
  0x3f   : > { %1610 = vmatprep.mubr.bf16.mxu0 %v1706_v24  ;;  %1642 = vmatprep.mubr.bf16.mxu1 %v1707_v25 }
  0x46   : > { %1611 = vmatmul.mubr.bf16.gmra.mrb[16].mxu0 %v1708_v26  ;;  %1643 = vmatmul.mubr.bf16.gmra.mrb[16].mxu1 %v1709_v27 }
  0x47   : > { %1614 = vmatprep.mubr.bf16.mxu0 %v1710_v28  ;;  %1646 = vmatprep.mubr.bf16.mxu1 %v1711_v29 }
  0x4e   : > { %1615 = vmatmul.mubr.bf16.gmra.mrb[20].mxu0 %v1712_v30  ;;  %1647 = vmatmul.mubr.bf16.gmra.mrb[20].mxu1 %v1713_v31 }
  0x4f   : > { %1618 = vmatprep.mubr.bf16.mxu0 %v1714_v32  ;;  %1650 = vmatprep.mubr.bf16.mxu1 %v1715_v33 }
  0x56   : > { %1619 = vmatmul.mubr.bf16.gmra.mrb[24].mxu0 %v1716_v34  ;;  %1651 = vmatmul.mubr.bf16.gmra.mrb[24].mxu1 %v1717_v35 }
  0x57   : > { %1622 = vmatprep.mubr.bf16.mxu0 %v1718_v36  ;;  %1654 = vmatprep.mubr.bf16.mxu1 %v1719_v37 }
  0x5e   : > { %1623 = vmatmul.mubr.bf16.gmra.mrb[28].mxu0 %v1720_v38  ;;  %1655 = vmatmul.mubr.bf16.gmra.mrb[28].mxu1 %v1721_v39 }
  0xf9   : > { %v1596_v40 = vpop.f32.mrb[0].mxu0  ;;  %v1628_v42 = vpop.f32.mrb[0].mxu1 }
  0xfa   : > { %v536_v43 = vpop.f32.mrb[1].mxu0  ;;  %v664_v44 = vpop.f32.mrb[1].mxu1  ;;  %v545_v47 = vadd.f32 %v1596_v40, %v1827_v41  ;;  %v673_v48 = vadd.f32 %v1628_v42, %v1827_v41 }
  0xfb   : > { %v1597_v45 = vpop.f32.mrb[2].mxu0  ;;  %v1629_v46 = vpop.f32.mrb[2].mxu1  ;;  %v537_v53 = vadd.f32 %v1827_v41, %v536_v43  ;;  %v665_v54 = vadd.f32 %v1827_v41, %v664_v44 }
  0xfc   : > { %v548_v49 = vadd.f32 %v1597_v45, %v1827_v41  ;;  %v676_v50 = vadd.f32 %v1629_v46, %v1827_v41  ;;  %v539_v51 = vpop.f32.mrb[3].mxu0  ;;  %v667_v52 = vpop.f32.mrb[3].mxu1 }
  0xfd   : > { %v540_v55 = vadd.f32 %v1827_v41, %v539_v51  ;;  %v668_v56 = vadd.f32 %v1827_v41, %v667_v52 }
  0xfe   : > { %v1355_v57 = vpack.c.bf16 %v548_v49, %v545_v47  ;;  %v1435_v58 = vpack.c.bf16 %v676_v50, %v673_v48 }
  0xff   : > { %v1350_v59 = vpack.c.bf16 %v540_v55, %v537_v53  ;;  %v1430_v60 = vpack.c.bf16 %v668_v56, %v665_v54 }
 0x100   : > { %1507 = vst [vmem:[%s1840_s13 + $0x8] sm:$0xff] %v1355_v57   ;;  %1523 = vst [vmem:[%s1840_s13 + $0x88] sm:$0xff] %v1435_v58  }
 0x101   : > { %1351 = vst [vmem:[%s1840_s13] sm:$0xff] %v1350_v59   ;;  %1522 = vst [vmem:[%s1840_s13 + $0x80] sm:$0xff] %v1430_v60   ;;  %v1600_v61 = vpop.f32.mrb[4].mxu0  ;;  %v1632_v62 = vpop.f32.mrb[4].mxu1 }
 0x102   : > { %v552_v63 = vpop.f32.mrb[5].mxu0  ;;  %v680_v0 = vpop.f32.mrb[5].mxu1  ;;  %v561_v3 = vadd.f32 %v1600_v61, %v1827_v41  ;;  %v689_v4 = vadd.f32 %v1632_v62, %v1827_v41 }
 0x103   : > { %v1601_v1 = vpop.f32.mrb[6].mxu0  ;;  %v1633_v2 = vpop.f32.mrb[6].mxu1  ;;  %v553_v9 = vadd.f32 %v1827_v41, %v552_v63  ;;  %v681_v10 = vadd.f32 %v1827_v41, %v680_v0 }
 0x104   : > { %v564_v5 = vadd.f32 %v1601_v1, %v1827_v41  ;;  %v692_v6 = vadd.f32 %v1633_v2, %v1827_v41  ;;  %v555_v7 = vpop.f32.mrb[7].mxu0  ;;  %v683_v8 = vpop.f32.mrb[7].mxu1 }
 0x105   : > { %v556_v11 = vadd.f32 %v1827_v41, %v555_v7  ;;  %v684_v12 = vadd.f32 %v1827_v41, %v683_v8 }
 0x106   : > { %v1365_v13 = vpack.c.bf16 %v564_v5, %v561_v3  ;;  %v1445_v14 = vpack.c.bf16 %v692_v6, %v689_v4 }
 0x107   : > { %v1360_v15 = vpack.c.bf16 %v556_v11, %v553_v9  ;;  %v1440_v16 = vpack.c.bf16 %v684_v12, %v681_v10 }
 0x108   : > { %1509 = vst [vmem:[%s1840_s13 + $0x18] sm:$0xff] %v1365_v13   ;;  %1525 = vst [vmem:[%s1840_s13 + $0x98] sm:$0xff] %v1445_v14  }
 0x109   : > { %1508 = vst [vmem:[%s1840_s13 + $0x10] sm:$0xff] %v1360_v15   ;;  %1524 = vst [vmem:[%s1840_s13 + $0x90] sm:$0xff] %v1440_v16   ;;  %v1604_v17 = vpop.f32.mrb[8].mxu0  ;;  %v1636_v18 = vpop.f32.mrb[8].mxu1 }
 0x10a   : > { %v568_v19 = vpop.f32.mrb[9].mxu0  ;;  %v696_v20 = vpop.f32.mrb[9].mxu1  ;;  %v577_v23 = vadd.f32 %v1604_v17, %v1827_v41  ;;  %v705_v24 = vadd.f32 %v1636_v18, %v1827_v41 }
 0x10b   : > { %v1605_v21 = vpop.f32.mrb[10].mxu0  ;;  %v1637_v22 = vpop.f32.mrb[10].mxu1  ;;  %v569_v29 = vadd.f32 %v1827_v41, %v568_v19  ;;  %v697_v30 = vadd.f32 %v1827_v41, %v696_v20 }
 0x10c   : > { %v580_v25 = vadd.f32 %v1605_v21, %v1827_v41  ;;  %v708_v26 = vadd.f32 %v1637_v22, %v1827_v41  ;;  %v571_v27 = vpop.f32.mrb[11].mxu0  ;;  %v699_v28 = vpop.f32.mrb[11].mxu1 }
 0x10d   : > { %v572_v31 = vadd.f32 %v1827_v41, %v571_v27  ;;  %v700_v32 = vadd.f32 %v1827_v41, %v699_v28 }
 0x10e   : > { %v1375_v33 = vpack.c.bf16 %v580_v25, %v577_v23  ;;  %v1455_v34 = vpack.c.bf16 %v708_v26, %v705_v24 }
 0x10f   : > { %v1370_v35 = vpack.c.bf16 %v572_v31, %v569_v29  ;;  %v1450_v36 = vpack.c.bf16 %v700_v32, %v697_v30 }
 0x110   : > { %1511 = vst [vmem:[%s1840_s13 + $0x28] sm:$0xff] %v1375_v33   ;;  %1527 = vst [vmem:[%s1840_s13 + $0xa8] sm:$0xff] %v1455_v34  }
 0x111   : > { %1510 = vst [vmem:[%s1840_s13 + $0x20] sm:$0xff] %v1370_v35   ;;  %1526 = vst [vmem:[%s1840_s13 + $0xa0] sm:$0xff] %v1450_v36   ;;  %v1608_v37 = vpop.f32.mrb[12].mxu0  ;;  %v1640_v38 = vpop.f32.mrb[12].mxu1 }
 0x112   : > { %v584_v39 = vpop.f32.mrb[13].mxu0  ;;  %v712_v40 = vpop.f32.mrb[13].mxu1  ;;  %v593_v44 = vadd.f32 %v1608_v37, %v1827_v41  ;;  %v721_v45 = vadd.f32 %v1640_v38, %v1827_v41 }
 0x113   : > { %v1609_v42 = vpop.f32.mrb[14].mxu0  ;;  %v1641_v43 = vpop.f32.mrb[14].mxu1  ;;  %v585_v50 = vadd.f32 %v1827_v41, %v584_v39  ;;  %v713_v51 = vadd.f32 %v1827_v41, %v712_v40 }
 0x114   : > { %v596_v46 = vadd.f32 %v1609_v42, %v1827_v41  ;;  %v724_v47 = vadd.f32 %v1641_v43, %v1827_v41  ;;  %v587_v48 = vpop.f32.mrb[15].mxu0  ;;  %v715_v49 = vpop.f32.mrb[15].mxu1 }
 0x115   : > { %v588_v52 = vadd.f32 %v1827_v41, %v587_v48  ;;  %v716_v53 = vadd.f32 %v1827_v41, %v715_v49 }
 0x116   : > { %v1385_v54 = vpack.c.bf16 %v596_v46, %v593_v44  ;;  %v1465_v55 = vpack.c.bf16 %v724_v47, %v721_v45 }
 0x117   : > { %v1380_v56 = vpack.c.bf16 %v588_v52, %v585_v50  ;;  %v1460_v57 = vpack.c.bf16 %v716_v53, %v713_v51 }
 0x118   : > { %1513 = vst [vmem:[%s1840_s13 + $0x38] sm:$0xff] %v1385_v54   ;;  %1529 = vst [vmem:[%s1840_s13 + $0xb8] sm:$0xff] %v1465_v55  }
 0x119   : > { %1512 = vst [vmem:[%s1840_s13 + $0x30] sm:$0xff] %v1380_v56   ;;  %1528 = vst [vmem:[%s1840_s13 + $0xb0] sm:$0xff] %v1460_v57   ;;  %v1612_v58 = vpop.f32.mrb[16].mxu0  ;;  %v1644_v59 = vpop.f32.mrb[16].mxu1 }
 0x11a   : > { %v600_v60 = vpop.f32.mrb[17].mxu0  ;;  %v728_v61 = vpop.f32.mrb[17].mxu1  ;;  %v609_v0 = vadd.f32 %v1612_v58, %v1827_v41  ;;  %v737_v1 = vadd.f32 %v1644_v59, %v1827_v41 }
 0x11b   : > { %v1613_v62 = vpop.f32.mrb[18].mxu0  ;;  %v1645_v63 = vpop.f32.mrb[18].mxu1  ;;  %v601_v6 = vadd.f32 %v1827_v41, %v600_v60  ;;  %v729_v7 = vadd.f32 %v1827_v41, %v728_v61 }
 0x11c   : > { %v612_v2 = vadd.f32 %v1613_v62, %v1827_v41  ;;  %v740_v3 = vadd.f32 %v1645_v63, %v1827_v41  ;;  %v603_v4 = vpop.f32.mrb[19].mxu0  ;;  %v731_v5 = vpop.f32.mrb[19].mxu1 }
 0x11d   : > { %v604_v8 = vadd.f32 %v1827_v41, %v603_v4  ;;  %v732_v9 = vadd.f32 %v1827_v41, %v731_v5 }
 0x11e   : > { %v1395_v10 = vpack.c.bf16 %v612_v2, %v609_v0  ;;  %v1475_v11 = vpack.c.bf16 %v740_v3, %v737_v1 }
 0x11f   : > { %v1390_v12 = vpack.c.bf16 %v604_v8, %v601_v6  ;;  %v1470_v13 = vpack.c.bf16 %v732_v9, %v729_v7 }
 0x120   : > { %1515 = vst [vmem:[%s1840_s13 + $0x48] sm:$0xff] %v1395_v10   ;;  %1531 = vst [vmem:[%s1840_s13 + $0xc8] sm:$0xff] %v1475_v11  }
 0x121   : > { %1514 = vst [vmem:[%s1840_s13 + $0x40] sm:$0xff] %v1390_v12   ;;  %1530 = vst [vmem:[%s1840_s13 + $0xc0] sm:$0xff] %v1470_v13   ;;  %v1616_v14 = vpop.f32.mrb[20].mxu0  ;;  %v1648_v15 = vpop.f32.mrb[20].mxu1 }
 0x122   : > { %v616_v16 = vpop.f32.mrb[21].mxu0  ;;  %v744_v17 = vpop.f32.mrb[21].mxu1  ;;  %v625_v20 = vadd.f32 %v1616_v14, %v1827_v41  ;;  %v753_v21 = vadd.f32 %v1648_v15, %v1827_v41 }
 0x123   : > { %v1617_v18 = vpop.f32.mrb[22].mxu0  ;;  %v1649_v19 = vpop.f32.mrb[22].mxu1  ;;  %v617_v26 = vadd.f32 %v1827_v41, %v616_v16  ;;  %v745_v27 = vadd.f32 %v1827_v41, %v744_v17 }
 0x124   : > { %v628_v22 = vadd.f32 %v1617_v18, %v1827_v41  ;;  %v756_v23 = vadd.f32 %v1649_v19, %v1827_v41  ;;  %v619_v24 = vpop.f32.mrb[23].mxu0  ;;  %v747_v25 = vpop.f32.mrb[23].mxu1 }
 0x125   : > { %v620_v28 = vadd.f32 %v1827_v41, %v619_v24  ;;  %v748_v29 = vadd.f32 %v1827_v41, %v747_v25 }
 0x126   : > { %v1405_v30 = vpack.c.bf16 %v628_v22, %v625_v20  ;;  %v1485_v31 = vpack.c.bf16 %v756_v23, %v753_v21 }
 0x127   : > { %v1400_v32 = vpack.c.bf16 %v620_v28, %v617_v26  ;;  %v1480_v33 = vpack.c.bf16 %v748_v29, %v745_v27 }
 0x128   : > { %1517 = vst [vmem:[%s1840_s13 + $0x58] sm:$0xff] %v1405_v30   ;;  %1533 = vst [vmem:[%s1840_s13 + $0xd8] sm:$0xff] %v1485_v31  }
 0x129   : > { %1516 = vst [vmem:[%s1840_s13 + $0x50] sm:$0xff] %v1400_v32   ;;  %1532 = vst [vmem:[%s1840_s13 + $0xd0] sm:$0xff] %v1480_v33   ;;  %v1620_v34 = vpop.f32.mrb[24].mxu0  ;;  %v1652_v35 = vpop.f32.mrb[24].mxu1 }
 0x12a   : > { %v632_v36 = vpop.f32.mrb[25].mxu0  ;;  %v760_v37 = vpop.f32.mrb[25].mxu1  ;;  %v641_v40 = vadd.f32 %v1620_v34, %v1827_v41  ;;  %v769_v42 = vadd.f32 %v1652_v35, %v1827_v41 }
 0x12b   : > { %v1621_v38 = vpop.f32.mrb[26].mxu0  ;;  %v1653_v39 = vpop.f32.mrb[26].mxu1  ;;  %v633_v47 = vadd.f32 %v1827_v41, %v632_v36  ;;  %v761_v48 = vadd.f32 %v1827_v41, %v760_v37 }
 0x12c   : > { %v644_v43 = vadd.f32 %v1621_v38, %v1827_v41  ;;  %v772_v44 = vadd.f32 %v1653_v39, %v1827_v41  ;;  %v635_v45 = vpop.f32.mrb[27].mxu0  ;;  %v763_v46 = vpop.f32.mrb[27].mxu1 }
 0x12d   : > { %v636_v49 = vadd.f32 %v1827_v41, %v635_v45  ;;  %v764_v50 = vadd.f32 %v1827_v41, %v763_v46 }
 0x12e   : > { %v1415_v51 = vpack.c.bf16 %v644_v43, %v641_v40  ;;  %v1495_v52 = vpack.c.bf16 %v772_v44, %v769_v42 }
 0x12f   : > { %v1410_v53 = vpack.c.bf16 %v636_v49, %v633_v47  ;;  %v1490_v54 = vpack.c.bf16 %v764_v50, %v761_v48 }
 0x130   : > { %1519 = vst [vmem:[%s1840_s13 + $0x68] sm:$0xff] %v1415_v51   ;;  %1535 = vst [vmem:[%s1840_s13 + $0xe8] sm:$0xff] %v1495_v52  }
 0x131   : > { %1518 = vst [vmem:[%s1840_s13 + $0x60] sm:$0xff] %v1410_v53   ;;  %1534 = vst [vmem:[%s1840_s13 + $0xe0] sm:$0xff] %v1490_v54   ;;  %v1624_v55 = vpop.f32.mrb[28].mxu0  ;;  %v1656_v56 = vpop.f32.mrb[28].mxu1 }
 0x132   : > { %v648_v57 = vpop.f32.mrb[29].mxu0  ;;  %v776_v58 = vpop.f32.mrb[29].mxu1  ;;  %v657_v61 = vadd.f32 %v1624_v55, %v1827_v41  ;;  %v785_v62 = vadd.f32 %v1656_v56, %v1827_v41 }
 0x133   : > { %v1625_v59 = vpop.f32.mrb[30].mxu0  ;;  %v1657_v60 = vpop.f32.mrb[30].mxu1  ;;  %v649_v3 = vadd.f32 %v1827_v41, %v648_v57  ;;  %v777_v4 = vadd.f32 %v1827_v41, %v776_v58 }
 0x134   : > { %v660_v63 = vadd.f32 %v1625_v59, %v1827_v41  ;;  %v788_v0 = vadd.f32 %v1657_v60, %v1827_v41  ;;  %v651_v1 = vpop.f32.mrb[31].mxu0  ;;  %v779_v2 = vpop.f32.mrb[31].mxu1 }
 0x135   : > { %v652_v5 = vadd.f32 %v1827_v41, %v651_v1  ;;  %v780_v6 = vadd.f32 %v1827_v41, %v779_v2 }
 0x136   : > { %v1425_v7 = vpack.c.bf16 %v660_v63, %v657_v61  ;;  %v1505_v8 = vpack.c.bf16 %v788_v0, %v785_v62 }
 0x137   : > { %v1420_v9 = vpack.c.bf16 %v652_v5, %v649_v3  ;;  %v1500_v10 = vpack.c.bf16 %v780_v6, %v777_v4 }
 0x138   : > { %1521 = vst [vmem:[%s1840_s13 + $0x78] sm:$0xff] %v1425_v7   ;;  %1537 = vst [vmem:[%s1840_s13 + $0xf8] sm:$0xff] %v1505_v8  }
 0x139   : > { %1520 = vst [vmem:[%s1840_s13 + $0x70] sm:$0xff] %v1420_v9   ;;  %1536 = vst [vmem:[%s1840_s13 + $0xf0] sm:$0xff] %v1500_v10  }
 0x13a PF: > { %s13_s12 = sadd.s32 1, %s1728_s12  }
 0x13b   : > { %p10_p4 = scmp.ge.s32.totalorder %s13_s12, 5  }
 0x13d   :  { %12 = sbr.rel (!%p10_p4) target bundleno = 1 (0x1), region = 62 }

// kernel: forward.16
= control target key start
LH: loop header
LB: loop body
LE: loop exit
PB: predicated region body
PF: predicated region fallthrough
CT: control target
= control target key end

     0   :  { %s2233_s15 = smov 0   ;;  %s2697_s0 = inlined_call_operand.vmem [shape: bf16[1536,128], index: 0, kind: input, shape index: {}]   ;;  %s2698_s1 = inlined_call_operand.vmem [shape: bf16[128,128], index: 1, kind: input, shape index: {}]   ;;  %s2699_s2 = inlined_call_operand.vmem [shape: f32[1,128], index: 2, kind: input, shape index: {}]   ;;  %s2700_s3 = inlined_call_operand.vmem [shape: bf16[1536,128], index: 3, kind: input, shape index: {}]   ;;  %s2701_s4 = inlined_call_operand.vmem [shape: bf16[1536,128], index: 4, kind: output, shape index: {}]  }
   0x1 LB: > { %s1484_s16 = sadd.s32 4294967295, %s2206_s15   ;;  %p1488_p0 = scmp.ge.s32.totalorder %s2206_s15, 1  ;;  %s2206_s15 = sphi %s2233_s15, %s14_s15  }
   0x2   : > { %p174_p1 = scmp.lt.s32.totalorder %s2206_s15, 4 }
   0x4   : > { %p175_p2 = pnand %p1488_p0, %p174_p1 }
   0x5   : > { %v2160_v0 = vld [vmem:[%s2698_s1] sm:$0xff] (!%p175_p2)   ;;  %s1489_s19 = sshll.u32 (!%p175_p2), %s1484_s16, 6  ;;  %v2161_v1 = vld [vmem:[%s2698_s1 + $0x8] sm:$0xff] (!%p175_p2)   ;;  %v2162_v2 = vld [vmem:[%s2698_s1 + $0x10] sm:$0xff] (!%p175_p2)  }
   0x6   : > { %178 = sbr.rel (%p175_p2) target bundleno = 322 (0x142), region = 36  ;;  %p206_p3 = scmp.lt.s32.totalorder (!%p175_p2), %s1489_s19, 191  ;;  %2056 = vmatprep.subr.bf16.mxu0 (!%p175_p2), %v2160_v0  ;;  %2136 = vmatprep.subr.bf16.mxu1 (!%p175_p2), %v2160_v0  ;;  %v2163_v3 = vld [vmem:[%s2698_s1 + $0x18] sm:$0xff] (!%p175_p2)   ;;  %v2164_v6 = vld [vmem:[%s2698_s1 + $0x20] sm:$0xff] (!%p175_p2)   ;;  %v2165_v7 = vld [vmem:[%s2698_s1 + $0x28] sm:$0xff] (!%p175_p2)  }
   0x7   : > { %2057 = vmatpush3.bf16.msra.mxu0 (!%p175_p2), %v2160_v0  ;;  %2144 = vmatpush3.bf16.msra.mxu1 (!%p175_p2), %v2160_v0  ;;  %v2166_v8 = vld [vmem:[%s2698_s1 + $0x30] sm:$0xff] (!%p175_p2)   ;;  %v2167_v9 = vld [vmem:[%s2698_s1 + $0x38] sm:$0xff] (!%p175_p2)  }
   0x8   : > { %2058 = vmatprep.subr.bf16.mxu0 (!%p175_p2), %v2161_v1  ;;  %2137 = vmatprep.subr.bf16.mxu1 (!%p175_p2), %v2161_v1 }
   0xb   : > { %2059 = vmatpush3.bf16.msra.mxu0 (!%p175_p2), %v2161_v1  ;;  %2145 = vmatpush3.bf16.msra.mxu1 (!%p175_p2), %v2161_v1 }
   0xc   : > { %2060 = vmatprep.subr.bf16.mxu0 (!%p175_p2), %v2162_v2  ;;  %2138 = vmatprep.subr.bf16.mxu1 (!%p175_p2), %v2162_v2 }
   0xd   : > { %s2712_s19 = smov (!%p206_p3, %s1489_s19), 191 }
   0xe   : > { %s2250_s24 = sshll.u32 %s2712_s19, 2 }
   0xf   : > { %s2256_s27 = scalar_lea.vmem %s2697_s0, %s2250_s24  ;;  %2061 = vmatpush3.bf16.msra.mxu0 %v2162_v2  ;;  %2146 = vmatpush3.bf16.msra.mxu1 %v2162_v2  ;;  %s2309_s14 = scalar_lea.vmem %s2700_s3, %s2250_s24 }
  0x10   : > { %v2168_v4 = vld [vmem:[%s2256_s27] sm:$0xff]   ;;  %2062 = vmatprep.subr.bf16.mxu0 %v2163_v3  ;;  %2139 = vmatprep.subr.bf16.mxu1 %v2163_v3  ;;  %v2170_v10 = vld [vmem:[%s2256_s27 + $0x8] sm:$0xff]   ;;  %v2172_v12 = vld [vmem:[%s2256_s27 + $0x10] sm:$0xff]   ;;  %s2440_s20 = scalar_lea.vmem %s2701_s4, %s2250_s24 }
  0x11   : > { %v2169_v5 = vld [vmem:[%s2256_s27 + $0x80] sm:$0xff]   ;;  %2072 = vmatprep.mubr.bf16.mxu0 %v2168_v4  ;;  %v2171_v11 = vld [vmem:[%s2256_s27 + $0x88] sm:$0xff]   ;;  %v2173_v13 = vld [vmem:[%s2256_s27 + $0x90] sm:$0xff]  }
  0x12   : > { %2104 = vmatprep.mubr.bf16.mxu1 %v2169_v5  ;;  %v2174_v14 = vld [vmem:[%s2256_s27 + $0x18] sm:$0xff]   ;;  %v2176_v16 = vld [vmem:[%s2256_s27 + $0x20] sm:$0xff]   ;;  %v2178_v18 = vld [vmem:[%s2256_s27 + $0x28] sm:$0xff]  }
  0x13   : > { %2063 = vmatpush3.bf16.msra.mxu0 %v2163_v3  ;;  %2147 = vmatpush3.bf16.msra.mxu1 %v2163_v3  ;;  %v2175_v15 = vld [vmem:[%s2256_s27 + $0x98] sm:$0xff]   ;;  %v2177_v17 = vld [vmem:[%s2256_s27 + $0xa0] sm:$0xff]   ;;  %v2179_v19 = vld [vmem:[%s2256_s27 + $0xa8] sm:$0xff]  }
  0x14   : > { %2064 = vmatprep.subr.bf16.mxu0 %v2164_v6  ;;  %2140 = vmatprep.subr.bf16.mxu1 %v2164_v6  ;;  %v2180_v20 = vld [vmem:[%s2256_s27 + $0x30] sm:$0xff]   ;;  %v2182_v22 = vld [vmem:[%s2256_s27 + $0x38] sm:$0xff]   ;;  %v2184_v24 = vld [vmem:[%s2256_s27 + $0x40] sm:$0xff]  }
  0x15   : > { %v2181_v21 = vld [vmem:[%s2256_s27 + $0xb0] sm:$0xff]   ;;  %v2183_v23 = vld [vmem:[%s2256_s27 + $0xb8] sm:$0xff]   ;;  %v2185_v25 = vld [vmem:[%s2256_s27 + $0xc0] sm:$0xff]  }
  0x16   : > { %v2186_v26 = vld [vmem:[%s2256_s27 + $0x48] sm:$0xff]   ;;  %v2188_v28 = vld [vmem:[%s2256_s27 + $0x50] sm:$0xff]   ;;  %v2190_v30 = vld [vmem:[%s2256_s27 + $0x58] sm:$0xff]  }
  0x17   : > { %2065 = vmatpush3.bf16.msra.mxu0 %v2164_v6  ;;  %2148 = vmatpush3.bf16.msra.mxu1 %v2164_v6  ;;  %v2187_v27 = vld [vmem:[%s2256_s27 + $0xc8] sm:$0xff]   ;;  %v2189_v29 = vld [vmem:[%s2256_s27 + $0xd0] sm:$0xff]   ;;  %v2191_v31 = vld [vmem:[%s2256_s27 + $0xd8] sm:$0xff]  }
  0x18   : > { %2066 = vmatprep.subr.bf16.mxu0 %v2165_v7  ;;  %2141 = vmatprep.subr.bf16.mxu1 %v2165_v7  ;;  %v2192_v32 = vld [vmem:[%s2256_s27 + $0x60] sm:$0xff]   ;;  %v2194_v34 = vld [vmem:[%s2256_s27 + $0x68] sm:$0xff]   ;;  %v2196_v36 = vld [vmem:[%s2256_s27 + $0x70] sm:$0xff]  }
  0x19   : > { %v2193_v33 = vld [vmem:[%s2256_s27 + $0xe0] sm:$0xff]   ;;  %v2195_v35 = vld [vmem:[%s2256_s27 + $0xe8] sm:$0xff]   ;;  %v2197_v37 = vld [vmem:[%s2256_s27 + $0xf0] sm:$0xff]  }
  0x1a   : > { %v2198_v38 = vld [vmem:[%s2256_s27 + $0x78] sm:$0xff]   ;;  %v2312_v40 = vld [vmem:[%s2309_s14 + $0x8] sm:$0xff]   ;;  %v2318_v42 = vld [vmem:[%s2309_s14] sm:$0xff]  }
  0x1b   : > { %2067 = vmatpush3.bf16.msra.mxu0 %v2165_v7  ;;  %2149 = vmatpush3.bf16.msra.mxu1 %v2165_v7  ;;  %v2199_v39 = vld [vmem:[%s2256_s27 + $0xf8] sm:$0xff]   ;;  %v2315_v41 = vld [vmem:[%s2309_s14 + $0x88] sm:$0xff]   ;;  %v2321_v43 = vld [vmem:[%s2309_s14 + $0x80] sm:$0xff]   ;;  %v1672_v48 = vunpack.c.l.bf16 %v2312_v40  ;;  %v1668_v50 = vunpack.c.l.bf16 %v2318_v42  ;;  %v1673_v53 = vunpack.c.h.bf16 %v2312_v40  ;;  %v1669_v55 = vunpack.c.h.bf16 %v2318_v42 }
  0x1c   : > { %2068 = vmatprep.subr.bf16.mxu0 %v2166_v8  ;;  %2142 = vmatprep.subr.bf16.mxu1 %v2166_v8  ;;  %v2324_v44 = vld [vmem:[%s2309_s14 + $0x18] sm:$0xff]   ;;  %v2330_v46 = vld [vmem:[%s2309_s14 + $0x10] sm:$0xff]   ;;  %v1736_v49 = vunpack.c.l.bf16 %v2315_v41  ;;  %v1732_v51 = vunpack.c.l.bf16 %v2321_v43  ;;  %v2340_v52 = vld [vmem:[%s2309_s14 + $0x28] sm:$0xff]   ;;  %v1737_v54 = vunpack.c.h.bf16 %v2315_v41  ;;  %v1733_v56 = vunpack.c.h.bf16 %v2321_v43 }
  0x1d   : > { %v2327_v45 = vld [vmem:[%s2309_s14 + $0x98] sm:$0xff]   ;;  %v2333_v47 = vld [vmem:[%s2309_s14 + $0x90] sm:$0xff]   ;;  %v2347_v57 = vld [vmem:[%s2309_s14 + $0xa8] sm:$0xff]   ;;  %v1680_v60 = vunpack.c.l.bf16 %v2324_v44  ;;  %v1676_v62 = vunpack.c.l.bf16 %v2330_v46  ;;  %v1681_v1 = vunpack.c.h.bf16 %v2324_v44  ;;  %v1677_v3 = vunpack.c.h.bf16 %v2330_v46 }
  0x1e   : > { %v2350_v58 = vld [vmem:[%s2309_s14 + $0x20] sm:$0xff]   ;;  %v1744_v61 = vunpack.c.l.bf16 %v2327_v45  ;;  %v1740_v63 = vunpack.c.l.bf16 %v2333_v47  ;;  %v2360_v0 = vld [vmem:[%s2309_s14 + $0x38] sm:$0xff]   ;;  %v1745_v2 = vunpack.c.h.bf16 %v2327_v45  ;;  %v1741_v4 = vunpack.c.h.bf16 %v2333_v47  ;;  %v2370_v6 = vld [vmem:[%s2309_s14 + $0x30] sm:$0xff]  }
  0x1f   : > { %2069 = vmatpush3.bf16.msra.mxu0 %v2166_v8  ;;  %2150 = vmatpush3.bf16.msra.mxu1 %v2166_v8  ;;  %v2353_v59 = vld [vmem:[%s2309_s14 + $0xa0] sm:$0xff]   ;;  %v2367_v5 = vld [vmem:[%s2309_s14 + $0xb8] sm:$0xff]   ;;  %v2373_v7 = vld [vmem:[%s2309_s14 + $0xb0] sm:$0xff]   ;;  %v1688_v8 = vunpack.c.l.bf16 %v2340_v52 }
  0x20   : > { %2070 = vmatprep.subr.bf16.mxu0 %v2167_v9  ;;  %2143 = vmatprep.subr.bf16.mxu1 %v2167_v9 }
  0x23   : > { %2071 = vmatpush3.bf16.msra.mxu0 %v2167_v9  ;;  %2151 = vmatpush3.bf16.msra.mxu1 %v2167_v9  ;;  %v1752_v9 = vunpack.c.l.bf16 %v2347_v57 }
  0x26   : > { %2073 = vmatmul.mubr.bf16.vlgmr.msra.gmra.mrb[0].mxu0 %v2170_v10  ;;  %2105 = vmatmul.mubr.bf16.vlgmr.msra.gmra.mrb[0].mxu1 %v2171_v11  ;;  %v1684_v10 = vunpack.c.l.bf16 %v2350_v58  ;;  %v1748_v11 = vunpack.c.l.bf16 %v2353_v59 }
  0x27   : > { %2076 = vmatprep.mubr.bf16.mxu0 %v2172_v12  ;;  %2108 = vmatprep.mubr.bf16.mxu1 %v2173_v13  ;;  %v2382_v12 = vld [vmem:[%s2699_s2] ss:$0 sm:$0xff]  ;;  %v1689_v13 = vunpack.c.h.bf16 %v2340_v52 }
  0x2e   : > { %2077 = vmatmul.mubr.bf16.gmra.mrb[4].mxu0 %v2174_v14  ;;  %2109 = vmatmul.mubr.bf16.gmra.mrb[4].mxu1 %v2175_v15  ;;  %v1753_v14 = vunpack.c.h.bf16 %v2347_v57  ;;  %v1685_v15 = vunpack.c.h.bf16 %v2350_v58 }
  0x2f   : > { %2080 = vmatprep.mubr.bf16.mxu0 %v2176_v16  ;;  %2112 = vmatprep.mubr.bf16.mxu1 %v2177_v17  ;;  %v1749_v16 = vunpack.c.h.bf16 %v2353_v59  ;;  %v2389_v17 = vld [vmem:[%s2309_s14 + $0x48] sm:$0xff]  }
  0x36   : > { %2081 = vmatmul.mubr.bf16.gmra.mrb[8].mxu0 %v2178_v18  ;;  %2113 = vmatmul.mubr.bf16.gmra.mrb[8].mxu1 %v2179_v19  ;;  %v2392_v18 = vld [vmem:[%s2309_s14 + $0xc8] sm:$0xff]   ;;  %v1696_v19 = vunpack.c.l.bf16 %v2360_v0 }
  0x37   : > { %2084 = vmatprep.mubr.bf16.mxu0 %v2180_v20  ;;  %2116 = vmatprep.mubr.bf16.mxu1 %v2181_v21  ;;  %v1760_v20 = vunpack.c.l.bf16 %v2367_v5 }
  0x3e   : > { %2085 = vmatmul.mubr.bf16.gmra.mrb[12].mxu0 %v2182_v22  ;;  %2117 = vmatmul.mubr.bf16.gmra.mrb[12].mxu1 %v2183_v23  ;;  %v2399_v23 = vld [vmem:[%s2309_s14 + $0x40] sm:$0xff]  }
  0x3f   : > { %2088 = vmatprep.mubr.bf16.mxu0 %v2184_v24  ;;  %2120 = vmatprep.mubr.bf16.mxu1 %v2185_v25  ;;  %v2402_v24 = vld [vmem:[%s2309_s14 + $0xc0] sm:$0xff]  }
  0x46   : > { %2089 = vmatmul.mubr.bf16.gmra.mrb[16].mxu0 %v2186_v26  ;;  %2121 = vmatmul.mubr.bf16.gmra.mrb[16].mxu1 %v2187_v27 }
  0x47   : > { %2092 = vmatprep.mubr.bf16.mxu0 %v2188_v28  ;;  %2124 = vmatprep.mubr.bf16.mxu1 %v2189_v29 }
  0x4e   : > { %2093 = vmatmul.mubr.bf16.gmra.mrb[20].mxu0 %v2190_v30  ;;  %2125 = vmatmul.mubr.bf16.gmra.mrb[20].mxu1 %v2191_v31  ;;  %v1764_v30 = vunpack.c.l.bf16 %v2402_v24 }
  0x4f   : > { %2096 = vmatprep.mubr.bf16.mxu0 %v2192_v32  ;;  %2128 = vmatprep.mubr.bf16.mxu1 %v2193_v33 }
  0x56   : > { %2097 = vmatmul.mubr.bf16.gmra.mrb[24].mxu0 %v2194_v34  ;;  %2129 = vmatmul.mubr.bf16.gmra.mrb[24].mxu1 %v2195_v35 }
  0x57   : > { %2100 = vmatprep.mubr.bf16.mxu0 %v2196_v36  ;;  %2132 = vmatprep.mubr.bf16.mxu1 %v2197_v37 }
  0x5e   : > { %2101 = vmatmul.mubr.bf16.gmra.mrb[28].mxu0 %v2198_v38  ;;  %2133 = vmatmul.mubr.bf16.gmra.mrb[28].mxu1 %v2199_v39 }
  0xf9   : > { %v2074_v25 = vpop.f32.mrb[0].mxu0  ;;  %v2106_v26 = vpop.f32.mrb[0].mxu1 }
  0xfa   : > { %v594_v31 = vadd.f32 %v2074_v25, %v2382_v12  ;;  %v722_v32 = vadd.f32 %v2106_v26, %v2382_v12  ;;  %v585_v33 = vpop.f32.mrb[1].mxu0  ;;  %v713_v34 = vpop.f32.mrb[1].mxu1 }
  0xfb   : > { %v586_v37 = vadd.f32 %v2382_v12, %v585_v33  ;;  %v714_v38 = vadd.f32 %v2382_v12, %v713_v34  ;;  %v2075_v39 = vpop.f32.mrb[2].mxu0  ;;  %v2107_v28 = vpop.f32.mrb[2].mxu1 }
  0xfc   : > { %v970_v27 = vadd.f32 %v1672_v48, %v594_v31  ;;  %v1002_v25 = vadd.f32 %v1736_v49, %v722_v32  ;;  %v597_v26 = vadd.f32 %v2075_v39, %v2382_v12  ;;  %v725_v22 = vadd.f32 %v2107_v28, %v2382_v12  ;;  %v588_v21 = vpop.f32.mrb[3].mxu0  ;;  %v716_v35 = vpop.f32.mrb[3].mxu1 }
  0xfd   : > { %v968_v36 = vadd.f32 %v1668_v50, %v586_v37  ;;  %v1000_v33 = vadd.f32 %v1732_v51, %v714_v38  ;;  %v589_v34 = vadd.f32 %v2382_v12, %v588_v21  ;;  %v717_v29 = vadd.f32 %v2382_v12, %v716_v35 }
  0xfe   : > { %v971_v48 = vadd.f32 %v1673_v53, %v597_v26  ;;  %v1003_v49 = vadd.f32 %v1737_v54, %v725_v22  ;;  %v1705_v28 = vunpack.c.h.bf16 %v2389_v17  ;;  %v1769_v31 = vunpack.c.h.bf16 %v2392_v18 }
  0xff   : > { %v969_v50 = vadd.f32 %v1669_v55, %v589_v34  ;;  %v1001_v51 = vadd.f32 %v1733_v56, %v717_v29  ;;  %v1701_v21 = vunpack.c.h.bf16 %v2399_v23  ;;  %v1765_v32 = vunpack.c.h.bf16 %v2402_v24 }
 0x100   : > { %v1034_v35 = vmax.f32 %v970_v27, 0.0  ;;  %v1066_v40 = vmax.f32 %v1002_v25, 0.0  ;;  %v1035_v53 = vmax.f32 %v971_v48, 0.0  ;;  %v1067_v37 = vmax.f32 %v1003_v49, 0.0 }
 0x101   : > { %v1032_v41 = vmax.f32 %v968_v36, 0.0  ;;  %v1064_v54 = vmax.f32 %v1000_v33, 0.0  ;;  %v1033_v42 = vmax.f32 %v969_v50, 0.0  ;;  %v1065_v55 = vmax.f32 %v1001_v51, 0.0  ;;  %v2078_v43 = vpop.f32.mrb[4].mxu0  ;;  %v2110_v56 = vpop.f32.mrb[4].mxu1 }
 0x102   : > { %v1802_v22 = vpack.c.bf16 %v1035_v53, %v1034_v35  ;;  %v1882_v27 = vpack.c.bf16 %v1067_v37, %v1066_v40  ;;  %v610_v29 = vadd.f32 %v2078_v43, %v2382_v12  ;;  %v738_v36 = vadd.f32 %v2110_v56, %v2382_v12  ;;  %v601_v38 = vpop.f32.mrb[5].mxu0  ;;  %v729_v39 = vpop.f32.mrb[5].mxu1  ;;  %v2447_v50 = vld [vmem:[%s2309_s14 + $0x58] sm:$0xff]  }
 0x103   : > { %v1797_v25 = vpack.c.bf16 %v1033_v42, %v1032_v41  ;;  %v1877_v26 = vpack.c.bf16 %v1065_v55, %v1064_v54  ;;  %v602_v33 = vadd.f32 %v2382_v12, %v601_v38  ;;  %v730_v34 = vadd.f32 %v2382_v12, %v729_v39  ;;  %v2079_v48 = vpop.f32.mrb[6].mxu0  ;;  %v2111_v49 = vpop.f32.mrb[6].mxu1  ;;  %v2450_v51 = vld [vmem:[%s2309_s14 + $0xd8] sm:$0xff]   ;;  %v2461_v42 = vld [vmem:[%s2309_s14 + $0x50] sm:$0xff]  }
 0x104   : > { %1985 = vst [vmem:[%s2440_s20 + $0x8] sm:$0xff] %v1802_v22   ;;  %2001 = vst [vmem:[%s2440_s20 + $0x88] sm:$0xff] %v1882_v27   ;;  %v974_v35 = vadd.f32 %v1680_v60, %v610_v29  ;;  %v1006_v40 = vadd.f32 %v1744_v61, %v738_v36  ;;  %v613_v53 = vadd.f32 %v2079_v48, %v2382_v12  ;;  %v604_v41 = vpop.f32.mrb[7].mxu0  ;;  %v732_v54 = vpop.f32.mrb[7].mxu1  ;;  %v2464_v55 = vld [vmem:[%s2309_s14 + $0xd0] sm:$0xff]   ;;  %v1712_v29 = vunpack.c.l.bf16 %v2447_v50 }
 0x105   : > { %v741_v37 = vadd.f32 %v2111_v49, %v2382_v12  ;;  %1798 = vst [vmem:[%s2440_s20] sm:$0xff] %v1797_v25   ;;  %2000 = vst [vmem:[%s2440_s20 + $0x80] sm:$0xff] %v1877_v26   ;;  %v972_v43 = vadd.f32 %v1676_v62, %v602_v33  ;;  %v1004_v60 = vadd.f32 %v1740_v63, %v730_v34  ;;  %v1776_v36 = vunpack.c.l.bf16 %v2450_v51 }
 0x106   : > { %v605_v61 = vadd.f32 %v2382_v12, %v604_v41  ;;  %v733_v56 = vadd.f32 %v2382_v12, %v732_v54  ;;  %v975_v22 = vadd.f32 %v1681_v1, %v613_v53  ;;  %v1708_v38 = vunpack.c.l.bf16 %v2461_v42 }
 0x107   : > { %v1007_v27 = vadd.f32 %v1745_v2, %v741_v37  ;;  %v1772_v39 = vunpack.c.l.bf16 %v2464_v55  ;;  %v1038_v25 = vmax.f32 %v974_v35, 0.0  ;;  %v1070_v44 = vmax.f32 %v1006_v40, 0.0 }
 0x108   : > { %v973_v62 = vadd.f32 %v1677_v3, %v605_v61  ;;  %v1005_v63 = vadd.f32 %v1741_v4, %v733_v56  ;;  %v1039_v1 = vmax.f32 %v975_v22, 0.0  ;;  %v1036_v45 = vmax.f32 %v972_v43, 0.0 }
 0x109   : > { %v1071_v26 = vmax.f32 %v1007_v27, 0.0  ;;  %v1068_v2 = vmax.f32 %v1004_v60, 0.0  ;;  %v2082_v48 = vpop.f32.mrb[8].mxu0  ;;  %v2114_v46 = vpop.f32.mrb[8].mxu1 }
 0x10a   : > { %v1037_v33 = vmax.f32 %v973_v62, 0.0  ;;  %v1069_v34 = vmax.f32 %v1005_v63, 0.0  ;;  %v1812_v3 = vpack.c.bf16 %v1039_v1, %v1038_v25  ;;  %v626_v47 = vadd.f32 %v2082_v48, %v2382_v12  ;;  %v617_v53 = vpop.f32.mrb[9].mxu0  ;;  %v745_v35 = vpop.f32.mrb[9].mxu1 }
 0x10b   : > { %v1892_v49 = vpack.c.bf16 %v1071_v26, %v1070_v44  ;;  %v754_v4 = vadd.f32 %v2114_v46, %v2382_v12  ;;  %v618_v41 = vadd.f32 %v2382_v12, %v617_v53  ;;  %v746_v54 = vadd.f32 %v2382_v12, %v745_v35  ;;  %v2083_v43 = vpop.f32.mrb[10].mxu0  ;;  %v2115_v60 = vpop.f32.mrb[10].mxu1 }
 0x10c   : > { %v1807_v40 = vpack.c.bf16 %v1037_v33, %v1036_v45  ;;  %v1887_v37 = vpack.c.bf16 %v1069_v34, %v1068_v2  ;;  %1987 = vst [vmem:[%s2440_s20 + $0x18] sm:$0xff] %v1812_v3   ;;  %v978_v61 = vadd.f32 %v1688_v8, %v626_v47  ;;  %v629_v22 = vadd.f32 %v2083_v43, %v2382_v12  ;;  %v620_v62 = vpop.f32.mrb[11].mxu0  ;;  %v748_v63 = vpop.f32.mrb[11].mxu1 }
 0x10d   : > { %2003 = vst [vmem:[%s2440_s20 + $0x98] sm:$0xff] %v1892_v49   ;;  %v1010_v56 = vadd.f32 %v1752_v9, %v754_v4  ;;  %v757_v27 = vadd.f32 %v2115_v60, %v2382_v12  ;;  %v976_v25 = vadd.f32 %v1684_v10, %v618_v41  ;;  %v1008_v44 = vadd.f32 %v1748_v11, %v746_v54 }
 0x10e   : > { %1986 = vst [vmem:[%s2440_s20 + $0x10] sm:$0xff] %v1807_v40   ;;  %2002 = vst [vmem:[%s2440_s20 + $0x90] sm:$0xff] %v1887_v37   ;;  %v621_v1 = vadd.f32 %v2382_v12, %v620_v62  ;;  %v749_v8 = vadd.f32 %v2382_v12, %v748_v63  ;;  %v979_v9 = vadd.f32 %v1689_v13, %v629_v22  ;;  %v1713_v45 = vunpack.c.h.bf16 %v2447_v50 }
 0x10f   : > { %v1011_v26 = vadd.f32 %v1753_v14, %v757_v27  ;;  %v1777_v2 = vunpack.c.h.bf16 %v2450_v51  ;;  %v1709_v33 = vunpack.c.h.bf16 %v2461_v42  ;;  %v1773_v34 = vunpack.c.h.bf16 %v2464_v55 }
 0x110   : > { %v977_v10 = vadd.f32 %v1685_v15, %v621_v1  ;;  %v1009_v11 = vadd.f32 %v1749_v16, %v749_v8  ;;  %v1042_v48 = vmax.f32 %v978_v61, 0.0  ;;  %v1074_v52 = vmax.f32 %v1010_v56, 0.0  ;;  %v2523_v61 = vld [vmem:[%s2309_s14 + $0x68] sm:$0xff]   ;;  %v2537_v1 = vld [vmem:[%s2309_s14 + $0x60] sm:$0xff]  }
 0x111   : > { %v1043_v13 = vmax.f32 %v979_v9, 0.0  ;;  %v1075_v46 = vmax.f32 %v1011_v26, 0.0  ;;  %v1040_v57 = vmax.f32 %v976_v25, 0.0  ;;  %v1072_v14 = vmax.f32 %v1008_v44, 0.0  ;;  %v2086_v47 = vpop.f32.mrb[12].mxu0  ;;  %v2118_v58 = vpop.f32.mrb[12].mxu1 }
 0x112   : > { %v1041_v3 = vmax.f32 %v977_v10, 0.0  ;;  %v1073_v49 = vmax.f32 %v1009_v11, 0.0  ;;  %v642_v16 = vadd.f32 %v2086_v47, %v2382_v12  ;;  %v770_v4 = vadd.f32 %v2118_v58, %v2382_v12  ;;  %v633_v53 = vpop.f32.mrb[13].mxu0  ;;  %v761_v35 = vpop.f32.mrb[13].mxu1  ;;  %v2526_v56 = vld [vmem:[%s2309_s14 + $0xe8] sm:$0xff]   ;;  %v2540_v8 = vld [vmem:[%s2309_s14 + $0xe0] sm:$0xff]  }
 0x113   : > { %v1822_v59 = vpack.c.bf16 %v1043_v13, %v1042_v48  ;;  %v1902_v15 = vpack.c.bf16 %v1075_v46, %v1074_v52  ;;  %v634_v41 = vadd.f32 %v2382_v12, %v633_v53  ;;  %v762_v54 = vadd.f32 %v2382_v12, %v761_v35  ;;  %v2087_v43 = vpop.f32.mrb[14].mxu0  ;;  %v2119_v60 = vpop.f32.mrb[14].mxu1 }
 0x114   : > { %v1817_v40 = vpack.c.bf16 %v1041_v3, %v1040_v57  ;;  %v1897_v37 = vpack.c.bf16 %v1073_v49, %v1072_v14  ;;  %v982_v22 = vadd.f32 %v1696_v19, %v642_v16  ;;  %v1014_v27 = vadd.f32 %v1760_v20, %v770_v4  ;;  %v636_v25 = vpop.f32.mrb[15].mxu0  ;;  %v764_v44 = vpop.f32.mrb[15].mxu1 }
 0x115   : > { %1989 = vst [vmem:[%s2440_s20 + $0x28] sm:$0xff] %v1822_v59   ;;  %2005 = vst [vmem:[%s2440_s20 + $0xa8] sm:$0xff] %v1902_v15   ;;  %v645_v62 = vadd.f32 %v2087_v43, %v2382_v12  ;;  %v773_v63 = vadd.f32 %v2119_v60, %v2382_v12  ;;  %v2702_v9 = vunpack.c.l.bf16 %v2370_v6  ;;  %v2703_v19 = vunpack.c.l.bf16 %v2373_v7 }
 0x116   : > { %1988 = vst [vmem:[%s2440_s20 + $0x20] sm:$0xff] %v1817_v40   ;;  %2004 = vst [vmem:[%s2440_s20 + $0xa0] sm:$0xff] %v1897_v37   ;;  %v637_v20 = vadd.f32 %v2382_v12, %v636_v25  ;;  %v765_v11 = vadd.f32 %v2382_v12, %v764_v44  ;;  %v2704_v48 = vunpack.c.h.bf16 %v2360_v0  ;;  %v2705_v13 = vunpack.c.h.bf16 %v2367_v5 }
 0x117   : > { %v980_v26 = vadd.f32 %v2702_v9, %v634_v41  ;;  %v1012_v10 = vadd.f32 %v2703_v19, %v762_v54  ;;  %v1720_v57 = vunpack.c.l.bf16 %v2523_v61  ;;  %v1784_v14 = vunpack.c.l.bf16 %v2526_v56 }
 0x118   : > { %v983_v52 = vadd.f32 %v2704_v48, %v645_v62  ;;  %v1015_v46 = vadd.f32 %v2705_v13, %v773_v63  ;;  %v2706_v3 = vunpack.c.h.bf16 %v2370_v6  ;;  %v2707_v47 = vunpack.c.h.bf16 %v2373_v7 }
 0x119   : > { %v1716_v59 = vunpack.c.l.bf16 %v2537_v1  ;;  %v1780_v15 = vunpack.c.l.bf16 %v2540_v8  ;;  %v1046_v16 = vmax.f32 %v982_v22, 0.0  ;;  %v1078_v0 = vmax.f32 %v1014_v27, 0.0  ;;  %v2090_v41 = vpop.f32.mrb[16].mxu0  ;;  %v2122_v6 = vpop.f32.mrb[16].mxu1 }
 0x11a   : > { %v981_v49 = vadd.f32 %v2706_v3, %v637_v20  ;;  %v1013_v58 = vadd.f32 %v2707_v47, %v765_v11  ;;  %v1047_v4 = vmax.f32 %v983_v52, 0.0  ;;  %v1079_v53 = vmax.f32 %v1015_v46, 0.0  ;;  %v649_v62 = vpop.f32.mrb[17].mxu0  ;;  %v777_v22 = vpop.f32.mrb[17].mxu1 }
 0x11b   : > { %v1044_v5 = vmax.f32 %v980_v26, 0.0  ;;  %v1076_v35 = vmax.f32 %v1012_v10, 0.0  ;;  %v658_v7 = vadd.f32 %v2090_v41, %v2382_v12  ;;  %v786_v60 = vadd.f32 %v2122_v6, %v2382_v12  ;;  %v2091_v9 = vpop.f32.mrb[18].mxu0  ;;  %v2123_v26 = vpop.f32.mrb[18].mxu1 }
 0x11c   : > { %v1045_v40 = vmax.f32 %v981_v49, 0.0  ;;  %v1077_v37 = vmax.f32 %v1013_v58, 0.0  ;;  %v1832_v54 = vpack.c.bf16 %v1047_v4, %v1046_v16  ;;  %v1912_v43 = vpack.c.bf16 %v1079_v53, %v1078_v0  ;;  %v652_v13 = vpop.f32.mrb[19].mxu0  ;;  %v780_v46 = vpop.f32.mrb[19].mxu1 }
 0x11d   : > { %v650_v25 = vadd.f32 %v2382_v12, %v649_v62  ;;  %v778_v44 = vadd.f32 %v2382_v12, %v777_v22  ;;  %v2708_v19 = vunpack.c.l.bf16 %v2389_v17  ;;  %v2709_v20 = vunpack.c.l.bf16 %v2392_v18 }
 0x11e   : > { %v1827_v27 = vpack.c.bf16 %v1045_v40, %v1044_v5  ;;  %v1907_v63 = vpack.c.bf16 %v1077_v37, %v1076_v35  ;;  %1991 = vst [vmem:[%s2440_s20 + $0x38] sm:$0xff] %v1832_v54   ;;  %2007 = vst [vmem:[%s2440_s20 + $0xb8] sm:$0xff] %v1912_v43   ;;  %v661_v48 = vadd.f32 %v2091_v9, %v2382_v12  ;;  %v2710_v3 = vunpack.c.l.bf16 %v2399_v23 }
 0x11f   : > { %v986_v10 = vadd.f32 %v2708_v19, %v658_v7  ;;  %v1018_v11 = vadd.f32 %v2709_v20, %v786_v60  ;;  %v789_v52 = vadd.f32 %v2123_v26, %v2382_v12  ;;  %v1016_v47 = vadd.f32 %v1764_v30, %v778_v44  ;;  %v2599_v19 = vld [vmem:[%s2309_s14 + $0x78] sm:$0xff]  }
 0x120   : > { %1990 = vst [vmem:[%s2440_s20 + $0x30] sm:$0xff] %v1827_v27   ;;  %2006 = vst [vmem:[%s2440_s20 + $0xb0] sm:$0xff] %v1907_v63   ;;  %v984_v49 = vadd.f32 %v2710_v3, %v650_v25  ;;  %v653_v58 = vadd.f32 %v2382_v12, %v652_v13  ;;  %v781_v16 = vadd.f32 %v2382_v12, %v780_v46  ;;  %v1721_v53 = vunpack.c.h.bf16 %v2523_v61  ;;  %v2613_v3 = vld [vmem:[%s2309_s14 + $0x70] sm:$0xff]  }
 0x121   : > { %v987_v0 = vadd.f32 %v1705_v28, %v661_v48  ;;  %v1019_v4 = vadd.f32 %v1769_v31, %v789_v52  ;;  %v1785_v5 = vunpack.c.h.bf16 %v2526_v56  ;;  %v1717_v40 = vunpack.c.h.bf16 %v2537_v1  ;;  %v2094_v7 = vpop.f32.mrb[20].mxu0  ;;  %v2126_v23 = vpop.f32.mrb[20].mxu1 }
 0x122   : > { %v985_v35 = vadd.f32 %v1701_v21, %v653_v58  ;;  %v1017_v30 = vadd.f32 %v1765_v32, %v781_v16  ;;  %v1781_v37 = vunpack.c.h.bf16 %v2540_v8  ;;  %v1050_v41 = vmax.f32 %v986_v10, 0.0  ;;  %v665_v62 = vpop.f32.mrb[21].mxu0  ;;  %v793_v22 = vpop.f32.mrb[21].mxu1  ;;  %v2602_v10 = vld [vmem:[%s2309_s14 + $0xf8] sm:$0xff]  }
 0x123   : > { %v1082_v17 = vmax.f32 %v1018_v11, 0.0  ;;  %v1051_v28 = vmax.f32 %v987_v0, 0.0  ;;  %v1083_v6 = vmax.f32 %v1019_v4, 0.0  ;;  %v1048_v18 = vmax.f32 %v984_v49, 0.0  ;;  %v2095_v9 = vpop.f32.mrb[22].mxu0  ;;  %v2127_v26 = vpop.f32.mrb[22].mxu1 }
 0x124   : > { %v1080_v31 = vmax.f32 %v1016_v47, 0.0  ;;  %v1049_v54 = vmax.f32 %v985_v35, 0.0  ;;  %v1081_v43 = vmax.f32 %v1017_v30, 0.0  ;;  %v674_v32 = vadd.f32 %v2094_v7, %v2382_v12  ;;  %v668_v13 = vpop.f32.mrb[23].mxu0  ;;  %v796_v46 = vpop.f32.mrb[23].mxu1  ;;  %v2616_v49 = vld [vmem:[%s2309_s14 + $0xf0] sm:$0xff]  }
 0x125   : > { %v1842_v24 = vpack.c.bf16 %v1051_v28, %v1050_v41  ;;  %v1922_v21 = vpack.c.bf16 %v1083_v6, %v1082_v17  ;;  %v802_v60 = vadd.f32 %v2126_v23, %v2382_v12  ;;  %v666_v25 = vadd.f32 %v2382_v12, %v665_v62 }
 0x126   : > { %v1837_v27 = vpack.c.bf16 %v1049_v54, %v1048_v18  ;;  %v1917_v63 = vpack.c.bf16 %v1081_v43, %v1080_v31  ;;  %v794_v44 = vadd.f32 %v2382_v12, %v793_v22  ;;  %v990_v20 = vadd.f32 %v1712_v29, %v674_v32 }
 0x127   : > { %1993 = vst [vmem:[%s2440_s20 + $0x48] sm:$0xff] %v1842_v24   ;;  %2009 = vst [vmem:[%s2440_s20 + $0xc8] sm:$0xff] %v1922_v21   ;;  %v1022_v11 = vadd.f32 %v1776_v36, %v802_v60  ;;  %v677_v48 = vadd.f32 %v2095_v9, %v2382_v12  ;;  %v805_v52 = vadd.f32 %v2127_v26, %v2382_v12  ;;  %v1728_v4 = vunpack.c.l.bf16 %v2599_v19 }
 0x128   : > { %1992 = vst [vmem:[%s2440_s20 + $0x40] sm:$0xff] %v1837_v27   ;;  %2008 = vst [vmem:[%s2440_s20 + $0xc0] sm:$0xff] %v1917_v63   ;;  %v988_v47 = vadd.f32 %v1708_v38, %v666_v25  ;;  %v1020_v29 = vadd.f32 %v1772_v39, %v794_v44  ;;  %v669_v36 = vadd.f32 %v2382_v12, %v668_v13  ;;  %v1792_v35 = vunpack.c.l.bf16 %v2602_v10 }
 0x129   : > { %v797_v58 = vadd.f32 %v2382_v12, %v796_v46  ;;  %v991_v16 = vadd.f32 %v1713_v45, %v677_v48  ;;  %v1023_v0 = vadd.f32 %v1777_v2, %v805_v52  ;;  %v1724_v30 = vunpack.c.l.bf16 %v2613_v3  ;;  %v2098_v31 = vpop.f32.mrb[24].mxu0  ;;  %v2130_v42 = vpop.f32.mrb[24].mxu1 }
 0x12a   : > { %v989_v38 = vadd.f32 %v1709_v33, %v669_v36  ;;  %v1788_v41 = vunpack.c.l.bf16 %v2616_v49  ;;  %v1054_v17 = vmax.f32 %v990_v20, 0.0  ;;  %v1086_v50 = vmax.f32 %v1022_v11, 0.0  ;;  %v681_v43 = vpop.f32.mrb[25].mxu0  ;;  %v809_v7 = vpop.f32.mrb[25].mxu1 }
 0x12b   : > { %v1021_v39 = vadd.f32 %v1773_v34, %v797_v58  ;;  %v1055_v45 = vmax.f32 %v991_v16, 0.0  ;;  %v1087_v28 = vmax.f32 %v1023_v0, 0.0  ;;  %v1052_v51 = vmax.f32 %v988_v47, 0.0  ;;  %v2099_v60 = vpop.f32.mrb[26].mxu0  ;;  %v2131_v62 = vpop.f32.mrb[26].mxu1 }
 0x12c   : > { %v1084_v2 = vmax.f32 %v1020_v29, 0.0  ;;  %v1053_v6 = vmax.f32 %v989_v38, 0.0  ;;  %v690_v55 = vadd.f32 %v2098_v31, %v2382_v12  ;;  %v818_v34 = vadd.f32 %v2130_v42, %v2382_v12  ;;  %v684_v44 = vpop.f32.mrb[27].mxu0  ;;  %v812_v9 = vpop.f32.mrb[27].mxu1 }
 0x12d   : > { %v1085_v18 = vmax.f32 %v1021_v39, 0.0  ;;  %v1852_v33 = vpack.c.bf16 %v1055_v45, %v1054_v17  ;;  %v1932_v54 = vpack.c.bf16 %v1087_v28, %v1086_v50  ;;  %v682_v21 = vadd.f32 %v2382_v12, %v681_v43 }
 0x12e   : > { %v1847_v23 = vpack.c.bf16 %v1053_v6, %v1052_v51  ;;  %v810_v32 = vadd.f32 %v2382_v12, %v809_v7  ;;  %v994_v22 = vadd.f32 %v1720_v57, %v690_v55  ;;  %v1026_v27 = vadd.f32 %v1784_v14, %v818_v34 }
 0x12f   : > { %v1927_v24 = vpack.c.bf16 %v1085_v18, %v1084_v2  ;;  %1995 = vst [vmem:[%s2440_s20 + $0x58] sm:$0xff] %v1852_v33   ;;  %2011 = vst [vmem:[%s2440_s20 + $0xd8] sm:$0xff] %v1932_v54   ;;  %v693_v63 = vadd.f32 %v2099_v60, %v2382_v12  ;;  %v821_v25 = vadd.f32 %v2131_v62, %v2382_v12  ;;  %v1729_v52 = vunpack.c.h.bf16 %v2599_v19 }
 0x130   : > { %1994 = vst [vmem:[%s2440_s20 + $0x50] sm:$0xff] %v1847_v23   ;;  %v992_v26 = vadd.f32 %v1716_v59, %v682_v21  ;;  %v1024_v20 = vadd.f32 %v1780_v15, %v810_v32  ;;  %v685_v11 = vadd.f32 %v2382_v12, %v684_v44  ;;  %v813_v57 = vadd.f32 %v2382_v12, %v812_v9 }
 0x131   : > { %2010 = vst [vmem:[%s2440_s20 + $0xd0] sm:$0xff] %v1927_v24   ;;  %v995_v14 = vadd.f32 %v1721_v53, %v693_v63  ;;  %v1027_v48 = vadd.f32 %v1785_v5, %v821_v25  ;;  %v1793_v13 = vunpack.c.h.bf16 %v2602_v10  ;;  %v1725_v46 = vunpack.c.h.bf16 %v2613_v3  ;;  %v2102_v0 = vpop.f32.mrb[28].mxu0  ;;  %v2134_v1 = vpop.f32.mrb[28].mxu1 }
 0x132   : > { %v993_v59 = vadd.f32 %v1717_v40, %v685_v11  ;;  %v1025_v15 = vadd.f32 %v1781_v37, %v813_v57  ;;  %v1789_v47 = vunpack.c.h.bf16 %v2616_v49  ;;  %v1058_v29 = vmax.f32 %v994_v22, 0.0  ;;  %v697_v39 = vpop.f32.mrb[29].mxu0  ;;  %v825_v17 = vpop.f32.mrb[29].mxu1 }
 0x133   : > { %v1090_v61 = vmax.f32 %v1026_v27, 0.0  ;;  %v1059_v53 = vmax.f32 %v995_v14, 0.0  ;;  %v1091_v36 = vmax.f32 %v1027_v48, 0.0  ;;  %v1056_v56 = vmax.f32 %v992_v26, 0.0  ;;  %v2103_v2 = vpop.f32.mrb[30].mxu0  ;;  %v2135_v6 = vpop.f32.mrb[30].mxu1 }
 0x134   : > { %v1088_v5 = vmax.f32 %v1024_v20, 0.0  ;;  %v1057_v58 = vmax.f32 %v993_v59, 0.0  ;;  %v1089_v16 = vmax.f32 %v1025_v15, 0.0  ;;  %v706_v8 = vadd.f32 %v2102_v0, %v2382_v12  ;;  %v700_v54 = vpop.f32.mrb[31].mxu0  ;;  %v828_v55 = vpop.f32.mrb[31].mxu1 }
 0x135   : > { %v1862_v40 = vpack.c.bf16 %v1059_v53, %v1058_v29  ;;  %v1942_v38 = vpack.c.bf16 %v1091_v36, %v1090_v61  ;;  %v834_v37 = vadd.f32 %v2134_v1, %v2382_v12  ;;  %v698_v28 = vadd.f32 %v2382_v12, %v697_v39 }
 0x136   : > { %v1857_v50 = vpack.c.bf16 %v1057_v58, %v1056_v56  ;;  %v1937_v45 = vpack.c.bf16 %v1089_v16, %v1088_v5  ;;  %v826_v51 = vadd.f32 %v2382_v12, %v825_v17  ;;  %v998_v18 = vadd.f32 %v1728_v4, %v706_v8 }
 0x137   : > { %1997 = vst [vmem:[%s2440_s20 + $0x68] sm:$0xff] %v1862_v40   ;;  %2013 = vst [vmem:[%s2440_s20 + $0xe8] sm:$0xff] %v1942_v38   ;;  %v1030_v31 = vadd.f32 %v1792_v35, %v834_v37  ;;  %v709_v42 = vadd.f32 %v2103_v2, %v2382_v12  ;;  %v837_v33 = vadd.f32 %v2135_v6, %v2382_v12 }
 0x138   : > { %1996 = vst [vmem:[%s2440_s20 + $0x60] sm:$0xff] %v1857_v50   ;;  %2012 = vst [vmem:[%s2440_s20 + $0xe0] sm:$0xff] %v1937_v45   ;;  %v996_v34 = vadd.f32 %v1724_v30, %v698_v28  ;;  %v1028_v43 = vadd.f32 %v1788_v41, %v826_v51  ;;  %v701_v19 = vadd.f32 %v2382_v12, %v700_v54  ;;  %v1062_v24 = vmax.f32 %v998_v18, 0.0 }
 0x139   : > { %v829_v4 = vadd.f32 %v2382_v12, %v828_v55  ;;  %v999_v10 = vadd.f32 %v1729_v52, %v709_v42  ;;  %v1031_v35 = vadd.f32 %v1793_v13, %v837_v33  ;;  %v1094_v21 = vmax.f32 %v1030_v31, 0.0 }
 0x13a   : > { %v997_v7 = vadd.f32 %v1725_v46, %v701_v19  ;;  %v1060_v30 = vmax.f32 %v996_v34, 0.0  ;;  %v1092_v60 = vmax.f32 %v1028_v43, 0.0 }
 0x13b   : > { %v1029_v23 = vadd.f32 %v1789_v47, %v829_v4  ;;  %v1063_v32 = vmax.f32 %v999_v10, 0.0  ;;  %v1095_v3 = vmax.f32 %v1031_v35, 0.0 }
 0x13c   : > { %v1061_v49 = vmax.f32 %v997_v7, 0.0 }
 0x13d   : > { %v1093_v41 = vmax.f32 %v1029_v23, 0.0  ;;  %v1872_v62 = vpack.c.bf16 %v1063_v32, %v1062_v24  ;;  %v1952_v22 = vpack.c.bf16 %v1095_v3, %v1094_v21 }
 0x13e   : > { %v1867_v27 = vpack.c.bf16 %v1061_v49, %v1060_v30 }
 0x13f   : > { %v1947_v12 = vpack.c.bf16 %v1093_v41, %v1092_v60  ;;  %1999 = vst [vmem:[%s2440_s20 + $0x78] sm:$0xff] %v1872_v62   ;;  %2015 = vst [vmem:[%s2440_s20 + $0xf8] sm:$0xff] %v1952_v22  }
 0x140   : > { %1998 = vst [vmem:[%s2440_s20 + $0x70] sm:$0xff] %v1867_v27  }
 0x141   : > { %2014 = vst [vmem:[%s2440_s20 + $0xf0] sm:$0xff] %v1947_v12  }
 0x142 PF: > { %s14_s15 = sadd.s32 1, %s2206_s15  }
 0x143   : > { %p11_p4 = scmp.ge.s32.totalorder %s14_s15, 5  }
 0x145   :  { %13 = sbr.rel (!%p11_p4) target bundleno = 1 (0x1), region = 69 }

// kernel: forward.17
= control target key start
LH: loop header
LB: loop body
LE: loop exit
PB: predicated region body
PF: predicated region fallthrough
CT: control target
= control target key end

     0   :  { %s766_s12 = smov 0   ;;  %s837_s0 = inlined_call_operand.vmem [shape: bf16[384,128], index: 0, kind: input, shape index: {}]   ;;  %s838_s1 = inlined_call_operand.vmem [shape: bf16[128,128], index: 1, kind: input, shape index: {}]   ;;  %s839_s2 = inlined_call_operand.vmem [shape: f32[1,128], index: 2, kind: input, shape index: {}]   ;;  %s840_s3 = inlined_call_operand.vmem [shape: bf16[384,128], index: 3, kind: output, shape index: {}]  }
   0x1 LB: > { %s543_s13 = sadd.s32 4294967295, %s744_s12   ;;  %p547_p0 = scmp.ge.s32.totalorder %s744_s12, 1  ;;  %s744_s12 = sphi %s766_s12, %s13_s12  }
   0x2   : > { %p138_p1 = scmp.lt.s32.totalorder %s744_s12, 4 }
   0x4   : > { %p139_p2 = pnand %p547_p0, %p138_p1 }
   0x5   : > { %v722_v0 = vld [vmem:[%s838_s1] sm:$0xff] (!%p139_p2)   ;;  %s548_s16 = sshll.u32 (!%p139_p2), %s543_s13, 4  ;;  %v723_v1 = vld [vmem:[%s838_s1 + $0x8] sm:$0xff] (!%p139_p2)   ;;  %v724_v2 = vld [vmem:[%s838_s1 + $0x10] sm:$0xff] (!%p139_p2)  }
   0x6   : > { %142 = sbr.rel (%p139_p2) target bundleno = 266 (0x10a), region = 32  ;;  %p163_p3 = scmp.lt.s32.totalorder (!%p139_p2), %s548_s16, 47  ;;  %666 = vmatprep.subr.bf16.mxu0 (!%p139_p2), %v722_v0  ;;  %698 = vmatprep.subr.bf16.mxu1 (!%p139_p2), %v722_v0  ;;  %v725_v3 = vld [vmem:[%s838_s1 + $0x18] sm:$0xff] (!%p139_p2)   ;;  %v726_v6 = vld [vmem:[%s838_s1 + $0x20] sm:$0xff] (!%p139_p2)   ;;  %v727_v7 = vld [vmem:[%s838_s1 + $0x28] sm:$0xff] (!%p139_p2)  }
   0x7   : > { %667 = vmatpush3.bf16.msra.mxu0 (!%p139_p2), %v722_v0  ;;  %706 = vmatpush3.bf16.msra.mxu1 (!%p139_p2), %v722_v0  ;;  %v728_v8 = vld [vmem:[%s838_s1 + $0x30] sm:$0xff] (!%p139_p2)   ;;  %v729_v9 = vld [vmem:[%s838_s1 + $0x38] sm:$0xff] (!%p139_p2)   ;;  %v552_v17 = vld [vmem:[%s839_s2] ss:$0 sm:$0xff] (!%p139_p2) }
   0x8   : > { %668 = vmatprep.subr.bf16.mxu0 (!%p139_p2), %v723_v1  ;;  %699 = vmatprep.subr.bf16.mxu1 (!%p139_p2), %v723_v1 }
   0xb   : > { %669 = vmatpush3.bf16.msra.mxu0 (!%p139_p2), %v723_v1  ;;  %707 = vmatpush3.bf16.msra.mxu1 (!%p139_p2), %v723_v1 }
   0xc   : > { %670 = vmatprep.subr.bf16.mxu0 (!%p139_p2), %v724_v2  ;;  %700 = vmatprep.subr.bf16.mxu1 (!%p139_p2), %v724_v2 }
   0xd   : > { %s842_s16 = smov (!%p163_p3, %s548_s16), 47 }
   0xe   : > { %s549_s21 = sshll.u32 %s842_s16, 2 }
   0xf   : > { %s791_s24 = scalar_lea.vmem %s837_s0, %s549_s21  ;;  %671 = vmatpush3.bf16.msra.mxu0 %v724_v2  ;;  %708 = vmatpush3.bf16.msra.mxu1 %v724_v2  ;;  %s824_s13 = scalar_lea.vmem %s840_s3, %s549_s21 }
  0x10   : > { %v730_v4 = vld [vmem:[%s791_s24] sm:$0xff]   ;;  %672 = vmatprep.subr.bf16.mxu0 %v725_v3  ;;  %701 = vmatprep.subr.bf16.mxu1 %v725_v3  ;;  %v732_v10 = vld [vmem:[%s791_s24 + $0x8] sm:$0xff]   ;;  %v734_v12 = vld [vmem:[%s791_s24 + $0x10] sm:$0xff]  }
  0x11   : > { %v731_v5 = vld [vmem:[%s791_s24 + $0x20] sm:$0xff]   ;;  %682 = vmatprep.mubr.bf16.mxu0 %v730_v4  ;;  %v733_v11 = vld [vmem:[%s791_s24 + $0x28] sm:$0xff]   ;;  %v735_v13 = vld [vmem:[%s791_s24 + $0x30] sm:$0xff]  }
  0x12   : > { %690 = vmatprep.mubr.bf16.mxu1 %v731_v5  ;;  %v736_v14 = vld [vmem:[%s791_s24 + $0x18] sm:$0xff]  }
  0x13   : > { %673 = vmatpush3.bf16.msra.mxu0 %v725_v3  ;;  %709 = vmatpush3.bf16.msra.mxu1 %v725_v3  ;;  %v737_v15 = vld [vmem:[%s791_s24 + $0x38] sm:$0xff]  }
  0x14   : > { %674 = vmatprep.subr.bf16.mxu0 %v726_v6  ;;  %702 = vmatprep.subr.bf16.mxu1 %v726_v6 }
  0x17   : > { %675 = vmatpush3.bf16.msra.mxu0 %v726_v6  ;;  %710 = vmatpush3.bf16.msra.mxu1 %v726_v6 }
  0x18   : > { %676 = vmatprep.subr.bf16.mxu0 %v727_v7  ;;  %703 = vmatprep.subr.bf16.mxu1 %v727_v7 }
  0x1b   : > { %677 = vmatpush3.bf16.msra.mxu0 %v727_v7  ;;  %711 = vmatpush3.bf16.msra.mxu1 %v727_v7 }
  0x1c   : > { %678 = vmatprep.subr.bf16.mxu0 %v728_v8  ;;  %704 = vmatprep.subr.bf16.mxu1 %v728_v8 }
  0x1f   : > { %679 = vmatpush3.bf16.msra.mxu0 %v728_v8  ;;  %712 = vmatpush3.bf16.msra.mxu1 %v728_v8 }
  0x20   : > { %680 = vmatprep.subr.bf16.mxu0 %v729_v9  ;;  %705 = vmatprep.subr.bf16.mxu1 %v729_v9 }
  0x23   : > { %681 = vmatpush3.bf16.msra.mxu0 %v729_v9  ;;  %713 = vmatpush3.bf16.msra.mxu1 %v729_v9 }
  0x26   : > { %683 = vmatmul.mubr.bf16.vlgmr.msra.gmra.mrb[0].mxu0 %v732_v10  ;;  %691 = vmatmul.mubr.bf16.vlgmr.msra.gmra.mrb[0].mxu1 %v733_v11 }
  0x27   : > { %686 = vmatprep.mubr.bf16.mxu0 %v734_v12  ;;  %694 = vmatprep.mubr.bf16.mxu1 %v735_v13 }
  0x2e   : > { %687 = vmatmul.mubr.bf16.gmra.mrb[4].mxu0 %v736_v14  ;;  %695 = vmatmul.mubr.bf16.gmra.mrb[4].mxu1 %v737_v15 }
  0xf9   : > { %v684_v16 = vpop.f32.mrb[0].mxu0  ;;  %v692_v18 = vpop.f32.mrb[0].mxu1 }
  0xfa   : > { %v344_v19 = vpop.f32.mrb[1].mxu0  ;;  %v376_v20 = vpop.f32.mrb[1].mxu1  ;;  %v353_v23 = vadd.f32 %v684_v16, %v552_v17  ;;  %v385_v24 = vadd.f32 %v692_v18, %v552_v17 }
  0xfb   : > { %v685_v21 = vpop.f32.mrb[2].mxu0  ;;  %v693_v22 = vpop.f32.mrb[2].mxu1  ;;  %v345_v29 = vadd.f32 %v552_v17, %v344_v19  ;;  %v377_v30 = vadd.f32 %v552_v17, %v376_v20 }
  0xfc   : > { %v356_v25 = vadd.f32 %v685_v21, %v552_v17  ;;  %v388_v26 = vadd.f32 %v693_v22, %v552_v17  ;;  %v347_v27 = vpop.f32.mrb[3].mxu0  ;;  %v379_v28 = vpop.f32.mrb[3].mxu1 }
  0xfd   : > { %v348_v31 = vadd.f32 %v552_v17, %v347_v27  ;;  %v380_v32 = vadd.f32 %v552_v17, %v379_v28 }
  0xfe   : > { %v611_v33 = vpack.c.bf16 %v356_v25, %v353_v23  ;;  %v631_v34 = vpack.c.bf16 %v388_v26, %v385_v24 }
  0xff   : > { %v606_v35 = vpack.c.bf16 %v348_v31, %v345_v29  ;;  %v626_v36 = vpack.c.bf16 %v380_v32, %v377_v30 }
 0x100   : > { %643 = vst [vmem:[%s824_s13 + $0x8] sm:$0xff] %v611_v33   ;;  %647 = vst [vmem:[%s824_s13 + $0x28] sm:$0xff] %v631_v34  }
 0x101   : > { %607 = vst [vmem:[%s824_s13] sm:$0xff] %v606_v35   ;;  %646 = vst [vmem:[%s824_s13 + $0x20] sm:$0xff] %v626_v36   ;;  %v688_v37 = vpop.f32.mrb[4].mxu0  ;;  %v696_v38 = vpop.f32.mrb[4].mxu1 }
 0x102   : > { %v360_v39 = vpop.f32.mrb[5].mxu0  ;;  %v392_v40 = vpop.f32.mrb[5].mxu1  ;;  %v369_v43 = vadd.f32 %v688_v37, %v552_v17  ;;  %v401_v44 = vadd.f32 %v696_v38, %v552_v17 }
 0x103   : > { %v689_v41 = vpop.f32.mrb[6].mxu0  ;;  %v697_v42 = vpop.f32.mrb[6].mxu1  ;;  %v361_v49 = vadd.f32 %v552_v17, %v360_v39  ;;  %v393_v50 = vadd.f32 %v552_v17, %v392_v40 }
 0x104   : > { %v372_v45 = vadd.f32 %v689_v41, %v552_v17  ;;  %v404_v46 = vadd.f32 %v697_v42, %v552_v17  ;;  %v363_v47 = vpop.f32.mrb[7].mxu0  ;;  %v395_v48 = vpop.f32.mrb[7].mxu1 }
 0x105   : > { %v364_v51 = vadd.f32 %v552_v17, %v363_v47  ;;  %v396_v52 = vadd.f32 %v552_v17, %v395_v48 }
 0x106   : > { %v621_v53 = vpack.c.bf16 %v372_v45, %v369_v43  ;;  %v641_v54 = vpack.c.bf16 %v404_v46, %v401_v44 }
 0x107   : > { %v616_v55 = vpack.c.bf16 %v364_v51, %v361_v49  ;;  %v636_v56 = vpack.c.bf16 %v396_v52, %v393_v50 }
 0x108   : > { %645 = vst [vmem:[%s824_s13 + $0x18] sm:$0xff] %v621_v53   ;;  %649 = vst [vmem:[%s824_s13 + $0x38] sm:$0xff] %v641_v54  }
 0x109   : > { %644 = vst [vmem:[%s824_s13 + $0x10] sm:$0xff] %v616_v55   ;;  %648 = vst [vmem:[%s824_s13 + $0x30] sm:$0xff] %v636_v56  }
 0x10a PF: > { %s13_s12 = sadd.s32 1, %s744_s12  }
 0x10b   : > { %p10_p4 = scmp.ge.s32.totalorder %s13_s12, 5  }
 0x10d   :  { %12 = sbr.rel (!%p10_p4) target bundleno = 1 (0x1), region = 62 }

// kernel: forward.20
= control target key start
LH: loop header
LB: loop body
LE: loop exit
PB: predicated region body
PF: predicated region fallthrough
CT: control target
= control target key end

     0   :  { %s937_s15 = smov 0   ;;  %s1043_s0 = inlined_call_operand.vmem [shape: bf16[384,128], index: 0, kind: input, shape index: {}]   ;;  %s1044_s1 = inlined_call_operand.vmem [shape: bf16[128,128], index: 1, kind: input, shape index: {}]   ;;  %s1045_s2 = inlined_call_operand.vmem [shape: f32[1,128], index: 2, kind: input, shape index: {}]   ;;  %s1046_s3 = inlined_call_operand.vmem [shape: bf16[384,128], index: 3, kind: input, shape index: {}]   ;;  %s1047_s4 = inlined_call_operand.vmem [shape: bf16[384,128], index: 4, kind: output, shape index: {}]  }
   0x1 LB: > { %s668_s16 = sadd.s32 4294967295, %s910_s15   ;;  %p672_p0 = scmp.ge.s32.totalorder %s910_s15, 1  ;;  %s910_s15 = sphi %s937_s15, %s14_s15  }
   0x2   : > { %p174_p1 = scmp.lt.s32.totalorder %s910_s15, 4 }
   0x4   : > { %p175_p2 = pnand %p672_p0, %p174_p1 }
   0x5   : > { %v888_v0 = vld [vmem:[%s1044_s1] sm:$0xff] (!%p175_p2)   ;;  %s673_s19 = sshll.u32 (!%p175_p2), %s668_s16, 4  ;;  %v889_v1 = vld [vmem:[%s1044_s1 + $0x8] sm:$0xff] (!%p175_p2)   ;;  %v890_v2 = vld [vmem:[%s1044_s1 + $0x10] sm:$0xff] (!%p175_p2)  }
   0x6   : > { %178 = sbr.rel (%p175_p2) target bundleno = 271 (0x10f), region = 36  ;;  %p206_p3 = scmp.lt.s32.totalorder (!%p175_p2), %s673_s19, 47  ;;  %832 = vmatprep.subr.bf16.mxu0 (!%p175_p2), %v888_v0  ;;  %864 = vmatprep.subr.bf16.mxu1 (!%p175_p2), %v888_v0  ;;  %v891_v3 = vld [vmem:[%s1044_s1 + $0x18] sm:$0xff] (!%p175_p2)   ;;  %v892_v6 = vld [vmem:[%s1044_s1 + $0x20] sm:$0xff] (!%p175_p2)   ;;  %v893_v7 = vld [vmem:[%s1044_s1 + $0x28] sm:$0xff] (!%p175_p2)  }
   0x7   : > { %833 = vmatpush3.bf16.msra.mxu0 (!%p175_p2), %v888_v0  ;;  %872 = vmatpush3.bf16.msra.mxu1 (!%p175_p2), %v888_v0  ;;  %v894_v8 = vld [vmem:[%s1044_s1 + $0x30] sm:$0xff] (!%p175_p2)   ;;  %v895_v9 = vld [vmem:[%s1044_s1 + $0x38] sm:$0xff] (!%p175_p2)   ;;  %v992_v20 = vld [vmem:[%s1045_s2] ss:$0 sm:$0xff] (!%p175_p2) }
   0x8   : > { %834 = vmatprep.subr.bf16.mxu0 (!%p175_p2), %v889_v1  ;;  %865 = vmatprep.subr.bf16.mxu1 (!%p175_p2), %v889_v1 }
   0xb   : > { %835 = vmatpush3.bf16.msra.mxu0 (!%p175_p2), %v889_v1  ;;  %873 = vmatpush3.bf16.msra.mxu1 (!%p175_p2), %v889_v1 }
   0xc   : > { %836 = vmatprep.subr.bf16.mxu0 (!%p175_p2), %v890_v2  ;;  %866 = vmatprep.subr.bf16.mxu1 (!%p175_p2), %v890_v2 }
   0xd   : > { %s1049_s19 = smov (!%p206_p3, %s673_s19), 47 }
   0xe   : > { %s954_s24 = sshll.u32 %s1049_s19, 2 }
   0xf   : > { %s960_s27 = scalar_lea.vmem %s1043_s0, %s954_s24  ;;  %837 = vmatpush3.bf16.msra.mxu0 %v890_v2  ;;  %874 = vmatpush3.bf16.msra.mxu1 %v890_v2  ;;  %s215_s14 = scalar_lea.vmem %s1046_s3, %s954_s24 }
  0x10   : > { %v896_v4 = vld [vmem:[%s960_s27] sm:$0xff]   ;;  %838 = vmatprep.subr.bf16.mxu0 %v891_v3  ;;  %867 = vmatprep.subr.bf16.mxu1 %v891_v3  ;;  %v898_v10 = vld [vmem:[%s960_s27 + $0x8] sm:$0xff]   ;;  %v900_v12 = vld [vmem:[%s960_s27 + $0x10] sm:$0xff]   ;;  %s1022_s20 = scalar_lea.vmem %s1047_s4, %s954_s24 }
  0x11   : > { %v897_v5 = vld [vmem:[%s960_s27 + $0x20] sm:$0xff]   ;;  %848 = vmatprep.mubr.bf16.mxu0 %v896_v4  ;;  %v899_v11 = vld [vmem:[%s960_s27 + $0x28] sm:$0xff]   ;;  %v901_v13 = vld [vmem:[%s960_s27 + $0x30] sm:$0xff]  }
  0x12   : > { %856 = vmatprep.mubr.bf16.mxu1 %v897_v5  ;;  %v902_v14 = vld [vmem:[%s960_s27 + $0x18] sm:$0xff]   ;;  %v802_v16 = vld [vmem:[%s215_s14 + $0x8] sm:$0xff]   ;;  %v731_v18 = vld [vmem:[%s215_s14] sm:$0xff]  }
  0x13   : > { %839 = vmatpush3.bf16.msra.mxu0 %v891_v3  ;;  %875 = vmatpush3.bf16.msra.mxu1 %v891_v3  ;;  %v903_v15 = vld [vmem:[%s960_s27 + $0x38] sm:$0xff]   ;;  %v806_v17 = vld [vmem:[%s215_s14 + $0x28] sm:$0xff]   ;;  %v805_v19 = vld [vmem:[%s215_s14 + $0x20] sm:$0xff]   ;;  %v736_v23 = vunpack.c.l.bf16 %v802_v16  ;;  %v732_v25 = vunpack.c.l.bf16 %v731_v18  ;;  %v737_v31 = vunpack.c.h.bf16 %v802_v16  ;;  %v733_v33 = vunpack.c.h.bf16 %v731_v18 }
  0x14   : > { %840 = vmatprep.subr.bf16.mxu0 %v892_v6  ;;  %868 = vmatprep.subr.bf16.mxu1 %v892_v6  ;;  %v994_v21 = vld [vmem:[%s215_s14 + $0x18] sm:$0xff]   ;;  %v752_v24 = vunpack.c.l.bf16 %v806_v17  ;;  %v748_v26 = vunpack.c.l.bf16 %v805_v19  ;;  %v998_v27 = vld [vmem:[%s215_s14 + $0x10] sm:$0xff]   ;;  %v753_v32 = vunpack.c.h.bf16 %v806_v17  ;;  %v749_v34 = vunpack.c.h.bf16 %v805_v19 }
  0x15   : > { %v996_v22 = vld [vmem:[%s215_s14 + $0x38] sm:$0xff]   ;;  %v1000_v28 = vld [vmem:[%s215_s14 + $0x30] sm:$0xff]   ;;  %v744_v39 = vunpack.c.l.bf16 %v994_v21  ;;  %v740_v45 = vunpack.c.l.bf16 %v998_v27  ;;  %v745_v59 = vunpack.c.h.bf16 %v994_v21  ;;  %v741_v63 = vunpack.c.h.bf16 %v998_v27 }
  0x16   : > { %v760_v40 = vunpack.c.l.bf16 %v996_v22  ;;  %v756_v46 = vunpack.c.l.bf16 %v1000_v28  ;;  %v761_v60 = vunpack.c.h.bf16 %v996_v22  ;;  %v757_v0 = vunpack.c.h.bf16 %v1000_v28 }
  0x17   : > { %841 = vmatpush3.bf16.msra.mxu0 %v892_v6  ;;  %876 = vmatpush3.bf16.msra.mxu1 %v892_v6 }
  0x18   : > { %842 = vmatprep.subr.bf16.mxu0 %v893_v7  ;;  %869 = vmatprep.subr.bf16.mxu1 %v893_v7 }
  0x1b   : > { %843 = vmatpush3.bf16.msra.mxu0 %v893_v7  ;;  %877 = vmatpush3.bf16.msra.mxu1 %v893_v7 }
  0x1c   : > { %844 = vmatprep.subr.bf16.mxu0 %v894_v8  ;;  %870 = vmatprep.subr.bf16.mxu1 %v894_v8 }
  0x1f   : > { %845 = vmatpush3.bf16.msra.mxu0 %v894_v8  ;;  %878 = vmatpush3.bf16.msra.mxu1 %v894_v8 }
  0x20   : > { %846 = vmatprep.subr.bf16.mxu0 %v895_v9  ;;  %871 = vmatprep.subr.bf16.mxu1 %v895_v9 }
  0x23   : > { %847 = vmatpush3.bf16.msra.mxu0 %v895_v9  ;;  %879 = vmatpush3.bf16.msra.mxu1 %v895_v9 }
  0x26   : > { %849 = vmatmul.mubr.bf16.vlgmr.msra.gmra.mrb[0].mxu0 %v898_v10  ;;  %857 = vmatmul.mubr.bf16.vlgmr.msra.gmra.mrb[0].mxu1 %v899_v11 }
  0x27   : > { %852 = vmatprep.mubr.bf16.mxu0 %v900_v12  ;;  %860 = vmatprep.mubr.bf16.mxu1 %v901_v13 }
  0x2e   : > { %853 = vmatmul.mubr.bf16.gmra.mrb[4].mxu0 %v902_v14  ;;  %861 = vmatmul.mubr.bf16.gmra.mrb[4].mxu1 %v903_v15 }
  0xf9   : > { %v850_v29 = vpop.f32.mrb[0].mxu0  ;;  %v858_v30 = vpop.f32.mrb[0].mxu1 }
  0xfa   : > { %v402_v35 = vadd.f32 %v850_v29, %v992_v20  ;;  %v434_v36 = vadd.f32 %v858_v30, %v992_v20  ;;  %v393_v37 = vpop.f32.mrb[1].mxu0  ;;  %v425_v38 = vpop.f32.mrb[1].mxu1 }
  0xfb   : > { %v394_v41 = vadd.f32 %v992_v20, %v393_v37  ;;  %v426_v42 = vadd.f32 %v992_v20, %v425_v38  ;;  %v851_v43 = vpop.f32.mrb[2].mxu0  ;;  %v859_v44 = vpop.f32.mrb[2].mxu1 }
  0xfc   : > { %v490_v47 = vadd.f32 %v736_v23, %v402_v35  ;;  %v498_v48 = vadd.f32 %v752_v24, %v434_v36  ;;  %v405_v49 = vadd.f32 %v851_v43, %v992_v20  ;;  %v437_v50 = vadd.f32 %v859_v44, %v992_v20  ;;  %v396_v51 = vpop.f32.mrb[3].mxu0  ;;  %v428_v52 = vpop.f32.mrb[3].mxu1 }
  0xfd   : > { %v488_v53 = vadd.f32 %v732_v25, %v394_v41  ;;  %v496_v54 = vadd.f32 %v748_v26, %v426_v42  ;;  %v397_v55 = vadd.f32 %v992_v20, %v396_v51  ;;  %v429_v56 = vadd.f32 %v992_v20, %v428_v52 }
  0xfe   : > { %v491_v57 = vadd.f32 %v737_v31, %v405_v49  ;;  %v499_v58 = vadd.f32 %v753_v32, %v437_v50  ;;  %v506_v1 = vmax.f32 %v490_v47, 0.0  ;;  %v514_v2 = vmax.f32 %v498_v48, 0.0 }
  0xff   : > { %v489_v61 = vadd.f32 %v733_v33, %v397_v55  ;;  %v497_v62 = vadd.f32 %v749_v34, %v429_v56  ;;  %v504_v5 = vmax.f32 %v488_v53, 0.0  ;;  %v512_v6 = vmax.f32 %v496_v54, 0.0 }
 0x100   : > { %v507_v3 = vmax.f32 %v491_v57, 0.0  ;;  %v515_v4 = vmax.f32 %v499_v58, 0.0 }
 0x101   : > { %v505_v7 = vmax.f32 %v489_v61, 0.0  ;;  %v513_v8 = vmax.f32 %v497_v62, 0.0  ;;  %v854_v9 = vpop.f32.mrb[4].mxu0  ;;  %v862_v10 = vpop.f32.mrb[4].mxu1 }
 0x102   : > { %v770_v11 = vpack.c.bf16 %v507_v3, %v506_v1  ;;  %v790_v12 = vpack.c.bf16 %v515_v4, %v514_v2  ;;  %v418_v13 = vadd.f32 %v854_v9, %v992_v20  ;;  %v450_v14 = vadd.f32 %v862_v10, %v992_v20  ;;  %v409_v15 = vpop.f32.mrb[5].mxu0  ;;  %v441_v16 = vpop.f32.mrb[5].mxu1 }
 0x103   : > { %v765_v17 = vpack.c.bf16 %v505_v7, %v504_v5  ;;  %v785_v18 = vpack.c.bf16 %v513_v8, %v512_v6  ;;  %v410_v19 = vadd.f32 %v992_v20, %v409_v15  ;;  %v442_v21 = vadd.f32 %v992_v20, %v441_v16  ;;  %v855_v22 = vpop.f32.mrb[6].mxu0  ;;  %v863_v23 = vpop.f32.mrb[6].mxu1 }
 0x104   : > { %809 = vst [vmem:[%s1022_s20 + $0x8] sm:$0xff] %v770_v11   ;;  %813 = vst [vmem:[%s1022_s20 + $0x28] sm:$0xff] %v790_v12   ;;  %v494_v24 = vadd.f32 %v744_v39, %v418_v13  ;;  %v502_v25 = vadd.f32 %v760_v40, %v450_v14  ;;  %v421_v26 = vadd.f32 %v855_v22, %v992_v20  ;;  %v412_v28 = vpop.f32.mrb[7].mxu0  ;;  %v444_v29 = vpop.f32.mrb[7].mxu1 }
 0x105   : > { %v453_v27 = vadd.f32 %v863_v23, %v992_v20  ;;  %766 = vst [vmem:[%s1022_s20] sm:$0xff] %v765_v17   ;;  %812 = vst [vmem:[%s1022_s20 + $0x20] sm:$0xff] %v785_v18   ;;  %v492_v30 = vadd.f32 %v740_v45, %v410_v19  ;;  %v500_v31 = vadd.f32 %v756_v46, %v442_v21 }
 0x106   : > { %v413_v32 = vadd.f32 %v992_v20, %v412_v28  ;;  %v445_v33 = vadd.f32 %v992_v20, %v444_v29  ;;  %v495_v34 = vadd.f32 %v745_v59, %v421_v26  ;;  %v510_v38 = vmax.f32 %v494_v24, 0.0 }
 0x107   : > { %v503_v35 = vadd.f32 %v761_v60, %v453_v27  ;;  %v518_v39 = vmax.f32 %v502_v25, 0.0  ;;  %v508_v42 = vmax.f32 %v492_v30, 0.0  ;;  %v516_v43 = vmax.f32 %v500_v31, 0.0 }
 0x108   : > { %v493_v36 = vadd.f32 %v741_v63, %v413_v32  ;;  %v501_v37 = vadd.f32 %v757_v0, %v445_v33  ;;  %v511_v40 = vmax.f32 %v495_v34, 0.0 }
 0x109   : > { %v519_v41 = vmax.f32 %v503_v35, 0.0 }
 0x10a   : > { %v509_v44 = vmax.f32 %v493_v36, 0.0  ;;  %v517_v45 = vmax.f32 %v501_v37, 0.0  ;;  %v780_v46 = vpack.c.bf16 %v511_v40, %v510_v38 }
 0x10b   : > { %v800_v47 = vpack.c.bf16 %v519_v41, %v518_v39 }
 0x10c   : > { %v775_v48 = vpack.c.bf16 %v509_v44, %v508_v42  ;;  %v795_v20 = vpack.c.bf16 %v517_v45, %v516_v43  ;;  %811 = vst [vmem:[%s1022_s20 + $0x18] sm:$0xff] %v780_v46  }
 0x10d   : > { %815 = vst [vmem:[%s1022_s20 + $0x38] sm:$0xff] %v800_v47  }
 0x10e   : > { %810 = vst [vmem:[%s1022_s20 + $0x10] sm:$0xff] %v775_v48   ;;  %814 = vst [vmem:[%s1022_s20 + $0x30] sm:$0xff] %v795_v20  }
 0x10f PF: > { %s14_s15 = sadd.s32 1, %s910_s15  }
 0x110   : > { %p11_p4 = scmp.ge.s32.totalorder %s14_s15, 5  }
 0x112   :  { %13 = sbr.rel (!%p11_p4) target bundleno = 1 (0x1), region = 69 }

// kernel: forward.19
= control target key start
LH: loop header
LB: loop body
LE: loop exit
PB: predicated region body
PF: predicated region fallthrough
CT: control target
= control target key end

     0   :  { %s2671_s12 = smov 0   ;;  %s2949_s0 = inlined_call_operand.vmem [shape: bf16[6,6,9,8,128], index: 0, kind: input, shape index: {}]   ;;  %s2950_s1 = inlined_call_operand.vmem [shape: bf16[9,128,128], index: 1, kind: input, shape index: {}]   ;;  %s2951_s2 = inlined_call_operand.vmem [shape: f32[1,128], index: 2, kind: input, shape index: {}]   ;;  %s2952_s3 = inlined_call_operand.vmem [shape: bf16[6,8,8,128], index: 3, kind: output, shape index: {}]  }
   0x1 LB: > { %s1787_s13 = sadd.s32 4294967295, %s2649_s12   ;;  %p1791_p0 = scmp.ge.s32.totalorder %s2649_s12, 1  ;;  %s2649_s12 = sphi %s2671_s12, %s13_s12  }
   0x2   : > { %p137_p1 = scmp.lt.s32.totalorder %s2649_s12, 7 }
   0x4   : > { %p138_p2 = pnand %p1791_p0, %p137_p1 }
   0x5   : > { %v2535_v0 = vld [vmem:[%s2950_s1 + $0x40] sm:$0xff] (!%p138_p2)   ;;  %p161_p3 = scmp.lt.s32.totalorder (!%p138_p2), %s1787_s13, 5  ;;  %v2537_v2 = vld [vmem:[%s2950_s1 + $0x48] sm:$0xff] (!%p138_p2)   ;;  %v2539_v4 = vld [vmem:[%s2950_s1 + $0x50] sm:$0xff] (!%p138_p2)  }
   0x6   : > { %141 = sbr.rel (%p138_p2) target bundleno = 391 (0x187), region = 32  ;;  %v2536_v1 = vld [vmem:[%s2950_s1 + $0x100] sm:$0xff] (!%p138_p2)   ;;  %2230 = vmatprep.subr.bf16.mxu1 (!%p138_p2), %v2535_v0  ;;  %v2538_v3 = vld [vmem:[%s2950_s1 + $0x108] sm:$0xff] (!%p138_p2)   ;;  %v2540_v5 = vld [vmem:[%s2950_s1 + $0x110] sm:$0xff] (!%p138_p2)  }
   0x7   : > { %2326 = vmatprep.subr.bf16.mxu0 (!%p138_p2), %v2536_v1  ;;  %2231 = vmatpush3.bf16.msra.mxu1 (!%p138_p2), %v2535_v0  ;;  %v2541_v6 = vld [vmem:[%s2950_s1 + $0x58] sm:$0xff] (!%p138_p2)   ;;  %v2543_v8 = vld [vmem:[%s2950_s1 + $0x60] sm:$0xff] (!%p138_p2)   ;;  %v2545_v10 = vld [vmem:[%s2950_s1 + $0x68] sm:$0xff] (!%p138_p2)  }
   0x8   : > { %2327 = vmatpush3.bf16.msra.mxu0 (!%p138_p2), %v2536_v1  ;;  %2232 = vmatprep.subr.bf16.mxu1 (!%p138_p2), %v2537_v2  ;;  %v2542_v7 = vld [vmem:[%s2950_s1 + $0x118] sm:$0xff] (!%p138_p2)   ;;  %v2544_v9 = vld [vmem:[%s2950_s1 + $0x120] sm:$0xff] (!%p138_p2)   ;;  %v2546_v12 = vld [vmem:[%s2950_s1 + $0x128] sm:$0xff] (!%p138_p2)  }
   0x9   : > { %2328 = vmatprep.subr.bf16.mxu0 (!%p138_p2), %v2538_v3  ;;  %v2547_v14 = vld [vmem:[%s2950_s1 + $0x70] sm:$0xff] (!%p138_p2)   ;;  %v2549_v16 = vld [vmem:[%s2950_s1 + $0x78] sm:$0xff] (!%p138_p2)   ;;  %v2552_v18 = vld [vmem:[%s2950_s1] sm:$0xff] (!%p138_p2)  }
   0xa   : > { %v2548_v15 = vld [vmem:[%s2950_s1 + $0x130] sm:$0xff] (!%p138_p2)   ;;  %v2550_v17 = vld [vmem:[%s2950_s1 + $0x138] sm:$0xff] (!%p138_p2)   ;;  %v2554_v19 = vld [vmem:[%s2950_s1 + $0x140] sm:$0xff] (!%p138_p2)  }
   0xb   : > { %2233 = vmatpush3.bf16.msra.mxu1 (!%p138_p2), %v2537_v2  ;;  %v2557_v22 = vld [vmem:[%s2950_s1 + $0x8] sm:$0xff] (!%p138_p2)   ;;  %v2559_v26 = vld [vmem:[%s2950_s1 + $0x10] sm:$0xff] (!%p138_p2)   ;;  %v2561_v28 = vld [vmem:[%s2950_s1 + $0x18] sm:$0xff] (!%p138_p2)  }
   0xc   : > { %2329 = vmatpush3.bf16.msra.mxu0 (!%p138_p2), %v2538_v3  ;;  %2234 = vmatprep.subr.bf16.mxu1 (!%p138_p2), %v2539_v4  ;;  %v2558_v23 = vld [vmem:[%s2950_s1 + $0x148] sm:$0xff] (!%p138_p2)   ;;  %v2560_v27 = vld [vmem:[%s2950_s1 + $0x150] sm:$0xff] (!%p138_p2)   ;;  %v2562_v31 = vld [vmem:[%s2950_s1 + $0x158] sm:$0xff] (!%p138_p2)  }
   0xd   : > { %s2954_s13 = smov (!%p161_p3, %s1787_s13), 5  ;;  %2330 = vmatprep.subr.bf16.mxu0 %v2540_v5  ;;  %v2563_v34 = vld [vmem:[%s2950_s1 + $0x20] sm:$0xff]   ;;  %v2565_v36 = vld [vmem:[%s2950_s1 + $0x28] sm:$0xff]   ;;  %v2568_v38 = vld [vmem:[%s2950_s1 + $0x30] sm:$0xff]  }
   0xe   : > { %s2526_s30 = smul.u32 216, %s2954_s13  ;;  %v2564_v35 = vld [vmem:[%s2950_s1 + $0x160] sm:$0xff]   ;;  %v2566_v37 = vld [vmem:[%s2950_s1 + $0x168] sm:$0xff]   ;;  %v2570_v39 = vld [vmem:[%s2950_s1 + $0x170] sm:$0xff]   ;;  %s2098_s18 = sshll.u32 %s2954_s13, 5 }
   0xf   : > { %2235 = vmatpush3.bf16.msra.mxu1 %v2539_v4  ;;  %v2573_v40 = vld [vmem:[%s2950_s1 + $0x38] sm:$0xff]   ;;  %v2576_v42 = vld [vmem:[%s2950_s1 + $0x80] sm:$0xff]   ;;  %v2581_v46 = vld [vmem:[%s2950_s1 + $0x88] sm:$0xff]   ;;  %s170_s21 = scalar_lea.vmem %s2952_s3, %s2098_s18 }
  0x10   : > { %2331 = vmatpush3.bf16.msra.mxu0 %v2540_v5  ;;  %2236 = vmatprep.subr.bf16.mxu1 %v2541_v6  ;;  %s2715_s10 = scalar_lea.vmem %s2949_s0, %s2526_s30  ;;  %v2574_v41 = vld [vmem:[%s2950_s1 + $0x178] sm:$0xff]   ;;  %v2578_v43 = vld [vmem:[%s2950_s1 + $0x180] sm:$0xff]   ;;  %v2582_v47 = vld [vmem:[%s2950_s1 + $0x188] sm:$0xff]  }
  0x11   : > { %2332 = vmatprep.subr.bf16.mxu0 %v2542_v7  ;;  %v2551_v11 = vld [vmem:[%s2715_s10 + $0x48] sm:$0xff]   ;;  %v2555_v20 = vld [vmem:[%s2715_s10 + $0x50] sm:$0xff]   ;;  %v2567_v24 = vld [vmem:[%s2715_s10 + $0x58] sm:$0xff]  }
  0x12   : > { %2246 = vmatprep.mubr.bf16.mxu1 %v2551_v11  ;;  %v2553_v13 = vld [vmem:[%s2715_s10 + $0x6c] sm:$0xff]   ;;  %v2556_v21 = vld [vmem:[%s2715_s10 + $0x74] sm:$0xff]   ;;  %v2569_v25 = vld [vmem:[%s2715_s10 + $0x7c] sm:$0xff]  }
  0x13   : > { %2237 = vmatpush3.bf16.msra.mxu1 %v2541_v6  ;;  %2342 = vmatprep.mubr.bf16.mxu0 %v2553_v13  ;;  %v2571_v29 = vld [vmem:[%s2715_s10 + $0x60] sm:$0xff]   ;;  %v2577_v33 = vld [vmem:[%s2715_s10 + $0xb4] sm:$0xff]   ;;  %v2579_v44 = vld [vmem:[%s2715_s10 + $0x8] sm:$0xff]  }
  0x14   : > { %2333 = vmatpush3.bf16.msra.mxu0 %v2542_v7  ;;  %2238 = vmatprep.subr.bf16.mxu1 %v2543_v8  ;;  %v2572_v30 = vld [vmem:[%s2715_s10 + $0x84] sm:$0xff]   ;;  %v2580_v45 = vld [vmem:[%s2715_s10 + $0xbc] sm:$0xff]   ;;  %v2591_v48 = vld [vmem:[%s2715_s10 + $0x10] sm:$0xff]  }
  0x15   : > { %2334 = vmatprep.subr.bf16.mxu0 %v2544_v9  ;;  %v2575_v32 = vld [vmem:[%s2715_s10] sm:$0xff]   ;;  %v2583_v50 = vld [vmem:[%s2950_s1 + $0x90] sm:$0xff]   ;;  %v2585_v52 = vld [vmem:[%s2950_s1 + $0x98] sm:$0xff]  }
  0x16   : > { %v2593_v49 = vld [vmem:[%s2715_s10 + $0xc4] sm:$0xff]   ;;  %v2584_v51 = vld [vmem:[%s2950_s1 + $0x190] sm:$0xff]   ;;  %v2595_v53 = vld [vmem:[%s2715_s10 + $0x18] sm:$0xff]  }
  0x17   : > { %2239 = vmatpush3.bf16.msra.mxu1 %v2543_v8  ;;  %v2596_v54 = vld [vmem:[%s2715_s10 + $0xcc] sm:$0xff]   ;;  %v2586_v55 = vld [vmem:[%s2950_s1 + $0x198] sm:$0xff]   ;;  %v2601_v57 = vld [vmem:[%s2715_s10 + $0x4] sm:$0xff]  }
  0x18   : > { %2335 = vmatpush3.bf16.msra.mxu0 %v2544_v9  ;;  %2240 = vmatprep.subr.bf16.mxu1 %v2545_v10  ;;  %v2599_v56 = vld [vmem:[%s2715_s10 + $0x90] sm:$0xff]   ;;  %v2587_v58 = vld [vmem:[%s2950_s1 + $0xa0] sm:$0xff]   ;;  %v2589_v60 = vld [vmem:[%s2950_s1 + $0xa8] sm:$0xff]  }
  0x19   : > { %2336 = vmatprep.subr.bf16.mxu0 %v2546_v12  ;;  %v2588_v59 = vld [vmem:[%s2950_s1 + $0x1a0] sm:$0xff]   ;;  %v2590_v61 = vld [vmem:[%s2950_s1 + $0x1a8] sm:$0xff]   ;;  %v2592_v62 = vld [vmem:[%s2950_s1 + $0xb0] sm:$0xff]  }
  0x1a   : > { %v2594_v63 = vld [vmem:[%s2950_s1 + $0x1b0] sm:$0xff]   ;;  %v2597_v0 = vld [vmem:[%s2950_s1 + $0xb8] sm:$0xff]   ;;  %v2600_v2 = vld [vmem:[%s2950_s1 + $0xc0] sm:$0xff]  }
  0x1b   : > { %2241 = vmatpush3.bf16.msra.mxu1 %v2545_v10  ;;  %v2598_v1 = vld [vmem:[%s2950_s1 + $0x1b8] sm:$0xff]   ;;  %v2602_v3 = vld [vmem:[%s2950_s1 + $0x1c0] sm:$0xff]   ;;  %v2604_v5 = vld [vmem:[%s2715_s10 + $0xc] sm:$0xff]  }
  0x1c   : > { %2337 = vmatpush3.bf16.msra.mxu0 %v2546_v12  ;;  %2242 = vmatprep.subr.bf16.mxu1 %v2547_v14  ;;  %v2603_v4 = vld [vmem:[%s2715_s10 + $0x98] sm:$0xff]   ;;  %v2605_v6 = vld [vmem:[%s2950_s1 + $0xc8] sm:$0xff]   ;;  %v2615_v8 = vld [vmem:[%s2715_s10 + $0xa0] sm:$0xff]  }
  0x1d   : > { %2338 = vmatprep.subr.bf16.mxu0 %v2548_v15  ;;  %v2606_v7 = vld [vmem:[%s2950_s1 + $0x1c8] sm:$0xff]   ;;  %v2616_v9 = vld [vmem:[%s2715_s10 + $0x14] sm:$0xff]  }
  0x1e   : > { %v2607_v10 = vld [vmem:[%s2950_s1 + $0xd0] sm:$0xff]   ;;  %v2609_v12 = vld [vmem:[%s2950_s1 + $0xd8] sm:$0xff]   ;;  %v2617_v13 = vld [vmem:[%s2715_s10 + $0xa8] sm:$0xff]  }
  0x1f   : > { %2243 = vmatpush3.bf16.msra.mxu1 %v2547_v14  ;;  %v2608_v11 = vld [vmem:[%s2950_s1 + $0x1d0] sm:$0xff]   ;;  %v2619_v14 = vld [vmem:[%s2715_s10 + $0x1c] sm:$0xff]  }
  0x20   : > { %2339 = vmatpush3.bf16.msra.mxu0 %v2548_v15  ;;  %2244 = vmatprep.subr.bf16.mxu1 %v2549_v16  ;;  %v2610_v15 = vld [vmem:[%s2950_s1 + $0x1d8] sm:$0xff]  }
  0x21   : > { %2340 = vmatprep.subr.bf16.mxu0 %v2550_v17 }
  0x23   : > { %2245 = vmatpush3.bf16.msra.mxu1 %v2549_v16  ;;  %v2623_v16 = vld [vmem:[%s2715_s10 + $0x24] sm:$0xff]  }
  0x24   : > { %2341 = vmatpush3.bf16.msra.mxu0 %v2550_v17  ;;  %2254 = vmatprep.subr.bf16.mxu1 %v2552_v18  ;;  %v2624_v17 = vld [vmem:[%s2715_s10 + $0x4c] sm:$0xff]  }
  0x25   : > { %2350 = vmatprep.subr.bf16.mxu0 %v2554_v19 }
  0x26   : > { %2247 = vmatmul.mubr.bf16.vlgmr.msra.gmra.mrb[0].mxu1 %v2555_v20  ;;  %v2613_v20 = vld [vmem:[%s2950_s1 + $0xe8] sm:$0xff]  }
  0x27   : > { %2255 = vmatpush3.bf16.msra.mxu1 %v2552_v18  ;;  %2343 = vmatmul.mubr.bf16.vlgmr.msra.gmra.mrb[0].mxu0 %v2556_v21  ;;  %v2611_v18 = vld [vmem:[%s2950_s1 + $0xe0] sm:$0xff]   ;;  %v2614_v21 = vld [vmem:[%s2950_s1 + $0x1e8] sm:$0xff]  }
  0x28   : > { %2351 = vmatpush3.bf16.msra.mxu0 %v2554_v19  ;;  %2256 = vmatprep.subr.bf16.mxu1 %v2557_v22  ;;  %v2612_v19 = vld [vmem:[%s2950_s1 + $0x1e0] sm:$0xff]  }
  0x29   : > { %2352 = vmatprep.subr.bf16.mxu0 %v2558_v23  ;;  %2250 = vmatprep.mubr.bf16.mxu1 %v2567_v24  ;;  %v2621_v24 = vld [vmem:[%s2950_s1 + $0xf8] sm:$0xff]  }
  0x2a   : > { %2346 = vmatprep.mubr.bf16.mxu0 %v2569_v25  ;;  %v2622_v25 = vld [vmem:[%s2950_s1 + $0x1f8] sm:$0xff]  }
  0x2b   : > { %2257 = vmatpush3.bf16.msra.mxu1 %v2557_v22  ;;  %v2618_v22 = vld [vmem:[%s2950_s1 + $0xf0] sm:$0xff]  }
  0x2c   : > { %2353 = vmatpush3.bf16.msra.mxu0 %v2558_v23  ;;  %2258 = vmatprep.subr.bf16.mxu1 %v2559_v26  ;;  %v2620_v23 = vld [vmem:[%s2950_s1 + $0x1f0] sm:$0xff]  }
  0x2d   : > { %2354 = vmatprep.subr.bf16.mxu0 %v2560_v27 }
  0x2e   : > { %2251 = vmatmul.mubr.bf16.gmra.mrb[4].mxu1 %v2571_v29  ;;  %v2628_v29 = vld [vmem:[%s2950_s1 + $0x208] sm:$0xff]  }
  0x2f   : > { %2259 = vmatpush3.bf16.msra.mxu1 %v2559_v26  ;;  %2347 = vmatmul.mubr.bf16.gmra.mrb[4].mxu0 %v2572_v30  ;;  %v2627_v26 = vld [vmem:[%s2950_s1 + $0x200] sm:$0xff]   ;;  %v2629_v30 = vld [vmem:[%s2715_s10 + $0x34] sm:$0xff]  }
  0x30   : > { %2355 = vmatpush3.bf16.msra.mxu0 %v2560_v27  ;;  %2260 = vmatprep.subr.bf16.mxu1 %v2561_v28  ;;  %v2625_v27 = vld [vmem:[%s2715_s10 + $0x2c] sm:$0xff]  }
  0x31   : > { %2356 = vmatprep.subr.bf16.mxu0 %v2562_v31  ;;  %2270 = vmatprep.mubr.bf16.mxu1 %v2575_v32  ;;  %v2633_v32 = vld [vmem:[%s2950_s1 + $0x210] sm:$0xff]  }
  0x32   : > { %2366 = vmatprep.mubr.bf16.mxu0 %v2577_v33  ;;  %v2631_v33 = vld [vmem:[%s2715_s10 + $0x3c] sm:$0xff]  }
  0x33   : > { %2261 = vmatpush3.bf16.msra.mxu1 %v2561_v28  ;;  %v2626_v28 = vld [vmem:[%s2715_s10 + $0x54] sm:$0xff]  }
  0x34   : > { %2357 = vmatpush3.bf16.msra.mxu0 %v2562_v31  ;;  %2262 = vmatprep.subr.bf16.mxu1 %v2563_v34  ;;  %v2630_v31 = vld [vmem:[%s2715_s10 + $0x5c] sm:$0xff]  }
  0x35   : > { %2358 = vmatprep.subr.bf16.mxu0 %v2564_v35 }
  0x37   : > { %2263 = vmatpush3.bf16.msra.mxu1 %v2563_v34  ;;  %v2632_v34 = vld [vmem:[%s2715_s10 + $0x64] sm:$0xff]  }
  0x38   : > { %2359 = vmatpush3.bf16.msra.mxu0 %v2564_v35  ;;  %2264 = vmatprep.subr.bf16.mxu1 %v2565_v36  ;;  %v2634_v35 = vld [vmem:[%s2950_s1 + $0x218] sm:$0xff]  }
  0x39   : > { %2360 = vmatprep.subr.bf16.mxu0 %v2566_v37 }
  0x3b   : > { %2265 = vmatpush3.bf16.msra.mxu1 %v2565_v36  ;;  %v2639_v36 = vld [vmem:[%s2715_s10 + $0x94] sm:$0xff]  }
  0x3c   : > { %2361 = vmatpush3.bf16.msra.mxu0 %v2566_v37  ;;  %2266 = vmatprep.subr.bf16.mxu1 %v2568_v38  ;;  %v2640_v37 = vld [vmem:[%s2715_s10 + $0xa4] sm:$0xff]  }
  0x3d   : > { %2362 = vmatprep.subr.bf16.mxu0 %v2570_v39 }
  0x3f   : > { %2267 = vmatpush3.bf16.msra.mxu1 %v2568_v38  ;;  %v2635_v38 = vld [vmem:[%s2950_s1 + $0x220] sm:$0xff]  }
  0x40   : > { %2363 = vmatpush3.bf16.msra.mxu0 %v2570_v39  ;;  %2268 = vmatprep.subr.bf16.mxu1 %v2573_v40  ;;  %v2636_v39 = vld [vmem:[%s2950_s1 + $0x228] sm:$0xff]  }
  0x41   : > { %2364 = vmatprep.subr.bf16.mxu0 %v2574_v41 }
  0x43   : > { %2269 = vmatpush3.bf16.msra.mxu1 %v2573_v40  ;;  %v2637_v40 = vld [vmem:[%s2950_s1 + $0x230] sm:$0xff]  }
  0x44   : > { %2365 = vmatpush3.bf16.msra.mxu0 %v2574_v41  ;;  %2278 = vmatprep.subr.bf16.mxu1 %v2576_v42  ;;  %v2638_v41 = vld [vmem:[%s2950_s1 + $0x238] sm:$0xff]  }
  0x45   : > { %2374 = vmatprep.subr.bf16.mxu0 %v2578_v43 }
  0x46   : > { %2271 = vmatmul.mubr.bf16.vlgmr.msra.gmra.mrb[0].mxu1 %v2579_v44 }
  0x47   : > { %2279 = vmatpush3.bf16.msra.mxu1 %v2576_v42  ;;  %2367 = vmatmul.mubr.bf16.vlgmr.msra.gmra.mrb[0].mxu0 %v2580_v45  ;;  %v2642_v42 = vld [vmem:[%s2715_s10 + $0xac] sm:$0xff]  }
  0x48   : > { %2375 = vmatpush3.bf16.msra.mxu0 %v2578_v43  ;;  %2280 = vmatprep.subr.bf16.mxu1 %v2581_v46  ;;  %v2641_v43 = vld [vmem:[%s2715_s10 + $0x9c] sm:$0xff]  }
  0x49   : > { %2376 = vmatprep.subr.bf16.mxu0 %v2582_v47  ;;  %2274 = vmatprep.mubr.bf16.mxu1 %v2591_v48 }
  0x4a   : > { %2370 = vmatprep.mubr.bf16.mxu0 %v2593_v49 }
  0x4b   : > { %2281 = vmatpush3.bf16.msra.mxu1 %v2581_v46 }
  0x4c   : > { %2377 = vmatpush3.bf16.msra.mxu0 %v2582_v47  ;;  %2282 = vmatprep.subr.bf16.mxu1 %v2583_v50 }
  0x4d   : > { %2378 = vmatprep.subr.bf16.mxu0 %v2584_v51 }
  0x4e   : > { %2275 = vmatmul.mubr.bf16.gmra.mrb[4].mxu1 %v2595_v53 }
  0x4f   : > { %2283 = vmatpush3.bf16.msra.mxu1 %v2583_v50  ;;  %2371 = vmatmul.mubr.bf16.gmra.mrb[4].mxu0 %v2596_v54 }
  0x50   : > { %2379 = vmatpush3.bf16.msra.mxu0 %v2584_v51  ;;  %2284 = vmatprep.subr.bf16.mxu1 %v2585_v52 }
  0x51   : > { %2380 = vmatprep.subr.bf16.mxu0 %v2586_v55  ;;  %2294 = vmatprep.mubr.bf16.mxu1 %v2599_v56 }
  0x52   : > { %2390 = vmatprep.mubr.bf16.mxu0 %v2601_v57 }
  0x53   : > { %2285 = vmatpush3.bf16.msra.mxu1 %v2585_v52 }
  0x54   : > { %2381 = vmatpush3.bf16.msra.mxu0 %v2586_v55  ;;  %2286 = vmatprep.subr.bf16.mxu1 %v2587_v58 }
  0x55   : > { %2382 = vmatprep.subr.bf16.mxu0 %v2588_v59 }
  0x57   : > { %2287 = vmatpush3.bf16.msra.mxu1 %v2587_v58 }
  0x58   : > { %2383 = vmatpush3.bf16.msra.mxu0 %v2588_v59  ;;  %2288 = vmatprep.subr.bf16.mxu1 %v2589_v60 }
  0x59   : > { %2384 = vmatprep.subr.bf16.mxu0 %v2590_v61 }
  0x5b   : > { %2289 = vmatpush3.bf16.msra.mxu1 %v2589_v60  ;;  %v2095_v60 = vld [vmem:[%s2951_s2] ss:$0 sm:$0xff] }
  0x5c   : > { %2385 = vmatpush3.bf16.msra.mxu0 %v2590_v61  ;;  %2290 = vmatprep.subr.bf16.mxu1 %v2592_v62 }
  0x5d   : > { %2386 = vmatprep.subr.bf16.mxu0 %v2594_v63 }
  0x5f   : > { %2291 = vmatpush3.bf16.msra.mxu1 %v2592_v62 }
  0x60   : > { %2387 = vmatpush3.bf16.msra.mxu0 %v2594_v63  ;;  %2292 = vmatprep.subr.bf16.mxu1 %v2597_v0 }
  0x61   : > { %2388 = vmatprep.subr.bf16.mxu0 %v2598_v1 }
  0x63   : > { %2293 = vmatpush3.bf16.msra.mxu1 %v2597_v0 }
  0x64   : > { %2389 = vmatpush3.bf16.msra.mxu0 %v2598_v1  ;;  %2302 = vmatprep.subr.bf16.mxu1 %v2600_v2 }
  0x65   : > { %2398 = vmatprep.subr.bf16.mxu0 %v2602_v3 }
  0x66   : > { %2295 = vmatmul.mubr.bf16.vlgmr.msra.gmra.mrb[0].mxu1 %v2603_v4 }
  0x67   : > { %2303 = vmatpush3.bf16.msra.mxu1 %v2600_v2  ;;  %2391 = vmatmul.mubr.bf16.vlgmr.msra.gmra.mrb[0].mxu0 %v2604_v5 }
  0x68   : > { %2399 = vmatpush3.bf16.msra.mxu0 %v2602_v3  ;;  %2304 = vmatprep.subr.bf16.mxu1 %v2605_v6 }
  0x69   : > { %2400 = vmatprep.subr.bf16.mxu0 %v2606_v7  ;;  %2298 = vmatprep.mubr.bf16.mxu1 %v2615_v8 }
  0x6a   : > { %2394 = vmatprep.mubr.bf16.mxu0 %v2616_v9 }
  0x6b   : > { %2305 = vmatpush3.bf16.msra.mxu1 %v2605_v6 }
  0x6c   : > { %2401 = vmatpush3.bf16.msra.mxu0 %v2606_v7  ;;  %2306 = vmatprep.subr.bf16.mxu1 %v2607_v10 }
  0x6d   : > { %2402 = vmatprep.subr.bf16.mxu0 %v2608_v11 }
  0x6e   : > { %2299 = vmatmul.mubr.bf16.gmra.mrb[4].mxu1 %v2617_v13 }
  0x6f   : > { %2307 = vmatpush3.bf16.msra.mxu1 %v2607_v10  ;;  %2395 = vmatmul.mubr.bf16.gmra.mrb[4].mxu0 %v2619_v14 }
  0x70   : > { %2403 = vmatpush3.bf16.msra.mxu0 %v2608_v11  ;;  %2308 = vmatprep.subr.bf16.mxu1 %v2609_v12 }
  0x71   : > { %2404 = vmatprep.subr.bf16.mxu0 %v2610_v15  ;;  %2318 = vmatprep.mubr.bf16.mxu1 %v2623_v16 }
  0x72   : > { %2414 = vmatprep.mubr.bf16.mxu0 %v2624_v17 }
  0x73   : > { %2309 = vmatpush3.bf16.msra.mxu1 %v2609_v12 }
  0x74   : > { %2405 = vmatpush3.bf16.msra.mxu0 %v2610_v15  ;;  %2310 = vmatprep.subr.bf16.mxu1 %v2611_v18 }
  0x75   : > { %2406 = vmatprep.subr.bf16.mxu0 %v2612_v19 }
  0x77   : > { %2311 = vmatpush3.bf16.msra.mxu1 %v2611_v18 }
  0x78   : > { %2407 = vmatpush3.bf16.msra.mxu0 %v2612_v19  ;;  %2312 = vmatprep.subr.bf16.mxu1 %v2613_v20 }
  0x79   : > { %2408 = vmatprep.subr.bf16.mxu0 %v2614_v21 }
  0x7b   : > { %2313 = vmatpush3.bf16.msra.mxu1 %v2613_v20 }
  0x7c   : > { %2409 = vmatpush3.bf16.msra.mxu0 %v2614_v21  ;;  %2314 = vmatprep.subr.bf16.mxu1 %v2618_v22 }
  0x7d   : > { %2410 = vmatprep.subr.bf16.mxu0 %v2620_v23 }
  0x7f   : > { %2315 = vmatpush3.bf16.msra.mxu1 %v2618_v22 }
  0x80   : > { %2411 = vmatpush3.bf16.msra.mxu0 %v2620_v23  ;;  %2316 = vmatprep.subr.bf16.mxu1 %v2621_v24 }
  0x81   : > { %2412 = vmatprep.subr.bf16.mxu0 %v2622_v25 }
  0x83   : > { %2317 = vmatpush3.bf16.msra.mxu1 %v2621_v24 }
  0x84   : > { %2413 = vmatpush3.bf16.msra.mxu0 %v2622_v25  ;;  %2446 = vmatprep.subr.bf16.mxu1 %v2627_v26 }
  0x85   : > { %2422 = vmatprep.subr.bf16.mxu0 %v2627_v26 }
  0x86   : > { %2319 = vmatmul.mubr.bf16.vlgmr.msra.gmra.mrb[0].mxu1 %v2625_v27 }
  0x87   : > { %2415 = vmatmul.mubr.bf16.vlgmr.msra.gmra.mrb[0].mxu0 %v2626_v28  ;;  %2454 = vmatpush3.bf16.msra.mxu1 %v2627_v26 }
  0x88   : > { %2423 = vmatpush3.bf16.msra.mxu0 %v2627_v26  ;;  %2447 = vmatprep.subr.bf16.mxu1 %v2628_v29 }
  0x89   : > { %2424 = vmatprep.subr.bf16.mxu0 %v2628_v29  ;;  %2322 = vmatprep.mubr.bf16.mxu1 %v2629_v30 }
  0x8a   : > { %2418 = vmatprep.mubr.bf16.mxu0 %v2630_v31 }
  0x8b   : > { %2455 = vmatpush3.bf16.msra.mxu1 %v2628_v29 }
  0x8c   : > { %2425 = vmatpush3.bf16.msra.mxu0 %v2628_v29  ;;  %2448 = vmatprep.subr.bf16.mxu1 %v2633_v32 }
  0x8d   : > { %2426 = vmatprep.subr.bf16.mxu0 %v2633_v32 }
  0x8e   : > { %2323 = vmatmul.mubr.bf16.gmra.mrb[4].mxu1 %v2631_v33 }
  0x8f   : > { %2419 = vmatmul.mubr.bf16.gmra.mrb[4].mxu0 %v2632_v34  ;;  %2456 = vmatpush3.bf16.msra.mxu1 %v2633_v32 }
  0x90   : > { %2427 = vmatpush3.bf16.msra.mxu0 %v2633_v32  ;;  %2449 = vmatprep.subr.bf16.mxu1 %v2634_v35 }
  0x91   : > { %2428 = vmatprep.subr.bf16.mxu0 %v2634_v35  ;;  %2438 = vmatprep.mubr.bf16.mxu0 %v2639_v36 }
  0x92   : > { %2442 = vmatprep.mubr.bf16.mxu1 %v2640_v37 }
  0x93   : > { %2457 = vmatpush3.bf16.msra.mxu1 %v2634_v35 }
  0x94   : > { %2429 = vmatpush3.bf16.msra.mxu0 %v2634_v35  ;;  %2450 = vmatprep.subr.bf16.mxu1 %v2635_v38 }
  0x95   : > { %2430 = vmatprep.subr.bf16.mxu0 %v2635_v38 }
  0x97   : > { %2458 = vmatpush3.bf16.msra.mxu1 %v2635_v38 }
  0x98   : > { %2431 = vmatpush3.bf16.msra.mxu0 %v2635_v38  ;;  %2451 = vmatprep.subr.bf16.mxu1 %v2636_v39 }
  0x99   : > { %2432 = vmatprep.subr.bf16.mxu0 %v2636_v39 }
  0x9b   : > { %2459 = vmatpush3.bf16.msra.mxu1 %v2636_v39 }
  0x9c   : > { %2433 = vmatpush3.bf16.msra.mxu0 %v2636_v39  ;;  %2452 = vmatprep.subr.bf16.mxu1 %v2637_v40 }
  0x9d   : > { %2434 = vmatprep.subr.bf16.mxu0 %v2637_v40 }
  0x9f   : > { %2460 = vmatpush3.bf16.msra.mxu1 %v2637_v40 }
  0xa0   : > { %2435 = vmatpush3.bf16.msra.mxu0 %v2637_v40  ;;  %2453 = vmatprep.subr.bf16.mxu1 %v2638_v41 }
  0xa1   : > { %2436 = vmatprep.subr.bf16.mxu0 %v2638_v41 }
  0xa3   : > { %2461 = vmatpush3.bf16.msra.mxu1 %v2638_v41 }
  0xa4   : > { %2437 = vmatpush3.bf16.msra.mxu0 %v2638_v41 }
  0xa6   : > { %2443 = vmatmul.mubr.bf16.vlgmr.msra.gmra.mrb[8].mxu1 %v2642_v42 }
  0xa7   : > { %2439 = vmatmul.mubr.bf16.vlgmr.msra.gmra.mrb[0].mxu0 %v2641_v43 }
 0x159   : > { %v2320_v44 = vpop.f32.mrb[0].mxu1 }
 0x15a   : > { %v799_v45 = vpop.f32.mrb[1].mxu1 }
 0x15b   : > { %v2321_v46 = vpop.f32.mrb[2].mxu1 }
 0x15c   : > { %v802_v47 = vpop.f32.mrb[3].mxu1 }
 0x161   : > { %v2324_v48 = vpop.f32.mrb[4].mxu1 }
 0x162   : > { %v2420_v49 = vpop.f32.mrb[4].mxu0  ;;  %v815_v50 = vpop.f32.mrb[5].mxu1 }
 0x163   : > { %v2466_v51 = vadd.f32 %v2420_v49, %v2324_v48  ;;  %v1499_v52 = vpop.f32.mrb[5].mxu0  ;;  %v2325_v53 = vpop.f32.mrb[6].mxu1 }
 0x164   : > { %v2468_v54 = vadd.f32 %v1499_v52, %v815_v50  ;;  %v2421_v55 = vpop.f32.mrb[6].mxu0  ;;  %v818_v56 = vpop.f32.mrb[7].mxu1 }
 0x165   : > { %v2470_v57 = vadd.f32 %v2421_v55, %v2325_v53  ;;  %v1502_v58 = vpop.f32.mrb[7].mxu0 }
 0x166   : > { %v2472_v59 = vadd.f32 %v1502_v58, %v818_v56 }
 0x179   : > { %v2444_v61 = vpop.f32.mrb[8].mxu1 }
 0x17a   : > { %v2440_v62 = vpop.f32.mrb[0].mxu0  ;;  %v2467_v63 = vadd.f32 %v2466_v51, %v2444_v61  ;;  %v1670_v0 = vpop.f32.mrb[9].mxu1 }
 0x17b   : > { %v2462_v1 = vadd.f32 %v2440_v62, %v2320_v44  ;;  %v1654_v2 = vpop.f32.mrb[1].mxu0  ;;  %v2469_v3 = vadd.f32 %v2468_v54, %v1670_v0  ;;  %v2445_v4 = vpop.f32.mrb[10].mxu1 }
 0x17c   : > { %v1706_v5 = vadd.f32 %v2467_v63, %v2095_v60  ;;  %v2463_v6 = vadd.f32 %v1654_v2, %v799_v45  ;;  %v2441_v7 = vpop.f32.mrb[2].mxu0  ;;  %v2471_v8 = vadd.f32 %v2470_v57, %v2445_v4  ;;  %v1673_v9 = vpop.f32.mrb[11].mxu1 }
 0x17d   : > { %v1702_v10 = vadd.f32 %v2462_v1, %v2095_v60  ;;  %v1704_v11 = vadd.f32 %v2469_v3, %v2095_v60  ;;  %v2464_v12 = vadd.f32 %v2441_v7, %v2321_v46  ;;  %v1657_v13 = vpop.f32.mrb[3].mxu0  ;;  %v2473_v14 = vadd.f32 %v2472_v59, %v1673_v9 }
 0x17e   : > { %v1700_v15 = vadd.f32 %v2463_v6, %v2095_v60  ;;  %v1707_v16 = vadd.f32 %v2471_v8, %v2095_v60  ;;  %v2465_v17 = vadd.f32 %v1657_v13, %v802_v47  ;;  %v1714_v20 = vmax.f32 %v1706_v5, 0.0 }
 0x17f   : > { %v1703_v18 = vadd.f32 %v2464_v12, %v2095_v60  ;;  %v1705_v19 = vadd.f32 %v2473_v14, %v2095_v60  ;;  %v1710_v23 = vmax.f32 %v1702_v10, 0.0  ;;  %v1712_v24 = vmax.f32 %v1704_v11, 0.0 }
 0x180   : > { %v1715_v21 = vmax.f32 %v1707_v16, 0.0  ;;  %v1701_v22 = vadd.f32 %v2465_v17, %v2095_v60  ;;  %v1708_v27 = vmax.f32 %v1700_v15, 0.0 }
 0x181   : > { %v1711_v25 = vmax.f32 %v1703_v18, 0.0  ;;  %v1713_v26 = vmax.f32 %v1705_v19, 0.0 }
 0x182   : > { %v2117_v28 = vpack.c.bf16 %v1715_v21, %v1714_v20  ;;  %v1709_v29 = vmax.f32 %v1701_v22, 0.0 }
 0x183   : > { %v2107_v30 = vpack.c.bf16 %v1711_v25, %v1710_v23  ;;  %v2112_v31 = vpack.c.bf16 %v1713_v26, %v1712_v24 }
 0x184   : > { %2121 = vst [vmem:[%s170_s21 + $0x18] sm:$0xff] %v2117_v28   ;;  %v2102_v32 = vpack.c.bf16 %v1709_v29, %v1708_v27 }
 0x185   : > { %2119 = vst [vmem:[%s170_s21 + $0x8] sm:$0xff] %v2107_v30   ;;  %2120 = vst [vmem:[%s170_s21 + $0x10] sm:$0xff] %v2112_v31  }
 0x186   : > { %2103 = vst [vmem:[%s170_s21] sm:$0xff] %v2102_v32  }
 0x187 PF: > { %s13_s12 = sadd.s32 1, %s2649_s12  }
 0x188   : > { %p10_p4 = scmp.ge.s32.totalorder %s13_s12, 8  }
 0x18a   :  { %12 = sbr.rel (!%p10_p4) target bundleno = 1 (0x1), region = 78 }

// kernel: forward.21
= control target key start
LH: loop header
LB: loop body
LE: loop exit
PB: predicated region body
PF: predicated region fallthrough
CT: control target
= control target key end

     0   :  { %v673_v0 = vmov 0.0   ;;  %vm674_vm0 = vmmov 0   ;;  %vm242_vm1 = vcmask 1041409   ;;  %vm244_vm2 = vcmask 1042434   ;;  %s950_s1 = inlined_call_operand.vmem [shape: bf16[128,128], index: 1, kind: input, shape index: {}]   ;;  %s951_s0 = inlined_call_operand.vmem [shape: bf16[6,64,128], index: 0, kind: input, shape index: {}]   ;;  %s952_s3 = inlined_call_operand.vmem [shape: bf16[128,128], index: 3, kind: input, shape index: {}]   ;;  %s953_s2 = inlined_call_operand.vmem [shape: f32[1,128], index: 2, kind: input, shape index: {}]   ;;  %s954_s4 = inlined_call_operand.vmem [shape: f32[1,128], index: 4, kind: input, shape index: {}]   ;;  %s955_s5 = inlined_call_operand.vmem [shape: f32[6,128], index: 5, kind: output, shape index: {}]  }
   0x1   :  { %615 = vmatprep.subr.bf16.mxu0 %v673_v0  ;;  %v657_v1 = vld [vmem:[%s950_s1] sm:$0xff]   ;;  %631 = vmatprep.mubr.msk.bf16.mxu0 %vm674_vm0, %v673_v0  ;;  %v658_v2 = vld [vmem:[%s950_s1 + $0x8] sm:$0xff]   ;;  %v659_v3 = vld [vmem:[%s950_s1 + $0x10] sm:$0xff]   ;;  %vm246_vm3 = vcmask 1043459   ;;  %vm248_vm4 = vcmask 1044484   ;;  %vm250_vm5 = vcmask 1045509  }
   0x2   :  { %635 = vmatprep.subr.bf16.mxu1 %v673_v0  ;;  %651 = vmatprep.mubr.msk.bf16.mxu1 %vm674_vm0, %v673_v0  ;;  %v723_v4 = vld [vmem:[%s951_s0] sm:$0xff]   ;;  %v728_v5 = vld [vmem:[%s951_s0 + $0x8] sm:$0xff]   ;;  %v733_v6 = vld [vmem:[%s951_s0 + $0x10] sm:$0xff]  }
   0x3   :  { %616 = vmatpush3.bf16.msra.mxu0 %v657_v1  ;;  %v660_v7 = vld [vmem:[%s950_s1 + $0x18] sm:$0xff]   ;;  %v746_v9 = vld [vmem:[%s951_s0 + $0x20] sm:$0xff]   ;;  %v480_v10 = vunpack.c.l.bf16 %v723_v4  ;;  %v481_v11 = vunpack.c.h.bf16 %v723_v4  ;;  %v754_v12 = vld [vmem:[%s951_s0 + $0x28] sm:$0xff]   ;;  %v484_v15 = vunpack.c.l.bf16 %v728_v5  ;;  %v485_v16 = vunpack.c.h.bf16 %v728_v5 }
   0x4   :  { %617 = vmatprep.subr.bf16.mxu0 %v673_v0  ;;  %v741_v8 = vld [vmem:[%s951_s0 + $0x18] sm:$0xff]   ;;  %v759_v13 = vld [vmem:[%s951_s0 + $0x30] sm:$0xff]   ;;  %v661_v14 = vld [vmem:[%s950_s1 + $0x20] sm:$0xff]   ;;  %v488_v17 = vunpack.c.l.bf16 %v733_v6  ;;  %v489_v18 = vunpack.c.h.bf16 %v733_v6  ;;  %v496_v23 = vunpack.c.l.bf16 %v746_v9  ;;  %v497_v24 = vunpack.c.h.bf16 %v746_v9 }
   0x5   :  { %v771_v19 = vld [vmem:[%s951_s0 + $0x38] sm:$0xff]   ;;  %v581_v20 = vld [vmem:[%s951_s0 + $0x40] sm:$0xff]   ;;  %v492_v21 = vunpack.c.l.bf16 %v741_v8  ;;  %v493_v22 = vunpack.c.h.bf16 %v741_v8  ;;  %v783_v25 = vld [vmem:[%s951_s0 + $0x48] sm:$0xff]   ;;  %v500_v28 = vunpack.c.l.bf16 %v754_v12  ;;  %v501_v29 = vunpack.c.h.bf16 %v754_v12 }
   0x6   :  { %v788_v26 = vld [vmem:[%s951_s0 + $0x50] sm:$0xff]   ;;  %v793_v27 = vld [vmem:[%s951_s0 + $0x58] sm:$0xff]   ;;  %v504_v30 = vunpack.c.l.bf16 %v759_v13  ;;  %v505_v31 = vunpack.c.h.bf16 %v759_v13  ;;  %v585_v32 = vld [vmem:[%s951_s0 + $0x60] sm:$0xff]   ;;  %v508_v35 = vunpack.c.l.bf16 %v771_v19  ;;  %v509_v36 = vunpack.c.h.bf16 %v771_v19 }
   0x7   :  { %618 = vmatpush3.bf16.msra.mxu0 %v658_v2  ;;  %v805_v33 = vld [vmem:[%s951_s0 + $0x68] sm:$0xff]   ;;  %v810_v34 = vld [vmem:[%s951_s0 + $0x70] sm:$0xff]   ;;  %v512_v37 = vunpack.c.l.bf16 %v581_v20  ;;  %v513_v38 = vunpack.c.h.bf16 %v581_v20  ;;  %v818_v39 = vld [vmem:[%s951_s0 + $0x78] sm:$0xff]   ;;  %v516_v44 = vunpack.c.l.bf16 %v783_v25  ;;  %v517_v45 = vunpack.c.h.bf16 %v783_v25 }
   0x8   :  { %619 = vmatprep.subr.bf16.mxu0 %v673_v0  ;;  %v589_v40 = vld [vmem:[%s951_s0 + $0x80] sm:$0xff]   ;;  %v826_v41 = vld [vmem:[%s951_s0 + $0x88] sm:$0xff]   ;;  %v520_v46 = vunpack.c.l.bf16 %v788_v26  ;;  %v521_v47 = vunpack.c.h.bf16 %v788_v26  ;;  %v524_v49 = vunpack.c.l.bf16 %v793_v27  ;;  %v525_v50 = vunpack.c.h.bf16 %v793_v27  ;;  %v663_v63 = vld [vmem:[%s950_s1 + $0x30] sm:$0xff]  }
   0x9   :  { %v593_v42 = vld [vmem:[%s951_s0 + $0xa0] sm:$0xff]   ;;  %v662_v43 = vld [vmem:[%s950_s1 + $0x28] sm:$0xff]   ;;  %v528_v51 = vunpack.c.l.bf16 %v585_v32  ;;  %v529_v52 = vunpack.c.h.bf16 %v585_v32  ;;  %v532_v54 = vunpack.c.l.bf16 %v805_v33  ;;  %v533_v55 = vunpack.c.h.bf16 %v805_v33  ;;  %v667_v2 = vld [vmem:[%s952_s3 + $0x10] sm:$0xff]  }
   0xa   :  { %v665_v48 = vld [vmem:[%s952_s3] sm:$0xff]   ;;  %v594_v53 = vld [vmem:[%s951_s0 + $0xa8] sm:$0xff]   ;;  %v544_v56 = vunpack.c.l.bf16 %v589_v40  ;;  %v545_v57 = vunpack.c.h.bf16 %v589_v40  ;;  %v536_v59 = vunpack.c.l.bf16 %v810_v34  ;;  %v537_v60 = vunpack.c.h.bf16 %v810_v34  ;;  %v668_v5 = vld [vmem:[%s952_s3 + $0x18] sm:$0xff]  }
   0xb   :  { %620 = vmatpush3.bf16.msra.mxu0 %v659_v3  ;;  %636 = vmatpush3.bf16.msra.mxu1 %v665_v48  ;;  %v666_v58 = vld [vmem:[%s952_s3 + $0x8] sm:$0xff]   ;;  %v560_v61 = vunpack.c.l.bf16 %v593_v42  ;;  %v561_v62 = vunpack.c.h.bf16 %v593_v42  ;;  %v540_v1 = vunpack.c.l.bf16 %v818_v39  ;;  %v548_v3 = vunpack.c.l.bf16 %v826_v41 }
   0xc   :  { %621 = vmatprep.subr.bf16.mxu0 %v673_v0  ;;  %637 = vmatprep.subr.bf16.mxu1 %v673_v0  ;;  %v564_v9 = vunpack.c.l.bf16 %v594_v53  ;;  %v117_v20 = vadd.f32 %v481_v11, %v480_v10  ;;  %v130_v25 = vadd.f32 %v497_v24, %v496_v23  ;;  %v143_v32 = vadd.f32 %v513_v38, %v512_v37 }
   0xd   :  { %v156_v33 = vadd.f32 %v529_v52, %v528_v51  ;;  %v549_v34 = vunpack.c.h.bf16 %v826_v41  ;;  %v565_v40 = vunpack.c.h.bf16 %v594_v53  ;;  %v169_v42 = vadd.f32 %v545_v57, %v544_v56  ;;  %v596_v51 = vld [vmem:[%s951_s0 + $0xb8] sm:$0xff]  }
   0xe   :  { %v182_v48 = vadd.f32 %v561_v62, %v560_v61  ;;  %v118_v4 = vadd.f32 %v484_v15, %v117_v20  ;;  %v131_v10 = vadd.f32 %v500_v28, %v130_v25  ;;  %v144_v11 = vadd.f32 %v516_v44, %v143_v32  ;;  %v664_v53 = vld [vmem:[%s950_s1 + $0x38] sm:$0xff]  }
   0xf   :  { %622 = vmatpush3.bf16.msra.mxu0 %v660_v7  ;;  %v591_v7 = vld [vmem:[%s951_s0 + $0x90] sm:$0xff]   ;;  %638 = vmatpush3.bf16.msra.mxu1 %v666_v58  ;;  %v157_v23 = vadd.f32 %v532_v54, %v156_v33  ;;  %v170_v38 = vadd.f32 %v548_v3, %v169_v42  ;;  %v572_v61 = vunpack.c.l.bf16 %v596_v51 }
  0x10   :  { %623 = vmatprep.subr.bf16.mxu0 %v673_v0  ;;  %v552_v24 = vunpack.c.l.bf16 %v591_v7  ;;  %v183_v41 = vadd.f32 %v564_v9, %v182_v48  ;;  %639 = vmatprep.subr.bf16.mxu1 %v673_v0  ;;  %v119_v15 = vadd.f32 %v485_v16, %v118_v4  ;;  %v132_v28 = vadd.f32 %v501_v29, %v131_v10 }
  0x11   :  { %v145_v44 = vadd.f32 %v517_v45, %v144_v11  ;;  %v158_v52 = vadd.f32 %v533_v55, %v157_v23  ;;  %v553_v54 = vunpack.c.h.bf16 %v591_v7  ;;  %v171_v57 = vadd.f32 %v549_v34, %v170_v38 }
  0x12   :  { %v184_v58 = vadd.f32 %v565_v40, %v183_v41  ;;  %v120_v12 = vadd.f32 %v488_v17, %v119_v15  ;;  %v133_v16 = vadd.f32 %v504_v30, %v132_v28 }
  0x13   :  { %624 = vmatpush3.bf16.msra.mxu0 %v661_v14  ;;  %v595_v14 = vld [vmem:[%s951_s0 + $0xb0] sm:$0xff]   ;;  %640 = vmatpush3.bf16.msra.mxu1 %v667_v2  ;;  %v146_v29 = vadd.f32 %v520_v46, %v145_v44  ;;  %v159_v45 = vadd.f32 %v536_v59, %v158_v52  ;;  %v172_v62 = vadd.f32 %v552_v24, %v171_v57  ;;  %v573_v46 = vunpack.c.h.bf16 %v596_v51 }
  0x14   :  { %625 = vmatprep.subr.bf16.mxu0 %v673_v0  ;;  %v568_v37 = vunpack.c.l.bf16 %v595_v14  ;;  %v569_v56 = vunpack.c.h.bf16 %v595_v14  ;;  %641 = vmatprep.subr.bf16.mxu1 %v673_v0  ;;  %v121_v2 = vadd.f32 %v489_v18, %v120_v12  ;;  %v134_v3 = vadd.f32 %v505_v31, %v133_v16  ;;  %v669_v14 = vld [vmem:[%s952_s3 + $0x20] sm:$0xff]  }
  0x15   :  { %v147_v17 = vadd.f32 %v521_v47, %v146_v29  ;;  %v160_v30 = vadd.f32 %v537_v60, %v159_v45  ;;  %v173_v59 = vadd.f32 %v553_v54, %v172_v62 }
  0x16   :  { %v122_v6 = vadd.f32 %v492_v21, %v121_v2  ;;  %v135_v13 = vadd.f32 %v508_v35, %v134_v3  ;;  %v956_v35 = vunpack.c.h.bf16 %v818_v39 }
  0x17   :  { %626 = vmatpush3.bf16.msra.mxu0 %v662_v43  ;;  %v592_v43 = vld [vmem:[%s951_s0 + $0x98] sm:$0xff]   ;;  %642 = vmatpush3.bf16.msra.mxu1 %v668_v5  ;;  %v148_v18 = vadd.f32 %v524_v49, %v147_v17  ;;  %v161_v26 = vadd.f32 %v540_v1, %v160_v30  ;;  %v670_v1 = vld [vmem:[%s952_s3 + $0x28] sm:$0xff]  }
  0x18   :  { %627 = vmatprep.subr.bf16.mxu0 %v673_v0  ;;  %v556_v55 = vunpack.c.l.bf16 %v592_v43  ;;  %v557_v7 = vunpack.c.h.bf16 %v592_v43  ;;  %643 = vmatprep.subr.bf16.mxu1 %v673_v0  ;;  %v123_v60 = vadd.f32 %v493_v22, %v122_v6  ;;  %v136_v20 = vadd.f32 %v509_v36, %v135_v13 }
  0x19   :  { %v149_v21 = vadd.f32 %v525_v50, %v148_v18  ;;  %v162_v25 = vadd.f32 %v956_v35, %v161_v26 }
  0x1a   :  { %v174_v31 = vadd.f32 %v556_v55, %v173_v59  ;;  %v124_v33 = vrot.slane %v123_v60, 4  ;;  %v137_v34 = vrot.slane %v136_v20, 4 }
  0x1b   :  { %628 = vmatpush3.bf16.msra.mxu0 %v663_v63  ;;  %v185_v63 = vadd.f32 %v568_v37, %v184_v58  ;;  %644 = vmatpush3.bf16.msra.mxu1 %v669_v14  ;;  %v150_v8 = vrot.slane %v149_v21, 4  ;;  %v163_v22 = vrot.slane %v162_v25, 4 }
  0x1c   :  { %629 = vmatprep.subr.bf16.mxu0 %v673_v0  ;;  %v175_v49 = vadd.f32 %v557_v7, %v174_v31  ;;  %645 = vmatprep.subr.bf16.mxu1 %v673_v0  ;;  %v125_v27 = vadd.f32 %v124_v33, %v123_v60  ;;  %v138_v50 = vadd.f32 %v137_v34, %v136_v20 }
  0x1d   :  { %v186_v9 = vadd.f32 %v569_v56, %v185_v63  ;;  %v151_v40 = vadd.f32 %v150_v8, %v149_v21  ;;  %v164_v39 = vadd.f32 %v163_v22, %v162_v25 }
  0x1e   :  { %v176_v19 = vrot.slane %v175_v49, 4  ;;  %v126_v4 = vrot.slane %v125_v27, 2  ;;  %v139_v10 = vrot.slane %v138_v50, 2 }
  0x1f   :  { %630 = vmatpush3.bf16.msra.mxu0 %v664_v53  ;;  %v187_v47 = vadd.f32 %v572_v61, %v186_v9  ;;  %646 = vmatpush3.bf16.msra.mxu1 %v670_v1  ;;  %v152_v11 = vrot.slane %v151_v40, 2  ;;  %v165_v23 = vrot.slane %v164_v39, 2  ;;  %v460_v1 = vld [vmem:[%s953_s2] ss:$0 sm:$0xff] }
  0x20   :  { %v177_v42 = vadd.f32 %v176_v19, %v175_v49  ;;  %647 = vmatprep.subr.bf16.mxu1 %v673_v0  ;;  %v127_v38 = vadd.f32 %v126_v4, %v125_v27  ;;  %v140_v41 = vadd.f32 %v139_v10, %v138_v50  ;;  %v671_v49 = vld [vmem:[%s952_s3 + $0x30] sm:$0xff]  }
  0x21   :  { %v188_v32 = vadd.f32 %v573_v46, %v187_v47  ;;  %v153_v43 = vadd.f32 %v152_v11, %v151_v40  ;;  %v166_v51 = vadd.f32 %v165_v23, %v164_v39 }
  0x22   :  { %v178_v24 = vrot.slane %v177_v42, 2  ;;  %v128_v44 = vrot.slane %v127_v38, 1  ;;  %v141_v52 = vrot.slane %v140_v41, 1 }
  0x23   :  { %v189_v36 = vrot.slane %v188_v32, 4  ;;  %v154_v53 = vrot.slane %v153_v43, 1  ;;  %v167_v54 = vrot.slane %v166_v51, 1  ;;  %648 = vmatpush3.bf16.msra.mxu1 %v671_v49 }
  0x24   :  { %v179_v15 = vadd.f32 %v178_v24, %v177_v42  ;;  %v129_v58 = vadd.f32 %v128_v44, %v127_v38  ;;  %v142_v5 = vadd.f32 %v141_v52, %v140_v41  ;;  %649 = vmatprep.subr.bf16.mxu1 %v673_v0  ;;  %v469_v0 = vld [vmem:[%s954_s4] ss:$0 sm:$0xff] }
  0x25   :  { %v190_v48 = vadd.f32 %v189_v36, %v188_v32  ;;  %v155_v12 = vadd.f32 %v154_v53, %v153_v43  ;;  %v168_v16 = vadd.f32 %v167_v54, %v166_v51  ;;  %v672_v32 = vld [vmem:[%s952_s3 + $0x38] sm:$0xff]  }
  0x26   :  { %v180_v56 = vrot.slane %v179_v15, 1  ;;  %v195_v55 = vmul.f32 0.015625, %v129_v58  ;;  %v196_v61 = vmul.f32 0.015625, %v142_v5 }
  0x27   :  { %v191_v37 = vrot.slane %v190_v48, 2  ;;  %v197_v62 = vmul.f32 0.015625, %v155_v12  ;;  %v198_v63 = vmul.f32 0.015625, %v168_v16  ;;  %650 = vmatpush3.bf16.msra.mxu1 %v672_v32 }
  0x28   :  { %v181_v29 = vadd.f32 %v180_v56, %v179_v15  ;;  %v201_v17 = vpack.c.bf16 %v195_v55, %v195_v55  ;;  %v202_v30 = vpack.c.bf16 %v196_v61, %v196_v61 }
  0x29   :  { %v192_v28 = vadd.f32 %v191_v37, %v190_v48  ;;  %v203_v7 = vpack.c.bf16 %v197_v62, %v197_v62  ;;  %v204_v46 = vpack.c.bf16 %v198_v63, %v198_v63 }
  0x2a   :  { %v199_v2 = vmul.f32 0.015625, %v181_v29  ;;  %v236_v14 = vunpack.c.l.b16 %v201_v17  ;;  %v237_v6 = vunpack.c.l.b16 %v202_v30 }
  0x2b   :  { %v193_v57 = vrot.slane %v192_v28, 1  ;;  %v238_v13 = vunpack.c.l.b16 %v203_v7  ;;  %v239_v18 = vunpack.c.l.b16 %v204_v46 }
  0x2c   :  { %v205_v59 = vpack.c.bf16 %v199_v2, %v199_v2  ;;  %v243_v47 = vsel %vm242_vm1, %v237_v6, %v236_v14 }
  0x2d   :  { %v194_v45 = vadd.f32 %v193_v57, %v192_v28  ;;  %v245_v60 = vsel %vm244_vm2, %v238_v13, %v243_v47 }
  0x2e   :  { %v240_v26 = vunpack.c.l.b16 %v205_v59  ;;  %v247_v20 = vsel %vm246_vm3, %v239_v18, %v245_v60 }
  0x2f   :  { %v200_v3 = vmul.f32 0.015625, %v194_v45 }
  0x30   :  { %v249_v21 = vsel %vm248_vm4, %v240_v26, %v247_v20 }
  0x31   :  { %v206_v9 = vpack.c.bf16 %v200_v3, %v200_v3 }
  0x33   :  { %v241_v31 = vunpack.c.l.b16 %v206_v9 }
  0x35   :  { %v251_v35 = vsel %vm250_vm5, %v241_v31, %v249_v21 }
  0x36   :  { %v252_v25 = vpack.c.b16 %v251_v35, %v251_v35 }
  0x38   :  { %632 = vmatmul.mubr.bf16.vlgmr.msra.gmra.mrb[0].mxu0 %v252_v25 }
 0x10b   :  { %v336_v33 = vpop.f32.mrb[0].mxu0 }
 0x10c   :  { %v337_v34 = vadd.f32 %v460_v1, %v336_v33  ;;  %v633_v8 = vpop.f32.mrb[1].mxu0 }
 0x10d   :  { %v339_v22 = vpop.f32.mrb[2].mxu0 }
 0x10e   :  { %v342_v19 = vmax.f32 %v337_v34, 0.0  ;;  %v634_v36 = vpop.f32.mrb[3].mxu0 }
 0x110   :  { %v343_v27 = vpack.c.bf16 %v342_v19, %v342_v19 }
 0x112   :  { %652 = vmatmul.mubr.bf16.vlgmr.msra.gmra.mrb[0].mxu1 %v343_v27 }
 0x1e5   :  { %v449_v50 = vpop.f32.mrb[0].mxu1 }
 0x1e6   :  { %v450_v40 = vadd.f32 %v469_v0, %v449_v50  ;;  %v653_v39 = vpop.f32.mrb[1].mxu1 }
 0x1e7   :  { %v452_v42 = vpop.f32.mrb[2].mxu1 }
 0x1e8   :  { %455 = vst [vmem:[%s955_s5] sm:$0x3f] %v450_v40  ;;  %v654_v48 = vpop.f32.mrb[3].mxu1 }

</bundles_post_ra>
